<compile_context>
chip_gen: v7x
topology: tpu7x:2x2x1
jax: 0.10.0
libtpu: 0.0.40
codegen_flags: <defaults>
</compile_context>

<pallas_src>
import numpy as np
import jax
import jax.numpy as jnp
from jax import lax
from jax.experimental import pallas as pl
from jax.experimental.pallas import tpu as pltpu


# ----------------------------------------------------------------------------
# Fused per-image kernel: conv1 -> relu -> pool -> conv2 -> relu -> pool ->
#                         fc1 -> relu -> fc2
# ----------------------------------------------------------------------------
def _net_kernel(pat_ref, w1_ref, b1_ref, w2_ref, b2_ref,
                wf1_ref, bf1_ref, wf2_ref, bf2_ref, o_ref, p1_scr):
    # pat_ref : (1, 4, 196, 128) im2col patches for conv1, phase-major rows
    # w1_ref  : (128, 32)   conv1 weights, (kh,kw,cin)-flattened, zero padded
    # b1_ref  : (1, 32)
    # w2_ref  : (3, 3, 12, 32, 64) conv2 HWIO weights, broadcast over 12 rows
    # b2_ref  : (1, 64)
    # wf1_ref : (6, 6, 64, 128) fc1 weights as [pw, ph, c, out]
    # bf1_ref : (1, 128)
    # wf2_ref : (128, 10)
    # bf2_ref : (1, 10)
    # o_ref   : (1, 1, 10)
    # p1_scr  : VMEM (14, 14, 32) pooled conv1 activation

    # ---- conv1 + bias + relu + 2x2 maxpool -------------------------------
    # One (196,128)@(128,32) MXU matmul per pooling phase; the wrapper ordered
    # the im2col rows so that the 4 phases are the 4 window elements.
    pooled = None
    for t in range(4):
        v = jnp.dot(pat_ref[0, t], w1_ref[...],
                    preferred_element_type=jnp.float32)          # (196, 32)
        v = jnp.maximum(v + b1_ref[...], 0.0)
        pooled = v if pooled is None else jnp.maximum(pooled, v)
    # pooled: (196, 32), rows = ph*14 + pw  ==  pool1 output (14,14,32)

    # Stage into a 3-D scratch so conv2 can take clean sliding-window slices.
    for ph in range(14):
        p1_scr[ph] = pooled[ph * 14:(ph + 1) * 14, :]            # (14, 32)

    # ---- conv2 + bias + relu --------------------------------------------
    # 9 taps; each tap is a batched matmul over the 12 output rows:
    # (12,12,32) x (12,32,64) -> (12,12,64)
    acc2 = jnp.zeros((12, 12, 64), jnp.float32)
    for kh in range(3):
        for kw in range(3):
            patch = p1_scr[pl.ds(kh, 12), pl.ds(kw, 12), :]      # (12,12,32)
            acc2 = acc2 + jnp.einsum(
                'hwc,hcd->hwd', patch, w2_ref[kh, kw],
                preferred_element_type=jnp.float32)
    acc2 = jnp.maximum(acc2 + b2_ref[...], 0.0)                  # (12,12,64)

    # ---- 2x2 maxpool + fc1 + relu + fc2 ----------------------------------
    # H-halving: pair adjacent row-slabs (free leading-dim regrouping).
    a = acc2.reshape(6, 2, 12, 64)
    hp = jnp.maximum(a[:, 0], a[:, 1])                           # (6,12,64)

    # W-halving fused with the fc1 contraction (weights pre-permuted so no
    # NCHW transpose / flatten of the activation is ever needed).
    accf = jnp.zeros((6, 1, 128), jnp.float32)
    for pw in range(6):
        col = jnp.maximum(hp[:, 2 * pw:2 * pw + 1, :],
                          hp[:, 2 * pw + 1:2 * pw + 2, :])       # (6,1,64)
        accf = accf + jnp.einsum(
            'hqc,hcj->hqj', col, wf1_ref[pw],
            preferred_element_type=jnp.float32)                  # (6,1,128)
    h1 = accf[0] + accf[1] + accf[2] + accf[3] + accf[4] + accf[5]   # (1,128)
    h1 = jnp.maximum(h1 + bf1_ref[...], 0.0)

    out = jnp.dot(h1, wf2_ref[...],
                  preferred_element_type=jnp.float32) + bf2_ref[...]  # (1,10)
    o_ref[0] = out.astype(o_ref.dtype)


def _fused_net(pat, kp):
    B = pat.shape[0]
    return pl.pallas_call(
        _net_kernel,
        out_shape=jax.ShapeDtypeStruct((B, 1, 10), jnp.float32),
        grid_spec=pltpu.PrefetchScalarGridSpec(
            num_scalar_prefetch=0,
            grid=(B,),
            in_specs=[
                pl.BlockSpec((1, 4, 196, 128), lambda b: (b, 0, 0, 0)),
                pl.BlockSpec((128, 32), lambda b: (0, 0)),
                pl.BlockSpec((1, 32), lambda b: (0, 0)),
                pl.BlockSpec((3, 3, 12, 32, 64), lambda b: (0, 0, 0, 0, 0)),
                pl.BlockSpec((1, 64), lambda b: (0, 0)),
                pl.BlockSpec((6, 6, 64, 128), lambda b: (0, 0, 0, 0)),
                pl.BlockSpec((1, 128), lambda b: (0, 0)),
                pl.BlockSpec((128, 10), lambda b: (0, 0)),
                pl.BlockSpec((1, 10), lambda b: (0, 0)),
            ],
            out_specs=pl.BlockSpec((1, 1, 10), lambda b: (b, 0, 0)),
            scratch_shapes=[pltpu.VMEM((14, 14, 32), jnp.float32)],
        ),
        compiler_params=pltpu.CompilerParams(
            dimension_semantics=("parallel",)),
    )(pat, kp["w1"], kp["b1"], kp["w2b"], kp["b2"],
      kp["wf1"], kp["bf1"], kp["wf2"], kp["bf2"])


# ----------------------------------------------------------------------------
# Forward pass: cheap XLA im2col for conv1 (phase-ordered rows) + one fused
# Pallas kernel.
# ----------------------------------------------------------------------------
def net_forward(x_nchw, kp):
    B = x_nchw.shape[0]
    x = jnp.transpose(x_nchw, (0, 2, 3, 1))                      # (B,32,32,3)

    # conv1 im2col: rows ordered (phase i, phase j, ph, pw); k = kh*15+kw*3+ci
    cols = []
    for kh in range(5):
        for kw in range(5):
            cols.append(x[:, kh:kh + 28, kw:kw + 28, :])         # (B,28,28,3)
    pat = jnp.stack(cols, axis=3).reshape(B, 28, 28, 75)
    pat = pat.reshape(B, 14, 2, 14, 2, 75)                       # (B,ph,i,pw,j,k)
    pat = jnp.transpose(pat, (0, 2, 4, 1, 3, 5))                 # (B,i,j,ph,pw,k)
    pat = pat.reshape(B, 4, 196, 75)
    pat = jnp.pad(pat, ((0, 0), (0, 0), (0, 0), (0, 128 - 75)))  # K -> 128

    out = _fused_net(pat, kp)                                    # (B,1,10)
    return out.reshape(B, 10)


# ----------------------------------------------------------------------------
# One-time parameter layout conversion (PyTorch layouts -> kernel layouts).
# ----------------------------------------------------------------------------
def prepare_params(p):
    # conv1: OIHW -> (kh*kw*cin, cout), zero-padded K to 128
    w1 = jnp.transpose(p["conv1_w"], (2, 3, 1, 0)).reshape(75, 32)
    w1 = jnp.pad(w1, ((0, 128 - 75), (0, 0)))
    # conv2: OIHW -> HWIO, broadcast over the 12 conv2 output rows (batch dim)
    w2 = jnp.transpose(p["conv2_w"], (2, 3, 1, 0))               # (3,3,32,64)
    w2b = jnp.asarray(jnp.broadcast_to(w2[:, :, None, :, :], (3, 3, 12, 32, 64)))
    # fc1: permute input columns so the kernel's NHWC-ordered accumulation
    # matches PyTorch's NCHW flatten (index c*36 + h*6 + w).
    wf1 = jnp.transpose(p["fc1_w"].reshape(128, 64, 6, 6), (3, 2, 1, 0))  # (w,h,c,j)
    return {
        "w1": w1, "b1": p["conv1_b"].reshape(1, 32),
        "w2b": w2b, "b2": p["conv2_b"].reshape(1, 64),
        "wf1": wf1, "bf1": p["fc1_b"].reshape(1, 128),
        "wf2": p["fc2_w"].T, "bf2": p["fc2_b"].reshape(1, 10),
    }


def init_params(key):
    ks = jax.random.split(key, 8)
    nrm = lambda k, s, sc: sc * jax.random.normal(k, s, dtype=jnp.float32)
    return {
        "conv1_w": nrm(ks[0], (32, 3, 5, 5), 0.10),   # OIHW (PyTorch)
        "conv1_b": nrm(ks[1], (32,), 0.10),
        "conv2_w": nrm(ks[2], (64, 32, 3, 3), 0.05),
        "conv2_b": nrm(ks[3], (64,), 0.05),
        "fc1_w":   nrm(ks[4], (128, 64 * 6 * 6), 0.02),  # (out, in)
        "fc1_b":   nrm(ks[5], (128,), 0.02),
        "fc2_w":   nrm(ks[6], (10, 128), 0.10),
        "fc2_b":   nrm(ks[7], (10,), 0.10),
    }


def reference_forward(x_nchw, p):
    """Pure-JAX (XLA) reference mirroring the PyTorch module."""
    def conv(x, w):
        dn = lax.conv_dimension_numbers(x.shape, w.shape, ("NCHW", "OIHW", "NCHW"))
        return lax.conv_general_dilated(x, w, (1, 1), "VALID",
                                        dimension_numbers=dn,
                                        precision=lax.Precision.HIGHEST)
    def pool(x):
        return lax.reduce_window(x, -jnp.inf, lax.max,
                                 (1, 1, 2, 2), (1, 1, 2, 2), "VALID")
    y = jnp.maximum(conv(x_nchw, p["conv1_w"]) + p["conv1_b"][None, :, None, None], 0.0)
    y = pool(y)
    y = jnp.maximum(conv(y, p["conv2_w"]) + p["conv2_b"][None, :, None, None], 0.0)
    y = pool(y)
    y = y.reshape(y.shape[0], -1)
    h = jnp.maximum(y @ p["fc1_w"].T + p["fc1_b"], 0.0)
    return h @ p["fc2_w"].T + p["fc2_b"]


if __name__ == "__main__":
    key = jax.random.PRNGKey(0)
    kx, kp = jax.random.split(key)
    x = jax.random.normal(kx, (2, 3, 32, 32), dtype=jnp.float32)   # batch=2, 3x32x32
    params = init_params(kp)
    kparams = prepare_params(params)       # one-time weight layout conversion

    fwd = jax.jit(net_forward)
    out = jax.block_until_ready(fwd(x, kparams))
    assert out.shape == (2, 10), out.shape

    ref = reference_forward(x, params)
    np.testing.assert_allclose(np.asarray(out), np.asarray(ref),
                               rtol=5e-2, atol=5e-2)
    print("KERNEL_OK")
</pallas_src>

<mosaic_0001>
module attributes {stable_mosaic.version = 11 : i64} {
  func.func @_net_kernel(%arg0: i32, %arg1: memref<1x4x196x128xf32, #tpu.memory_space<vmem>>, %arg2: memref<128x32xf32, #tpu.memory_space<vmem>>, %arg3: memref<1x32xf32, #tpu.memory_space<vmem>>, %arg4: memref<3x3x12x32x64xf32, #tpu.memory_space<vmem>>, %arg5: memref<1x64xf32, #tpu.memory_space<vmem>>, %arg6: memref<6x6x64x128xf32, #tpu.memory_space<vmem>>, %arg7: memref<1x128xf32, #tpu.memory_space<vmem>>, %arg8: memref<128x10xf32, #tpu.memory_space<vmem>>, %arg9: memref<1x10xf32, #tpu.memory_space<vmem>>, %arg10: memref<1x1x10xf32, #tpu.memory_space<vmem>>, %arg11: memref<14x14x32xf32, #tpu.memory_space<vmem>>) attributes {dimension_semantics = [#tpu.dimension_semantics<parallel>], iteration_bounds = array<i64: 2>, scalar_prefetch = 0 : i64, scratch_operands = 1 : i64, tpu.core_type = #tpu.core_type<tc>, window_params = [{transform_indices = @transform_0, window_bounds = array<i64: 1, 4, 196, 128>}, {pipeline_mode = #tpu.pipeline_mode<synchronous>, transform_indices = @transform_1, window_bounds = array<i64: 128, 32>}, {pipeline_mode = #tpu.pipeline_mode<synchronous>, transform_indices = @transform_2, window_bounds = array<i64: 1, 32>}, {pipeline_mode = #tpu.pipeline_mode<synchronous>, transform_indices = @transform_3, window_bounds = array<i64: 3, 3, 12, 32, 64>}, {pipeline_mode = #tpu.pipeline_mode<synchronous>, transform_indices = @transform_4, window_bounds = array<i64: 1, 64>}, {pipeline_mode = #tpu.pipeline_mode<synchronous>, transform_indices = @transform_5, window_bounds = array<i64: 6, 6, 64, 128>}, {pipeline_mode = #tpu.pipeline_mode<synchronous>, transform_indices = @transform_6, window_bounds = array<i64: 1, 128>}, {pipeline_mode = #tpu.pipeline_mode<synchronous>, transform_indices = @transform_7, window_bounds = array<i64: 128, 10>}, {pipeline_mode = #tpu.pipeline_mode<synchronous>, transform_indices = @transform_8, window_bounds = array<i64: 1, 10>}, {transform_indices = @transform_9, window_bounds = array<i64: 1, 1, 10>}]} {
    %c0 = arith.constant 0 : index
    %c0_0 = arith.constant 0 : index
    %c0_1 = arith.constant 0 : index
    %c0_2 = arith.constant 0 : index
    %0 = vector.load %arg1[%c0, %c0_0, %c0_1, %c0_2] : memref<1x4x196x128xf32, #tpu.memory_space<vmem>>, vector<1x1x196x128xf32>
    %1 = vector.shape_cast %0 : vector<1x1x196x128xf32> to vector<196x128xf32>
    %c0_3 = arith.constant 0 : index
    %c0_4 = arith.constant 0 : index
    %2 = vector.load %arg2[%c0_3, %c0_4] : memref<128x32xf32, #tpu.memory_space<vmem>>, vector<128x32xf32>
    %cst = arith.constant dense<0.000000e+00> : vector<196x32xf32>
    %3 = tpu.matmul %1, %2, %cst {dimension_numbers = #tpu.dot_dimension_numbers<[1], [0], [0], [1], [0, 0, 1, 1], [], []>} : vector<196x128xf32>, vector<128x32xf32>, vector<196x32xf32> -> vector<196x32xf32>
    %c0_5 = arith.constant 0 : index
    %c0_6 = arith.constant 0 : index
    %4 = vector.load %arg3[%c0_5, %c0_6] : memref<1x32xf32, #tpu.memory_space<vmem>>, vector<1x32xf32>
    %5 = vector.broadcast %4 : vector<1x32xf32> to vector<196x32xf32>
    %6 = arith.addf %3, %5 : vector<196x32xf32>
    %cst_7 = arith.constant 0.000000e+00 : f32
    %7 = vector.broadcast %cst_7 : f32 to vector<196x32xf32>
    %8 = arith.maximumf %6, %7 : vector<196x32xf32>
    %c0_8 = arith.constant 0 : index
    %c1 = arith.constant 1 : index
    %c0_9 = arith.constant 0 : index
    %c0_10 = arith.constant 0 : index
    %9 = vector.load %arg1[%c0_8, %c1, %c0_9, %c0_10] : memref<1x4x196x128xf32, #tpu.memory_space<vmem>>, vector<1x1x196x128xf32>
    %10 = vector.shape_cast %9 : vector<1x1x196x128xf32> to vector<196x128xf32>
    %c0_11 = arith.constant 0 : index
    %c0_12 = arith.constant 0 : index
    %11 = vector.load %arg2[%c0_11, %c0_12] : memref<128x32xf32, #tpu.memory_space<vmem>>, vector<128x32xf32>
    %cst_13 = arith.constant dense<0.000000e+00> : vector<196x32xf32>
    %12 = tpu.matmul %10, %11, %cst_13 {dimension_numbers = #tpu.dot_dimension_numbers<[1], [0], [0], [1], [0, 0, 1, 1], [], []>} : vector<196x128xf32>, vector<128x32xf32>, vector<196x32xf32> -> vector<196x32xf32>
    %c0_14 = arith.constant 0 : index
    %c0_15 = arith.constant 0 : index
    %13 = vector.load %arg3[%c0_14, %c0_15] : memref<1x32xf32, #tpu.memory_space<vmem>>, vector<1x32xf32>
    %14 = vector.broadcast %13 : vector<1x32xf32> to vector<196x32xf32>
    %15 = arith.addf %12, %14 : vector<196x32xf32>
    %cst_16 = arith.constant 0.000000e+00 : f32
    %16 = vector.broadcast %cst_16 : f32 to vector<196x32xf32>
    %17 = arith.maximumf %15, %16 : vector<196x32xf32>
    %18 = arith.maximumf %8, %17 : vector<196x32xf32>
    %c0_17 = arith.constant 0 : index
    %c2 = arith.constant 2 : index
    %c0_18 = arith.constant 0 : index
    %c0_19 = arith.constant 0 : index
    %19 = vector.load %arg1[%c0_17, %c2, %c0_18, %c0_19] : memref<1x4x196x128xf32, #tpu.memory_space<vmem>>, vector<1x1x196x128xf32>
    %20 = vector.shape_cast %19 : vector<1x1x196x128xf32> to vector<196x128xf32>
    %c0_20 = arith.constant 0 : index
    %c0_21 = arith.constant 0 : index
    %21 = vector.load %arg2[%c0_20, %c0_21] : memref<128x32xf32, #tpu.memory_space<vmem>>, vector<128x32xf32>
    %cst_22 = arith.constant dense<0.000000e+00> : vector<196x32xf32>
    %22 = tpu.matmul %20, %21, %cst_22 {dimension_numbers = #tpu.dot_dimension_numbers<[1], [0], [0], [1], [0, 0, 1, 1], [], []>} : vector<196x128xf32>, vector<128x32xf32>, vector<196x32xf32> -> vector<196x32xf32>
    %c0_23 = arith.constant 0 : index
    %c0_24 = arith.constant 0 : index
    %23 = vector.load %arg3[%c0_23, %c0_24] : memref<1x32xf32, #tpu.memory_space<vmem>>, vector<1x32xf32>
    %24 = vector.broadcast %23 : vector<1x32xf32> to vector<196x32xf32>
    %25 = arith.addf %22, %24 : vector<196x32xf32>
    %cst_25 = arith.constant 0.000000e+00 : f32
    %26 = vector.broadcast %cst_25 : f32 to vector<196x32xf32>
    %27 = arith.maximumf %25, %26 : vector<196x32xf32>
    %28 = arith.maximumf %18, %27 : vector<196x32xf32>
    %c0_26 = arith.constant 0 : index
    %c3 = arith.constant 3 : index
    %c0_27 = arith.constant 0 : index
    %c0_28 = arith.constant 0 : index
    %29 = vector.load %arg1[%c0_26, %c3, %c0_27, %c0_28] : memref<1x4x196x128xf32, #tpu.memory_space<vmem>>, vector<1x1x196x128xf32>
    %30 = vector.shape_cast %29 : vector<1x1x196x128xf32> to vector<196x128xf32>
    %c0_29 = arith.constant 0 : index
    %c0_30 = arith.constant 0 : index
    %31 = vector.load %arg2[%c0_29, %c0_30] : memref<128x32xf32, #tpu.memory_space<vmem>>, vector<128x32xf32>
    %cst_31 = arith.constant dense<0.000000e+00> : vector<196x32xf32>
    %32 = tpu.matmul %30, %31, %cst_31 {dimension_numbers = #tpu.dot_dimension_numbers<[1], [0], [0], [1], [0, 0, 1, 1], [], []>} : vector<196x128xf32>, vector<128x32xf32>, vector<196x32xf32> -> vector<196x32xf32>
    %c0_32 = arith.constant 0 : index
    %c0_33 = arith.constant 0 : index
    %33 = vector.load %arg3[%c0_32, %c0_33] : memref<1x32xf32, #tpu.memory_space<vmem>>, vector<1x32xf32>
    %34 = vector.broadcast %33 : vector<1x32xf32> to vector<196x32xf32>
    %35 = arith.addf %32, %34 : vector<196x32xf32>
    %cst_34 = arith.constant 0.000000e+00 : f32
    %36 = vector.broadcast %cst_34 : f32 to vector<196x32xf32>
    %37 = arith.maximumf %35, %36 : vector<196x32xf32>
    %38 = arith.maximumf %28, %37 : vector<196x32xf32>
    %39 = vector.extract_strided_slice %38 {offsets = [0, 0], sizes = [14, 32], strides = [1, 1]} : vector<196x32xf32> to vector<14x32xf32>
    %c0_35 = arith.constant 0 : index
    %c0_36 = arith.constant 0 : index
    %c0_37 = arith.constant 0 : index
    %40 = vector.load %arg11[%c0_35, %c0_36, %c0_37] : memref<14x14x32xf32, #tpu.memory_space<vmem>>, vector<1x14x32xf32>
    %41 = vector.shape_cast %40 : vector<1x14x32xf32> to vector<14x32xf32>
    %42 = vector.shape_cast %39 : vector<14x32xf32> to vector<1x14x32xf32>
    tpu.vector_store %arg11[%c0_35, %c0_36, %c0_37], %42 {strides = array<i32>} : memref<14x14x32xf32, #tpu.memory_space<vmem>>, vector<1x14x32xf32>,
    %43 = vector.extract_strided_slice %38 {offsets = [14, 0], sizes = [14, 32], strides = [1, 1]} : vector<196x32xf32> to vector<14x32xf32>
    %c1_38 = arith.constant 1 : index
    %c0_39 = arith.constant 0 : index
    %c0_40 = arith.constant 0 : index
    %44 = vector.load %arg11[%c1_38, %c0_39, %c0_40] : memref<14x14x32xf32, #tpu.memory_space<vmem>>, vector<1x14x32xf32>
    %45 = vector.shape_cast %44 : vector<1x14x32xf32> to vector<14x32xf32>
    %46 = vector.shape_cast %43 : vector<14x32xf32> to vector<1x14x32xf32>
    tpu.vector_store %arg11[%c1_38, %c0_39, %c0_40], %46 {strides = array<i32>} : memref<14x14x32xf32, #tpu.memory_space<vmem>>, vector<1x14x32xf32>,
    %47 = vector.extract_strided_slice %38 {offsets = [28, 0], sizes = [14, 32], strides = [1, 1]} : vector<196x32xf32> to vector<14x32xf32>
    %c2_41 = arith.constant 2 : index
    %c0_42 = arith.constant 0 : index
    %c0_43 = arith.constant 0 : index
    %48 = vector.load %arg11[%c2_41, %c0_42, %c0_43] : memref<14x14x32xf32, #tpu.memory_space<vmem>>, vector<1x14x32xf32>
    %49 = vector.shape_cast %48 : vector<1x14x32xf32> to vector<14x32xf32>
    %50 = vector.shape_cast %47 : vector<14x32xf32> to vector<1x14x32xf32>
    tpu.vector_store %arg11[%c2_41, %c0_42, %c0_43], %50 {strides = array<i32>} : memref<14x14x32xf32, #tpu.memory_space<vmem>>, vector<1x14x32xf32>,
    %51 = vector.extract_strided_slice %38 {offsets = [42, 0], sizes = [14, 32], strides = [1, 1]} : vector<196x32xf32> to vector<14x32xf32>
    %c3_44 = arith.constant 3 : index
    %c0_45 = arith.constant 0 : index
    %c0_46 = arith.constant 0 : index
    %52 = vector.load %arg11[%c3_44, %c0_45, %c0_46] : memref<14x14x32xf32, #tpu.memory_space<vmem>>, vector<1x14x32xf32>
    %53 = vector.shape_cast %52 : vector<1x14x32xf32> to vector<14x32xf32>
    %54 = vector.shape_cast %51 : vector<14x32xf32> to vector<1x14x32xf32>
    tpu.vector_store %arg11[%c3_44, %c0_45, %c0_46], %54 {strides = array<i32>} : memref<14x14x32xf32, #tpu.memory_space<vmem>>, vector<1x14x32xf32>,
    %55 = vector.extract_strided_slice %38 {offsets = [56, 0], sizes = [14, 32], strides = [1, 1]} : vector<196x32xf32> to vector<14x32xf32>
    %c4 = arith.constant 4 : index
    %c0_47 = arith.constant 0 : index
    %c0_48 = arith.constant 0 : index
    %56 = vector.load %arg11[%c4, %c0_47, %c0_48] : memref<14x14x32xf32, #tpu.memory_space<vmem>>, vector<1x14x32xf32>
    %57 = vector.shape_cast %56 : vector<1x14x32xf32> to vector<14x32xf32>
    %58 = vector.shape_cast %55 : vector<14x32xf32> to vector<1x14x32xf32>
    tpu.vector_store %arg11[%c4, %c0_47, %c0_48], %58 {strides = array<i32>} : memref<14x14x32xf32, #tpu.memory_space<vmem>>, vector<1x14x32xf32>,
    %59 = vector.extract_strided_slice %38 {offsets = [70, 0], sizes = [14, 32], strides = [1, 1]} : vector<196x32xf32> to vector<14x32xf32>
    %c5 = arith.constant 5 : index
    %c0_49 = arith.constant 0 : index
    %c0_50 = arith.constant 0 : index
    %60 = vector.load %arg11[%c5, %c0_49, %c0_50] : memref<14x14x32xf32, #tpu.memory_space<vmem>>, vector<1x14x32xf32>
    %61 = vector.shape_cast %60 : vector<1x14x32xf32> to vector<14x32xf32>
    %62 = vector.shape_cast %59 : vector<14x32xf32> to vector<1x14x32xf32>
    tpu.vector_store %arg11[%c5, %c0_49, %c0_50], %62 {strides = array<i32>} : memref<14x14x32xf32, #tpu.memory_space<vmem>>, vector<1x14x32xf32>,
    %63 = vector.extract_strided_slice %38 {offsets = [84, 0], sizes = [14, 32], strides = [1, 1]} : vector<196x32xf32> to vector<14x32xf32>
    %c6 = arith.constant 6 : index
    %c0_51 = arith.constant 0 : index
    %c0_52 = arith.constant 0 : index
    %64 = vector.load %arg11[%c6, %c0_51, %c0_52] : memref<14x14x32xf32, #tpu.memory_space<vmem>>, vector<1x14x32xf32>
    %65 = vector.shape_cast %64 : vector<1x14x32xf32> to vector<14x32xf32>
    %66 = vector.shape_cast %63 : vector<14x32xf32> to vector<1x14x32xf32>
    tpu.vector_store %arg11[%c6, %c0_51, %c0_52], %66 {strides = array<i32>} : memref<14x14x32xf32, #tpu.memory_space<vmem>>, vector<1x14x32xf32>,
    %67 = vector.extract_strided_slice %38 {offsets = [98, 0], sizes = [14, 32], strides = [1, 1]} : vector<196x32xf32> to vector<14x32xf32>
    %c7 = arith.constant 7 : index
    %c0_53 = arith.constant 0 : index
    %c0_54 = arith.constant 0 : index
    %68 = vector.load %arg11[%c7, %c0_53, %c0_54] : memref<14x14x32xf32, #tpu.memory_space<vmem>>, vector<1x14x32xf32>
    %69 = vector.shape_cast %68 : vector<1x14x32xf32> to vector<14x32xf32>
    %70 = vector.shape_cast %67 : vector<14x32xf32> to vector<1x14x32xf32>
    tpu.vector_store %arg11[%c7, %c0_53, %c0_54], %70 {strides = array<i32>} : memref<14x14x32xf32, #tpu.memory_space<vmem>>, vector<1x14x32xf32>,
    %71 = vector.extract_strided_slice %38 {offsets = [112, 0], sizes = [14, 32], strides = [1, 1]} : vector<196x32xf32> to vector<14x32xf32>
    %c8 = arith.constant 8 : index
    %c0_55 = arith.constant 0 : index
    %c0_56 = arith.constant 0 : index
    %72 = vector.load %arg11[%c8, %c0_55, %c0_56] : memref<14x14x32xf32, #tpu.memory_space<vmem>>, vector<1x14x32xf32>
    %73 = vector.shape_cast %72 : vector<1x14x32xf32> to vector<14x32xf32>
    %74 = vector.shape_cast %71 : vector<14x32xf32> to vector<1x14x32xf32>
    tpu.vector_store %arg11[%c8, %c0_55, %c0_56], %74 {strides = array<i32>} : memref<14x14x32xf32, #tpu.memory_space<vmem>>, vector<1x14x32xf32>,
    %75 = vector.extract_strided_slice %38 {offsets = [126, 0], sizes = [14, 32], strides = [1, 1]} : vector<196x32xf32> to vector<14x32xf32>
    %c9 = arith.constant 9 : index
    %c0_57 = arith.constant 0 : index
    %c0_58 = arith.constant 0 : index
    %76 = vector.load %arg11[%c9, %c0_57, %c0_58] : memref<14x14x32xf32, #tpu.memory_space<vmem>>, vector<1x14x32xf32>
    %77 = vector.shape_cast %76 : vector<1x14x32xf32> to vector<14x32xf32>
    %78 = vector.shape_cast %75 : vector<14x32xf32> to vector<1x14x32xf32>
    tpu.vector_store %arg11[%c9, %c0_57, %c0_58], %78 {strides = array<i32>} : memref<14x14x32xf32, #tpu.memory_space<vmem>>, vector<1x14x32xf32>,
    %79 = vector.extract_strided_slice %38 {offsets = [140, 0], sizes = [14, 32], strides = [1, 1]} : vector<196x32xf32> to vector<14x32xf32>
    %c10 = arith.constant 10 : index
    %c0_59 = arith.constant 0 : index
    %c0_60 = arith.constant 0 : index
    %80 = vector.load %arg11[%c10, %c0_59, %c0_60] : memref<14x14x32xf32, #tpu.memory_space<vmem>>, vector<1x14x32xf32>
    %81 = vector.shape_cast %80 : vector<1x14x32xf32> to vector<14x32xf32>
    %82 = vector.shape_cast %79 : vector<14x32xf32> to vector<1x14x32xf32>
    tpu.vector_store %arg11[%c10, %c0_59, %c0_60], %82 {strides = array<i32>} : memref<14x14x32xf32, #tpu.memory_space<vmem>>, vector<1x14x32xf32>,
    %83 = vector.extract_strided_slice %38 {offsets = [154, 0], sizes = [14, 32], strides = [1, 1]} : vector<196x32xf32> to vector<14x32xf32>
    %c11 = arith.constant 11 : index
    %c0_61 = arith.constant 0 : index
    %c0_62 = arith.constant 0 : index
    %84 = vector.load %arg11[%c11, %c0_61, %c0_62] : memref<14x14x32xf32, #tpu.memory_space<vmem>>, vector<1x14x32xf32>
    %85 = vector.shape_cast %84 : vector<1x14x32xf32> to vector<14x32xf32>
    %86 = vector.shape_cast %83 : vector<14x32xf32> to vector<1x14x32xf32>
    tpu.vector_store %arg11[%c11, %c0_61, %c0_62], %86 {strides = array<i32>} : memref<14x14x32xf32, #tpu.memory_space<vmem>>, vector<1x14x32xf32>,
    %87 = vector.extract_strided_slice %38 {offsets = [168, 0], sizes = [14, 32], strides = [1, 1]} : vector<196x32xf32> to vector<14x32xf32>
    %c12 = arith.constant 12 : index
    %c0_63 = arith.constant 0 : index
    %c0_64 = arith.constant 0 : index
    %88 = vector.load %arg11[%c12, %c0_63, %c0_64] : memref<14x14x32xf32, #tpu.memory_space<vmem>>, vector<1x14x32xf32>
    %89 = vector.shape_cast %88 : vector<1x14x32xf32> to vector<14x32xf32>
    %90 = vector.shape_cast %87 : vector<14x32xf32> to vector<1x14x32xf32>
    tpu.vector_store %arg11[%c12, %c0_63, %c0_64], %90 {strides = array<i32>} : memref<14x14x32xf32, #tpu.memory_space<vmem>>, vector<1x14x32xf32>,
    %91 = vector.extract_strided_slice %38 {offsets = [182, 0], sizes = [14, 32], strides = [1, 1]} : vector<196x32xf32> to vector<14x32xf32>
    %c13 = arith.constant 13 : index
    %c0_65 = arith.constant 0 : index
    %c0_66 = arith.constant 0 : index
    %92 = vector.load %arg11[%c13, %c0_65, %c0_66] : memref<14x14x32xf32, #tpu.memory_space<vmem>>, vector<1x14x32xf32>
    %93 = vector.shape_cast %92 : vector<1x14x32xf32> to vector<14x32xf32>
    %94 = vector.shape_cast %91 : vector<14x32xf32> to vector<1x14x32xf32>
    tpu.vector_store %arg11[%c13, %c0_65, %c0_66], %94 {strides = array<i32>} : memref<14x14x32xf32, #tpu.memory_space<vmem>>, vector<1x14x32xf32>,
    %cst_67 = arith.constant 0.000000e+00 : f32
    %95 = vector.broadcast %cst_67 : f32 to vector<12x12x64xf32>
    %c0_68 = arith.constant 0 : index
    %c0_69 = arith.constant 0 : index
    %c0_70 = arith.constant 0 : index
    %96 = vector.load %arg11[%c0_68, %c0_69, %c0_70] : memref<14x14x32xf32, #tpu.memory_space<vmem>>, vector<12x12x32xf32>
    %c0_71 = arith.constant 0 : index
    %c0_72 = arith.constant 0 : index
    %c0_73 = arith.constant 0 : index
    %c0_74 = arith.constant 0 : index
    %c0_75 = arith.constant 0 : index
    %97 = vector.load %arg4[%c0_71, %c0_72, %c0_73, %c0_74, %c0_75] : memref<3x3x12x32x64xf32, #tpu.memory_space<vmem>>, vector<1x1x12x32x64xf32>
    %98 = vector.shape_cast %97 : vector<1x1x12x32x64xf32> to vector<12x32x64xf32>
    "tpu.trace_start"() <{level = 10 : i32, message = "hwc,hcd->hwd"}> : () -> ()
    %cst_76 = arith.constant dense<0.000000e+00> : vector<12x12x64xf32>
    %99 = tpu.matmul %96, %98, %cst_76 {dimension_numbers = #tpu.dot_dimension_numbers<[2], [1], [1], [2], [0, 0, 0, 1, 1, 2], [0], [0]>} : vector<12x12x32xf32>, vector<12x32x64xf32>, vector<12x12x64xf32> -> vector<12x12x64xf32>
    "tpu.trace_stop"() : () -> ()
    %100 = arith.addf %95, %99 : vector<12x12x64xf32>
    %c0_77 = arith.constant 0 : index
    %c1_78 = arith.constant 1 : index
    %c0_79 = arith.constant 0 : index
    %101 = vector.load %arg11[%c0_77, %c1_78, %c0_79] : memref<14x14x32xf32, #tpu.memory_space<vmem>>, vector<12x12x32xf32>
    %c0_80 = arith.constant 0 : index
    %c1_81 = arith.constant 1 : index
    %c0_82 = arith.constant 0 : index
    %c0_83 = arith.constant 0 : index
    %c0_84 = arith.constant 0 : index
    %102 = vector.load %arg4[%c0_80, %c1_81, %c0_82, %c0_83, %c0_84] : memref<3x3x12x32x64xf32, #tpu.memory_space<vmem>>, vector<1x1x12x32x64xf32>
    %103 = vector.shape_cast %102 : vector<1x1x12x32x64xf32> to vector<12x32x64xf32>
    "tpu.trace_start"() <{level = 10 : i32, message = "hwc,hcd->hwd"}> : () -> ()
    %cst_85 = arith.constant dense<0.000000e+00> : vector<12x12x64xf32>
    %104 = tpu.matmul %101, %103, %cst_85 {dimension_numbers = #tpu.dot_dimension_numbers<[2], [1], [1], [2], [0, 0, 0, 1, 1, 2], [0], [0]>} : vector<12x12x32xf32>, vector<12x32x64xf32>, vector<12x12x64xf32> -> vector<12x12x64xf32>
    "tpu.trace_stop"() : () -> ()
    %105 = arith.addf %100, %104 : vector<12x12x64xf32>
    %c0_86 = arith.constant 0 : index
    %c2_87 = arith.constant 2 : index
    %c0_88 = arith.constant 0 : index
    %106 = vector.load %arg11[%c0_86, %c2_87, %c0_88] : memref<14x14x32xf32, #tpu.memory_space<vmem>>, vector<12x12x32xf32>
    %c0_89 = arith.constant 0 : index
    %c2_90 = arith.constant 2 : index
    %c0_91 = arith.constant 0 : index
    %c0_92 = arith.constant 0 : index
    %c0_93 = arith.constant 0 : index
    %107 = vector.load %arg4[%c0_89, %c2_90, %c0_91, %c0_92, %c0_93] : memref<3x3x12x32x64xf32, #tpu.memory_space<vmem>>, vector<1x1x12x32x64xf32>
    %108 = vector.shape_cast %107 : vector<1x1x12x32x64xf32> to vector<12x32x64xf32>
    "tpu.trace_start"() <{level = 10 : i32, message = "hwc,hcd->hwd"}> : () -> ()
    %cst_94 = arith.constant dense<0.000000e+00> : vector<12x12x64xf32>
    %109 = tpu.matmul %106, %108, %cst_94 {dimension_numbers = #tpu.dot_dimension_numbers<[2], [1], [1], [2], [0, 0, 0, 1, 1, 2], [0], [0]>} : vector<12x12x32xf32>, vector<12x32x64xf32>, vector<12x12x64xf32> -> vector<12x12x64xf32>
    "tpu.trace_stop"() : () -> ()
    %110 = arith.addf %105, %109 : vector<12x12x64xf32>
    %c1_95 = arith.constant 1 : index
    %c0_96 = arith.constant 0 : index
    %c0_97 = arith.constant 0 : index
    %111 = vector.load %arg11[%c1_95, %c0_96, %c0_97] : memref<14x14x32xf32, #tpu.memory_space<vmem>>, vector<12x12x32xf32>
    %c1_98 = arith.constant 1 : index
    %c0_99 = arith.constant 0 : index
    %c0_100 = arith.constant 0 : index
    %c0_101 = arith.constant 0 : index
    %c0_102 = arith.constant 0 : index
    %112 = vector.load %arg4[%c1_98, %c0_99, %c0_100, %c0_101, %c0_102] : memref<3x3x12x32x64xf32, #tpu.memory_space<vmem>>, vector<1x1x12x32x64xf32>
    %113 = vector.shape_cast %112 : vector<1x1x12x32x64xf32> to vector<12x32x64xf32>
    "tpu.trace_start"() <{level = 10 : i32, message = "hwc,hcd->hwd"}> : () -> ()
    %cst_103 = arith.constant dense<0.000000e+00> : vector<12x12x64xf32>
    %114 = tpu.matmul %111, %113, %cst_103 {dimension_numbers = #tpu.dot_dimension_numbers<[2], [1], [1], [2], [0, 0, 0, 1, 1, 2], [0], [0]>} : vector<12x12x32xf32>, vector<12x32x64xf32>, vector<12x12x64xf32> -> vector<12x12x64xf32>
    "tpu.trace_stop"() : () -> ()
    %115 = arith.addf %110, %114 : vector<12x12x64xf32>
    %c1_104 = arith.constant 1 : index
    %c1_105 = arith.constant 1 : index
    %c0_106 = arith.constant 0 : index
    %116 = vector.load %arg11[%c1_104, %c1_105, %c0_106] : memref<14x14x32xf32, #tpu.memory_space<vmem>>, vector<12x12x32xf32>
    %c1_107 = arith.constant 1 : index
    %c1_108 = arith.constant 1 : index
    %c0_109 = arith.constant 0 : index
    %c0_110 = arith.constant 0 : index
    %c0_111 = arith.constant 0 : index
    %117 = vector.load %arg4[%c1_107, %c1_108, %c0_109, %c0_110, %c0_111] : memref<3x3x12x32x64xf32, #tpu.memory_space<vmem>>, vector<1x1x12x32x64xf32>
    %118 = vector.shape_cast %117 : vector<1x1x12x32x64xf32> to vector<12x32x64xf32>
    "tpu.trace_start"() <{level = 10 : i32, message = "hwc,hcd->hwd"}> : () -> ()
    %cst_112 = arith.constant dense<0.000000e+00> : vector<12x12x64xf32>
    %119 = tpu.matmul %116, %118, %cst_112 {dimension_numbers = #tpu.dot_dimension_numbers<[2], [1], [1], [2], [0, 0, 0, 1, 1, 2], [0], [0]>} : vector<12x12x32xf32>, vector<12x32x64xf32>, vector<12x12x64xf32> -> vector<12x12x64xf32>
    "tpu.trace_stop"() : () -> ()
    %120 = arith.addf %115, %119 : vector<12x12x64xf32>
    %c1_113 = arith.constant 1 : index
    %c2_114 = arith.constant 2 : index
    %c0_115 = arith.constant 0 : index
    %121 = vector.load %arg11[%c1_113, %c2_114, %c0_115] : memref<14x14x32xf32, #tpu.memory_space<vmem>>, vector<12x12x32xf32>
    %c1_116 = arith.constant 1 : index
    %c2_117 = arith.constant 2 : index
    %c0_118 = arith.constant 0 : index
    %c0_119 = arith.constant 0 : index
    %c0_120 = arith.constant 0 : index
    %122 = vector.load %arg4[%c1_116, %c2_117, %c0_118, %c0_119, %c0_120] : memref<3x3x12x32x64xf32, #tpu.memory_space<vmem>>, vector<1x1x12x32x64xf32>
    %123 = vector.shape_cast %122 : vector<1x1x12x32x64xf32> to vector<12x32x64xf32>
    "tpu.trace_start"() <{level = 10 : i32, message = "hwc,hcd->hwd"}> : () -> ()
    %cst_121 = arith.constant dense<0.000000e+00> : vector<12x12x64xf32>
    %124 = tpu.matmul %121, %123, %cst_121 {dimension_numbers = #tpu.dot_dimension_numbers<[2], [1], [1], [2], [0, 0, 0, 1, 1, 2], [0], [0]>} : vector<12x12x32xf32>, vector<12x32x64xf32>, vector<12x12x64xf32> -> vector<12x12x64xf32>
    "tpu.trace_stop"() : () -> ()
    %125 = arith.addf %120, %124 : vector<12x12x64xf32>
    %c2_122 = arith.constant 2 : index
    %c0_123 = arith.constant 0 : index
    %c0_124 = arith.constant 0 : index
    %126 = vector.load %arg11[%c2_122, %c0_123, %c0_124] : memref<14x14x32xf32, #tpu.memory_space<vmem>>, vector<12x12x32xf32>
    %c2_125 = arith.constant 2 : index
    %c0_126 = arith.constant 0 : index
    %c0_127 = arith.constant 0 : index
    %c0_128 = arith.constant 0 : index
    %c0_129 = arith.constant 0 : index
    %127 = vector.load %arg4[%c2_125, %c0_126, %c0_127, %c0_128, %c0_129] : memref<3x3x12x32x64xf32, #tpu.memory_space<vmem>>, vector<1x1x12x32x64xf32>
    %128 = vector.shape_cast %127 : vector<1x1x12x32x64xf32> to vector<12x32x64xf32>
    "tpu.trace_start"() <{level = 10 : i32, message = "hwc,hcd->hwd"}> : () -> ()
    %cst_130 = arith.constant dense<0.000000e+00> : vector<12x12x64xf32>
    %129 = tpu.matmul %126, %128, %cst_130 {dimension_numbers = #tpu.dot_dimension_numbers<[2], [1], [1], [2], [0, 0, 0, 1, 1, 2], [0], [0]>} : vector<12x12x32xf32>, vector<12x32x64xf32>, vector<12x12x64xf32> -> vector<12x12x64xf32>
    "tpu.trace_stop"() : () -> ()
    %130 = arith.addf %125, %129 : vector<12x12x64xf32>
    %c2_131 = arith.constant 2 : index
    %c1_132 = arith.constant 1 : index
    %c0_133 = arith.constant 0 : index
    %131 = vector.load %arg11[%c2_131, %c1_132, %c0_133] : memref<14x14x32xf32, #tpu.memory_space<vmem>>, vector<12x12x32xf32>
    %c2_134 = arith.constant 2 : index
    %c1_135 = arith.constant 1 : index
    %c0_136 = arith.constant 0 : index
    %c0_137 = arith.constant 0 : index
    %c0_138 = arith.constant 0 : index
    %132 = vector.load %arg4[%c2_134, %c1_135, %c0_136, %c0_137, %c0_138] : memref<3x3x12x32x64xf32, #tpu.memory_space<vmem>>, vector<1x1x12x32x64xf32>
    %133 = vector.shape_cast %132 : vector<1x1x12x32x64xf32> to vector<12x32x64xf32>
    "tpu.trace_start"() <{level = 10 : i32, message = "hwc,hcd->hwd"}> : () -> ()
    %cst_139 = arith.constant dense<0.000000e+00> : vector<12x12x64xf32>
    %134 = tpu.matmul %131, %133, %cst_139 {dimension_numbers = #tpu.dot_dimension_numbers<[2], [1], [1], [2], [0, 0, 0, 1, 1, 2], [0], [0]>} : vector<12x12x32xf32>, vector<12x32x64xf32>, vector<12x12x64xf32> -> vector<12x12x64xf32>
    "tpu.trace_stop"() : () -> ()
    %135 = arith.addf %130, %134 : vector<12x12x64xf32>
    %c2_140 = arith.constant 2 : index
    %c2_141 = arith.constant 2 : index
    %c0_142 = arith.constant 0 : index
    %136 = vector.load %arg11[%c2_140, %c2_141, %c0_142] : memref<14x14x32xf32, #tpu.memory_space<vmem>>, vector<12x12x32xf32>
    %c2_143 = arith.constant 2 : index
    %c2_144 = arith.constant 2 : index
    %c0_145 = arith.constant 0 : index
    %c0_146 = arith.constant 0 : index
    %c0_147 = arith.constant 0 : index
    %137 = vector.load %arg4[%c2_143, %c2_144, %c0_145, %c0_146, %c0_147] : memref<3x3x12x32x64xf32, #tpu.memory_space<vmem>>, vector<1x1x12x32x64xf32>
    %138 = vector.shape_cast %137 : vector<1x1x12x32x64xf32> to vector<12x32x64xf32>
    "tpu.trace_start"() <{level = 10 : i32, message = "hwc,hcd->hwd"}> : () -> ()
    %cst_148 = arith.constant dense<0.000000e+00> : vector<12x12x64xf32>
    %139 = tpu.matmul %136, %138, %cst_148 {dimension_numbers = #tpu.dot_dimension_numbers<[2], [1], [1], [2], [0, 0, 0, 1, 1, 2], [0], [0]>} : vector<12x12x32xf32>, vector<12x32x64xf32>, vector<12x12x64xf32> -> vector<12x12x64xf32>
    "tpu.trace_stop"() : () -> ()
    %140 = arith.addf %135, %139 : vector<12x12x64xf32>
    %c0_149 = arith.constant 0 : index
    %c0_150 = arith.constant 0 : index
    %141 = vector.load %arg5[%c0_149, %c0_150] : memref<1x64xf32, #tpu.memory_space<vmem>>, vector<1x64xf32>
    %142 = vector.shape_cast %141 : vector<1x64xf32> to vector<1x1x64xf32>
    %143 = vector.broadcast %142 : vector<1x1x64xf32> to vector<12x12x64xf32>
    %144 = arith.addf %140, %143 : vector<12x12x64xf32>
    %cst_151 = arith.constant 0.000000e+00 : f32
    %145 = vector.broadcast %cst_151 : f32 to vector<12x12x64xf32>
    %146 = arith.maximumf %144, %145 : vector<12x12x64xf32>
    %147 = vector.shape_cast %146 : vector<12x12x64xf32> to vector<6x2x12x64xf32>
    %148 = vector.extract_strided_slice %147 {offsets = [0, 0, 0, 0], sizes = [6, 1, 12, 64], strides = [1, 1, 1, 1]} : vector<6x2x12x64xf32> to vector<6x1x12x64xf32>
    %149 = vector.shape_cast %148 : vector<6x1x12x64xf32> to vector<6x12x64xf32>
    %150 = vector.extract_strided_slice %147 {offsets = [0, 1, 0, 0], sizes = [6, 1, 12, 64], strides = [1, 1, 1, 1]} : vector<6x2x12x64xf32> to vector<6x1x12x64xf32>
    %151 = vector.shape_cast %150 : vector<6x1x12x64xf32> to vector<6x12x64xf32>
    %152 = arith.maximumf %149, %151 : vector<6x12x64xf32>
    %cst_152 = arith.constant 0.000000e+00 : f32
    %153 = vector.broadcast %cst_152 : f32 to vector<6x1x128xf32>
    %154 = vector.extract_strided_slice %152 {offsets = [0, 0, 0], sizes = [6, 1, 64], strides = [1, 1, 1]} : vector<6x12x64xf32> to vector<6x1x64xf32>
    %155 = vector.extract_strided_slice %152 {offsets = [0, 1, 0], sizes = [6, 1, 64], strides = [1, 1, 1]} : vector<6x12x64xf32> to vector<6x1x64xf32>
    %156 = arith.maximumf %154, %155 : vector<6x1x64xf32>
    %c0_153 = arith.constant 0 : index
    %c0_154 = arith.constant 0 : index
    %c0_155 = arith.constant 0 : index
    %c0_156 = arith.constant 0 : index
    %157 = vector.load %arg6[%c0_153, %c0_154, %c0_155, %c0_156] : memref<6x6x64x128xf32, #tpu.memory_space<vmem>>, vector<1x6x64x128xf32>
    %158 = vector.shape_cast %157 : vector<1x6x64x128xf32> to vector<6x64x128xf32>
    "tpu.trace_start"() <{level = 10 : i32, message = "hqc,hcj->hqj"}> : () -> ()
    %cst_157 = arith.constant dense<0.000000e+00> : vector<6x1x128xf32>
    %159 = tpu.matmul %156, %158, %cst_157 {dimension_numbers = #tpu.dot_dimension_numbers<[2], [1], [1], [2], [0, 0, 0, 1, 1, 2], [0], [0]>} : vector<6x1x64xf32>, vector<6x64x128xf32>, vector<6x1x128xf32> -> vector<6x1x128xf32>
    "tpu.trace_stop"() : () -> ()
    %160 = arith.addf %153, %159 : vector<6x1x128xf32>
    %161 = vector.extract_strided_slice %152 {offsets = [0, 2, 0], sizes = [6, 1, 64], strides = [1, 1, 1]} : vector<6x12x64xf32> to vector<6x1x64xf32>
    %162 = vector.extract_strided_slice %152 {offsets = [0, 3, 0], sizes = [6, 1, 64], strides = [1, 1, 1]} : vector<6x12x64xf32> to vector<6x1x64xf32>
    %163 = arith.maximumf %161, %162 : vector<6x1x64xf32>
    %c1_158 = arith.constant 1 : index
    %c0_159 = arith.constant 0 : index
    %c0_160 = arith.constant 0 : index
    %c0_161 = arith.constant 0 : index
    %164 = vector.load %arg6[%c1_158, %c0_159, %c0_160, %c0_161] : memref<6x6x64x128xf32, #tpu.memory_space<vmem>>, vector<1x6x64x128xf32>
    %165 = vector.shape_cast %164 : vector<1x6x64x128xf32> to vector<6x64x128xf32>
    "tpu.trace_start"() <{level = 10 : i32, message = "hqc,hcj->hqj"}> : () -> ()
    %cst_162 = arith.constant dense<0.000000e+00> : vector<6x1x128xf32>
    %166 = tpu.matmul %163, %165, %cst_162 {dimension_numbers = #tpu.dot_dimension_numbers<[2], [1], [1], [2], [0, 0, 0, 1, 1, 2], [0], [0]>} : vector<6x1x64xf32>, vector<6x64x128xf32>, vector<6x1x128xf32> -> vector<6x1x128xf32>
    "tpu.trace_stop"() : () -> ()
    %167 = arith.addf %160, %166 : vector<6x1x128xf32>
    %168 = vector.extract_strided_slice %152 {offsets = [0, 4, 0], sizes = [6, 1, 64], strides = [1, 1, 1]} : vector<6x12x64xf32> to vector<6x1x64xf32>
    %169 = vector.extract_strided_slice %152 {offsets = [0, 5, 0], sizes = [6, 1, 64], strides = [1, 1, 1]} : vector<6x12x64xf32> to vector<6x1x64xf32>
    %170 = arith.maximumf %168, %169 : vector<6x1x64xf32>
    %c2_163 = arith.constant 2 : index
    %c0_164 = arith.constant 0 : index
    %c0_165 = arith.constant 0 : index
    %c0_166 = arith.constant 0 : index
    %171 = vector.load %arg6[%c2_163, %c0_164, %c0_165, %c0_166] : memref<6x6x64x128xf32, #tpu.memory_space<vmem>>, vector<1x6x64x128xf32>
    %172 = vector.shape_cast %171 : vector<1x6x64x128xf32> to vector<6x64x128xf32>
    "tpu.trace_start"() <{level = 10 : i32, message = "hqc,hcj->hqj"}> : () -> ()
    %cst_167 = arith.constant dense<0.000000e+00> : vector<6x1x128xf32>
    %173 = tpu.matmul %170, %172, %cst_167 {dimension_numbers = #tpu.dot_dimension_numbers<[2], [1], [1], [2], [0, 0, 0, 1, 1, 2], [0], [0]>} : vector<6x1x64xf32>, vector<6x64x128xf32>, vector<6x1x128xf32> -> vector<6x1x128xf32>
    "tpu.trace_stop"() : () -> ()
    %174 = arith.addf %167, %173 : vector<6x1x128xf32>
    %175 = vector.extract_strided_slice %152 {offsets = [0, 6, 0], sizes = [6, 1, 64], strides = [1, 1, 1]} : vector<6x12x64xf32> to vector<6x1x64xf32>
    %176 = vector.extract_strided_slice %152 {offsets = [0, 7, 0], sizes = [6, 1, 64], strides = [1, 1, 1]} : vector<6x12x64xf32> to vector<6x1x64xf32>
    %177 = arith.maximumf %175, %176 : vector<6x1x64xf32>
    %c3_168 = arith.constant 3 : index
    %c0_169 = arith.constant 0 : index
    %c0_170 = arith.constant 0 : index
    %c0_171 = arith.constant 0 : index
    %178 = vector.load %arg6[%c3_168, %c0_169, %c0_170, %c0_171] : memref<6x6x64x128xf32, #tpu.memory_space<vmem>>, vector<1x6x64x128xf32>
    %179 = vector.shape_cast %178 : vector<1x6x64x128xf32> to vector<6x64x128xf32>
    "tpu.trace_start"() <{level = 10 : i32, message = "hqc,hcj->hqj"}> : () -> ()
    %cst_172 = arith.constant dense<0.000000e+00> : vector<6x1x128xf32>
    %180 = tpu.matmul %177, %179, %cst_172 {dimension_numbers = #tpu.dot_dimension_numbers<[2], [1], [1], [2], [0, 0, 0, 1, 1, 2], [0], [0]>} : vector<6x1x64xf32>, vector<6x64x128xf32>, vector<6x1x128xf32> -> vector<6x1x128xf32>
    "tpu.trace_stop"() : () -> ()
    %181 = arith.addf %174, %180 : vector<6x1x128xf32>
    %182 = vector.extract_strided_slice %152 {offsets = [0, 8, 0], sizes = [6, 1, 64], strides = [1, 1, 1]} : vector<6x12x64xf32> to vector<6x1x64xf32>
    %183 = vector.extract_strided_slice %152 {offsets = [0, 9, 0], sizes = [6, 1, 64], strides = [1, 1, 1]} : vector<6x12x64xf32> to vector<6x1x64xf32>
    %184 = arith.maximumf %182, %183 : vector<6x1x64xf32>
    %c4_173 = arith.constant 4 : index
    %c0_174 = arith.constant 0 : index
    %c0_175 = arith.constant 0 : index
    %c0_176 = arith.constant 0 : index
    %185 = vector.load %arg6[%c4_173, %c0_174, %c0_175, %c0_176] : memref<6x6x64x128xf32, #tpu.memory_space<vmem>>, vector<1x6x64x128xf32>
    %186 = vector.shape_cast %185 : vector<1x6x64x128xf32> to vector<6x64x128xf32>
    "tpu.trace_start"() <{level = 10 : i32, message = "hqc,hcj->hqj"}> : () -> ()
    %cst_177 = arith.constant dense<0.000000e+00> : vector<6x1x128xf32>
    %187 = tpu.matmul %184, %186, %cst_177 {dimension_numbers = #tpu.dot_dimension_numbers<[2], [1], [1], [2], [0, 0, 0, 1, 1, 2], [0], [0]>} : vector<6x1x64xf32>, vector<6x64x128xf32>, vector<6x1x128xf32> -> vector<6x1x128xf32>
    "tpu.trace_stop"() : () -> ()
    %188 = arith.addf %181, %187 : vector<6x1x128xf32>
    %189 = vector.extract_strided_slice %152 {offsets = [0, 10, 0], sizes = [6, 1, 64], strides = [1, 1, 1]} : vector<6x12x64xf32> to vector<6x1x64xf32>
    %190 = vector.extract_strided_slice %152 {offsets = [0, 11, 0], sizes = [6, 1, 64], strides = [1, 1, 1]} : vector<6x12x64xf32> to vector<6x1x64xf32>
    %191 = arith.maximumf %189, %190 : vector<6x1x64xf32>
    %c5_178 = arith.constant 5 : index
    %c0_179 = arith.constant 0 : index
    %c0_180 = arith.constant 0 : index
    %c0_181 = arith.constant 0 : index
    %192 = vector.load %arg6[%c5_178, %c0_179, %c0_180, %c0_181] : memref<6x6x64x128xf32, #tpu.memory_space<vmem>>, vector<1x6x64x128xf32>
    %193 = vector.shape_cast %192 : vector<1x6x64x128xf32> to vector<6x64x128xf32>
    "tpu.trace_start"() <{level = 10 : i32, message = "hqc,hcj->hqj"}> : () -> ()
    %cst_182 = arith.constant dense<0.000000e+00> : vector<6x1x128xf32>
    %194 = tpu.matmul %191, %193, %cst_182 {dimension_numbers = #tpu.dot_dimension_numbers<[2], [1], [1], [2], [0, 0, 0, 1, 1, 2], [0], [0]>} : vector<6x1x64xf32>, vector<6x64x128xf32>, vector<6x1x128xf32> -> vector<6x1x128xf32>
    "tpu.trace_stop"() : () -> ()
    %195 = arith.addf %188, %194 : vector<6x1x128xf32>
    %196 = vector.extract_strided_slice %195 {offsets = [0, 0, 0], sizes = [1, 1, 128], strides = [1, 1, 1]} : vector<6x1x128xf32> to vector<1x1x128xf32>
    %197 = vector.shape_cast %196 : vector<1x1x128xf32> to vector<1x128xf32>
    %198 = vector.extract_strided_slice %195 {offsets = [1, 0, 0], sizes = [1, 1, 128], strides = [1, 1, 1]} : vector<6x1x128xf32> to vector<1x1x128xf32>
    %199 = vector.shape_cast %198 : vector<1x1x128xf32> to vector<1x128xf32>
    %200 = arith.addf %197, %199 : vector<1x128xf32>
    %201 = vector.extract_strided_slice %195 {offsets = [2, 0, 0], sizes = [1, 1, 128], strides = [1, 1, 1]} : vector<6x1x128xf32> to vector<1x1x128xf32>
    %202 = vector.shape_cast %201 : vector<1x1x128xf32> to vector<1x128xf32>
    %203 = arith.addf %200, %202 : vector<1x128xf32>
    %204 = vector.extract_strided_slice %195 {offsets = [3, 0, 0], sizes = [1, 1, 128], strides = [1, 1, 1]} : vector<6x1x128xf32> to vector<1x1x128xf32>
    %205 = vector.shape_cast %204 : vector<1x1x128xf32> to vector<1x128xf32>
    %206 = arith.addf %203, %205 : vector<1x128xf32>
    %207 = vector.extract_strided_slice %195 {offsets = [4, 0, 0], sizes = [1, 1, 128], strides = [1, 1, 1]} : vector<6x1x128xf32> to vector<1x1x128xf32>
    %208 = vector.shape_cast %207 : vector<1x1x128xf32> to vector<1x128xf32>
    %209 = arith.addf %206, %208 : vector<1x128xf32>
    %210 = vector.extract_strided_slice %195 {offsets = [5, 0, 0], sizes = [1, 1, 128], strides = [1, 1, 1]} : vector<6x1x128xf32> to vector<1x1x128xf32>
    %211 = vector.shape_cast %210 : vector<1x1x128xf32> to vector<1x128xf32>
    %212 = arith.addf %209, %211 : vector<1x128xf32>
    %c0_183 = arith.constant 0 : index
    %c0_184 = arith.constant 0 : index
    %213 = vector.load %arg7[%c0_183, %c0_184] : memref<1x128xf32, #tpu.memory_space<vmem>>, vector<1x128xf32>
    %214 = arith.addf %212, %213 : vector<1x128xf32>
    %cst_185 = arith.constant 0.000000e+00 : f32
    %215 = vector.broadcast %cst_185 : f32 to vector<1x128xf32>
    %216 = arith.maximumf %214, %215 : vector<1x128xf32>
    %c0_186 = arith.constant 0 : index
    %c0_187 = arith.constant 0 : index
    %217 = vector.load %arg8[%c0_186, %c0_187] : memref<128x10xf32, #tpu.memory_space<vmem>>, vector<128x10xf32>
    %cst_188 = arith.constant dense<0.000000e+00> : vector<1x10xf32>
    %218 = tpu.matmul %216, %217, %cst_188 {dimension_numbers = #tpu.dot_dimension_numbers<[1], [0], [0], [1], [0, 0, 1, 1], [], []>} : vector<1x128xf32>, vector<128x10xf32>, vector<1x10xf32> -> vector<1x10xf32>
    %c0_189 = arith.constant 0 : index
    %c0_190 = arith.constant 0 : index
    %219 = vector.load %arg9[%c0_189, %c0_190] : memref<1x10xf32, #tpu.memory_space<vmem>>, vector<1x10xf32>
    %220 = arith.addf %218, %219 : vector<1x10xf32>
    %c0_191 = arith.constant 0 : index
    %c0_192 = arith.constant 0 : index
    %c0_193 = arith.constant 0 : index
    %221 = vector.load %arg10[%c0_191, %c0_192, %c0_193] : memref<1x1x10xf32, #tpu.memory_space<vmem>>, vector<1x1x10xf32>
    %222 = vector.shape_cast %221 : vector<1x1x10xf32> to vector<1x10xf32>
    %223 = vector.shape_cast %220 : vector<1x10xf32> to vector<1x1x10xf32>
    tpu.vector_store %arg10[%c0_191, %c0_192, %c0_193], %223 {strides = array<i32>} : memref<1x1x10xf32, #tpu.memory_space<vmem>>, vector<1x1x10xf32>,
    return
  }
  func.func @transform_0(%arg0: i32) -> (i32, i32, i32, i32) {
    %c0_i32 = arith.constant 0 : i32
    %c0_i32_0 = arith.constant 0 : i32
    %c0_i32_1 = arith.constant 0 : i32
    %c0_i32_2 = arith.constant 0 : i32
    return %arg0, %c0_i32, %c0_i32_0, %c0_i32_1 : i32, i32, i32, i32
  }
  func.func @transform_1(%arg0: i32) -> (i32, i32) {
    %c0_i32 = arith.constant 0 : i32
    %c0_i32_0 = arith.constant 0 : i32
    %c0_i32_1 = arith.constant 0 : i32
    return %c0_i32, %c0_i32_0 : i32, i32
  }
  func.func @transform_2(%arg0: i32) -> (i32, i32) {
    %c0_i32 = arith.constant 0 : i32
    %c0_i32_0 = arith.constant 0 : i32
    %c0_i32_1 = arith.constant 0 : i32
    return %c0_i32, %c0_i32_0 : i32, i32
  }
  func.func @transform_3(%arg0: i32) -> (i32, i32, i32, i32, i32) {
    %c0_i32 = arith.constant 0 : i32
    %c0_i32_0 = arith.constant 0 : i32
    %c0_i32_1 = arith.constant 0 : i32
    %c0_i32_2 = arith.constant 0 : i32
    %c0_i32_3 = arith.constant 0 : i32
    %c0_i32_4 = arith.constant 0 : i32
    return %c0_i32, %c0_i32_0, %c0_i32_1, %c0_i32_2, %c0_i32_3 : i32, i32, i32, i32, i32
  }
  func.func @transform_4(%arg0: i32) -> (i32, i32) {
    %c0_i32 = arith.constant 0 : i32
    %c0_i32_0 = arith.constant 0 : i32
    %c0_i32_1 = arith.constant 0 : i32
    return %c0_i32, %c0_i32_0 : i32, i32
  }
  func.func @transform_5(%arg0: i32) -> (i32, i32, i32, i32) {
    %c0_i32 = arith.constant 0 : i32
    %c0_i32_0 = arith.constant 0 : i32
    %c0_i32_1 = arith.constant 0 : i32
    %c0_i32_2 = arith.constant 0 : i32
    %c0_i32_3 = arith.constant 0 : i32
    return %c0_i32, %c0_i32_0, %c0_i32_1, %c0_i32_2 : i32, i32, i32, i32
  }
  func.func @transform_6(%arg0: i32) -> (i32, i32) {
    %c0_i32 = arith.constant 0 : i32
    %c0_i32_0 = arith.constant 0 : i32
    %c0_i32_1 = arith.constant 0 : i32
    return %c0_i32, %c0_i32_0 : i32, i32
  }
  func.func @transform_7(%arg0: i32) -> (i32, i32) {
    %c0_i32 = arith.constant 0 : i32
    %c0_i32_0 = arith.constant 0 : i32
    %c0_i32_1 = arith.constant 0 : i32
    return %c0_i32, %c0_i32_0 : i32, i32
  }
  func.func @transform_8(%arg0: i32) -> (i32, i32) {
    %c0_i32 = arith.constant 0 : i32
    %c0_i32_0 = arith.constant 0 : i32
    %c0_i32_1 = arith.constant 0 : i32
    return %c0_i32, %c0_i32_0 : i32, i32
  }
  func.func @transform_9(%arg0: i32) -> (i32, i32, i32) {
    %c0_i32 = arith.constant 0 : i32
    %c0_i32_0 = arith.constant 0 : i32
    %c0_i32_1 = arith.constant 0 : i32
    return %arg0, %c0_i32, %c0_i32_0 : i32, i32, i32
  }
}

</mosaic_0001>

<bundles_post_ra>
// kernel: net_forward.1
= control target key start
LH: loop header
LB: loop body
LE: loop exit
PB: predicated region body
PF: predicated region fallthrough
CT: control target
= control target key end

     0   :  { %14 = vsyncpa [#allocation4], 0  ;;  %s24211_s0 = inlined_call_operand.vmem [shape: f32[2,4,196,128], index: 0, kind: input, shape index: {}]   ;;  %s24212_s1 = inlined_call_operand.vmem [shape: f32[128,32], index: 1, kind: input, shape index: {}]   ;;  %s24213_s2 = inlined_call_operand.vmem [shape: f32[1,32], index: 2, kind: input, shape index: {}]   ;;  %s24214_s3 = inlined_call_operand.vmem [shape: f32[3,3,12,32,64], index: 3, kind: input, shape index: {}]   ;;  %s24215_s4 = inlined_call_operand.vmem [shape: f32[1,64], index: 4, kind: input, shape index: {}]   ;;  %s24216_s5 = inlined_call_operand.vmem [shape: f32[6,6,64,128], index: 5, kind: input, shape index: {}]   ;;  %s24217_s6 = inlined_call_operand.vmem [shape: f32[1,128], index: 6, kind: input, shape index: {}]   ;;  %s24218_s7 = inlined_call_operand.vmem [shape: f32[128,10], index: 7, kind: input, shape index: {}]   ;;  %s24219_s8 = inlined_call_operand.vmem [shape: f32[1,10], index: 8, kind: input, shape index: {}]   ;;  %s24220_s9 = inlined_call_operand.hbm [shape: f32[2,1,10], index: 9, kind: output, shape index: {}]  }
   0x1   :  { %16 = vsyncpa [#allocation4 + $0x1], 0  ;;  %s20463_s30 = smov 0   ;;  %s20465_s10 = smov 0  }
   0x2   :  { %s20467_s11 = smov 0   ;;  %s20469_s12 = smov 0  }
   0x3 LB: > { %s20484_s13 = sadd.s32 4294967295, %s20407_s12   ;;  %s14244_s14 = sadd.s32 4294967294, %s20407_s12   ;;  %s20407_s12 = sphi %s20469_s12, %s24226_s12   ;;  %s20403_s11 = sphi %s20467_s11, %s24225_s11   ;;  %s20399_s10 = sphi %s20465_s10, %s24224_s10   ;;  %s20395_s30 = sphi %s20463_s30, %s24223_s30  }
   0x4   : > { %s20488_s15 = sadd.s32 1, %s20407_s12   ;;  %s223_s16 = sadd.s32 1, %s20403_s11 }
   0x5   : > { %s220_s17 = ssub.s32 %s20407_s12, %s20488_s15  ;;  %p233_p0 = scmp.ne.s32.totalorder %s20403_s11, %s20399_s10 }
   0x6   : > { %p221_p1 = scmp.eq.s32.totalorder %s220_s17, 0  ;;  %p234_p2 = scmp.eq.s32.totalorder %s20484_s13, 1 }
   0x7   : > { %p239_p3 = scmp.ne.s32.totalorder %s20399_s10, %s20395_s30  ;;  %p240_p4 = scmp.eq.s32.totalorder %s14244_s14, 1 }
   0x8   : > { %s20499_s18 = scalar_select %p221_p1, %s20403_s11, %s223_s16  }
   0x9   : > { %p20501_p5 = por %p234_p2, %p233_p0  ;;  %p20505_p6 = por %p240_p4, %p239_p3 }
   0xa   : > { %p14247_p7 = scmp.ge.s32.totalorder %s20407_s12, 1  ;;  %p290_p8 = scmp.lt.s32.totalorder %s20407_s12, 3 }
   0xc   : > { %p291_p9 = pnand %p14247_p7, %p290_p8 }
   0xd   : > { %v355_v0 = vld [vmem:[%s24212_s1] sm:$0xff] (!%p291_p9)  ;;  %v356_v1 = vld [vmem:[%s24212_s1 + $0x8] sm:$0xff] (!%p291_p9)  ;;  %v357_v2 = vld [vmem:[%s24212_s1 + $0x10] sm:$0xff] (!%p291_p9)  ;;  %v20409_v3 = vmov (!%p291_p9), 0.0|0.0   ;;  %vm20410_vm0 = vmmov (!%p291_p9), 0   ;;  %v20411_v6 = vmov (!%p291_p9), 0.0  }
   0xe   : > { %294 = sbr.rel (%p291_p9) target bundleno = 1761 (0x6e1), region = 56  ;;  %18693 = vmatprep.subr.bf16.mxu0 (!%p291_p9), %v20409_v3  ;;  %v20521_v4 = vpack.c.bf16 (!%p291_p9), %v356_v1, %v355_v0  ;;  %18717 = vmatprep.subr.bf16.mxu1 (!%p291_p9), %v20409_v3  ;;  %v358_v5 = vld [vmem:[%s24212_s1 + $0x18] sm:$0xff] (!%p291_p9)  ;;  %v359_v8 = vld [vmem:[%s24212_s1 + $0x20] sm:$0xff] (!%p291_p9)  ;;  %v360_v9 = vld [vmem:[%s24212_s1 + $0x28] sm:$0xff] (!%p291_p9)  ;;  %p325_p10 = scmp.lt.s32.totalorder (!%p291_p9), %s20484_s13, 1  ;;  %vm1391_vm1 = vcmask (!%p291_p9), 261120  }
   0xf   : > { %16390 = vmatprep.mubr.msk.f32.mxu0 (!%p291_p9), %vm20410_vm0, %v20411_v6  ;;  %16497 = vmatprep.mubr.msk.f32.mxu1 (!%p291_p9), %vm20410_vm0, %v20411_v6  ;;  %v20533_v7 = vpack.c.bf16 (!%p291_p9), %v358_v5, %v357_v2  ;;  %v20545_v10 = vpack.c.bf16 (!%p291_p9), %v360_v9, %v359_v8  ;;  %v361_v11 = vld [vmem:[%s24212_s1 + $0x30] sm:$0xff] (!%p291_p9)  ;;  %v362_v12 = vld [vmem:[%s24212_s1 + $0x38] sm:$0xff] (!%p291_p9)  ;;  %v363_v14 = vld [vmem:[%s24212_s1 + $0x40] sm:$0xff] (!%p291_p9)  ;;  %vm1393_vm2 = vcmask (!%p291_p9), 259072   ;;  %vm1396_vm3 = vcmask (!%p291_p9), 261126   ;;  %s15202_s29 = sshll.u32 (!%p291_p9), %s20484_s13, 4 }
  0x10   : > { %18695 = vmatpush3.bf16.msra.mxu0 (!%p291_p9), %v20521_v4  ;;  %18719 = vmatpush3.bf16.msra.mxu1 (!%p291_p9), %v20521_v4  ;;  %v20557_v13 = vpack.c.bf16 (!%p291_p9), %v362_v12, %v361_v11  ;;  %v364_v15 = vld [vmem:[%s24212_s1 + $0x48] sm:$0xff] (!%p291_p9)  ;;  %v365_v17 = vld [vmem:[%s24212_s1 + $0x50] sm:$0xff] (!%p291_p9)  ;;  %v366_v18 = vld [vmem:[%s24212_s1 + $0x58] sm:$0xff] (!%p291_p9)  ;;  %vm1399_vm4 = vcmask (!%p291_p9), 257024   ;;  %vm1402_vm5 = vcmask (!%p291_p9), 261124   ;;  %vm1405_vm6 = vcmask (!%p291_p9), 254976   ;;  %s24169_s23 = scalar_lea.hbm (!%p291_p9), %s24220_s9, %s15202_s29 }
  0x11   : > { %18696 = vmatprep.subr.bf16.mxu0 (!%p291_p9), %v20409_v3  ;;  %18720 = vmatprep.subr.bf16.mxu1 (!%p291_p9), %v20409_v3  ;;  %v20569_v16 = vpack.c.bf16 (!%p291_p9), %v364_v15, %v363_v14  ;;  %v20582_v19 = vpack.c.bf16 (!%p291_p9), %v366_v18, %v365_v17  ;;  %v367_v20 = vld [vmem:[%s24212_s1 + $0x60] sm:$0xff] (!%p291_p9)  ;;  %v368_v21 = vld [vmem:[%s24212_s1 + $0x68] sm:$0xff] (!%p291_p9)  ;;  %v369_v23 = vld [vmem:[%s24212_s1 + $0x70] sm:$0xff] (!%p291_p9)  ;;  %vm1408_vm7 = vcmask (!%p291_p9), 261122   ;;  %vm11208_vm8 = vcmask (!%p291_p9), 523264  }
  0x12   : > { %v20595_v22 = vpack.c.bf16 (!%p291_p9), %v368_v21, %v367_v20  ;;  %v370_v24 = vld [vmem:[%s24212_s1 + $0x78] sm:$0xff] (!%p291_p9)  ;;  %vm14174_vm9 = vcmask (!%p291_p9), 73728  }
  0x13   : > { %v20607_v25 = vpack.c.bf16 (!%p291_p9), %v370_v24, %v369_v23 }
  0x14   : > { %18698 = vmatpush3.bf16.msra.mxu0 (!%p291_p9), %v20533_v7  ;;  %18722 = vmatpush3.bf16.msra.mxu1 (!%p291_p9), %v20533_v7 }
  0x15   : > { %18699 = vmatprep.subr.bf16.mxu0 %v20409_v3  ;;  %18723 = vmatprep.subr.bf16.mxu1 %v20409_v3  ;;  %s326_s25 = scalar_select %p325_p10, %s20484_s13, 1 }
  0x16   : > { %s20412_s13 = smov [#allocation3]  }
  0x17   : > { %s20301_s14 = smul.u32 800, %s326_s25  ;;  %s20349_s26 = sshll.u32 %s20412_s13, 4  ;;  %s20350_s26 = int_to_ptr.vmem [resolvable:$false] %s20349_s26 }
  0x18   : > { %18701 = vmatpush3.bf16.msra.mxu0 %v20545_v10  ;;  %18725 = vmatpush3.bf16.msra.mxu1 %v20545_v10  ;;  %s20351_s27 = scalar_lea.vmem %s20350_s26, 32 }
  0x19   : > { %18702 = vmatprep.subr.bf16.mxu0 %v20409_v3  ;;  %18726 = vmatprep.subr.bf16.mxu1 %v20409_v3  ;;  %s20614_s21 = scalar_lea.vmem %s24211_s0, %s20301_s14 }
  0x1a   : > { %v330_v26 = vld [vmem:[%s20614_s21] sm:$0xff]  ;;  %v14250_v27 = vld [vmem:[%s20614_s21 + $0xc8] sm:$0xff]  ;;  %v14251_v29 = vld [vmem:[%s20614_s21 + $0xd0] sm:$0xff] }
  0x1b   : > { %v331_v28 = vld [vmem:[%s20614_s21 + $0x8] sm:$0xff]  ;;  %v332_v30 = vld [vmem:[%s20614_s21 + $0x10] sm:$0xff]  ;;  %v14252_v31 = vld [vmem:[%s20614_s21 + $0xd8] sm:$0xff] }
  0x1c   : > { %18704 = vmatpush3.bf16.msra.mxu0 %v20557_v13  ;;  %18728 = vmatpush3.bf16.msra.mxu1 %v20557_v13  ;;  %v333_v32 = vld [vmem:[%s20614_s21 + $0x18] sm:$0xff]  ;;  %v14253_v33 = vld [vmem:[%s20614_s21 + $0xe0] sm:$0xff]  ;;  %v14254_v35 = vld [vmem:[%s20614_s21 + $0xe8] sm:$0xff] }
  0x1d   : > { %18705 = vmatprep.subr.bf16.mxu0 %v20409_v3  ;;  %18729 = vmatprep.subr.bf16.mxu1 %v20409_v3  ;;  %v334_v34 = vld [vmem:[%s20614_s21 + $0x20] sm:$0xff]  ;;  %v335_v36 = vld [vmem:[%s20614_s21 + $0x28] sm:$0xff]  ;;  %v14255_v37 = vld [vmem:[%s20614_s21 + $0xf0] sm:$0xff] }
  0x1e   : > { %v336_v38 = vld [vmem:[%s20614_s21 + $0x30] sm:$0xff]  ;;  %v14256_v39 = vld [vmem:[%s20614_s21 + $0xf8] sm:$0xff]  ;;  %v14257_v41 = vld [vmem:[%s20614_s21 + $0x100] sm:$0xff] }
  0x1f   : > { %v337_v40 = vld [vmem:[%s20614_s21 + $0x38] sm:$0xff]  ;;  %v338_v42 = vld [vmem:[%s20614_s21 + $0x40] sm:$0xff]  ;;  %v14258_v43 = vld [vmem:[%s20614_s21 + $0x108] sm:$0xff] }
  0x20   : > { %18707 = vmatpush3.bf16.msra.mxu0 %v20569_v16  ;;  %18731 = vmatpush3.bf16.msra.mxu1 %v20569_v16  ;;  %v339_v44 = vld [vmem:[%s20614_s21 + $0x48] sm:$0xff]  ;;  %v14259_v45 = vld [vmem:[%s20614_s21 + $0x110] sm:$0xff]  ;;  %v14260_v47 = vld [vmem:[%s20614_s21 + $0x118] sm:$0xff] }
  0x21   : > { %18708 = vmatprep.subr.bf16.mxu0 %v20409_v3  ;;  %18732 = vmatprep.subr.bf16.mxu1 %v20409_v3  ;;  %v340_v46 = vld [vmem:[%s20614_s21 + $0x50] sm:$0xff]  ;;  %v341_v48 = vld [vmem:[%s20614_s21 + $0x58] sm:$0xff]  ;;  %v14261_v49 = vld [vmem:[%s20614_s21 + $0x120] sm:$0xff] }
  0x22   : > { %v342_v50 = vld [vmem:[%s20614_s21 + $0x60] sm:$0xff]  ;;  %v14262_v51 = vld [vmem:[%s20614_s21 + $0x128] sm:$0xff]  ;;  %v14263_v53 = vld [vmem:[%s20614_s21 + $0x130] sm:$0xff] }
  0x23   : > { %v343_v52 = vld [vmem:[%s20614_s21 + $0x68] sm:$0xff]  ;;  %v344_v54 = vld [vmem:[%s20614_s21 + $0x70] sm:$0xff]  ;;  %v14264_v55 = vld [vmem:[%s20614_s21 + $0x138] sm:$0xff] }
  0x24   : > { %18710 = vmatpush3.bf16.msra.mxu0 %v20582_v19  ;;  %18734 = vmatpush3.bf16.msra.mxu1 %v20582_v19  ;;  %v345_v56 = vld [vmem:[%s20614_s21 + $0x78] sm:$0xff]  ;;  %v14265_v57 = vld [vmem:[%s20614_s21 + $0x140] sm:$0xff]  ;;  %v14266_v59 = vld [vmem:[%s20614_s21 + $0x148] sm:$0xff] }
  0x25   : > { %18711 = vmatprep.subr.bf16.mxu0 %v20409_v3  ;;  %18735 = vmatprep.subr.bf16.mxu1 %v20409_v3  ;;  %v346_v58 = vld [vmem:[%s20614_s21 + $0x80] sm:$0xff]  ;;  %v347_v60 = vld [vmem:[%s20614_s21 + $0x88] sm:$0xff]  ;;  %v14267_v61 = vld [vmem:[%s20614_s21 + $0x150] sm:$0xff] }
  0x26   : > { %v348_v62 = vld [vmem:[%s20614_s21 + $0x90] sm:$0xff]  ;;  %v14268_v63 = vld [vmem:[%s20614_s21 + $0x158] sm:$0xff]  ;;  %v14269_v1 = vld [vmem:[%s20614_s21 + $0x160] sm:$0xff] }
  0x27   : > { %v349_v0 = vld [vmem:[%s20614_s21 + $0x98] sm:$0xff]  ;;  %v350_v2 = vld [vmem:[%s20614_s21 + $0xa0] sm:$0xff]  ;;  %v351_v5 = vld [vmem:[%s20614_s21 + $0xa8] sm:$0xff] }
  0x28   : > { %18713 = vmatpush3.bf16.msra.mxu0 %v20595_v22  ;;  %18737 = vmatpush3.bf16.msra.mxu1 %v20595_v22  ;;  %v352_v8 = vld [vmem:[%s20614_s21 + $0xb0] sm:$0xff]  ;;  %v14272_v9 = vld [vmem:[%s20614_s21 + $0x178] sm:$0xff]  ;;  %v14273_v11 = vld [vmem:[%s20614_s21 + $0x180] sm:$0xff] }
  0x29   : > { %18714 = vmatprep.subr.bf16.mxu0 %v20409_v3  ;;  %18738 = vmatprep.subr.bf16.mxu1 %v20409_v3  ;;  %v354_v12 = vld [vmem:[%s20614_s21 + $0xc0] sm:$0xf]  ;;  %v14275_v14 = vld [vmem:[%s20614_s21 + $0x190] sm:$0xff]  ;;  %v14300_v15 = vld [vmem:[%s20614_s21 + $0x258] sm:$0xff] }
  0x2a   : > { %v14301_v17 = vld [vmem:[%s20614_s21 + $0x260] sm:$0xff]  ;;  %v14278_v20 = vld [vmem:[%s20614_s21 + $0x1a8] sm:$0xff]  ;;  %v14303_v21 = vld [vmem:[%s20614_s21 + $0x270] sm:$0xff] }
  0x2b   : > { %v14277_v18 = vld [vmem:[%s20614_s21 + $0x1a0] sm:$0xff]  ;;  %v14304_v23 = vld [vmem:[%s20614_s21 + $0x278] sm:$0xff] }
  0x2c   : > { %18716 = vmatpush3.bf16.msra.mxu0 %v20607_v25  ;;  %18740 = vmatpush3.bf16.msra.mxu1 %v20607_v25  ;;  %v14280_v24 = vld [vmem:[%s20614_s21 + $0x1b8] sm:$0xff] }
  0x2d   : > { %18741 = vmatprep.subr.bf16.mxu0 %v20409_v3  ;;  %18765 = vmatprep.subr.bf16.mxu1 %v20409_v3 }
  0x2f   : > { %16391 = vmatmul.mubr.f32.vlgmr.msra.gmra.mrb[0].mxu0 %v330_v26  ;;  %16498 = vmatmul.mubr.f32.vlgmr.msra.gmra.mrb[0].mxu1 %v14250_v27  ;;  %v14281_v26 = vld [vmem:[%s20614_s21 + $0x1c0] sm:$0xff]  ;;  %v14306_v27 = vld [vmem:[%s20614_s21 + $0x288] sm:$0xff] }
  0x30   : > { %18743 = vmatpush3.bf16.msra.mxu0 %v20521_v4  ;;  %16393 = vmatprep.mubr.msk.f32.mxu0 %vm20410_vm0, %v20411_v6 }
  0x31   : > { %18767 = vmatpush3.bf16.msra.mxu1 %v20521_v4  ;;  %16500 = vmatprep.mubr.msk.f32.mxu1 %vm20410_vm0, %v20411_v6  ;;  %v14270_v4 = vld [vmem:[%s20614_s21 + $0x168] sm:$0xff] }
  0x32   : > { %18744 = vmatprep.subr.bf16.mxu0 %v20409_v3  ;;  %18768 = vmatprep.subr.bf16.mxu1 %v20409_v3 }
  0x33   : > { %16394 = vmatmul.mubr.f32.gmra.mrb[2].mxu0 %v331_v28  ;;  %16501 = vmatmul.mubr.f32.gmra.mrb[2].mxu1 %v14251_v29  ;;  %v14282_v28 = vld [vmem:[%s20614_s21 + $0x1c8] sm:$0xff]  ;;  %v14307_v29 = vld [vmem:[%s20614_s21 + $0x290] sm:$0xff] }
  0x34   : > { %16396 = vmatprep.mubr.msk.f32.mxu0 %vm20410_vm0, %v20411_v6  ;;  %16503 = vmatprep.mubr.msk.f32.mxu1 %vm20410_vm0, %v20411_v6 }
  0x35   : > { %18746 = vmatpush3.bf16.msra.mxu0 %v20533_v7  ;;  %18770 = vmatpush3.bf16.msra.mxu1 %v20533_v7  ;;  %v14271_v7 = vld [vmem:[%s20614_s21 + $0x170] sm:$0xff] }
  0x36   : > { %18747 = vmatprep.subr.bf16.mxu0 %v20409_v3  ;;  %18771 = vmatprep.subr.bf16.mxu1 %v20409_v3 }
  0x37   : > { %16397 = vmatmul.mubr.f32.gmra.mrb[4].mxu0 %v332_v30  ;;  %16504 = vmatmul.mubr.f32.gmra.mrb[4].mxu1 %v14252_v31  ;;  %v14283_v30 = vld [vmem:[%s20614_s21 + $0x1d0] sm:$0xff]  ;;  %v14308_v31 = vld [vmem:[%s20614_s21 + $0x298] sm:$0xff] }
  0x38   : > { %16399 = vmatprep.mubr.msk.f32.mxu0 %vm20410_vm0, %v20411_v6  ;;  %16506 = vmatprep.mubr.msk.f32.mxu1 %vm20410_vm0, %v20411_v6 }
  0x39   : > { %18749 = vmatpush3.bf16.msra.mxu0 %v20545_v10  ;;  %18773 = vmatpush3.bf16.msra.mxu1 %v20545_v10  ;;  %v353_v10 = vld [vmem:[%s20614_s21 + $0xb8] sm:$0xff] }
  0x3a   : > { %18750 = vmatprep.subr.bf16.mxu0 %v20409_v3  ;;  %18774 = vmatprep.subr.bf16.mxu1 %v20409_v3 }
  0x3b   : > { %16400 = vmatmul.mubr.f32.gmra.mrb[6].mxu0 %v333_v32  ;;  %16507 = vmatmul.mubr.f32.gmra.mrb[6].mxu1 %v14253_v33  ;;  %v14284_v32 = vld [vmem:[%s20614_s21 + $0x1d8] sm:$0xff]  ;;  %v14309_v33 = vld [vmem:[%s20614_s21 + $0x2a0] sm:$0xff] }
  0x3c   : > { %16402 = vmatprep.mubr.msk.f32.mxu0 %vm20410_vm0, %v20411_v6  ;;  %16509 = vmatprep.mubr.msk.f32.mxu1 %vm20410_vm0, %v20411_v6 }
  0x3d   : > { %18752 = vmatpush3.bf16.msra.mxu0 %v20557_v13  ;;  %18776 = vmatpush3.bf16.msra.mxu1 %v20557_v13  ;;  %v14274_v13 = vld [vmem:[%s20614_s21 + $0x188] sm:$0xf] }
  0x3e   : > { %18753 = vmatprep.subr.bf16.mxu0 %v20409_v3  ;;  %18777 = vmatprep.subr.bf16.mxu1 %v20409_v3 }
  0x3f   : > { %16403 = vmatmul.mubr.f32.gmra.mrb[8].mxu0 %v334_v34  ;;  %16510 = vmatmul.mubr.f32.gmra.mrb[8].mxu1 %v14254_v35  ;;  %v14285_v34 = vld [vmem:[%s20614_s21 + $0x1e0] sm:$0xff]  ;;  %v14310_v35 = vld [vmem:[%s20614_s21 + $0x2a8] sm:$0xff] }
  0x40   : > { %16405 = vmatprep.mubr.msk.f32.mxu0 %vm20410_vm0, %v20411_v6  ;;  %16512 = vmatprep.mubr.msk.f32.mxu1 %vm20410_vm0, %v20411_v6 }
  0x41   : > { %18755 = vmatpush3.bf16.msra.mxu0 %v20569_v16  ;;  %18779 = vmatpush3.bf16.msra.mxu1 %v20569_v16  ;;  %v14276_v16 = vld [vmem:[%s20614_s21 + $0x198] sm:$0xff] }
  0x42   : > { %18756 = vmatprep.subr.bf16.mxu0 %v20409_v3  ;;  %18780 = vmatprep.subr.bf16.mxu1 %v20409_v3 }
  0x43   : > { %16406 = vmatmul.mubr.f32.gmra.mrb[10].mxu0 %v335_v36  ;;  %16513 = vmatmul.mubr.f32.gmra.mrb[10].mxu1 %v14255_v37  ;;  %v14286_v36 = vld [vmem:[%s20614_s21 + $0x1e8] sm:$0xff]  ;;  %v14311_v37 = vld [vmem:[%s20614_s21 + $0x2b0] sm:$0xff] }
  0x44   : > { %16408 = vmatprep.mubr.msk.f32.mxu0 %vm20410_vm0, %v20411_v6  ;;  %16515 = vmatprep.mubr.msk.f32.mxu1 %vm20410_vm0, %v20411_v6 }
  0x45   : > { %18758 = vmatpush3.bf16.msra.mxu0 %v20582_v19  ;;  %18782 = vmatpush3.bf16.msra.mxu1 %v20582_v19  ;;  %v14302_v19 = vld [vmem:[%s20614_s21 + $0x268] sm:$0xff] }
  0x46   : > { %18759 = vmatprep.subr.bf16.mxu0 %v20409_v3  ;;  %18783 = vmatprep.subr.bf16.mxu1 %v20409_v3 }
  0x47   : > { %16409 = vmatmul.mubr.f32.gmra.mrb[12].mxu0 %v336_v38  ;;  %16516 = vmatmul.mubr.f32.gmra.mrb[12].mxu1 %v14256_v39  ;;  %v14325_v38 = vld [vmem:[%s24214_s3 + $0x180] sm:$0xff]  ;;  %v14326_v39 = vld [vmem:[%s24214_s3 + $0x188] sm:$0xff] }
  0x48   : > { %16411 = vmatprep.mubr.msk.f32.mxu0 %vm20410_vm0, %v20411_v6  ;;  %16518 = vmatprep.mubr.msk.f32.mxu1 %vm20410_vm0, %v20411_v6 }
  0x49   : > { %18761 = vmatpush3.bf16.msra.mxu0 %v20595_v22  ;;  %18785 = vmatpush3.bf16.msra.mxu1 %v20595_v22  ;;  %v14279_v22 = vld [vmem:[%s20614_s21 + $0x1b0] sm:$0xff] }
  0x4a   : > { %18762 = vmatprep.subr.bf16.mxu0 %v20409_v3  ;;  %18786 = vmatprep.subr.bf16.mxu1 %v20409_v3 }
  0x4b   : > { %16412 = vmatmul.mubr.f32.gmra.mrb[14].mxu0 %v337_v40  ;;  %16519 = vmatmul.mubr.f32.gmra.mrb[14].mxu1 %v14257_v41  ;;  %v14329_v40 = vld [vmem:[%s24214_s3 + $0x1a0] sm:$0xff]  ;;  %v14287_v41 = vld [vmem:[%s20614_s21 + $0x1f0] sm:$0xff] }
  0x4c   : > { %16414 = vmatprep.mubr.msk.f32.mxu0 %vm20410_vm0, %v20411_v6  ;;  %16521 = vmatprep.mubr.msk.f32.mxu1 %vm20410_vm0, %v20411_v6 }
  0x4d   : > { %18764 = vmatpush3.bf16.msra.mxu0 %v20607_v25  ;;  %18788 = vmatpush3.bf16.msra.mxu1 %v20607_v25  ;;  %v14305_v25 = vld [vmem:[%s20614_s21 + $0x280] sm:$0xff] }
  0x4f   : > { %16415 = vmatmul.mubr.f32.gmra.mrb[16].mxu0 %v338_v42  ;;  %16522 = vmatmul.mubr.f32.gmra.mrb[16].mxu1 %v14258_v43  ;;  %v14312_v42 = vld [vmem:[%s20614_s21 + $0x2b8] sm:$0xff]  ;;  %v18789_v43 = vpack.c.bf16 %v14326_v39, %v14325_v38 }
  0x50   : > { %16417 = vmatprep.mubr.msk.f32.mxu0 %vm20410_vm0, %v20411_v6  ;;  %16524 = vmatprep.mubr.msk.f32.mxu1 %vm20410_vm0, %v20411_v6 }
  0x51   : > { %18790 = vmatprep.subr.bf16.mxu0 %v18789_v43 }
  0x53   : > { %16418 = vmatmul.mubr.f32.gmra.mrb[18].mxu0 %v339_v44  ;;  %16525 = vmatmul.mubr.f32.gmra.mrb[18].mxu1 %v14259_v45  ;;  %v14330_v44 = vld [vmem:[%s24214_s3 + $0x1a8] sm:$0xff] }
  0x54   : > { %16420 = vmatprep.mubr.msk.f32.mxu0 %vm20410_vm0, %v20411_v6  ;;  %16527 = vmatprep.mubr.msk.f32.mxu1 %vm20410_vm0, %v20411_v6  ;;  %v18797_v45 = vpack.c.bf16 %v14330_v44, %v14329_v40 }
  0x56   : > { %18798 = vmatprep.subr.bf16.mxu1 %v18797_v45 }
  0x57   : > { %16421 = vmatmul.mubr.f32.gmra.mrb[20].mxu0 %v340_v46  ;;  %16528 = vmatmul.mubr.f32.gmra.mrb[20].mxu1 %v14260_v47  ;;  %v14288_v46 = vld [vmem:[%s20614_s21 + $0x1f8] sm:$0xff]  ;;  %v14313_v47 = vld [vmem:[%s20614_s21 + $0x2c0] sm:$0xff] }
  0x58   : > { %16423 = vmatprep.mubr.msk.f32.mxu0 %vm20410_vm0, %v20411_v6  ;;  %16530 = vmatprep.mubr.msk.f32.mxu1 %vm20410_vm0, %v20411_v6 }
  0x5b   : > { %16424 = vmatmul.mubr.f32.gmra.mrb[22].mxu0 %v341_v48  ;;  %16531 = vmatmul.mubr.f32.gmra.mrb[22].mxu1 %v14261_v49  ;;  %v14289_v48 = vld [vmem:[%s20614_s21 + $0x200] sm:$0xff]  ;;  %v14314_v49 = vld [vmem:[%s20614_s21 + $0x2c8] sm:$0xff] }
  0x5c   : > { %16426 = vmatprep.mubr.msk.f32.mxu0 %vm20410_vm0, %v20411_v6  ;;  %16533 = vmatprep.mubr.msk.f32.mxu1 %vm20410_vm0, %v20411_v6 }
  0x5f   : > { %16427 = vmatmul.mubr.f32.gmra.mrb[24].mxu0 %v342_v50  ;;  %16534 = vmatmul.mubr.f32.gmra.mrb[24].mxu1 %v14262_v51  ;;  %v14290_v50 = vld [vmem:[%s20614_s21 + $0x208] sm:$0xff]  ;;  %v14315_v51 = vld [vmem:[%s20614_s21 + $0x2d0] sm:$0xff] }
  0x60   : > { %16429 = vmatprep.mubr.msk.f32.mxu0 %vm20410_vm0, %v20411_v6  ;;  %16536 = vmatprep.mubr.msk.f32.mxu1 %vm20410_vm0, %v20411_v6 }
  0x63   : > { %16430 = vmatmul.mubr.f32.gmra.mrb[26].mxu0 %v343_v52  ;;  %16537 = vmatmul.mubr.f32.gmra.mrb[26].mxu1 %v14263_v53  ;;  %v14291_v52 = vld [vmem:[%s20614_s21 + $0x210] sm:$0xff]  ;;  %v14316_v53 = vld [vmem:[%s20614_s21 + $0x2d8] sm:$0xff] }
  0x64   : > { %16432 = vmatprep.mubr.msk.f32.mxu0 %vm20410_vm0, %v20411_v6  ;;  %16539 = vmatprep.mubr.msk.f32.mxu1 %vm20410_vm0, %v20411_v6 }
  0x67   : > { %16433 = vmatmul.mubr.f32.gmra.mrb[28].mxu0 %v344_v54  ;;  %16540 = vmatmul.mubr.f32.gmra.mrb[28].mxu1 %v14264_v55  ;;  %v14292_v54 = vld [vmem:[%s20614_s21 + $0x218] sm:$0xff]  ;;  %v14317_v55 = vld [vmem:[%s20614_s21 + $0x2e0] sm:$0xff] }
  0x68   : > { %16435 = vmatprep.mubr.msk.f32.mxu0 %vm20410_vm0, %v20411_v6  ;;  %16542 = vmatprep.mubr.msk.f32.mxu1 %vm20410_vm0, %v20411_v6 }
  0x6b   : > { %16436 = vmatmul.mubr.f32.gmra.mrb[30].mxu0 %v345_v56  ;;  %16543 = vmatmul.mubr.f32.gmra.mrb[30].mxu1 %v14265_v57  ;;  %v14293_v56 = vld [vmem:[%s20614_s21 + $0x220] sm:$0xff]  ;;  %v14318_v57 = vld [vmem:[%s20614_s21 + $0x2e8] sm:$0xff] }
  0x6c   : > { %16438 = vmatprep.mubr.msk.f32.mxu0 %vm20410_vm0, %v20411_v6  ;;  %16545 = vmatprep.mubr.msk.f32.mxu1 %vm20410_vm0, %v20411_v6 }
  0x6f   : > { %16439 = vmatmul.mubr.f32.gmra.mrb[32].mxu0 %v346_v58  ;;  %16546 = vmatmul.mubr.f32.gmra.mrb[32].mxu1 %v14266_v59  ;;  %v14294_v58 = vld [vmem:[%s20614_s21 + $0x228] sm:$0xff]  ;;  %v14319_v59 = vld [vmem:[%s20614_s21 + $0x2f0] sm:$0xff] }
  0x70   : > { %16441 = vmatprep.mubr.msk.f32.mxu0 %vm20410_vm0, %v20411_v6  ;;  %16548 = vmatprep.mubr.msk.f32.mxu1 %vm20410_vm0, %v20411_v6 }
  0x73   : > { %16442 = vmatmul.mubr.f32.gmra.mrb[34].mxu0 %v347_v60  ;;  %16549 = vmatmul.mubr.f32.gmra.mrb[34].mxu1 %v14267_v61  ;;  %v14295_v60 = vld [vmem:[%s20614_s21 + $0x230] sm:$0xff]  ;;  %v14320_v61 = vld [vmem:[%s20614_s21 + $0x2f8] sm:$0xff] }
  0x74   : > { %16444 = vmatprep.mubr.msk.f32.mxu0 %vm20410_vm0, %v20411_v6  ;;  %16551 = vmatprep.mubr.msk.f32.mxu1 %vm20410_vm0, %v20411_v6 }
  0x77   : > { %16445 = vmatmul.mubr.f32.gmra.mrb[36].mxu0 %v348_v62  ;;  %16552 = vmatmul.mubr.f32.gmra.mrb[36].mxu1 %v14268_v63  ;;  %v14296_v62 = vld [vmem:[%s20614_s21 + $0x238] sm:$0xff]  ;;  %v14321_v63 = vld [vmem:[%s20614_s21 + $0x300] sm:$0xff] }
  0x78   : > { %16447 = vmatprep.mubr.msk.f32.mxu0 %vm20410_vm0, %v20411_v6  ;;  %16554 = vmatprep.mubr.msk.f32.mxu1 %vm20410_vm0, %v20411_v6 }
  0x7b   : > { %16448 = vmatmul.mubr.f32.gmra.mrb[38].mxu0 %v349_v0  ;;  %16555 = vmatmul.mubr.f32.gmra.mrb[38].mxu1 %v14269_v1  ;;  %v14297_v0 = vld [vmem:[%s20614_s21 + $0x240] sm:$0xff]  ;;  %v14322_v1 = vld [vmem:[%s20614_s21 + $0x308] sm:$0xff] }
  0x7c   : > { %16450 = vmatprep.mubr.msk.f32.mxu0 %vm20410_vm0, %v20411_v6  ;;  %16557 = vmatprep.mubr.msk.f32.mxu1 %vm20410_vm0, %v20411_v6 }
  0x7f   : > { %16451 = vmatmul.mubr.f32.gmra.mrb[40].mxu0 %v350_v2  ;;  %16558 = vmatmul.mubr.f32.gmra.mrb[40].mxu1 %v14270_v4  ;;  %v14298_v2 = vld [vmem:[%s20614_s21 + $0x248] sm:$0xff]  ;;  %v14323_v4 = vld [vmem:[%s20614_s21 + $0x310] sm:$0xff] }
  0x80   : > { %16453 = vmatprep.mubr.msk.f32.mxu0 %vm20410_vm0, %v20411_v6  ;;  %16560 = vmatprep.mubr.msk.f32.mxu1 %vm20410_vm0, %v20411_v6 }
  0x83   : > { %16454 = vmatmul.mubr.f32.gmra.mrb[42].mxu0 %v351_v5  ;;  %16561 = vmatmul.mubr.f32.gmra.mrb[42].mxu1 %v14271_v7  ;;  %v14299_v5 = vld [vmem:[%s20614_s21 + $0x250] sm:$0xf]  ;;  %v14324_v7 = vld [vmem:[%s20614_s21 + $0x318] sm:$0xf]  ;;  %s323_s21 = sand.u32 1, %s20399_s10  }
  0x84   : > { %16456 = vmatprep.mubr.msk.f32.mxu0 %vm20410_vm0, %v20411_v6  ;;  %16563 = vmatprep.mubr.msk.f32.mxu1 %vm20410_vm0, %v20411_v6  ;;  %s324_s14 = scalar_lea.vmem [#allocation3], %s323_s21  ;;  %s14177_s24 = scalar_lea.sflag [#allocation4], %s323_s21 }
  0x85   : > { %s14189_s16 = sshll.u32 %s324_s14, 4  ;;  %s24171_s16 = int_to_ptr.vmem [resolvable:$true] %s14189_s16 }
  0x86   : > { %s20345_s25 = scalar_lea.vmem %s24171_s16, 16  ;;  %p20352_p0 = scmp.lt.s32.totalorder %s24171_s16, %s20350_s26 }
  0x87   : > { %16457 = vmatmul.mubr.f32.gmra.mrb[44].mxu0 %v352_v8  ;;  %16564 = vmatmul.mubr.f32.gmra.mrb[44].mxu1 %v14272_v9  ;;  %v14327_v8 = vld [vmem:[%s24214_s3 + $0x190] sm:$0xff]  ;;  %v14328_v9 = vld [vmem:[%s24214_s3 + $0x198] sm:$0xff]  ;;  %p20346_p11 = scmp.ne.s32.totalorder %s24171_s16, %s20345_s25  ;;  %p20353_p1 = scmp.lt.s32.totalorder %s20351_s27, %s20345_s25 }
  0x88   : > { %16459 = vmatprep.mubr.msk.f32.mxu0 %vm20410_vm0, %v20411_v6  ;;  %16566 = vmatprep.mubr.msk.f32.mxu1 %vm20410_vm0, %v20411_v6 }
  0x89   : > { %p20347_p12 = pnand %p20346_p11, %p20501_p5  ;;  %p20354_p2 = por %p20353_p1, %p20352_p0 }
  0x8b   : > { %16460 = vmatmul.mubr.f32.gmra.mrb[46].mxu0 %v353_v10  ;;  %16567 = vmatmul.mubr.f32.gmra.mrb[46].mxu1 %v14273_v11  ;;  %v14331_v10 = vld [vmem:[%s24214_s3 + $0x1b0] sm:$0xff]  ;;  %v18793_v11 = vpack.c.bf16 %v14328_v9, %v14327_v8  ;;  %p20348_p13 = pneg %p20347_p12 }
  0x8c   : > { %16462 = vmatprep.mubr.msk.f32.mxu0 %vm20410_vm0, %v20411_v6  ;;  %16569 = vmatprep.mubr.msk.f32.mxu1 %vm20410_vm0, %v20411_v6 }
  0x8d   : > { %p20355_p3 = pnand %p20354_p2, %p20348_p13 }
  0x8f   : > { %16463 = vmatmul.mubr.f32.gmra.mrb[48].mxu0 %v354_v12  ;;  %16570 = vmatmul.mubr.f32.gmra.mrb[48].mxu1 %v14274_v13  ;;  %v14332_v12 = vld [vmem:[%s24214_s3 + $0x1b8] sm:$0xff] }
  0x90   : > { %16604 = vmatprep.mubr.msk.f32.mxu0 %vm20410_vm0, %v20411_v6  ;;  %16711 = vmatprep.mubr.msk.f32.mxu1 %vm20410_vm0, %v20411_v6  ;;  %v18801_v13 = vpack.c.bf16 %v14332_v12, %v14331_v10 }
  0x93   : > { %16605 = vmatmul.mubr.f32.vlgmr.msra.gmra.mrb[50].mxu0 %v14275_v14  ;;  %16712 = vmatmul.mubr.f32.vlgmr.msra.gmra.mrb[50].mxu1 %v14300_v15  ;;  %v20973_v14 = vld [vmem:[%s24213_s2] ss:$0 sm:$0xff] }
  0x94   : > { %16607 = vmatprep.mubr.msk.f32.mxu0 %vm20410_vm0, %v20411_v6  ;;  %16714 = vmatprep.mubr.msk.f32.mxu1 %vm20410_vm0, %v20411_v6  ;;  %v14333_v15 = vld [vmem:[%s24214_s3 + $0x1c0] sm:$0xff] }
  0x95   : > { %18792 = vmatpush3.bf16.msra.mxu0 %v18789_v43  ;;  %18800 = vmatpush3.bf16.msra.mxu1 %v18797_v45 }
  0x96   : > { %18794 = vmatprep.subr.bf16.mxu0 %v18793_v11  ;;  %18802 = vmatprep.subr.bf16.mxu1 %v18801_v13 }
  0x97   : > { %16608 = vmatmul.mubr.f32.gmra.mrb[52].mxu0 %v14276_v16  ;;  %16715 = vmatmul.mubr.f32.gmra.mrb[52].mxu1 %v14301_v17  ;;  %v14334_v16 = vld [vmem:[%s24214_s3 + $0x1c8] sm:$0xff] }
  0x98   : > { %16610 = vmatprep.mubr.msk.f32.mxu0 %vm20410_vm0, %v20411_v6  ;;  %16717 = vmatprep.mubr.msk.f32.mxu1 %vm20410_vm0, %v20411_v6  ;;  %v20981_v17 = vpack.c.bf16 %v14334_v16, %v14333_v15 }
  0x99   : > { %18796 = vmatpush3.bf16.msra.mxu0 %v18793_v11  ;;  %18804 = vmatpush3.bf16.msra.mxu1 %v18801_v13 }
  0x9a   : > { %18806 = vmatprep.subr.bf16.mxu0 %v20981_v17 }
  0x9b   : > { %16611 = vmatmul.mubr.f32.gmra.mrb[54].mxu0 %v14277_v18  ;;  %16718 = vmatmul.mubr.f32.gmra.mrb[54].mxu1 %v14302_v19 }
  0x9c   : > { %16613 = vmatprep.mubr.msk.f32.mxu0 %vm20410_vm0, %v20411_v6  ;;  %16720 = vmatprep.mubr.msk.f32.mxu1 %vm20410_vm0, %v20411_v6 }
  0x9f   : > { %16614 = vmatmul.mubr.f32.gmra.mrb[56].mxu0 %v14278_v20  ;;  %16721 = vmatmul.mubr.f32.gmra.mrb[56].mxu1 %v14303_v21 }
  0xa0   : > { %16616 = vmatprep.mubr.msk.f32.mxu0 %vm20410_vm0, %v20411_v6  ;;  %16723 = vmatprep.mubr.msk.f32.mxu1 %vm20410_vm0, %v20411_v6 }
  0xa3   : > { %16617 = vmatmul.mubr.f32.gmra.mrb[58].mxu0 %v14279_v22  ;;  %16724 = vmatmul.mubr.f32.gmra.mrb[58].mxu1 %v14304_v23 }
  0xa4   : > { %16619 = vmatprep.mubr.msk.f32.mxu0 %vm20410_vm0, %v20411_v6  ;;  %16726 = vmatprep.mubr.msk.f32.mxu1 %vm20410_vm0, %v20411_v6 }
  0xa7   : > { %16620 = vmatmul.mubr.f32.gmra.mrb[60].mxu0 %v14280_v24  ;;  %16727 = vmatmul.mubr.f32.gmra.mrb[60].mxu1 %v14305_v25 }
  0xa8   : > { %16622 = vmatprep.mubr.msk.f32.mxu0 %vm20410_vm0, %v20411_v6  ;;  %16729 = vmatprep.mubr.msk.f32.mxu1 %vm20410_vm0, %v20411_v6 }
  0xab   : > { %16623 = vmatmul.mubr.f32.gmra.mrb[62].mxu0 %v14281_v26  ;;  %16730 = vmatmul.mubr.f32.gmra.mrb[62].mxu1 %v14306_v27  ;;  %v14337_v26 = vld [vmem:[%s24214_s3 + $0x1e0] sm:$0xff]  ;;  %v14338_v27 = vld [vmem:[%s24214_s3 + $0x1e8] sm:$0xff] }
  0xac   : > { %16625 = vmatprep.mubr.msk.f32.mxu0 %vm20410_vm0, %v20411_v6  ;;  %16732 = vmatprep.mubr.msk.f32.mxu1 %vm20410_vm0, %v20411_v6 }
  0xaf   : > { %16626 = vmatmul.mubr.f32.gmra.mrb[64].mxu0 %v14282_v28  ;;  %16733 = vmatmul.mubr.f32.gmra.mrb[64].mxu1 %v14307_v29 }
  0xb0   : > { %16628 = vmatprep.mubr.msk.f32.mxu0 %vm20410_vm0, %v20411_v6  ;;  %16735 = vmatprep.mubr.msk.f32.mxu1 %vm20410_vm0, %v20411_v6 }
  0xb3   : > { %16629 = vmatmul.mubr.f32.gmra.mrb[66].mxu0 %v14283_v30  ;;  %16736 = vmatmul.mubr.f32.gmra.mrb[66].mxu1 %v14308_v31  ;;  %v20992_v30 = vpack.c.bf16 %v14338_v27, %v14337_v26 }
  0xb4   : > { %16631 = vmatprep.mubr.msk.f32.mxu0 %vm20410_vm0, %v20411_v6  ;;  %16738 = vmatprep.mubr.msk.f32.mxu1 %vm20410_vm0, %v20411_v6 }
  0xb5   : > { %18814 = vmatprep.subr.bf16.mxu1 %v20992_v30 }
  0xb7   : > { %16632 = vmatmul.mubr.f32.gmra.mrb[68].mxu0 %v14284_v32  ;;  %16739 = vmatmul.mubr.f32.gmra.mrb[68].mxu1 %v14309_v33 }
  0xb8   : > { %16634 = vmatprep.mubr.msk.f32.mxu0 %vm20410_vm0, %v20411_v6  ;;  %16741 = vmatprep.mubr.msk.f32.mxu1 %vm20410_vm0, %v20411_v6 }
  0xbb   : > { %16635 = vmatmul.mubr.f32.gmra.mrb[70].mxu0 %v14285_v34  ;;  %16742 = vmatmul.mubr.f32.gmra.mrb[70].mxu1 %v14310_v35 }
  0xbc   : > { %16637 = vmatprep.mubr.msk.f32.mxu0 %vm20410_vm0, %v20411_v6  ;;  %16744 = vmatprep.mubr.msk.f32.mxu1 %vm20410_vm0, %v20411_v6 }
  0xbf   : > { %16638 = vmatmul.mubr.f32.gmra.mrb[72].mxu0 %v14286_v36  ;;  %16745 = vmatmul.mubr.f32.gmra.mrb[72].mxu1 %v14311_v37 }
  0xc0   : > { %16640 = vmatprep.mubr.msk.f32.mxu0 %vm20410_vm0, %v20411_v6  ;;  %16747 = vmatprep.mubr.msk.f32.mxu1 %vm20410_vm0, %v20411_v6 }
  0xc3   : > { %16641 = vmatmul.mubr.f32.gmra.mrb[74].mxu0 %v14287_v41  ;;  %16748 = vmatmul.mubr.f32.gmra.mrb[74].mxu1 %v14312_v42 }
  0xc4   : > { %16643 = vmatprep.mubr.msk.f32.mxu0 %vm20410_vm0, %v20411_v6  ;;  %16750 = vmatprep.mubr.msk.f32.mxu1 %vm20410_vm0, %v20411_v6 }
  0xc7   : > { %16644 = vmatmul.mubr.f32.gmra.mrb[76].mxu0 %v14288_v46  ;;  %16751 = vmatmul.mubr.f32.gmra.mrb[76].mxu1 %v14313_v47 }
  0xc8   : > { %16646 = vmatprep.mubr.msk.f32.mxu0 %vm20410_vm0, %v20411_v6  ;;  %16753 = vmatprep.mubr.msk.f32.mxu1 %vm20410_vm0, %v20411_v6 }
  0xcb   : > { %16647 = vmatmul.mubr.f32.gmra.mrb[78].mxu0 %v14289_v48  ;;  %16754 = vmatmul.mubr.f32.gmra.mrb[78].mxu1 %v14314_v49 }
  0xcc   : > { %16649 = vmatprep.mubr.msk.f32.mxu0 %vm20410_vm0, %v20411_v6  ;;  %16756 = vmatprep.mubr.msk.f32.mxu1 %vm20410_vm0, %v20411_v6 }
  0xcf   : > { %16650 = vmatmul.mubr.f32.gmra.mrb[80].mxu0 %v14290_v50  ;;  %16757 = vmatmul.mubr.f32.gmra.mrb[80].mxu1 %v14315_v51 }
  0xd0   : > { %16652 = vmatprep.mubr.msk.f32.mxu0 %vm20410_vm0, %v20411_v6  ;;  %16759 = vmatprep.mubr.msk.f32.mxu1 %vm20410_vm0, %v20411_v6 }
  0xd3   : > { %16653 = vmatmul.mubr.f32.gmra.mrb[82].mxu0 %v14291_v52  ;;  %16760 = vmatmul.mubr.f32.gmra.mrb[82].mxu1 %v14316_v53 }
  0xd4   : > { %16655 = vmatprep.mubr.msk.f32.mxu0 %vm20410_vm0, %v20411_v6  ;;  %16762 = vmatprep.mubr.msk.f32.mxu1 %vm20410_vm0, %v20411_v6 }
  0xd7   : > { %16656 = vmatmul.mubr.f32.gmra.mrb[84].mxu0 %v14292_v54  ;;  %16763 = vmatmul.mubr.f32.gmra.mrb[84].mxu1 %v14317_v55 }
  0xd8   : > { %16658 = vmatprep.mubr.msk.f32.mxu0 %vm20410_vm0, %v20411_v6  ;;  %16765 = vmatprep.mubr.msk.f32.mxu1 %vm20410_vm0, %v20411_v6 }
  0xdb   : > { %16659 = vmatmul.mubr.f32.gmra.mrb[86].mxu0 %v14293_v56  ;;  %16766 = vmatmul.mubr.f32.gmra.mrb[86].mxu1 %v14318_v57 }
  0xdc   : > { %16661 = vmatprep.mubr.msk.f32.mxu0 %vm20410_vm0, %v20411_v6  ;;  %16768 = vmatprep.mubr.msk.f32.mxu1 %vm20410_vm0, %v20411_v6 }
  0xdf   : > { %16662 = vmatmul.mubr.f32.gmra.mrb[88].mxu0 %v14294_v58  ;;  %16769 = vmatmul.mubr.f32.gmra.mrb[88].mxu1 %v14319_v59 }
  0xe0   : > { %16664 = vmatprep.mubr.msk.f32.mxu0 %vm20410_vm0, %v20411_v6  ;;  %16771 = vmatprep.mubr.msk.f32.mxu1 %vm20410_vm0, %v20411_v6 }
  0xe3   : > { %16665 = vmatmul.mubr.f32.gmra.mrb[90].mxu0 %v14295_v60  ;;  %16772 = vmatmul.mubr.f32.gmra.mrb[90].mxu1 %v14320_v61 }
  0xe4   : > { %16667 = vmatprep.mubr.msk.f32.mxu0 %vm20410_vm0, %v20411_v6  ;;  %16774 = vmatprep.mubr.msk.f32.mxu1 %vm20410_vm0, %v20411_v6 }
  0xe7   : > { %16668 = vmatmul.mubr.f32.gmra.mrb[92].mxu0 %v14296_v62  ;;  %16775 = vmatmul.mubr.f32.gmra.mrb[92].mxu1 %v14321_v63 }
  0xe8   : > { %16670 = vmatprep.mubr.msk.f32.mxu0 %vm20410_vm0, %v20411_v6  ;;  %16777 = vmatprep.mubr.msk.f32.mxu1 %vm20410_vm0, %v20411_v6 }
  0xeb   : > { %16671 = vmatmul.mubr.f32.gmra.mrb[94].mxu0 %v14297_v0  ;;  %16778 = vmatmul.mubr.f32.gmra.mrb[94].mxu1 %v14322_v1 }
  0xec   : > { %16673 = vmatprep.mubr.msk.f32.mxu0 %vm20410_vm0, %v20411_v6  ;;  %16780 = vmatprep.mubr.msk.f32.mxu1 %vm20410_vm0, %v20411_v6 }
  0xef   : > { %16674 = vmatmul.mubr.f32.gmra.mrb[96].mxu0 %v14298_v2  ;;  %16781 = vmatmul.mubr.f32.gmra.mrb[96].mxu1 %v14323_v4 }
  0xf0   : > { %16676 = vmatprep.mubr.msk.f32.mxu0 %vm20410_vm0, %v20411_v6  ;;  %16783 = vmatprep.mubr.msk.f32.mxu1 %vm20410_vm0, %v20411_v6 }
  0xf3   : > { %16677 = vmatmul.mubr.f32.gmra.mrb[98].mxu0 %v14299_v5  ;;  %16784 = vmatmul.mubr.f32.gmra.mrb[98].mxu1 %v14324_v7 }
 0x102   : > { %v444_v18 = vpop.f32.mrb[0].mxu0  ;;  %v685_v19 = vpop.f32.mrb[0].mxu1 }
 0x103   : > { %v445_v20 = vadd.f32 %v20973_v14, %v444_v18  ;;  %v16392_v21 = vpop.f32.mrb[1].mxu0  ;;  %v686_v22 = vadd.f32 %v20973_v14, %v685_v19  ;;  %v16499_v23 = vpop.f32.mrb[1].mxu1 }
 0x105   : > { %v568_v24 = vmax.f32 %v445_v20, 0.0  ;;  %v809_v25 = vmax.f32 %v686_v22, 0.0 }
 0x106   : > { %v449_v28 = vpop.f32.mrb[2].mxu0  ;;  %v690_v29 = vpop.f32.mrb[2].mxu1 }
 0x107   : > { %v20994_v31 = vmax.f32 %v568_v24, %v809_v25  ;;  %v450_v32 = vadd.f32 %v20973_v14, %v449_v28  ;;  %v16395_v33 = vpop.f32.mrb[3].mxu0  ;;  %v691_v34 = vadd.f32 %v20973_v14, %v690_v29  ;;  %v16502_v35 = vpop.f32.mrb[3].mxu1 }
 0x109   : > { %v569_v36 = vmax.f32 %v450_v32, 0.0  ;;  %v810_v37 = vmax.f32 %v691_v34, 0.0 }
 0x10a   : > { %v454_v38 = vpop.f32.mrb[4].mxu0  ;;  %v695_v39 = vpop.f32.mrb[4].mxu1 }
 0x10b   : > { %v20999_v40 = vmax.f32 %v569_v36, %v810_v37  ;;  %v455_v41 = vadd.f32 %v20973_v14, %v454_v38  ;;  %v16398_v42 = vpop.f32.mrb[5].mxu0  ;;  %v696_v43 = vadd.f32 %v20973_v14, %v695_v39  ;;  %v16505_v44 = vpop.f32.mrb[5].mxu1 }
 0x10d   : > { %v570_v45 = vmax.f32 %v455_v41, 0.0  ;;  %v811_v46 = vmax.f32 %v696_v43, 0.0 }
 0x10e   : > { %v459_v47 = vpop.f32.mrb[6].mxu0  ;;  %v700_v48 = vpop.f32.mrb[6].mxu1 }
 0x10f   : > { %v21003_v49 = vmax.f32 %v570_v45, %v811_v46  ;;  %v460_v50 = vadd.f32 %v20973_v14, %v459_v47  ;;  %v16401_v51 = vpop.f32.mrb[7].mxu0  ;;  %v701_v52 = vadd.f32 %v20973_v14, %v700_v48  ;;  %v16508_v53 = vpop.f32.mrb[7].mxu1 }
 0x111   : > { %v571_v54 = vmax.f32 %v460_v50, 0.0  ;;  %v812_v55 = vmax.f32 %v701_v52, 0.0 }
 0x112   : > { %v464_v56 = vpop.f32.mrb[8].mxu0  ;;  %v705_v57 = vpop.f32.mrb[8].mxu1 }
 0x113   : > { %v21007_v58 = vmax.f32 %v571_v54, %v812_v55  ;;  %v465_v59 = vadd.f32 %v20973_v14, %v464_v56  ;;  %v16404_v60 = vpop.f32.mrb[9].mxu0  ;;  %v706_v61 = vadd.f32 %v20973_v14, %v705_v57  ;;  %v16511_v62 = vpop.f32.mrb[9].mxu1 }
 0x115   : > { %v572_v63 = vmax.f32 %v465_v59, 0.0  ;;  %v813_v0 = vmax.f32 %v706_v61, 0.0 }
 0x116   : > { %v469_v1 = vpop.f32.mrb[10].mxu0  ;;  %v710_v2 = vpop.f32.mrb[10].mxu1 }
 0x117   : > { %v21011_v4 = vmax.f32 %v572_v63, %v813_v0  ;;  %v470_v5 = vadd.f32 %v20973_v14, %v469_v1  ;;  %v16407_v7 = vpop.f32.mrb[11].mxu0  ;;  %v711_v8 = vadd.f32 %v20973_v14, %v710_v2  ;;  %v16514_v9 = vpop.f32.mrb[11].mxu1 }
 0x119   : > { %v573_v10 = vmax.f32 %v470_v5, 0.0  ;;  %v814_v11 = vmax.f32 %v711_v8, 0.0 }
 0x11a   : > { %v474_v12 = vpop.f32.mrb[12].mxu0  ;;  %v715_v13 = vpop.f32.mrb[12].mxu1 }
 0x11b   : > { %v21015_v15 = vmax.f32 %v573_v10, %v814_v11  ;;  %v475_v16 = vadd.f32 %v20973_v14, %v474_v12  ;;  %v16410_v18 = vpop.f32.mrb[13].mxu0  ;;  %v716_v19 = vadd.f32 %v20973_v14, %v715_v13  ;;  %v16517_v20 = vpop.f32.mrb[13].mxu1 }
 0x11d   : > { %v574_v21 = vmax.f32 %v475_v16, 0.0  ;;  %v815_v22 = vmax.f32 %v716_v19, 0.0 }
 0x11e   : > { %v479_v23 = vpop.f32.mrb[14].mxu0  ;;  %v720_v24 = vpop.f32.mrb[14].mxu1 }
 0x11f   : > { %v21019_v25 = vmax.f32 %v574_v21, %v815_v22  ;;  %v480_v26 = vadd.f32 %v20973_v14, %v479_v23  ;;  %v16413_v27 = vpop.f32.mrb[15].mxu0  ;;  %v721_v28 = vadd.f32 %v20973_v14, %v720_v24  ;;  %v16520_v29 = vpop.f32.mrb[15].mxu1 }
 0x121   : > { %v575_v32 = vmax.f32 %v480_v26, 0.0  ;;  %v816_v33 = vmax.f32 %v721_v28, 0.0 }
 0x122   : > { %v484_v34 = vpop.f32.mrb[16].mxu0  ;;  %v725_v35 = vpop.f32.mrb[16].mxu1 }
 0x123   : > { %v21023_v36 = vmax.f32 %v575_v32, %v816_v33  ;;  %v485_v37 = vadd.f32 %v20973_v14, %v484_v34  ;;  %v16416_v38 = vpop.f32.mrb[17].mxu0  ;;  %v726_v39 = vadd.f32 %v20973_v14, %v725_v35  ;;  %v16523_v41 = vpop.f32.mrb[17].mxu1 }
 0x125   : > { %v576_v42 = vmax.f32 %v485_v37, 0.0  ;;  %v817_v43 = vmax.f32 %v726_v39, 0.0 }
 0x126   : > { %v489_v44 = vpop.f32.mrb[18].mxu0  ;;  %v730_v45 = vpop.f32.mrb[18].mxu1 }
 0x127   : > { %v21027_v46 = vmax.f32 %v576_v42, %v817_v43  ;;  %v490_v47 = vadd.f32 %v20973_v14, %v489_v44  ;;  %v16419_v48 = vpop.f32.mrb[19].mxu0  ;;  %v731_v50 = vadd.f32 %v20973_v14, %v730_v45  ;;  %v16526_v51 = vpop.f32.mrb[19].mxu1 }
 0x129   : > { %v577_v52 = vmax.f32 %v490_v47, 0.0  ;;  %v818_v53 = vmax.f32 %v731_v50, 0.0 }
 0x12a   : > { %v494_v54 = vpop.f32.mrb[20].mxu0  ;;  %v735_v55 = vpop.f32.mrb[20].mxu1 }
 0x12b   : > { %v21031_v56 = vmax.f32 %v577_v52, %v818_v53  ;;  %v495_v57 = vadd.f32 %v20973_v14, %v494_v54  ;;  %v16422_v59 = vpop.f32.mrb[21].mxu0  ;;  %v736_v60 = vadd.f32 %v20973_v14, %v735_v55  ;;  %v16529_v61 = vpop.f32.mrb[21].mxu1 }
 0x12d   : > { %v578_v62 = vmax.f32 %v495_v57, 0.0  ;;  %v819_v63 = vmax.f32 %v736_v60, 0.0 }
 0x12e   : > { %v499_v0 = vpop.f32.mrb[22].mxu0  ;;  %v740_v1 = vpop.f32.mrb[22].mxu1 }
 0x12f   : > { %v21035_v2 = vmax.f32 %v578_v62, %v819_v63  ;;  %v500_v5 = vadd.f32 %v20973_v14, %v499_v0  ;;  %v16425_v7 = vpop.f32.mrb[23].mxu0  ;;  %v741_v8 = vadd.f32 %v20973_v14, %v740_v1  ;;  %v16532_v9 = vpop.f32.mrb[23].mxu1 }
 0x131   : > { %v579_v10 = vmax.f32 %v500_v5, 0.0  ;;  %v820_v11 = vmax.f32 %v741_v8, 0.0 }
 0x132   : > { %v504_v12 = vpop.f32.mrb[24].mxu0  ;;  %v745_v13 = vpop.f32.mrb[24].mxu1 }
 0x133   : > { %v21039_v16 = vmax.f32 %v579_v10, %v820_v11  ;;  %v505_v18 = vadd.f32 %v20973_v14, %v504_v12  ;;  %v16428_v19 = vpop.f32.mrb[25].mxu0  ;;  %v746_v20 = vadd.f32 %v20973_v14, %v745_v13  ;;  %v16535_v21 = vpop.f32.mrb[25].mxu1 }
 0x135   : > { %v580_v22 = vmax.f32 %v505_v18, 0.0  ;;  %v821_v23 = vmax.f32 %v746_v20, 0.0 }
 0x136   : > { %v509_v24 = vpop.f32.mrb[26].mxu0  ;;  %v750_v26 = vpop.f32.mrb[26].mxu1 }
 0x137   : > { %v21043_v27 = vmax.f32 %v580_v22, %v821_v23  ;;  %v510_v28 = vadd.f32 %v20973_v14, %v509_v24  ;;  %v16431_v29 = vpop.f32.mrb[27].mxu0  ;;  %v751_v32 = vadd.f32 %v20973_v14, %v750_v26  ;;  %v16538_v33 = vpop.f32.mrb[27].mxu1 }
 0x139   : > { %v581_v34 = vmax.f32 %v510_v28, 0.0  ;;  %v822_v35 = vmax.f32 %v751_v32, 0.0 }
 0x13a   : > { %v514_v37 = vpop.f32.mrb[28].mxu0  ;;  %v755_v38 = vpop.f32.mrb[28].mxu1 }
 0x13b   : > { %v21047_v39 = vmax.f32 %v581_v34, %v822_v35  ;;  %v515_v41 = vadd.f32 %v20973_v14, %v514_v37  ;;  %v16434_v42 = vpop.f32.mrb[29].mxu0  ;;  %v756_v43 = vadd.f32 %v20973_v14, %v755_v38  ;;  %v16541_v44 = vpop.f32.mrb[29].mxu1 }
 0x13d   : > { %v582_v45 = vmax.f32 %v515_v41, 0.0  ;;  %v823_v47 = vmax.f32 %v756_v43, 0.0 }
 0x13e   : > { %v519_v48 = vpop.f32.mrb[30].mxu0  ;;  %v760_v50 = vpop.f32.mrb[30].mxu1 }
 0x13f   : > { %v21051_v51 = vmax.f32 %v582_v45, %v823_v47  ;;  %v520_v52 = vadd.f32 %v20973_v14, %v519_v48  ;;  %v16437_v53 = vpop.f32.mrb[31].mxu0  ;;  %v761_v54 = vadd.f32 %v20973_v14, %v760_v50  ;;  %v16544_v55 = vpop.f32.mrb[31].mxu1 }
 0x141   : > { %v583_v57 = vmax.f32 %v520_v52, 0.0  ;;  %v824_v59 = vmax.f32 %v761_v54, 0.0 }
 0x142   : > { %v524_v60 = vpop.f32.mrb[32].mxu0  ;;  %v765_v61 = vpop.f32.mrb[32].mxu1 }
 0x143   : > { %v21055_v62 = vmax.f32 %v583_v57, %v824_v59  ;;  %v525_v63 = vadd.f32 %v20973_v14, %v524_v60  ;;  %v16440_v0 = vpop.f32.mrb[33].mxu0  ;;  %v766_v1 = vadd.f32 %v20973_v14, %v765_v61  ;;  %v16547_v5 = vpop.f32.mrb[33].mxu1 }
 0x145   : > { %v584_v7 = vmax.f32 %v525_v63, 0.0  ;;  %v825_v8 = vmax.f32 %v766_v1, 0.0 }
 0x146   : > { %v529_v9 = vpop.f32.mrb[34].mxu0  ;;  %v770_v10 = vpop.f32.mrb[34].mxu1 }
 0x147   : > { %v21059_v11 = vmax.f32 %v584_v7, %v825_v8  ;;  %v530_v12 = vadd.f32 %v20973_v14, %v529_v9  ;;  %v16443_v13 = vpop.f32.mrb[35].mxu0  ;;  %v771_v18 = vadd.f32 %v20973_v14, %v770_v10  ;;  %v16550_v19 = vpop.f32.mrb[35].mxu1 }
 0x149   : > { %v585_v20 = vmax.f32 %v530_v12, 0.0  ;;  %v826_v21 = vmax.f32 %v771_v18, 0.0 }
 0x14a   : > { %v534_v22 = vpop.f32.mrb[36].mxu0  ;;  %v775_v23 = vpop.f32.mrb[36].mxu1 }
 0x14b   : > { %v21063_v24 = vmax.f32 %v585_v20, %v826_v21  ;;  %v535_v26 = vadd.f32 %v20973_v14, %v534_v22  ;;  %v16446_v28 = vpop.f32.mrb[37].mxu0  ;;  %v776_v29 = vadd.f32 %v20973_v14, %v775_v23  ;;  %v16553_v32 = vpop.f32.mrb[37].mxu1 }
 0x14d   : > { %v586_v33 = vmax.f32 %v535_v26, 0.0  ;;  %v827_v34 = vmax.f32 %v776_v29, 0.0 }
 0x14e   : > { %v539_v35 = vpop.f32.mrb[38].mxu0  ;;  %v780_v37 = vpop.f32.mrb[38].mxu1 }
 0x14f   : > { %v21067_v38 = vmax.f32 %v586_v33, %v827_v34  ;;  %v540_v41 = vadd.f32 %v20973_v14, %v539_v35  ;;  %v16449_v42 = vpop.f32.mrb[39].mxu0  ;;  %v781_v43 = vadd.f32 %v20973_v14, %v780_v37  ;;  %v16556_v44 = vpop.f32.mrb[39].mxu1 }
 0x151   : > { %v587_v45 = vmax.f32 %v540_v41, 0.0  ;;  %v828_v47 = vmax.f32 %v781_v43, 0.0 }
 0x152   : > { %v544_v48 = vpop.f32.mrb[40].mxu0  ;;  %v785_v50 = vpop.f32.mrb[40].mxu1 }
 0x153   : > { %v21071_v52 = vmax.f32 %v587_v45, %v828_v47  ;;  %v545_v53 = vadd.f32 %v20973_v14, %v544_v48  ;;  %v16452_v54 = vpop.f32.mrb[41].mxu0  ;;  %v786_v55 = vadd.f32 %v20973_v14, %v785_v50  ;;  %v16559_v57 = vpop.f32.mrb[41].mxu1 }
 0x155   : > { %v588_v59 = vmax.f32 %v545_v53, 0.0  ;;  %v829_v60 = vmax.f32 %v786_v55, 0.0 }
 0x156   : > { %v549_v61 = vpop.f32.mrb[42].mxu0  ;;  %v790_v63 = vpop.f32.mrb[42].mxu1 }
 0x157   : > { %v21075_v0 = vmax.f32 %v588_v59, %v829_v60  ;;  %v550_v1 = vadd.f32 %v20973_v14, %v549_v61  ;;  %v16455_v5 = vpop.f32.mrb[43].mxu0  ;;  %v791_v7 = vadd.f32 %v20973_v14, %v790_v63  ;;  %v16562_v8 = vpop.f32.mrb[43].mxu1 }
 0x159   : > { %v589_v9 = vmax.f32 %v550_v1, 0.0  ;;  %v830_v10 = vmax.f32 %v791_v7, 0.0 }
 0x15a   : > { %v554_v12 = vpop.f32.mrb[44].mxu0  ;;  %v795_v13 = vpop.f32.mrb[44].mxu1 }
 0x15b   : > { %v21079_v18 = vmax.f32 %v589_v9, %v830_v10  ;;  %v555_v19 = vadd.f32 %v20973_v14, %v554_v12  ;;  %v16458_v20 = vpop.f32.mrb[45].mxu0  ;;  %v796_v21 = vadd.f32 %v20973_v14, %v795_v13  ;;  %v16565_v22 = vpop.f32.mrb[45].mxu1 }
 0x15d   : > { %v590_v23 = vmax.f32 %v555_v19, 0.0  ;;  %v831_v26 = vmax.f32 %v796_v21, 0.0 }
 0x15e   : > { %v559_v28 = vpop.f32.mrb[46].mxu0  ;;  %v800_v29 = vpop.f32.mrb[46].mxu1 }
 0x15f   : > { %v21083_v32 = vmax.f32 %v590_v23, %v831_v26  ;;  %v560_v33 = vadd.f32 %v20973_v14, %v559_v28  ;;  %v16461_v34 = vpop.f32.mrb[47].mxu0  ;;  %v801_v35 = vadd.f32 %v20973_v14, %v800_v29  ;;  %v16568_v37 = vpop.f32.mrb[47].mxu1 }
 0x161   : > { %v591_v41 = vmax.f32 %v560_v33, 0.0  ;;  %v832_v42 = vmax.f32 %v801_v35, 0.0 }
 0x162   : > { %v564_v43 = vpop.f32.mrb[48].mxu0  ;;  %v805_v44 = vpop.f32.mrb[48].mxu1 }
 0x163   : > { %v21087_v45 = vmax.f32 %v591_v41, %v832_v42  ;;  %v565_v47 = vadd.f32 %v20973_v14, %v564_v43  ;;  %v16464_v48 = vpop.f32.mrb[49].mxu0  ;;  %v806_v50 = vadd.f32 %v20973_v14, %v805_v44  ;;  %v16571_v53 = vpop.f32.mrb[49].mxu1 }
 0x165   : > { %v592_v54 = vmax.f32 %v565_v47, 0.0  ;;  %v833_v55 = vmax.f32 %v806_v50, 0.0 }
 0x166   : > { %v951_v57 = vpop.f32.mrb[50].mxu0  ;;  %v1217_v59 = vpop.f32.mrb[50].mxu1 }
 0x167   : > { %v21091_v60 = vmax.f32 %v592_v54, %v833_v55  ;;  %v952_v61 = vadd.f32 %v20973_v14, %v951_v57  ;;  %v16606_v63 = vpop.f32.mrb[51].mxu0  ;;  %v1218_v1 = vadd.f32 %v20973_v14, %v1217_v59  ;;  %v16713_v5 = vpop.f32.mrb[51].mxu1 }
 0x169   : > { %v1075_v7 = vmax.f32 %v952_v61, 0.0  ;;  %v1341_v8 = vmax.f32 %v1218_v1, 0.0 }
 0x16a   : > { %v956_v9 = vpop.f32.mrb[52].mxu0  ;;  %v1222_v10 = vpop.f32.mrb[52].mxu1 }
 0x16b   : > { %v1100_v12 = vmax.f32 %v20994_v31, %v1075_v7  ;;  %v957_v13 = vadd.f32 %v20973_v14, %v956_v9  ;;  %v16609_v19 = vpop.f32.mrb[53].mxu0  ;;  %v1223_v20 = vadd.f32 %v20973_v14, %v1222_v10  ;;  %v16716_v21 = vpop.f32.mrb[53].mxu1  ;;  %v14335_v9 = vld [vmem:[%s24214_s3 + $0x1d0] sm:$0xff]  ;;  %v14336_v10 = vld [vmem:[%s24214_s3 + $0x1d8] sm:$0xff] }
 0x16d   : > { %v1366_v22 = vmax.f32 %v1100_v12, %v1341_v8  ;;  %v1076_v23 = vmax.f32 %v957_v13, 0.0  ;;  %v1342_v26 = vmax.f32 %v1223_v20, 0.0 }
 0x16e   : > { %v961_v28 = vpop.f32.mrb[54].mxu0  ;;  %v1227_v29 = vpop.f32.mrb[54].mxu1 }
 0x16f   : > { %1392 = vst.msk [vmem:[#allocation2] sm:$0xff] %vm1391_vm1, %v1366_v22  ;;  %v1101_v33 = vmax.f32 %v20999_v40, %v1076_v23  ;;  %v962_v34 = vadd.f32 %v20973_v14, %v961_v28  ;;  %v16612_v35 = vpop.f32.mrb[55].mxu0  ;;  %v1228_v31 = vadd.f32 %v20973_v14, %v1227_v29  ;;  %v16719_v37 = vpop.f32.mrb[55].mxu1  ;;  %v18809_v23 = vpack.c.bf16 %v14336_v10, %v14335_v9 }
 0x170   : > { %v14341_v35 = vld [vmem:[%s24214_s3 + $0x200] sm:$0xff] }
 0x171   : > { %v1367_v41 = vmax.f32 %v1101_v33, %v1342_v26  ;;  %v1077_v42 = vmax.f32 %v962_v34, 0.0  ;;  %v1343_v43 = vmax.f32 %v1228_v31, 0.0  ;;  %v14342_v31 = vld [vmem:[%s24214_s3 + $0x208] sm:$0xff] }
 0x172   : > { %v966_v44 = vpop.f32.mrb[56].mxu0  ;;  %v1232_v47 = vpop.f32.mrb[56].mxu1 }
 0x173   : > { %1394 = vst.msk [vmem:[#allocation2 + $0x8] sm:$0x3f] %vm1393_vm2, %v1367_v41  ;;  %v1102_v48 = vmax.f32 %v21003_v49, %v1077_v42  ;;  %v967_v40 = vadd.f32 %v20973_v14, %v966_v44  ;;  %v16615_v50 = vpop.f32.mrb[57].mxu0  ;;  %v1233_v53 = vadd.f32 %v20973_v14, %v1232_v47  ;;  %v16722_v54 = vpop.f32.mrb[57].mxu1  ;;  %v14339_v47 = vld [vmem:[%s24214_s3 + $0x1f0] sm:$0xff] }
 0x174   : > { %1397 = vst.msk [vmem:[#allocation2 + $0xa] sm:$0xc0] %vm1396_vm3, %v1367_v41 }
 0x175   : > { %v1368_v55 = vmax.f32 %v1102_v48, %v1343_v43  ;;  %v1078_v57 = vmax.f32 %v967_v40, 0.0  ;;  %v1344_v59 = vmax.f32 %v1233_v53, 0.0  ;;  %v14340_v48 = vld [vmem:[%s24214_s3 + $0x1f8] sm:$0xff]  ;;  %v21137_v40 = vpack.c.bf16 %v14342_v31, %v14341_v35 }
 0x176   : > { %v971_v61 = vpop.f32.mrb[58].mxu0  ;;  %v1237_v63 = vpop.f32.mrb[58].mxu1 }
 0x177   : > { %1398 = vst.msk [vmem:[#allocation2 + $0x12] sm:$0xff] %vm1391_vm1, %v1368_v55  ;;  %v1103_v1 = vmax.f32 %v21007_v58, %v1078_v57  ;;  %v972_v5 = vadd.f32 %v20973_v14, %v971_v61  ;;  %v16618_v7 = vpop.f32.mrb[59].mxu0  ;;  %v1238_v49 = vadd.f32 %v20973_v14, %v1237_v63  ;;  %v16725_v8 = vpop.f32.mrb[59].mxu1  ;;  %v18817_v63 = vpack.c.bf16 %v14340_v48, %v14339_v47  ;;  %v14350_v47 = vld [vmem:[%s24214_s3 + $0x248] sm:$0xff] }
 0x179   : > { %v1369_v12 = vmax.f32 %v1103_v1, %v1344_v59  ;;  %v1079_v13 = vmax.f32 %v972_v5, 0.0  ;;  %v1345_v19 = vmax.f32 %v1238_v49, 0.0  ;;  %v14346_v49 = vld [vmem:[%s24214_s3 + $0x228] sm:$0xff] }
 0x17a   : > { %v976_v58 = vpop.f32.mrb[60].mxu0  ;;  %v1518_v20 = vld [vmem:[#allocation2 + $0x1] sm:$0xff]  ;;  %v1242_v21 = vpop.f32.mrb[60].mxu1  ;;  %v1519_v22 = vld [vmem:[#allocation2 + $0x9] sm:$0xf] }
 0x17b   : > { %1400 = vst.msk [vmem:[#allocation2 + $0x1a] sm:$0xf] %vm1399_vm4, %v1369_v12  ;;  %v1104_v26 = vmax.f32 %v21011_v4, %v1079_v13  ;;  %v977_v28 = vadd.f32 %v20973_v14, %v976_v58  ;;  %v16621_v29 = vpop.f32.mrb[61].mxu0  ;;  %16794 = vmatprep.mubr.msk.f32.mxu0 %vm1391_vm1, %v1518_v20  ;;  %v1243_v33 = vadd.f32 %v20973_v14, %v1242_v21  ;;  %v16728_v34 = vpop.f32.mrb[61].mxu1 }
 0x17c   : > { %1403 = vst.msk [vmem:[#allocation2 + $0x1c] sm:$0xf0] %vm1402_vm5, %v1369_v12  ;;  %16795 = vmatmul.mubr.msk.f32.vlgmr.msra.gmra.mrb[100].mxu0 %vm1391_vm1, %v1519_v22 }
 0x17d   : > { %v1370_v37 = vmax.f32 %v1104_v26, %v1345_v19  ;;  %v1080_v4 = vmax.f32 %v977_v28, 0.0  ;;  %v1346_v41 = vmax.f32 %v1243_v33, 0.0  ;;  %18808 = vmatpush3.bf16.msra.mxu0 %v20981_v17  ;;  %v14344_v28 = vld [vmem:[%s24214_s3 + $0x218] sm:$0xff] }
 0x17e   : > { %v981_v42 = vpop.f32.mrb[62].mxu0  ;;  %v1520_v43 = vld [vmem:[#allocation2 + $0x11] sm:$0xff]  ;;  %v1247_v44 = vpop.f32.mrb[62].mxu1  ;;  %18810 = vmatprep.subr.bf16.mxu0 %v18809_v23 }
 0x17f   : > { %1404 = vst.msk [vmem:[#allocation2 + $0x24] sm:$0xff] %vm1391_vm1, %v1370_v37  ;;  %v1105_v50 = vmax.f32 %v21015_v15, %v1080_v4  ;;  %v982_v17 = vadd.f32 %v20973_v14, %v981_v42  ;;  %v16624_v53 = vpop.f32.mrb[63].mxu0  ;;  %16805 = vmatprep.mubr.msk.f32.mxu1 %vm1391_vm1, %v1520_v43  ;;  %v1248_v54 = vadd.f32 %v20973_v14, %v1247_v44  ;;  %v16731_v55 = vpop.f32.mrb[63].mxu1  ;;  %v14345_v15 = vld [vmem:[%s24214_s3 + $0x220] sm:$0xff] }
 0x180   : > { %v18829_v21 = vpack.c.bf16 %v14346_v49, %v14345_v15  ;;  %v14347_v55 = vld [vmem:[%s24214_s3 + $0x230] sm:$0xff] }
 0x181   : > { %v1371_v57 = vmax.f32 %v1105_v50, %v1346_v41  ;;  %v1081_v59 = vmax.f32 %v982_v17, 0.0  ;;  %v1347_v61 = vmax.f32 %v1248_v54, 0.0  ;;  %18812 = vmatpush3.bf16.msra.mxu0 %v18809_v23 }
 0x182   : > { %v986_v1 = vpop.f32.mrb[64].mxu0  ;;  %v1521_v5 = vld [vmem:[#allocation2 + $0x19] sm:$0xf]  ;;  %v1252_v7 = vpop.f32.mrb[64].mxu1  ;;  %18822 = vmatprep.subr.bf16.mxu0 %v21137_v40 }
 0x183   : > { %1406 = vst.msk [vmem:[#allocation2 + $0x2c] sm:$0x3] %vm1405_vm6, %v1371_v57  ;;  %v1106_v8 = vmax.f32 %v21019_v25, %v1081_v59  ;;  %v987_v9 = vadd.f32 %v20973_v14, %v986_v1  ;;  %v16627_v10 = vpop.f32.mrb[65].mxu0  ;;  %16806 = vmatmul.mubr.msk.f32.vlgmr.msra.gmra.mrb[100].mxu1 %vm1391_vm1, %v1521_v5  ;;  %v1253_v12 = vadd.f32 %v20973_v14, %v1252_v7  ;;  %v16734_v13 = vpop.f32.mrb[65].mxu1  ;;  %v14343_v25 = vld [vmem:[%s24214_s3 + $0x210] sm:$0xff] }
 0x184   : > { %1409 = vst.msk [vmem:[#allocation2 + $0x2e] sm:$0xfc] %vm1408_vm7, %v1371_v57  ;;  %18816 = vmatpush3.bf16.msra.mxu1 %v20992_v30  ;;  %v18825_v41 = vpack.c.bf16 %v14344_v28, %v14343_v25  ;;  %v14348_v57 = vld [vmem:[%s24214_s3 + $0x238] sm:$0xff]  ;;  %v14353_v13 = vld [vmem:[%s24214_s3 + $0x260] sm:$0xff] }
 0x185   : > { %v1372_v19 = vmax.f32 %v1106_v8, %v1347_v61  ;;  %v1082_v58 = vmax.f32 %v987_v9, 0.0  ;;  %v1348_v20 = vmax.f32 %v1253_v12, 0.0  ;;  %18818 = vmatprep.subr.bf16.mxu1 %v18817_v63  ;;  %v18833_v49 = vpack.c.bf16 %v14348_v57, %v14347_v55 }
 0x186   : > { %v991_v22 = vpop.f32.mrb[66].mxu0  ;;  %v1522_v23 = vld [vmem:[#allocation2 + $0x21] sm:$0xff]  ;;  %v1257_v26 = vpop.f32.mrb[66].mxu1 }
 0x187   : > { %1410 = vst.msk [vmem:[#allocation2 + $0x36] sm:$0xff] %vm1391_vm1, %v1372_v19  ;;  %v1107_v30 = vmax.f32 %v21023_v36, %v1082_v58  ;;  %v992_v29 = vadd.f32 %v20973_v14, %v991_v22  ;;  %v16630_v33 = vpop.f32.mrb[67].mxu0  ;;  %16816 = vmatprep.mubr.msk.f32.mxu0 %vm1391_vm1, %v1522_v23  ;;  %v1258_v34 = vadd.f32 %v20973_v14, %v1257_v26  ;;  %v16737_v35 = vpop.f32.mrb[67].mxu1  ;;  %v14349_v36 = vld [vmem:[%s24214_s3 + $0x240] sm:$0xff]  ;;  %v14354_v19 = vld [vmem:[%s24214_s3 + $0x268] sm:$0xff] }
 0x188   : > { %18820 = vmatpush3.bf16.msra.mxu1 %v18817_v63  ;;  %v18837_v63 = vpack.c.bf16 %v14350_v47, %v14349_v36  ;;  %v21200_v26 = vpack.c.bf16 %v14354_v19, %v14353_v13 }
 0x189   : > { %v1373_v31 = vmax.f32 %v1107_v30, %v1348_v20  ;;  %v1083_v37 = vmax.f32 %v992_v29, 0.0  ;;  %v1349_v4 = vmax.f32 %v1258_v34, 0.0  ;;  %18830 = vmatprep.subr.bf16.mxu1 %v18829_v21  ;;  %v14352_v34 = vld [vmem:[%s24214_s3 + $0x258] sm:$0xff] }
 0x18a   : > { %v996_v42 = vpop.f32.mrb[68].mxu0  ;;  %v1523_v43 = vld [vmem:[#allocation2 + $0x29] sm:$0xf]  ;;  %v1262_v44 = vpop.f32.mrb[68].mxu1 }
 0x18b   : > { %1412 = vst.msk [vmem:[#allocation2 + $0x40] sm:$0xff] %vm1391_vm1, %v1373_v31  ;;  %v1108_v48 = vmax.f32 %v21027_v46, %v1083_v37  ;;  %v997_v50 = vadd.f32 %v20973_v14, %v996_v42  ;;  %v16633_v17 = vpop.f32.mrb[69].mxu0  ;;  %16817 = vmatmul.mubr.msk.f32.vlgmr.msra.gmra.mrb[102].mxu0 %vm1391_vm1, %v1523_v43  ;;  %v1263_v53 = vadd.f32 %v20973_v14, %v1262_v44  ;;  %v16740_v54 = vpop.f32.mrb[69].mxu1 }
 0x18c   : > { %18824 = vmatpush3.bf16.msra.mxu0 %v21137_v40  ;;  %v14357_v17 = vld [vmem:[%s24214_s3 + $0x280] sm:$0xff] }
 0x18d   : > { %v1374_v59 = vmax.f32 %v1108_v48, %v1349_v4  ;;  %v1084_v46 = vmax.f32 %v997_v50, 0.0  ;;  %v1350_v61 = vmax.f32 %v1263_v53, 0.0  ;;  %18826 = vmatprep.subr.bf16.mxu0 %v18825_v41  ;;  %v14358_v53 = vld [vmem:[%s24214_s3 + $0x288] sm:$0xff] }
 0x18e   : > { %v1001_v1 = vpop.f32.mrb[70].mxu0  ;;  %v1524_v5 = vld [vmem:[#allocation2 + $0x31] sm:$0xff]  ;;  %v1267_v7 = vpop.f32.mrb[70].mxu1  ;;  %v1525_v15 = vld [vmem:[#allocation2 + $0x39] sm:$0xf] }
 0x18f   : > { %1413 = vst.msk [vmem:[#allocation2 + $0x48] sm:$0x3f] %vm1393_vm2, %v1374_v59  ;;  %v1109_v8 = vmax.f32 %v21031_v56, %v1084_v46  ;;  %v1002_v9 = vadd.f32 %v20973_v14, %v1001_v1  ;;  %v16636_v10 = vpop.f32.mrb[71].mxu0  ;;  %16827 = vmatprep.mubr.msk.f32.mxu1 %vm1391_vm1, %v1524_v5  ;;  %v1268_v40 = vadd.f32 %v20973_v14, %v1267_v7  ;;  %v16743_v12 = vpop.f32.mrb[71].mxu1  ;;  %v14356_v1 = vld [vmem:[%s24214_s3 + $0x278] sm:$0xff] }
 0x190   : > { %1415 = vst.msk [vmem:[#allocation2 + $0x4a] sm:$0xc0] %vm1396_vm3, %v1374_v59  ;;  %16828 = vmatmul.mubr.msk.f32.vlgmr.msra.gmra.mrb[102].mxu1 %vm1391_vm1, %v1525_v15  ;;  %18828 = vmatpush3.bf16.msra.mxu0 %v18825_v41  ;;  %v21232_v5 = vpack.c.bf16 %v14358_v53, %v14357_v17  ;;  %v14366_v53 = vld [vmem:[%s24214_s3 + $0x2c8] sm:$0xff] }
 0x191   : > { %v1375_v56 = vmax.f32 %v1109_v8, %v1350_v61  ;;  %v1085_v58 = vmax.f32 %v1002_v9, 0.0  ;;  %v1351_v20 = vmax.f32 %v1268_v40, 0.0  ;;  %18832 = vmatpush3.bf16.msra.mxu1 %v18829_v21  ;;  %18838 = vmatprep.subr.bf16.mxu0 %v18837_v63  ;;  %v14351_v21 = vld [vmem:[%s24214_s3 + $0x250] sm:$0xff] }
 0x192   : > { %v1006_v22 = vpop.f32.mrb[72].mxu0  ;;  %v1272_v23 = vpop.f32.mrb[72].mxu1  ;;  %18834 = vmatprep.subr.bf16.mxu1 %v18833_v49  ;;  %v18841_v43 = vpack.c.bf16 %v14352_v34, %v14351_v21  ;;  %v14355_v61 = vld [vmem:[%s24214_s3 + $0x270] sm:$0xff] }
 0x193   : > { %1416 = vst.msk [vmem:[#allocation2 + $0x52] sm:$0xff] %vm1391_vm1, %v1375_v56  ;;  %v1110_v25 = vmax.f32 %v21035_v2, %v1085_v58  ;;  %v1007_v28 = vadd.f32 %v20973_v14, %v1006_v22  ;;  %v16639_v30 = vpop.f32.mrb[73].mxu0  ;;  %v1273_v29 = vadd.f32 %v20973_v14, %v1272_v23  ;;  %v16746_v33 = vpop.f32.mrb[73].mxu1  ;;  %v18849_v12 = vpack.c.bf16 %v14356_v1, %v14355_v61  ;;  %v14362_v58 = vld [vmem:[%s24214_s3 + $0x2a8] sm:$0xff] }
 0x195   : > { %v1376_v35 = vmax.f32 %v1110_v25, %v1351_v20  ;;  %v1086_v31 = vmax.f32 %v1007_v28, 0.0  ;;  %v1352_v37 = vmax.f32 %v1273_v29, 0.0  ;;  %18836 = vmatpush3.bf16.msra.mxu1 %v18833_v49 }
 0x196   : > { %v1011_v4 = vpop.f32.mrb[74].mxu0  ;;  %v1526_v2 = vld [vmem:[#allocation2 + $0x41] sm:$0xff]  ;;  %v1277_v41 = vpop.f32.mrb[74].mxu1  ;;  %v1527_v42 = vld [vmem:[#allocation2 + $0x49] sm:$0xf]  ;;  %18846 = vmatprep.subr.bf16.mxu1 %v21200_v26 }
 0x197   : > { %1417 = vst.msk [vmem:[#allocation2 + $0x5a] sm:$0xf] %vm1399_vm4, %v1376_v35  ;;  %v1111_v44 = vmax.f32 %v21039_v16, %v1086_v31  ;;  %v1012_v36 = vadd.f32 %v20973_v14, %v1011_v4  ;;  %v16642_v47 = vpop.f32.mrb[75].mxu0  ;;  %16838 = vmatprep.mubr.msk.f32.mxu0 %vm1391_vm1, %v1526_v2  ;;  %v1278_v48 = vadd.f32 %v20973_v14, %v1277_v41  ;;  %v16749_v50 = vpop.f32.mrb[75].mxu1 }
 0x198   : > { %1419 = vst.msk [vmem:[#allocation2 + $0x5c] sm:$0xf0] %vm1402_vm5, %v1376_v35  ;;  %16839 = vmatmul.mubr.msk.f32.vlgmr.msra.gmra.mrb[104].mxu0 %vm1391_vm1, %v1527_v42 }
 0x199   : > { %v1377_v54 = vmax.f32 %v1111_v44, %v1352_v37  ;;  %v1087_v16 = vmax.f32 %v1012_v36, 0.0  ;;  %v1353_v55 = vmax.f32 %v1278_v48, 0.0  ;;  %18840 = vmatpush3.bf16.msra.mxu0 %v18837_v63  ;;  %v14360_v37 = vld [vmem:[%s24214_s3 + $0x298] sm:$0xff] }
 0x19a   : > { %v1016_v57 = vpop.f32.mrb[76].mxu0  ;;  %v1528_v59 = vld [vmem:[#allocation2 + $0x51] sm:$0xff]  ;;  %v1282_v46 = vpop.f32.mrb[76].mxu1  ;;  %18842 = vmatprep.subr.bf16.mxu0 %v18841_v43 }
 0x19b   : > { %1420 = vst.msk [vmem:[#allocation2 + $0x64] sm:$0xff] %vm1391_vm1, %v1377_v54  ;;  %v1112_v7 = vmax.f32 %v21043_v27, %v1087_v16  ;;  %v1017_v63 = vadd.f32 %v20973_v14, %v1016_v57  ;;  %v16645_v15 = vpop.f32.mrb[77].mxu0  ;;  %16849 = vmatprep.mubr.msk.f32.mxu1 %vm1391_vm1, %v1528_v59  ;;  %v1283_v49 = vadd.f32 %v20973_v14, %v1282_v46  ;;  %v16752_v8 = vpop.f32.mrb[77].mxu1  ;;  %v14361_v27 = vld [vmem:[%s24214_s3 + $0x2a0] sm:$0xff]  ;;  %v14363_v46 = vld [vmem:[%s24214_s3 + $0x2b0] sm:$0xff] }
 0x19c   : > { %v18861_v21 = vpack.c.bf16 %v14362_v58, %v14361_v27  ;;  %v21275_v54 = vld [vmem:[%s24213_s2] ss:$0 sm:$0xff]  ;;  %v14370_v27 = vld [vmem:[%s24214_s3 + $0x2e8] sm:$0xff] }
 0x19d   : > { %v1378_v9 = vmax.f32 %v1112_v7, %v1353_v55  ;;  %v1088_v10 = vmax.f32 %v1017_v63, 0.0  ;;  %v1354_v40 = vmax.f32 %v1283_v49, 0.0  ;;  %18844 = vmatpush3.bf16.msra.mxu0 %v18841_v43 }
 0x19e   : > { %v1021_v13 = vpop.f32.mrb[78].mxu0  ;;  %v1529_v19 = vld [vmem:[#allocation2 + $0x59] sm:$0xf]  ;;  %v1287_v56 = vpop.f32.mrb[78].mxu1  ;;  %18854 = vmatprep.subr.bf16.mxu0 %v21232_v5 }
 0x19f   : > { %1421 = vst.msk [vmem:[#allocation2 + $0x6c] sm:$0x3] %vm1405_vm6, %v1378_v9  ;;  %v1113_v20 = vmax.f32 %v21047_v39, %v1088_v10  ;;  %v1022_v22 = vadd.f32 %v20973_v14, %v1021_v13  ;;  %v16648_v23 = vpop.f32.mrb[79].mxu0  ;;  %16850 = vmatmul.mubr.msk.f32.vlgmr.msra.gmra.mrb[104].mxu1 %vm1391_vm1, %v1529_v19  ;;  %v1288_v25 = vadd.f32 %v20973_v14, %v1287_v56  ;;  %v16755_v28 = vpop.f32.mrb[79].mxu1  ;;  %v14359_v39 = vld [vmem:[%s24214_s3 + $0x290] sm:$0xff]  ;;  %v14369_v56 = vld [vmem:[%s24214_s3 + $0x2e0] sm:$0xff] }
 0x1a0   : > { %1423 = vst.msk [vmem:[#allocation2 + $0x6e] sm:$0xfc] %vm1408_vm7, %v1378_v9  ;;  %18848 = vmatpush3.bf16.msra.mxu1 %v21200_v26  ;;  %v18857_v47 = vpack.c.bf16 %v14360_v37, %v14359_v39 }
 0x1a1   : > { %v1379_v30 = vmax.f32 %v1113_v20, %v1354_v40  ;;  %v1089_v29 = vmax.f32 %v1022_v22, 0.0  ;;  %v1355_v33 = vmax.f32 %v1288_v25, 0.0  ;;  %18850 = vmatprep.subr.bf16.mxu1 %v18849_v12  ;;  %v21300_v25 = vpack.c.bf16 %v14370_v27, %v14369_v56 }
 0x1a2   : > { %v1026_v34 = vpop.f32.mrb[80].mxu0  ;;  %v1530_v35 = vld [vmem:[#allocation2 + $0x61] sm:$0xff]  ;;  %v1292_v31 = vpop.f32.mrb[80].mxu1 }
 0x1a3   : > { %1424 = vst.msk [vmem:[#allocation2 + $0x76] sm:$0xff] %vm1391_vm1, %v1379_v30  ;;  %v1114_v26 = vmax.f32 %v21051_v51, %v1089_v29  ;;  %v1027_v4 = vadd.f32 %v20973_v14, %v1026_v34  ;;  %v16651_v2 = vpop.f32.mrb[81].mxu0  ;;  %16860 = vmatprep.mubr.msk.f32.mxu0 %vm1391_vm1, %v1530_v35  ;;  %v1293_v41 = vadd.f32 %v20973_v14, %v1292_v31  ;;  %v16758_v42 = vpop.f32.mrb[81].mxu1  ;;  %v14365_v51 = vld [vmem:[%s24214_s3 + $0x2c0] sm:$0xff]  ;;  %v14368_v35 = vld [vmem:[%s24214_s3 + $0x2d8] sm:$0xff] }
 0x1a4   : > { %18852 = vmatpush3.bf16.msra.mxu1 %v18849_v12  ;;  %v18869_v63 = vpack.c.bf16 %v14366_v53, %v14365_v51 }
 0x1a5   : > { %v1380_v43 = vmax.f32 %v1114_v26, %v1355_v33  ;;  %v1090_v44 = vmax.f32 %v1027_v4, 0.0  ;;  %v1356_v36 = vmax.f32 %v1293_v41, 0.0  ;;  %18862 = vmatprep.subr.bf16.mxu1 %v18861_v21 }
 0x1a6   : > { %v1031_v48 = vpop.f32.mrb[82].mxu0  ;;  %v1531_v50 = vld [vmem:[#allocation2 + $0x69] sm:$0xf]  ;;  %v1297_v17 = vpop.f32.mrb[82].mxu1 }
 0x1a7   : > { %1426 = vst.msk [vmem:[#allocation2 + $0x80] sm:$0xff] %vm1391_vm1, %v1380_v43  ;;  %v1115_v14 = vmax.f32 %v21055_v62, %v1090_v44  ;;  %v1032_v16 = vadd.f32 %v21275_v54, %v1031_v48  ;;  %v16654_v55 = vpop.f32.mrb[83].mxu0  ;;  %16861 = vmatmul.mubr.msk.f32.vlgmr.msra.gmra.mrb[106].mxu0 %vm1391_vm1, %v1531_v50  ;;  %v1298_v57 = vadd.f32 %v21275_v54, %v1297_v17  ;;  %v16761_v59 = vpop.f32.mrb[83].mxu1  ;;  %v14364_v62 = vld [vmem:[%s24214_s3 + $0x2b8] sm:$0xff]  ;;  %v1470_v48 = vld [vmem:[%s24214_s3] sm:$0xff]  ;;  %v1471_v50 = vld [vmem:[%s24214_s3 + $0x8] sm:$0xff] }
 0x1a8   : > { %18856 = vmatpush3.bf16.msra.mxu0 %v21232_v5  ;;  %v18865_v10 = vpack.c.bf16 %v14364_v62, %v14363_v46  ;;  %v21326_v55 = vpack.c.bf16 %v1471_v50, %v1470_v48  ;;  %v14372_v59 = vld [vmem:[%s24214_s3 + $0x2f8] sm:$0xff]  ;;  %v1476_v50 = vld [vmem:[%s24214_s3 + $0x30] sm:$0xff] }
 0x1a9   : > { %v1381_v61 = vmax.f32 %v1115_v14, %v1356_v36  ;;  %v1091_v1 = vmax.f32 %v1032_v16, 0.0  ;;  %v1357_v7 = vmax.f32 %v1298_v57, 0.0  ;;  %18858 = vmatprep.subr.bf16.mxu0 %v18857_v47  ;;  %v14371_v57 = vld [vmem:[%s24214_s3 + $0x2f0] sm:$0xff] }
 0x1aa   : > { %v1036_v15 = vpop.f32.mrb[84].mxu0  ;;  %v1532_v49 = vld [vmem:[#allocation2 + $0x71] sm:$0xff]  ;;  %v1302_v8 = vpop.f32.mrb[84].mxu1  ;;  %v1533_v9 = vld [vmem:[#allocation2 + $0x79] sm:$0xf] }
 0x1ab   : > { %1427 = vst.msk [vmem:[#allocation2 + $0x88] sm:$0x3f] %vm1393_vm2, %v1381_v61  ;;  %v1116_v40 = vmax.f32 %v21059_v11, %v1091_v1  ;;  %v1037_v12 = vadd.f32 %v21275_v54, %v1036_v15  ;;  %v16657_v13 = vpop.f32.mrb[85].mxu0  ;;  %16871 = vmatprep.mubr.msk.f32.mxu1 %vm1391_vm1, %v1532_v49  ;;  %v1303_v5 = vadd.f32 %v21275_v54, %v1302_v8  ;;  %v16764_v19 = vpop.f32.mrb[85].mxu1 }
 0x1ac   : > { %1429 = vst.msk [vmem:[#allocation2 + $0x8a] sm:$0xc0] %vm1396_vm3, %v1381_v61  ;;  %16872 = vmatmul.mubr.msk.f32.vlgmr.msra.gmra.mrb[106].mxu1 %vm1391_vm1, %v1533_v9  ;;  %18860 = vmatpush3.bf16.msra.mxu0 %v18857_v47  ;;  %v18881_v8 = vpack.c.bf16 %v14372_v59, %v14371_v57 }
 0x1ad   : > { %v1382_v11 = vmax.f32 %v1116_v40, %v1357_v7  ;;  %v1092_v58 = vmax.f32 %v1037_v12, 0.0  ;;  %v1358_v20 = vmax.f32 %v1303_v5, 0.0  ;;  %18864 = vmatpush3.bf16.msra.mxu1 %v18861_v21  ;;  %18870 = vmatprep.subr.bf16.mxu0 %v18869_v63  ;;  %v14367_v21 = vld [vmem:[%s24214_s3 + $0x2d0] sm:$0xff]  ;;  %v1475_v12 = vld [vmem:[%s24214_s3 + $0x28] sm:$0xff] }
 0x1ae   : > { %v1041_v22 = vpop.f32.mrb[86].mxu0  ;;  %v1307_v23 = vpop.f32.mrb[86].mxu1  ;;  %18866 = vmatprep.subr.bf16.mxu1 %v18865_v10  ;;  %v18873_v41 = vpack.c.bf16 %v14368_v35, %v14367_v21 }
 0x1af   : > { %1430 = vst.msk [vmem:[#allocation2 + $0x92] sm:$0xff] %vm1391_vm1, %v1382_v11  ;;  %v1117_v28 = vmax.f32 %v21063_v24, %v1092_v58  ;;  %v1042_v30 = vadd.f32 %v21275_v54, %v1041_v22  ;;  %v16660_v29 = vpop.f32.mrb[87].mxu0  ;;  %v1308_v33 = vadd.f32 %v21275_v54, %v1307_v23  ;;  %v16767_v34 = vpop.f32.mrb[87].mxu1 }
 0x1b0   : > { %v1473_v29 = vld [vmem:[%s24214_s3 + $0x18] sm:$0xff] }
 0x1b1   : > { %v1383_v31 = vmax.f32 %v1117_v28, %v1358_v20  ;;  %v1093_v39 = vmax.f32 %v1042_v30, 0.0  ;;  %v1359_v37 = vmax.f32 %v1308_v33, 0.0  ;;  %18868 = vmatpush3.bf16.msra.mxu1 %v18865_v10 }
 0x1b2   : > { %v1046_v26 = vpop.f32.mrb[88].mxu0  ;;  %v1534_v24 = vld [vmem:[#allocation2 + $0x81] sm:$0xff]  ;;  %v1312_v4 = vpop.f32.mrb[88].mxu1  ;;  %v1535_v2 = vld [vmem:[#allocation2 + $0x89] sm:$0xf]  ;;  %18878 = vmatprep.subr.bf16.mxu1 %v21300_v25 }
 0x1b3   : > { %1431 = vst.msk [vmem:[#allocation2 + $0x9a] sm:$0xf] %vm1399_vm4, %v1383_v31  ;;  %v1118_v42 = vmax.f32 %v21067_v38, %v1093_v39  ;;  %v1047_v43 = vadd.f32 %v21275_v54, %v1046_v26  ;;  %v16663_v44 = vpop.f32.mrb[89].mxu0  ;;  %16882 = vmatprep.mubr.msk.f32.mxu0 %vm1391_vm1, %v1534_v24  ;;  %v1313_v36 = vadd.f32 %v21275_v54, %v1312_v4  ;;  %v16770_v47 = vpop.f32.mrb[89].mxu1 }
 0x1b4   : > { %1433 = vst.msk [vmem:[#allocation2 + $0x9c] sm:$0xf0] %vm1402_vm5, %v1383_v31  ;;  %16883 = vmatmul.mubr.msk.f32.vlgmr.msra.gmra.mrb[108].mxu0 %vm1391_vm1, %v1535_v2 }
 0x1b5   : > { %v1384_v17 = vmax.f32 %v1118_v42, %v1359_v37  ;;  %v1094_v38 = vmax.f32 %v1047_v43, 0.0  ;;  %v1360_v51 = vmax.f32 %v1313_v36, 0.0  ;;  %18872 = vmatpush3.bf16.msra.mxu0 %v18869_v63  ;;  %v1446_v36 = vld [vmem:[#allocation2] sm:$0xff] }
 0x1b6   : > { %v1051_v53 = vpop.f32.mrb[90].mxu0  ;;  %v1536_v14 = vld [vmem:[#allocation2 + $0x91] sm:$0xff]  ;;  %v1317_v16 = vpop.f32.mrb[90].mxu1  ;;  %18874 = vmatprep.subr.bf16.mxu0 %v18873_v41 }
 0x1b7   : > { %1434 = vst.msk [vmem:[#allocation2 + $0xa4] sm:$0xff] %vm1391_vm1, %v1384_v17  ;;  %v1119_v46 = vmax.f32 %v21071_v52, %v1094_v38  ;;  %v1052_v62 = vadd.f32 %v21275_v54, %v1051_v53  ;;  %v16666_v61 = vpop.f32.mrb[91].mxu0  ;;  %16893 = vmatprep.mubr.msk.f32.mxu1 %vm1391_vm1, %v1536_v14  ;;  %v1318_v1 = vadd.f32 %v21275_v54, %v1317_v16  ;;  %v16773_v7 = vpop.f32.mrb[91].mxu1  ;;  %v1474_v52 = vld [vmem:[%s24214_s3 + $0x20] sm:$0xff]  ;;  %v1477_v17 = vld [vmem:[%s24214_s3 + $0x38] sm:$0xff]  ;;  %v1480_v53 = vld [vmem:[%s24214_s3 + $0x50] sm:$0xff] }
 0x1b8   : > { %v21353_v22 = vpack.c.bf16 %v1475_v12, %v1474_v52  ;;  %v1447_v52 = vld [vmem:[#allocation2 + $0x8] sm:$0xf] }
 0x1b9   : > { %v1385_v63 = vmax.f32 %v1119_v46, %v1360_v51  ;;  %v1095_v15 = vmax.f32 %v1052_v62, 0.0  ;;  %v1361_v49 = vmax.f32 %v1318_v1, 0.0  ;;  %18876 = vmatpush3.bf16.msra.mxu0 %v18873_v41  ;;  %v1479_v41 = vld [vmem:[%s24214_s3 + $0x48] sm:$0xff]  ;;  %v18897_v62 = vpack.c.bf16 %v1477_v17, %v1476_v50  ;;  %v21488_v17 = vld [vmem:[#allocation2 + $0x60] sm:$0xff] }
 0x1ba   : > { %v1056_v9 = vpop.f32.mrb[92].mxu0  ;;  %v1537_v10 = vld [vmem:[#allocation2 + $0x99] sm:$0xf]  ;;  %v1322_v40 = vpop.f32.mrb[92].mxu1  ;;  %18886 = vmatprep.subr.bf16.mxu0 %v21326_v55  ;;  %v1503_v50 = vld [vmem:[%s24214_s3 + $0x108] sm:$0xff] }
 0x1bb   : > { %1435 = vst.msk [vmem:[#allocation2 + $0xac] sm:$0x3] %vm1405_vm6, %v1385_v63  ;;  %v1120_v13 = vmax.f32 %v21075_v0, %v1095_v15  ;;  %v1057_v5 = vadd.f32 %v21275_v54, %v1056_v9  ;;  %16894 = vmatmul.mubr.msk.f32.vlgmr.msra.gmra.mrb[108].mxu1 %vm1391_vm1, %v1537_v10  ;;  %v1323_v19 = vadd.f32 %v21275_v54, %v1322_v40  ;;  %v16669_v56 = vpop.f32.mrb[93].mxu0  ;;  %v16776_v27 = vpop.f32.mrb[93].mxu1  ;;  %v1472_v0 = vld [vmem:[%s24214_s3 + $0x10] sm:$0xff]  ;;  %v1483_v15 = vld [vmem:[%s24214_s3 + $0x68] sm:$0xff] }
 0x1bc   : > { %1437 = vst.msk [vmem:[#allocation2 + $0xae] sm:$0xfc] %vm1408_vm7, %v1385_v63  ;;  %18880 = vmatpush3.bf16.msra.mxu1 %v21300_v25  ;;  %v18889_v26 = vpack.c.bf16 %v1473_v29, %v1472_v0  ;;  %v1482_v63 = vld [vmem:[%s24214_s3 + $0x60] sm:$0xff]  ;;  %v1484_v27 = vld [vmem:[%s24214_s3 + $0x70] sm:$0xff]  ;;  %v1491_v0 = vld [vmem:[%s24214_s3 + $0xa8] sm:$0xff] }
 0x1bd   : > { %v1386_v11 = vmax.f32 %v1120_v13, %v1361_v49  ;;  %v1096_v58 = vmax.f32 %v1057_v5, 0.0  ;;  %v1362_v20 = vmax.f32 %v1323_v19, 0.0  ;;  %18882 = vmatprep.subr.bf16.mxu1 %v18881_v8  ;;  %v18909_v12 = vpack.c.bf16 %v1483_v15, %v1482_v63  ;;  %v1486_v13 = vld [vmem:[%s24214_s3 + $0x80] sm:$0xff]  ;;  %v1487_v5 = vld [vmem:[%s24214_s3 + $0x88] sm:$0xff]  ;;  %v21443_v29 = vld [vmem:[#allocation2 + $0x30] sm:$0xff] }
 0x1be   : > { %v1061_v23 = vpop.f32.mrb[94].mxu0  ;;  %v1538_v28 = vld [vmem:[#allocation2 + $0xa1] sm:$0xff]  ;;  %v1327_v30 = vpop.f32.mrb[94].mxu1 }
 0x1bf   : > { %1438 = vst.msk [vmem:[#allocation2 + $0xb6] sm:$0xff] %vm1391_vm1, %v1386_v11  ;;  %v1121_v25 = vmax.f32 %v21079_v18, %v1096_v58  ;;  %v1062_v33 = vadd.f32 %v21275_v54, %v1061_v23  ;;  %16904 = vmatprep.mubr.msk.f32.mxu0 %vm1391_vm1, %v1538_v28  ;;  %v1328_v34 = vadd.f32 %v21275_v54, %v1327_v30  ;;  %v16672_v21 = vpop.f32.mrb[95].mxu0  ;;  %v16779_v35 = vpop.f32.mrb[95].mxu1  ;;  %v1478_v18 = vld [vmem:[%s24214_s3 + $0x40] sm:$0xff]  ;;  %v1485_v11 = vld [vmem:[%s24214_s3 + $0x78] sm:$0xff]  ;;  %v1511_v63 = vld [vmem:[%s24214_s3 + $0x148] sm:$0xff] }
 0x1c0   : > { %18884 = vmatpush3.bf16.msra.mxu1 %v18881_v8  ;;  %v18901_v46 = vpack.c.bf16 %v1479_v41, %v1478_v18  ;;  %v21405_v8 = vld [vmem:[#allocation2 + $0x10] sm:$0xff]  ;;  %v21419_v56 = vld [vmem:[#allocation2 + $0x20] sm:$0xff]  ;;  %v1489_v23 = vld [vmem:[%s24214_s3 + $0x98] sm:$0xff] }
 0x1c1   : > { %v1387_v31 = vmax.f32 %v1121_v25, %v1362_v20  ;;  %v1097_v39 = vmax.f32 %v1062_v33, 0.0  ;;  %v1363_v37 = vmax.f32 %v1328_v34, 0.0  ;;  %18894 = vmatprep.subr.bf16.mxu1 %v21353_v22  ;;  %v18913_v20 = vpack.c.bf16 %v1485_v11, %v1484_v27  ;;  %v1449_v28 = vld [vmem:[#allocation2 + $0x18] sm:$0xf]  ;;  %v1490_v30 = vld [vmem:[%s24214_s3 + $0xa0] sm:$0xff]  ;;  %v1495_v35 = vld [vmem:[%s24214_s3 + $0xc8] sm:$0xff] }
 0x1c2   : > { %v1066_v24 = vpop.f32.mrb[96].mxu0  ;;  %v1539_v4 = vld [vmem:[#allocation2 + $0xa9] sm:$0xf]  ;;  %v1332_v2 = vpop.f32.mrb[96].mxu1  ;;  %v18925_v34 = vpack.c.bf16 %v1491_v0, %v1490_v30  ;;  %v1494_v21 = vld [vmem:[%s24214_s3 + $0xc0] sm:$0xff]  ;;  %v14423_v0 = vld [vmem:[%s24214_s3 + $0x310] sm:$0xff] }
 0x1c3   : > { %1440 = vst.msk [vmem:[#allocation2 + $0xc0] sm:$0xff] %vm1391_vm1, %v1387_v31  ;;  %v1122_v42 = vmax.f32 %v21083_v32, %v1097_v39  ;;  %v1067_v43 = vadd.f32 %v21275_v54, %v1066_v24  ;;  %16905 = vmatmul.mubr.msk.f32.vlgmr.msra.gmra.mrb[110].mxu0 %vm1391_vm1, %v1539_v4  ;;  %v1333_v44 = vadd.f32 %v21275_v54, %v1332_v2  ;;  %v16675_v47 = vpop.f32.mrb[97].mxu0  ;;  %v16782_v48 = vpop.f32.mrb[97].mxu1  ;;  %v1451_v33 = vld [vmem:[#allocation2 + $0x28] sm:$0xf]  ;;  %v21454_v31 = vld [vmem:[#allocation2 + $0x40] sm:$0xff] }
 0x1c4   : > { %18888 = vmatpush3.bf16.msra.mxu0 %v21326_v55  ;;  %16926 = vmatprep.mubr.msk.f32.mxu0 %vm1391_vm1, %v1446_v36  ;;  %v1481_v55 = vld [vmem:[%s24214_s3 + $0x58] sm:$0xff]  ;;  %v1492_v39 = vld [vmem:[%s24214_s3 + $0xb0] sm:$0xff]  ;;  %v1498_v41 = vld [vmem:[%s24214_s3 + $0xe0] sm:$0xff] }
 0x1c5   : > { %v1388_v32 = vmax.f32 %v1122_v42, %v1363_v37  ;;  %v1098_v38 = vmax.f32 %v1067_v43, 0.0  ;;  %v1364_v51 = vmax.f32 %v1333_v44, 0.0  ;;  %18890 = vmatprep.subr.bf16.mxu0 %v18889_v26  ;;  %v1493_v37 = vld [vmem:[%s24214_s3 + $0xb8] sm:$0xff]  ;;  %v1496_v4 = vld [vmem:[%s24214_s3 + $0xd0] sm:$0xff]  ;;  %v1499_v42 = vld [vmem:[%s24214_s3 + $0xe8] sm:$0xff] }
 0x1c6   : > { %v1071_v14 = vpop.f32.mrb[98].mxu0  ;;  %v1540_v16 = vld [vmem:[#allocation2 + $0xb1] sm:$0xff]  ;;  %v1337_v57 = vpop.f32.mrb[98].mxu1  ;;  %v1541_v59 = vld [vmem:[#allocation2 + $0xb9] sm:$0xf]  ;;  %v18929_v24 = vpack.c.bf16 %v1493_v37, %v1492_v39  ;;  %v18941_v47 = vpack.c.bf16 %v1499_v42, %v1498_v41  ;;  %v1502_v48 = vld [vmem:[%s24214_s3 + $0x100] sm:$0xff] }
 0x1c7   : > { %1441 = vst.msk [vmem:[#allocation2 + $0xc8] sm:$0x3f] %vm1393_vm2, %v1388_v32  ;;  %v1123_v61 = vmax.f32 %v21087_v45, %v1098_v38  ;;  %v1072_v1 = vadd.f32 %v21275_v54, %v1071_v14  ;;  %16915 = vmatprep.mubr.msk.f32.mxu1 %vm1391_vm1, %v1540_v16  ;;  %v1338_v7 = vadd.f32 %v21275_v54, %v1337_v57  ;;  %v16678_v49 = vpop.f32.mrb[99].mxu0  ;;  %v16785_v45 = vpop.f32.mrb[99].mxu1  ;;  %v1497_v2 = vld [vmem:[%s24214_s3 + $0xd8] sm:$0xff]  ;;  %v21477_v43 = vld [vmem:[#allocation2 + $0x50] sm:$0xff] }
 0x1c8   : > { %1443 = vst.msk [vmem:[#allocation2 + $0xca] sm:$0xc0] %vm1396_vm3, %v1388_v32  ;;  %18892 = vmatpush3.bf16.msra.mxu0 %v18889_v26  ;;  %16916 = vmatmul.mubr.msk.f32.vlgmr.msra.gmra.mrb[110].mxu1 %vm1391_vm1, %v1541_v59  ;;  %v18905_v54 = vpack.c.bf16 %v1481_v55, %v1480_v53  ;;  %v18933_v26 = vpack.c.bf16 %v1495_v35, %v1494_v21  ;;  %v1453_v18 = vld [vmem:[#allocation2 + $0x38] sm:$0xf]  ;;  %v1455_v36 = vld [vmem:[#allocation2 + $0x48] sm:$0xf] }
 0x1c9   : > { %v1389_v9 = vmax.f32 %v1123_v61, %v1364_v51  ;;  %v1099_v10 = vmax.f32 %v1072_v1, 0.0  ;;  %v1365_v40 = vmax.f32 %v1338_v7, 0.0  ;;  %18896 = vmatpush3.bf16.msra.mxu1 %v21353_v22  ;;  %16937 = vmatprep.mubr.msk.f32.mxu1 %vm1391_vm1, %v21405_v8  ;;  %v1488_v22 = vld [vmem:[%s24214_s3 + $0x90] sm:$0xff]  ;;  %v18937_v44 = vpack.c.bf16 %v1497_v2, %v1496_v4  ;;  %v1501_v38 = vld [vmem:[%s24214_s3 + $0xf8] sm:$0xff]  ;;  %v1506_v59 = vld [vmem:[%s24214_s3 + $0x120] sm:$0xff] }
 0x1ca   : > { %18902 = vmatprep.subr.bf16.mxu0 %v18901_v46  ;;  %18898 = vmatprep.subr.bf16.mxu1 %v18897_v62  ;;  %v18921_v25 = vpack.c.bf16 %v1489_v23, %v1488_v22  ;;  %v1500_v32 = vld [vmem:[%s24214_s3 + $0xf0] sm:$0xff]  ;;  %v18949_v51 = vpack.c.bf16 %v1503_v50, %v1502_v48  ;;  %v1505_v16 = vld [vmem:[%s24214_s3 + $0x118] sm:$0xff]  ;;  %v1459_v61 = vld [vmem:[#allocation2 + $0x68] sm:$0xf] }
 0x1cb   : > { %1444 = vst.msk [vmem:[#allocation2 + $0xd2] sm:$0xff] %vm1391_vm1, %v1389_v9  ;;  %v1124_v19 = vmax.f32 %v21091_v60, %v1099_v10  ;;  %16927 = vmatmul.mubr.msk.f32.vlgmr.msra.gmra.mrb[100].mxu0 %vm1391_vm1, %v1447_v52  ;;  %v18917_v60 = vpack.c.bf16 %v1487_v5, %v1486_v13  ;;  %v18945_v53 = vpack.c.bf16 %v1501_v38, %v1500_v32  ;;  %v1504_v14 = vld [vmem:[%s24214_s3 + $0x110] sm:$0xff]  ;;  %v1457_v57 = vld [vmem:[#allocation2 + $0x58] sm:$0xf]  ;;  %v1510_v7 = vld [vmem:[%s24214_s3 + $0x140] sm:$0xff] }
 0x1cc   : > { %18904 = vmatpush3.bf16.msra.mxu0 %v18901_v46  ;;  %16948 = vmatprep.mubr.msk.f32.mxu0 %vm1391_vm1, %v21419_v56  ;;  %v1507_v46 = vld [vmem:[%s24214_s3 + $0x128] sm:$0xff]  ;;  %v18953_v55 = vpack.c.bf16 %v1505_v16, %v1504_v14  ;;  %v21522_v15 = vld [vmem:[#allocation2 + $0x80] sm:$0xff]  ;;  %v1508_v49 = vld [vmem:[%s24214_s3 + $0x130] sm:$0xff]  ;;  %v18965_v9 = vpack.c.bf16 %v1511_v63, %v1510_v7 }
 0x1cd   : > { %v1390_v58 = vmax.f32 %v1124_v19, %v1365_v40  ;;  %18900 = vmatpush3.bf16.msra.mxu1 %v18897_v62  ;;  %18906 = vmatprep.subr.bf16.mxu0 %v18905_v54  ;;  %v21511_v62 = vld [vmem:[#allocation2 + $0x70] sm:$0xff]  ;;  %v18957_v1 = vpack.c.bf16 %v1507_v46, %v1506_v59  ;;  %v1509_v45 = vld [vmem:[%s24214_s3 + $0x138] sm:$0xff]  ;;  %v1515_v13 = vld [vmem:[%s24214_s3 + $0x168] sm:$0xff] }
 0x1ce   : > { %18910 = vmatprep.subr.bf16.mxu1 %v18909_v12  ;;  %v18961_v10 = vpack.c.bf16 %v1509_v45, %v1508_v49  ;;  %v1512_v40 = vld [vmem:[%s24214_s3 + $0x150] sm:$0xff]  ;;  %v1461_v52 = vld [vmem:[#allocation2 + $0x78] sm:$0xf]  ;;  %v1463_v27 = vld [vmem:[#allocation2 + $0x88] sm:$0xf] }
 0x1cf   : > { %1445 = vst.msk [vmem:[#allocation2 + $0xda] sm:$0xf] %vm1399_vm4, %v1390_v58  ;;  %v21545_v5 = vld [vmem:[#allocation2 + $0x90] sm:$0xff]  ;;  %v14421_v58 = vld [vmem:[%s24214_s3 + $0x300] sm:$0xff]  ;;  %v1517_v23 = vld [vmem:[%s24214_s3 + $0x178] sm:$0xff] }
 0x1d0   : > { %16938 = vmatmul.mubr.msk.f32.vlgmr.msra.gmra.mrb[100].mxu1 %vm1391_vm1, %v1449_v28  ;;  %18908 = vmatpush3.bf16.msra.mxu0 %v18905_v54  ;;  %v1513_v54 = vld [vmem:[%s24214_s3 + $0x158] sm:$0xff]  ;;  %v1516_v22 = vld [vmem:[%s24214_s3 + $0x170] sm:$0xff]  ;;  %v14426_v21 = vld [vmem:[%s24214_s3 + $0x328] sm:$0xff] }
 0x1d1   : > { %18912 = vmatpush3.bf16.msra.mxu1 %v18909_v12  ;;  %16959 = vmatprep.mubr.msk.f32.mxu1 %vm1391_vm1, %v21443_v29  ;;  %v1514_v12 = vld [vmem:[%s24214_s3 + $0x160] sm:$0xff]  ;;  %v18969_v19 = vpack.c.bf16 %v1513_v54, %v1512_v40  ;;  %v18977_v30 = vpack.c.bf16 %v1517_v23, %v1516_v22  ;;  %v21579_v35 = vld [vmem:[#allocation2 + $0xb0] sm:$0xff]  ;;  %v1467_v37 = vld [vmem:[#allocation2 + $0xa8] sm:$0xf] }
 0x1d2   : > { %18918 = vmatprep.subr.bf16.mxu0 %v18917_v60  ;;  %18914 = vmatprep.subr.bf16.mxu1 %v18913_v20  ;;  %v18973_v11 = vpack.c.bf16 %v1515_v13, %v1514_v12  ;;  %v14430_v4 = vld [vmem:[%s24214_s3 + $0x348] sm:$0xff]  ;;  %v14428_v41 = vld [vmem:[%s24214_s3 + $0x338] sm:$0xff]  ;;  %v14433_v50 = vld [vmem:[%s24214_s3 + $0x360] sm:$0xff] }
 0x1d3   : > { %16949 = vmatmul.mubr.msk.f32.vlgmr.msra.gmra.mrb[102].mxu0 %vm1391_vm1, %v1451_v33  ;;  %v1465_v33 = vld [vmem:[#allocation2 + $0x98] sm:$0xf]  ;;  %v3535_v2 = vld [vmem:[#allocation2 + $0x2] sm:$0xff]  ;;  %v14435_v46 = vld [vmem:[%s24214_s3 + $0x370] sm:$0xff] }
 0x1d4   : > { %18920 = vmatpush3.bf16.msra.mxu0 %v18917_v60  ;;  %16970 = vmatprep.mubr.msk.f32.mxu0 %vm1391_vm1, %v21454_v31  ;;  %v14422_v60 = vld [vmem:[%s24214_s3 + $0x308] sm:$0xff]  ;;  %v1469_v48 = vld [vmem:[#allocation2 + $0xb8] sm:$0xf]  ;;  %v14437_v16 = vld [vmem:[%s24214_s3 + $0x380] sm:$0xff] }
 0x1d5   : > { %18916 = vmatpush3.bf16.msra.mxu1 %v18913_v20  ;;  %18922 = vmatprep.subr.bf16.mxu0 %v18921_v25  ;;  %v21556_v20 = vld [vmem:[#allocation2 + $0xa0] sm:$0xff]  ;;  %v18981_v28 = vpack.c.bf16 %v14422_v60, %v14421_v58  ;;  %v14434_v32 = vld [vmem:[%s24214_s3 + $0x368] sm:$0xff]  ;;  %v21610_v38 = vld [vmem:[#allocation2 + $0x12] sm:$0xff] }
 0x1d6   : > { %18926 = vmatprep.subr.bf16.mxu1 %v18925_v34  ;;  %v19005_v14 = vpack.c.bf16 %v14434_v32, %v14433_v50  ;;  %v21621_v59 = vld [vmem:[#allocation2 + $0x22] sm:$0xff]  ;;  %v14439_v7 = vld [vmem:[%s24214_s3 + $0x390] sm:$0xff]  ;;  %v14440_v63 = vld [vmem:[%s24214_s3 + $0x398] sm:$0xff] }
 0x1d7   : > { %v3538_v49 = vld [vmem:[#allocation2 + $0x1a] sm:$0xf]  ;;  %v14441_v45 = vld [vmem:[%s24214_s3 + $0x3a0] sm:$0xff]  ;;  %v19017_v40 = vpack.c.bf16 %v14440_v63, %v14439_v7  ;;  %v3540_v54 = vld [vmem:[#allocation2 + $0x2a] sm:$0xf] }
 0x1d8   : > { %16960 = vmatmul.mubr.msk.f32.vlgmr.msra.gmra.mrb[102].mxu1 %vm1391_vm1, %v1453_v18  ;;  %18924 = vmatpush3.bf16.msra.mxu0 %v18921_v25  ;;  %v14424_v25 = vld [vmem:[%s24214_s3 + $0x318] sm:$0xff]  ;;  %v14427_v18 = vld [vmem:[%s24214_s3 + $0x330] sm:$0xff]  ;;  %v14445_v12 = vld [vmem:[%s24214_s3 + $0x3c0] sm:$0xff] }
 0x1d9   : > { %18928 = vmatpush3.bf16.msra.mxu1 %v18925_v34  ;;  %16981 = vmatprep.mubr.msk.f32.mxu1 %vm1391_vm1, %v21477_v43  ;;  %v14425_v34 = vld [vmem:[%s24214_s3 + $0x320] sm:$0xff]  ;;  %v18985_v39 = vpack.c.bf16 %v14424_v25, %v14423_v0  ;;  %v14446_v13 = vld [vmem:[%s24214_s3 + $0x3c8] sm:$0xff]  ;;  %v14447_v22 = vld [vmem:[%s24214_s3 + $0x3d0] sm:$0xff] }
 0x1da   : > { %18934 = vmatprep.subr.bf16.mxu0 %v18933_v26  ;;  %18930 = vmatprep.subr.bf16.mxu1 %v18929_v24  ;;  %v19029_v58 = vpack.c.bf16 %v14446_v13, %v14445_v12  ;;  %v14448_v23 = vld [vmem:[%s24214_s3 + $0x3d8] sm:$0xff]  ;;  %v14450_v0 = vld [vmem:[%s24214_s3 + $0x3e8] sm:$0xff]  ;;  %v14493_v12 = vld [vmem:[%s24214_s3 + $0x480] sm:$0xff] }
 0x1db   : > { %16971 = vmatmul.mubr.msk.f32.vlgmr.msra.gmra.mrb[104].mxu0 %vm1391_vm1, %v1455_v36  ;;  %v14431_v36 = vld [vmem:[%s24214_s3 + $0x350] sm:$0xff]  ;;  %v3548_v32 = vld [vmem:[#allocation2 + $0x6a] sm:$0xf]  ;;  %v14464_v7 = vld [vmem:[%s24214_s3 + $0x458] sm:$0xff] }
 0x1dc   : > { %18936 = vmatpush3.bf16.msra.mxu0 %v18933_v26  ;;  %16992 = vmatprep.mubr.msk.f32.mxu0 %vm1391_vm1, %v21488_v17  ;;  %v18989_v26 = vpack.c.bf16 %v14426_v21, %v14425_v34  ;;  %v21678_v25 = vld [vmem:[#allocation2 + $0x52] sm:$0xff]  ;;  %v3544_v34 = vld [vmem:[#allocation2 + $0x4a] sm:$0xf]  ;;  %v3550_v63 = vld [vmem:[#allocation2 + $0x7a] sm:$0xf] }
 0x1dd   : > { %18932 = vmatpush3.bf16.msra.mxu1 %v18929_v24  ;;  %18938 = vmatprep.subr.bf16.mxu0 %v18937_v44  ;;  %v14429_v24 = vld [vmem:[%s24214_s3 + $0x340] sm:$0xff]  ;;  %v14494_v13 = vld [vmem:[%s24214_s3 + $0x488] sm:$0xff] }
 0x1de   : > { %18942 = vmatprep.subr.bf16.mxu1 %v18941_v47  ;;  %v18997_v42 = vpack.c.bf16 %v14430_v4, %v14429_v24  ;;  %v14451_v24 = vld [vmem:[%s24214_s3 + $0x3f0] sm:$0xff]  ;;  %v14452_v4 = vld [vmem:[%s24214_s3 + $0x3f8] sm:$0xff] }
 0x1e0   : > { %16982 = vmatmul.mubr.msk.f32.vlgmr.msra.gmra.mrb[104].mxu1 %vm1391_vm1, %v1457_v57  ;;  %18940 = vmatpush3.bf16.msra.mxu0 %v18937_v44  ;;  %v18993_v44 = vpack.c.bf16 %v14428_v41, %v14427_v18  ;;  %v14438_v57 = vld [vmem:[%s24214_s3 + $0x388] sm:$0xff]  ;;  %v19041_v18 = vpack.c.bf16 %v14452_v4, %v14451_v24  ;;  %v14455_v41 = vld [vmem:[%s24214_s3 + $0x410] sm:$0xff]  ;;  %v14501_v24 = vld [vmem:[%s24214_s3 + $0x4c0] sm:$0xff] }
 0x1e1   : > { %18944 = vmatpush3.bf16.msra.mxu1 %v18941_v47  ;;  %17003 = vmatprep.mubr.msk.f32.mxu1 %vm1391_vm1, %v21511_v62  ;;  %v14432_v47 = vld [vmem:[%s24214_s3 + $0x358] sm:$0xff]  ;;  %v14502_v4 = vld [vmem:[%s24214_s3 + $0x4c8] sm:$0xff] }
 0x1e2   : > { %18950 = vmatprep.subr.bf16.mxu0 %v18949_v51  ;;  %18946 = vmatprep.subr.bf16.mxu1 %v18945_v53 }
 0x1e3   : > { %16993 = vmatmul.mubr.msk.f32.vlgmr.msra.gmra.mrb[106].mxu0 %vm1391_vm1, %v1459_v61  ;;  %v19013_v61 = vpack.c.bf16 %v14438_v57, %v14437_v16  ;;  %v21723_v16 = vld [vmem:[#allocation2 + $0x82] sm:$0xff]  ;;  %v14459_v57 = vld [vmem:[%s24214_s3 + $0x430] sm:$0xff] }
 0x1e4   : > { %18952 = vmatpush3.bf16.msra.mxu0 %v18949_v51  ;;  %17014 = vmatprep.mubr.msk.f32.mxu0 %vm1391_vm1, %v21522_v15  ;;  %v19001_v51 = vpack.c.bf16 %v14432_v47, %v14431_v36  ;;  %v14457_v36 = vld [vmem:[%s24214_s3 + $0x420] sm:$0xff]  ;;  %v14458_v47 = vld [vmem:[%s24214_s3 + $0x428] sm:$0xff] }
 0x1e5   : > { %18948 = vmatpush3.bf16.msra.mxu1 %v18945_v53  ;;  %18954 = vmatprep.subr.bf16.mxu0 %v18953_v55  ;;  %v3536_v53 = vld [vmem:[#allocation2 + $0xa] sm:$0xf] }
 0x1e6   : > { %18958 = vmatprep.subr.bf16.mxu1 %v18957_v1 }
 0x1e8   : > { %17004 = vmatmul.mubr.msk.f32.vlgmr.msra.gmra.mrb[106].mxu1 %vm1391_vm1, %v1461_v52  ;;  %18956 = vmatpush3.bf16.msra.mxu0 %v18953_v55  ;;  %v14436_v55 = vld [vmem:[%s24214_s3 + $0x378] sm:$0xff] }
 0x1e9   : > { %18960 = vmatpush3.bf16.msra.mxu1 %v18957_v1  ;;  %17025 = vmatprep.mubr.msk.f32.mxu1 %vm1391_vm1, %v21545_v5  ;;  %v19009_v1 = vpack.c.bf16 %v14436_v55, %v14435_v46  ;;  %v14460_v46 = vld [vmem:[%s24214_s3 + $0x438] sm:$0xff] }
 0x1ea   : > { %18966 = vmatprep.subr.bf16.mxu0 %v18965_v9  ;;  %18962 = vmatprep.subr.bf16.mxu1 %v18961_v10 }
 0x1eb   : > { %17015 = vmatmul.mubr.msk.f32.vlgmr.msra.gmra.mrb[108].mxu0 %vm1391_vm1, %v1463_v27  ;;  %v14443_v27 = vld [vmem:[%s24214_s3 + $0x3b0] sm:$0xff] }
 0x1ec   : > { %18968 = vmatpush3.bf16.msra.mxu0 %v18965_v9  ;;  %17036 = vmatprep.mubr.msk.f32.mxu0 %vm1391_vm1, %v21556_v20  ;;  %v14442_v9 = vld [vmem:[%s24214_s3 + $0x3a8] sm:$0xff] }
 0x1ed   : > { %18964 = vmatpush3.bf16.msra.mxu1 %v18961_v10  ;;  %18970 = vmatprep.subr.bf16.mxu0 %v18969_v19  ;;  %v21644_v10 = vld [vmem:[#allocation2 + $0x32] sm:$0xff]  ;;  %v19021_v52 = vpack.c.bf16 %v14442_v9, %v14441_v45  ;;  %v14466_v45 = vld [vmem:[%s24214_s3 + $0x468] sm:$0xff] }
 0x1ee   : > { %18974 = vmatprep.subr.bf16.mxu1 %v18973_v11  ;;  %v21746_v9 = vld [vmem:[#allocation2 + $0x92] sm:$0xff] }
 0x1f0   : > { %17026 = vmatmul.mubr.msk.f32.vlgmr.msra.gmra.mrb[108].mxu1 %vm1391_vm1, %v1465_v33  ;;  %18972 = vmatpush3.bf16.msra.mxu0 %v18969_v19  ;;  %v21655_v19 = vld [vmem:[#allocation2 + $0x42] sm:$0xff]  ;;  %v19033_v33 = vpack.c.bf16 %v14448_v23, %v14447_v22  ;;  %v14495_v23 = vld [vmem:[%s24214_s3 + $0x490] sm:$0xff] }
 0x1f1   : > { %18976 = vmatpush3.bf16.msra.mxu1 %v18973_v11  ;;  %17047 = vmatprep.mubr.msk.f32.mxu1 %vm1391_vm1, %v21579_v35  ;;  %v14444_v11 = vld [vmem:[%s24214_s3 + $0x3b8] sm:$0xff] }
 0x1f2   : > { %18982 = vmatprep.subr.bf16.mxu0 %v18981_v28  ;;  %18978 = vmatprep.subr.bf16.mxu1 %v18977_v30  ;;  %v19025_v60 = vpack.c.bf16 %v14444_v11, %v14443_v27  ;;  %v21757_v27 = vld [vmem:[#allocation2 + $0xa2] sm:$0xff]  ;;  %v14467_v11 = vld [vmem:[%s24214_s3 + $0x470] sm:$0xff] }
 0x1f3   : > { %17037 = vmatmul.mubr.msk.f32.vlgmr.msra.gmra.mrb[110].mxu0 %vm1391_vm1, %v1467_v37  ;;  %v14454_v37 = vld [vmem:[%s24214_s3 + $0x408] sm:$0xff] }
 0x1f4   : > { %18984 = vmatpush3.bf16.msra.mxu0 %v18981_v28  ;;  %17058 = vmatprep.mubr.msk.f32.mxu0 %vm1391_vm1, %v3535_v2  ;;  %v3542_v28 = vld [vmem:[#allocation2 + $0x3a] sm:$0xf] }
 0x1f5   : > { %18980 = vmatpush3.bf16.msra.mxu1 %v18977_v30  ;;  %18986 = vmatprep.subr.bf16.mxu0 %v18985_v39  ;;  %v14449_v30 = vld [vmem:[%s24214_s3 + $0x3e0] sm:$0xff] }
 0x1f6   : > { %18990 = vmatprep.subr.bf16.mxu1 %v18989_v26  ;;  %v19037_v21 = vpack.c.bf16 %v14450_v0, %v14449_v30  ;;  %v3554_v30 = vld [vmem:[#allocation2 + $0x9a] sm:$0xf]  ;;  %v14497_v0 = vld [vmem:[%s24214_s3 + $0x4a0] sm:$0xff] }
 0x1f8   : > { %17048 = vmatmul.mubr.msk.f32.vlgmr.msra.gmra.mrb[110].mxu1 %vm1391_vm1, %v1469_v48  ;;  %18988 = vmatpush3.bf16.msra.mxu0 %v18985_v39  ;;  %v14453_v39 = vld [vmem:[%s24214_s3 + $0x400] sm:$0xff]  ;;  %v21712_v48 = vld [vmem:[#allocation2 + $0x72] sm:$0xff] }
 0x1f9   : > { %18992 = vmatpush3.bf16.msra.mxu1 %v18989_v26  ;;  %17069 = vmatprep.mubr.msk.f32.mxu1 %vm1391_vm1, %v21610_v38  ;;  %v21689_v26 = vld [vmem:[#allocation2 + $0x62] sm:$0xff]  ;;  %v19045_v2 = vpack.c.bf16 %v14454_v37, %v14453_v39  ;;  %v3556_v39 = vld [vmem:[#allocation2 + $0xaa] sm:$0xf] }
 0x1fa   : > { %18998 = vmatprep.subr.bf16.mxu0 %v18997_v42  ;;  %18994 = vmatprep.subr.bf16.mxu1 %v18993_v44 }
 0x1fb   : > { %17059 = vmatmul.mubr.msk.f32.vlgmr.msra.gmra.mrb[100].mxu0 %vm1391_vm1, %v3536_v53  ;;  %v14461_v53 = vld [vmem:[%s24214_s3 + $0x440] sm:$0xff] }
 0x1fc   : > { %19000 = vmatpush3.bf16.msra.mxu0 %v18997_v42  ;;  %17080 = vmatprep.mubr.msk.f32.mxu0 %vm1391_vm1, %v21621_v59  ;;  %v14456_v42 = vld [vmem:[%s24214_s3 + $0x418] sm:$0xff] }
 0x1fd   : > { %18996 = vmatpush3.bf16.msra.mxu1 %v18993_v44  ;;  %19002 = vmatprep.subr.bf16.mxu0 %v19001_v51  ;;  %v3546_v44 = vld [vmem:[#allocation2 + $0x5a] sm:$0xf]  ;;  %v19049_v50 = vpack.c.bf16 %v14456_v42, %v14455_v41  ;;  %v19093_v41 = vpack.c.bf16 %v14502_v4, %v14501_v24 }
 0x1fe   : > { %19006 = vmatprep.subr.bf16.mxu1 %v19005_v14 }
 0x200   : > { %17070 = vmatmul.mubr.msk.f32.vlgmr.msra.gmra.mrb[100].mxu1 %vm1391_vm1, %v3538_v49  ;;  %19004 = vmatpush3.bf16.msra.mxu0 %v19001_v51  ;;  %v19053_v51 = vpack.c.bf16 %v14458_v47, %v14457_v36  ;;  %v14465_v49 = vld [vmem:[%s24214_s3 + $0x460] sm:$0xff]  ;;  %v14504_v36 = vld [vmem:[%s24214_s3 + $0x4d8] sm:$0xff] }
 0x201   : > { %19008 = vmatpush3.bf16.msra.mxu1 %v19005_v14  ;;  %17091 = vmatprep.mubr.msk.f32.mxu1 %vm1391_vm1, %v21644_v10  ;;  %v14462_v14 = vld [vmem:[%s24214_s3 + $0x448] sm:$0xff]  ;;  %v3558_v47 = vld [vmem:[#allocation2 + $0xba] sm:$0xf] }
 0x202   : > { %19014 = vmatprep.subr.bf16.mxu0 %v19013_v61  ;;  %19010 = vmatprep.subr.bf16.mxu1 %v19009_v1  ;;  %v19061_v55 = vpack.c.bf16 %v14462_v14, %v14461_v53  ;;  %v14509_v14 = vld [vmem:[%s24214_s3 + $0x500] sm:$0xff] }
 0x203   : > { %17081 = vmatmul.mubr.msk.f32.vlgmr.msra.gmra.mrb[102].mxu0 %vm1391_vm1, %v3540_v54  ;;  %v3552_v54 = vld [vmem:[#allocation2 + $0x8a] sm:$0xf] }
 0x204   : > { %19016 = vmatpush3.bf16.msra.mxu0 %v19013_v61  ;;  %17102 = vmatprep.mubr.msk.f32.mxu0 %vm1391_vm1, %v21655_v19  ;;  %v19057_v61 = vpack.c.bf16 %v14460_v46, %v14459_v57  ;;  %v14510_v57 = vld [vmem:[%s24214_s3 + $0x508] sm:$0xff]  ;;  %v14507_v46 = vld [vmem:[%s24214_s3 + $0x4f0] sm:$0xff] }
 0x205   : > { %19012 = vmatpush3.bf16.msra.mxu1 %v19009_v1  ;;  %19018 = vmatprep.subr.bf16.mxu0 %v19017_v40  ;;  %v14463_v1 = vld [vmem:[%s24214_s3 + $0x450] sm:$0xff] }
 0x206   : > { %19022 = vmatprep.subr.bf16.mxu1 %v19021_v52 }
 0x208   : > { %17092 = vmatmul.mubr.msk.f32.vlgmr.msra.gmra.mrb[102].mxu1 %vm1391_vm1, %v3542_v28  ;;  %19020 = vmatpush3.bf16.msra.mxu0 %v19017_v40  ;;  %v19065_v40 = vpack.c.bf16 %v14464_v7, %v14463_v1  ;;  %v14496_v28 = vld [vmem:[%s24214_s3 + $0x498] sm:$0xff]  ;;  %v14511_v1 = vld [vmem:[%s24214_s3 + $0x510] sm:$0xff] }
 0x209   : > { %19024 = vmatpush3.bf16.msra.mxu1 %v19021_v52  ;;  %17113 = vmatprep.mubr.msk.f32.mxu1 %vm1391_vm1, %v21678_v25  ;;  %v19069_v52 = vpack.c.bf16 %v14466_v45, %v14465_v49  ;;  %v14512_v7 = vld [vmem:[%s24214_s3 + $0x518] sm:$0xff]  ;;  %v14513_v49 = vld [vmem:[%s24214_s3 + $0x520] sm:$0xff] }
 0x20a   : > { %19030 = vmatprep.subr.bf16.mxu0 %v19029_v58  ;;  %19026 = vmatprep.subr.bf16.mxu1 %v19025_v60  ;;  %v19113_v45 = vpack.c.bf16 %v14512_v7, %v14511_v1  ;;  %v14565_v7 = vld [vmem:[%s24214_s3 + $0x600] sm:$0xff] }
 0x20b   : > { %17103 = vmatmul.mubr.msk.f32.vlgmr.msra.gmra.mrb[104].mxu0 %vm1391_vm1, %v3544_v34  ;;  %v21780_v34 = vld [vmem:[#allocation2 + $0xb2] sm:$0xff] }
 0x20c   : > { %19032 = vmatpush3.bf16.msra.mxu0 %v19029_v58  ;;  %17124 = vmatprep.mubr.msk.f32.mxu0 %vm1391_vm1, %v21689_v26  ;;  %v14468_v58 = vld [vmem:[%s24214_s3 + $0x478] sm:$0xff] }
 0x20d   : > { %19028 = vmatpush3.bf16.msra.mxu1 %v19025_v60  ;;  %19034 = vmatprep.subr.bf16.mxu0 %v19033_v33  ;;  %v19077_v60 = vpack.c.bf16 %v14494_v13, %v14493_v12  ;;  %v19073_v22 = vpack.c.bf16 %v14468_v58, %v14467_v11  ;;  %v14518_v12 = vld [vmem:[%s24214_s3 + $0x548] sm:$0xff]  ;;  %v14515_v13 = vld [vmem:[%s24214_s3 + $0x530] sm:$0xff] }
 0x20e   : > { %19038 = vmatprep.subr.bf16.mxu1 %v19037_v21 }
 0x210   : > { %17114 = vmatmul.mubr.msk.f32.vlgmr.msra.gmra.mrb[104].mxu1 %vm1391_vm1, %v3546_v44  ;;  %19036 = vmatpush3.bf16.msra.mxu0 %v19033_v33  ;;  %v14498_v33 = vld [vmem:[%s24214_s3 + $0x4a8] sm:$0xff]  ;;  %v14503_v44 = vld [vmem:[%s24214_s3 + $0x4d0] sm:$0xff] }
 0x211   : > { %19040 = vmatpush3.bf16.msra.mxu1 %v19037_v21  ;;  %17135 = vmatprep.mubr.msk.f32.mxu1 %vm1391_vm1, %v21712_v48  ;;  %v19081_v21 = vpack.c.bf16 %v14496_v28, %v14495_v23  ;;  %v19085_v37 = vpack.c.bf16 %v14498_v33, %v14497_v0  ;;  %v4611_v23 = vld [vmem:[#allocation2 + $0x48] sm:$0xf]  ;;  %v14521_v28 = vld [vmem:[%s24214_s3 + $0x560] sm:$0xff]  ;;  %v4613_v0 = vld [vmem:[#allocation2 + $0x58] sm:$0xf] }
 0x212   : > { %19046 = vmatprep.subr.bf16.mxu0 %v19045_v2  ;;  %19042 = vmatprep.subr.bf16.mxu1 %v19041_v18 }
 0x213   : > { %17125 = vmatmul.mubr.msk.f32.vlgmr.msra.gmra.mrb[106].mxu0 %vm1391_vm1, %v3548_v32  ;;  %v19097_v32 = vpack.c.bf16 %v14504_v36, %v14503_v44  ;;  %v4617_v36 = vld [vmem:[#allocation2 + $0x78] sm:$0xf] }
 0x214   : > { %19048 = vmatpush3.bf16.msra.mxu0 %v19045_v2  ;;  %17146 = vmatprep.mubr.msk.f32.mxu0 %vm1391_vm1, %v21723_v16  ;;  %v14499_v2 = vld [vmem:[%s24214_s3 + $0x4b0] sm:$0xff] }
 0x215   : > { %19044 = vmatpush3.bf16.msra.mxu1 %v19041_v18  ;;  %19050 = vmatprep.subr.bf16.mxu0 %v19049_v50  ;;  %v14500_v18 = vld [vmem:[%s24214_s3 + $0x4b8] sm:$0xff] }
 0x216   : > { %19054 = vmatprep.subr.bf16.mxu1 %v19053_v51  ;;  %v19089_v42 = vpack.c.bf16 %v14500_v18, %v14499_v2  ;;  %v14527_v2 = vld [vmem:[%s24214_s3 + $0x590] sm:$0xff]  ;;  %v14528_v18 = vld [vmem:[%s24214_s3 + $0x598] sm:$0xff] }
 0x217   : > { %v19145_v44 = vpack.c.bf16 %v14528_v18, %v14527_v2  ;;  %v5674_v2 = vld [vmem:[#allocation2 + $0x19] sm:$0xf]  ;;  %v21997_v18 = vld [vmem:[#allocation2 + $0x31] sm:$0xff] }
 0x218   : > { %17136 = vmatmul.mubr.msk.f32.vlgmr.msra.gmra.mrb[106].mxu1 %vm1391_vm1, %v3550_v63  ;;  %19052 = vmatpush3.bf16.msra.mxu0 %v19049_v50  ;;  %v14505_v50 = vld [vmem:[%s24214_s3 + $0x4e0] sm:$0xff]  ;;  %v4607_v63 = vld [vmem:[#allocation2 + $0x28] sm:$0xf] }
 0x219   : > { %19056 = vmatpush3.bf16.msra.mxu1 %v19053_v51  ;;  %17157 = vmatprep.mubr.msk.f32.mxu1 %vm1391_vm1, %v21746_v9  ;;  %v4605_v51 = vld [vmem:[#allocation2 + $0x18] sm:$0xf] }
 0x21a   : > { %19062 = vmatprep.subr.bf16.mxu0 %v19061_v55  ;;  %19058 = vmatprep.subr.bf16.mxu1 %v19057_v61 }
 0x21b   : > { %17147 = vmatmul.mubr.msk.f32.vlgmr.msra.gmra.mrb[108].mxu0 %vm1391_vm1, %v3552_v54 }
 0x21c   : > { %19064 = vmatpush3.bf16.msra.mxu0 %v19061_v55  ;;  %17168 = vmatprep.mubr.msk.f32.mxu0 %vm1391_vm1, %v21757_v27  ;;  %v19109_v55 = vpack.c.bf16 %v14510_v57, %v14509_v14  ;;  %v14535_v14 = vld [vmem:[%s24214_s3 + $0x5d0] sm:$0xff]  ;;  %v14536_v57 = vld [vmem:[%s24214_s3 + $0x5d8] sm:$0xff] }
 0x21d   : > { %19060 = vmatpush3.bf16.msra.mxu1 %v19057_v61  ;;  %19066 = vmatprep.subr.bf16.mxu0 %v19065_v40 }
 0x21e   : > { %19070 = vmatprep.subr.bf16.mxu1 %v19069_v52 }
 0x220   : > { %17158 = vmatmul.mubr.msk.f32.vlgmr.msra.gmra.mrb[108].mxu1 %vm1391_vm1, %v3554_v30  ;;  %19068 = vmatpush3.bf16.msra.mxu0 %v19065_v40  ;;  %v4609_v40 = vld [vmem:[#allocation2 + $0x38] sm:$0xf] }
 0x221   : > { %19072 = vmatpush3.bf16.msra.mxu1 %v19069_v52  ;;  %17179 = vmatprep.mubr.msk.f32.mxu1 %vm1391_vm1, %v21780_v34  ;;  %v14517_v52 = vld [vmem:[%s24214_s3 + $0x540] sm:$0xff] }
 0x222   : > { %19078 = vmatprep.subr.bf16.mxu0 %v19077_v60  ;;  %19074 = vmatprep.subr.bf16.mxu1 %v19073_v22  ;;  %v19125_v11 = vpack.c.bf16 %v14518_v12, %v14517_v52  ;;  %v4623_v52 = vld [vmem:[#allocation2 + $0xa8] sm:$0xf]  ;;  %v14569_v12 = vld [vmem:[%s24214_s3 + $0x620] sm:$0xff] }
 0x223   : > { %17169 = vmatmul.mubr.msk.f32.vlgmr.msra.gmra.mrb[110].mxu0 %vm1391_vm1, %v3556_v39  ;;  %v14526_v39 = vld [vmem:[%s24214_s3 + $0x588] sm:$0xff] }
 0x224   : > { %19080 = vmatpush3.bf16.msra.mxu0 %v19077_v60  ;;  %17190 = vmatprep.mubr.msk.f32.mxu0 %vm1391_vm1, %v21405_v8  ;;  %v14506_v8 = vld [vmem:[%s24214_s3 + $0x4e8] sm:$0xff]  ;;  %v14519_v60 = vld [vmem:[%s24214_s3 + $0x550] sm:$0xff] }
 0x225   : > { %19076 = vmatpush3.bf16.msra.mxu1 %v19073_v22  ;;  %19082 = vmatprep.subr.bf16.mxu0 %v19081_v21  ;;  %v19101_v53 = vpack.c.bf16 %v14506_v8, %v14505_v50  ;;  %v14520_v22 = vld [vmem:[%s24214_s3 + $0x558] sm:$0xff]  ;;  %v14533_v50 = vld [vmem:[%s24214_s3 + $0x5c0] sm:$0xff]  ;;  %v14534_v8 = vld [vmem:[%s24214_s3 + $0x5c8] sm:$0xff] }
 0x226   : > { %19086 = vmatprep.subr.bf16.mxu1 %v19085_v37  ;;  %v19129_v30 = vpack.c.bf16 %v14520_v22, %v14519_v60  ;;  %v14573_v22 = vld [vmem:[%s24214_s3 + $0x640] sm:$0xff] }
 0x228   : > { %17180 = vmatmul.mubr.msk.f32.vlgmr.msra.gmra.mrb[110].mxu1 %vm1391_vm1, %v3558_v47  ;;  %19084 = vmatpush3.bf16.msra.mxu0 %v19081_v21  ;;  %v14525_v21 = vld [vmem:[%s24214_s3 + $0x580] sm:$0xff] }
 0x229   : > { %19088 = vmatpush3.bf16.msra.mxu1 %v19085_v37  ;;  %17201 = vmatprep.mubr.msk.f32.mxu1 %vm1391_vm1, %v21419_v56  ;;  %v14508_v56 = vld [vmem:[%s24214_s3 + $0x4f8] sm:$0xff]  ;;  %v14523_v37 = vld [vmem:[%s24214_s3 + $0x570] sm:$0xff]  ;;  %v19141_v24 = vpack.c.bf16 %v14526_v39, %v14525_v21  ;;  %v4627_v39 = vld [vmem:[#allocation2 + $0xc8] sm:$0xf] }
 0x22a   : > { %19094 = vmatprep.subr.bf16.mxu0 %v19093_v41  ;;  %19090 = vmatprep.subr.bf16.mxu1 %v19089_v42  ;;  %v19105_v61 = vpack.c.bf16 %v14508_v56, %v14507_v46  ;;  %v4619_v46 = vld [vmem:[#allocation2 + $0x88] sm:$0xf]  ;;  %v14537_v56 = vld [vmem:[%s24214_s3 + $0x5e0] sm:$0xff]  ;;  %v14576_v21 = vld [vmem:[%s24214_s3 + $0x658] sm:$0xff] }
 0x22b   : > { %17191 = vmatmul.mubr.msk.f32.vlgmr.msra.gmra.mrb[100].mxu0 %vm1391_vm1, %v4605_v51  ;;  %v19157_v51 = vpack.c.bf16 %v14534_v8, %v14533_v50  ;;  %v14583_v8 = vld [vmem:[%s24214_s3 + $0x690] sm:$0xff] }
 0x22c   : > { %19096 = vmatpush3.bf16.msra.mxu0 %v19093_v41  ;;  %17212 = vmatprep.mubr.msk.f32.mxu0 %vm1391_vm1, %v21443_v29  ;;  %v14514_v29 = vld [vmem:[%s24214_s3 + $0x528] sm:$0xff] }
 0x22d   : > { %19092 = vmatpush3.bf16.msra.mxu1 %v19089_v42  ;;  %19098 = vmatprep.subr.bf16.mxu0 %v19097_v32  ;;  %v19117_v54 = vpack.c.bf16 %v14514_v29, %v14513_v49  ;;  %v4615_v41 = vld [vmem:[#allocation2 + $0x68] sm:$0xf]  ;;  %v14529_v42 = vld [vmem:[%s24214_s3 + $0x5a0] sm:$0xff]  ;;  %v14539_v49 = vld [vmem:[%s24214_s3 + $0x5f0] sm:$0xff] }
 0x22e   : > { %19102 = vmatprep.subr.bf16.mxu1 %v19101_v53 }
 0x230   : > { %17202 = vmatmul.mubr.msk.f32.vlgmr.msra.gmra.mrb[100].mxu1 %vm1391_vm1, %v4607_v63  ;;  %19100 = vmatpush3.bf16.msra.mxu0 %v19097_v32  ;;  %v14531_v32 = vld [vmem:[%s24214_s3 + $0x5b0] sm:$0xff]  ;;  %v14566_v63 = vld [vmem:[%s24214_s3 + $0x608] sm:$0xff] }
 0x231   : > { %19104 = vmatpush3.bf16.msra.mxu1 %v19101_v53  ;;  %17223 = vmatprep.mubr.msk.f32.mxu1 %vm1391_vm1, %v21454_v31  ;;  %v14516_v31 = vld [vmem:[%s24214_s3 + $0x538] sm:$0xff]  ;;  %v19173_v29 = vpack.c.bf16 %v14566_v63, %v14565_v7 }
 0x232   : > { %19110 = vmatprep.subr.bf16.mxu0 %v19109_v55  ;;  %19106 = vmatprep.subr.bf16.mxu1 %v19105_v61  ;;  %v19121_v58 = vpack.c.bf16 %v14516_v31, %v14515_v13  ;;  %v21962_v13 = vld [vmem:[#allocation2 + $0xc0] sm:$0xff]  ;;  %v14588_v7 = vld [vmem:[%s24214_s3 + $0x6b8] sm:$0xff] }
 0x233   : > { %17213 = vmatmul.mubr.msk.f32.vlgmr.msra.gmra.mrb[102].mxu0 %vm1391_vm1, %v4609_v40  ;;  %v14567_v40 = vld [vmem:[%s24214_s3 + $0x610] sm:$0xff] }
 0x234   : > { %19112 = vmatpush3.bf16.msra.mxu0 %v19109_v55  ;;  %17234 = vmatprep.mubr.msk.f32.mxu0 %vm1391_vm1, %v21477_v43  ;;  %v14522_v43 = vld [vmem:[%s24214_s3 + $0x568] sm:$0xff]  ;;  %v19161_v55 = vpack.c.bf16 %v14536_v57, %v14535_v14 }
 0x235   : > { %19108 = vmatpush3.bf16.msra.mxu1 %v19105_v61  ;;  %19114 = vmatprep.subr.bf16.mxu0 %v19113_v45  ;;  %v19133_v33 = vpack.c.bf16 %v14522_v43, %v14521_v28  ;;  %v4621_v61 = vld [vmem:[#allocation2 + $0x98] sm:$0xf]  ;;  %v14571_v28 = vld [vmem:[%s24214_s3 + $0x630] sm:$0xff]  ;;  %v22027_v14 = vld [vmem:[#allocation2 + $0x41] sm:$0xff] }
 0x236   : > { %19118 = vmatprep.subr.bf16.mxu1 %v19117_v54  ;;  %v14572_v43 = vld [vmem:[%s24214_s3 + $0x638] sm:$0xff] }
 0x238   : > { %17224 = vmatmul.mubr.msk.f32.vlgmr.msra.gmra.mrb[102].mxu1 %vm1391_vm1, %v4611_v23  ;;  %19116 = vmatpush3.bf16.msra.mxu0 %v19113_v45  ;;  %v14574_v23 = vld [vmem:[%s24214_s3 + $0x648] sm:$0xff] }
 0x239   : > { %19120 = vmatpush3.bf16.msra.mxu1 %v19117_v54  ;;  %17245 = vmatprep.mubr.msk.f32.mxu1 %vm1391_vm1, %v21488_v17  ;;  %v14524_v17 = vld [vmem:[%s24214_s3 + $0x578] sm:$0xff] }
 0x23a   : > { %19126 = vmatprep.subr.bf16.mxu0 %v19125_v11  ;;  %19122 = vmatprep.subr.bf16.mxu1 %v19121_v58  ;;  %v19137_v4 = vpack.c.bf16 %v14524_v17, %v14523_v37  ;;  %v14568_v54 = vld [vmem:[%s24214_s3 + $0x618] sm:$0xff]  ;;  %v14577_v37 = vld [vmem:[%s24214_s3 + $0x660] sm:$0xff]  ;;  %v14578_v17 = vld [vmem:[%s24214_s3 + $0x668] sm:$0xff] }
 0x23b   : > { %17235 = vmatmul.mubr.msk.f32.vlgmr.msra.gmra.mrb[104].mxu0 %vm1391_vm1, %v4613_v0  ;;  %v19177_v31 = vpack.c.bf16 %v14568_v54, %v14567_v40  ;;  %v19185_v0 = vpack.c.bf16 %v14572_v43, %v14571_v28  ;;  %v14593_v40 = vld [vmem:[%s24214_s3 + $0x6e0] sm:$0xff]  ;;  %v14594_v54 = vld [vmem:[%s24214_s3 + $0x6e8] sm:$0xff] }
 0x23c   : > { %19128 = vmatpush3.bf16.msra.mxu0 %v19125_v11  ;;  %17256 = vmatprep.mubr.msk.f32.mxu0 %vm1391_vm1, %v21511_v62  ;;  %v14530_v62 = vld [vmem:[%s24214_s3 + $0x5a8] sm:$0xff]  ;;  %v4625_v11 = vld [vmem:[#allocation2 + $0xb8] sm:$0xf] }
 0x23d   : > { %19124 = vmatpush3.bf16.msra.mxu1 %v19121_v58  ;;  %19130 = vmatprep.subr.bf16.mxu0 %v19129_v30  ;;  %v19149_v47 = vpack.c.bf16 %v14530_v62, %v14529_v42  ;;  %v5673_v58 = vld [vmem:[#allocation2 + $0x11] sm:$0xff]  ;;  %v14581_v42 = vld [vmem:[%s24214_s3 + $0x680] sm:$0xff]  ;;  %v14582_v62 = vld [vmem:[%s24214_s3 + $0x688] sm:$0xff] }
 0x23e   : > { %19134 = vmatprep.subr.bf16.mxu1 %v19133_v33 }
 0x240   : > { %17246 = vmatmul.mubr.msk.f32.vlgmr.msra.gmra.mrb[104].mxu1 %vm1391_vm1, %v4615_v41  ;;  %19132 = vmatpush3.bf16.msra.mxu0 %v19129_v30  ;;  %v19189_v30 = vpack.c.bf16 %v14574_v23, %v14573_v22  ;;  %v19197_v41 = vpack.c.bf16 %v14578_v17, %v14577_v37  ;;  %v14595_v22 = vld [vmem:[%s24214_s3 + $0x6f0] sm:$0xff]  ;;  %v14596_v23 = vld [vmem:[%s24214_s3 + $0x6f8] sm:$0xff]  ;;  %v22095_v37 = vld [vmem:[#allocation2 + $0x81] sm:$0xff] }
 0x241   : > { %19136 = vmatpush3.bf16.msra.mxu1 %v19133_v33  ;;  %17267 = vmatprep.mubr.msk.f32.mxu1 %vm1391_vm1, %v21522_v15  ;;  %v14532_v15 = vld [vmem:[%s24214_s3 + $0x5b8] sm:$0xff]  ;;  %v14575_v33 = vld [vmem:[%s24214_s3 + $0x650] sm:$0xff]  ;;  %v19233_v43 = vpack.c.bf16 %v14596_v23, %v14595_v22  ;;  %v14645_v23 = vld [vmem:[%s24214_s3 + $0x7c0] sm:$0xff] }
 0x242   : > { %19142 = vmatprep.subr.bf16.mxu0 %v19141_v24  ;;  %19138 = vmatprep.subr.bf16.mxu1 %v19137_v4  ;;  %v19153_v53 = vpack.c.bf16 %v14532_v15, %v14531_v32  ;;  %v14584_v32 = vld [vmem:[%s24214_s3 + $0x698] sm:$0xff]  ;;  %v5676_v15 = vld [vmem:[#allocation2 + $0x29] sm:$0xf] }
 0x243   : > { %17257 = vmatmul.mubr.msk.f32.vlgmr.msra.gmra.mrb[106].mxu0 %vm1391_vm1, %v4617_v36  ;;  %v14580_v36 = vld [vmem:[%s24214_s3 + $0x678] sm:$0xff]  ;;  %v19209_v57 = vpack.c.bf16 %v14584_v32, %v14583_v8  ;;  %v14607_v8 = vld [vmem:[%s24214_s3 + $0x750] sm:$0xff] }
 0x244   : > { %19144 = vmatpush3.bf16.msra.mxu0 %v19141_v24  ;;  %17278 = vmatprep.mubr.msk.f32.mxu0 %vm1391_vm1, %v21545_v5  ;;  %v14538_v5 = vld [vmem:[%s24214_s3 + $0x5e8] sm:$0xff]  ;;  %v14608_v32 = vld [vmem:[%s24214_s3 + $0x758] sm:$0xff] }
 0x245   : > { %19140 = vmatpush3.bf16.msra.mxu1 %v19137_v4  ;;  %19146 = vmatprep.subr.bf16.mxu0 %v19145_v44  ;;  %v19165_v1 = vpack.c.bf16 %v14538_v5, %v14537_v56  ;;  %v21993_v24 = vld [vmem:[#allocation2 + $0x21] sm:$0xff]  ;;  %v19193_v4 = vpack.c.bf16 %v14576_v21, %v14575_v33  ;;  %v22031_v56 = vld [vmem:[#allocation2 + $0x51] sm:$0xff]  ;;  %v5684_v33 = vld [vmem:[#allocation2 + $0x69] sm:$0xf] }
 0x246   : > { %19150 = vmatprep.subr.bf16.mxu1 %v19149_v47  ;;  %v14601_v21 = vld [vmem:[%s24214_s3 + $0x720] sm:$0xff] }
 0x248   : > { %17268 = vmatmul.mubr.msk.f32.vlgmr.msra.gmra.mrb[106].mxu1 %vm1391_vm1, %v4619_v46  ;;  %19148 = vmatpush3.bf16.msra.mxu0 %v19145_v44  ;;  %v14579_v44 = vld [vmem:[%s24214_s3 + $0x670] sm:$0xff]  ;;  %v5678_v46 = vld [vmem:[#allocation2 + $0x39] sm:$0xf] }
 0x249   : > { %19152 = vmatpush3.bf16.msra.mxu1 %v19149_v47  ;;  %17289 = vmatprep.mubr.msk.f32.mxu1 %vm1391_vm1, %v21556_v20  ;;  %v14540_v20 = vld [vmem:[%s24214_s3 + $0x5f8] sm:$0xff]  ;;  %v19205_v47 = vpack.c.bf16 %v14582_v62, %v14581_v42  ;;  %v19201_v50 = vpack.c.bf16 %v14580_v36, %v14579_v44  ;;  %v14605_v42 = vld [vmem:[%s24214_s3 + $0x740] sm:$0xff]  ;;  %v14606_v62 = vld [vmem:[%s24214_s3 + $0x748] sm:$0xff] }
 0x24a   : > { %19158 = vmatprep.subr.bf16.mxu0 %v19157_v51  ;;  %19154 = vmatprep.subr.bf16.mxu1 %v19153_v53  ;;  %v19169_v45 = vpack.c.bf16 %v14540_v20, %v14539_v49  ;;  %v14591_v20 = vld [vmem:[%s24214_s3 + $0x6d0] sm:$0xff]  ;;  %v14604_v36 = vld [vmem:[%s24214_s3 + $0x738] sm:$0xff] }
 0x24b   : > { %17279 = vmatmul.mubr.msk.f32.vlgmr.msra.gmra.mrb[108].mxu0 %vm1391_vm1, %v4621_v61  ;;  %v14590_v61 = vld [vmem:[%s24214_s3 + $0x6c8] sm:$0xff]  ;;  %v14603_v44 = vld [vmem:[%s24214_s3 + $0x730] sm:$0xff] }
 0x24c   : > { %19160 = vmatpush3.bf16.msra.mxu0 %v19157_v51  ;;  %17300 = vmatprep.mubr.msk.f32.mxu0 %vm1391_vm1, %v21579_v35  ;;  %v14570_v35 = vld [vmem:[%s24214_s3 + $0x628] sm:$0xff]  ;;  %v14585_v51 = vld [vmem:[%s24214_s3 + $0x6a0] sm:$0xff] }
 0x24d   : > { %19156 = vmatpush3.bf16.msra.mxu1 %v19153_v53  ;;  %19162 = vmatprep.subr.bf16.mxu0 %v19161_v55  ;;  %v19181_v60 = vpack.c.bf16 %v14570_v35, %v14569_v12  ;;  %v14586_v53 = vld [vmem:[%s24214_s3 + $0x6a8] sm:$0xff]  ;;  %v5682_v35 = vld [vmem:[#allocation2 + $0x59] sm:$0xf] }
 0x24e   : > { %19166 = vmatprep.subr.bf16.mxu1 %v19165_v1  ;;  %v19213_v5 = vpack.c.bf16 %v14586_v53, %v14585_v51  ;;  %v14609_v51 = vld [vmem:[%s24214_s3 + $0x760] sm:$0xff]  ;;  %v14610_v53 = vld [vmem:[%s24214_s3 + $0x768] sm:$0xff] }
 0x250   : > { %17290 = vmatmul.mubr.msk.f32.vlgmr.msra.gmra.mrb[108].mxu1 %vm1391_vm1, %v4623_v52  ;;  %19164 = vmatpush3.bf16.msra.mxu0 %v19161_v55  ;;  %v14589_v55 = vld [vmem:[%s24214_s3 + $0x6c0] sm:$0xff] }
 0x251   : > { %19168 = vmatpush3.bf16.msra.mxu1 %v19165_v1  ;;  %17311 = vmatprep.mubr.msk.f32.mxu1 %vm1391_vm1, %v21962_v13  ;;  %v14587_v1 = vld [vmem:[%s24214_s3 + $0x6b0] sm:$0xff]  ;;  %v19221_v63 = vpack.c.bf16 %v14590_v61, %v14589_v55  ;;  %v22061_v52 = vld [vmem:[#allocation2 + $0x61] sm:$0xff]  ;;  %v19261_v61 = vpack.c.bf16 %v14610_v53, %v14609_v51  ;;  %v6745_v51 = vld [vmem:[#allocation2 + $0x2a] sm:$0xf] }
 0x252   : > { %19174 = vmatprep.subr.bf16.mxu0 %v19173_v29  ;;  %19170 = vmatprep.subr.bf16.mxu1 %v19169_v45  ;;  %v19217_v49 = vpack.c.bf16 %v14588_v7, %v14587_v1  ;;  %v22133_v55 = vld [vmem:[#allocation2 + $0xb1] sm:$0xff]  ;;  %v14637_v1 = vld [vmem:[%s24214_s3 + $0x780] sm:$0xff]  ;;  %v14638_v7 = vld [vmem:[%s24214_s3 + $0x788] sm:$0xff] }
 0x253   : > { %17301 = vmatmul.mubr.msk.f32.vlgmr.msra.gmra.mrb[110].mxu0 %vm1391_vm1, %v4625_v11  ;;  %v19229_v11 = vpack.c.bf16 %v14594_v54, %v14593_v40  ;;  %v14640_v40 = vld [vmem:[%s24214_s3 + $0x798] sm:$0xff]  ;;  %v5692_v54 = vld [vmem:[#allocation2 + $0xa9] sm:$0xf]  ;;  %v14657_v53 = vld [vmem:[%s24214_s3 + $0x820] sm:$0xff] }
 0x254   : > { %19176 = vmatpush3.bf16.msra.mxu0 %v19173_v29  ;;  %17322 = vmatprep.mubr.msk.f32.mxu0 %vm1391_vm1, %v5673_v58  ;;  %v14592_v29 = vld [vmem:[%s24214_s3 + $0x6d8] sm:$0xff]  ;;  %v14597_v58 = vld [vmem:[%s24214_s3 + $0x700] sm:$0xff] }
 0x255   : > { %19172 = vmatpush3.bf16.msra.mxu1 %v19169_v45  ;;  %19178 = vmatprep.subr.bf16.mxu0 %v19177_v31  ;;  %v5680_v45 = vld [vmem:[#allocation2 + $0x49] sm:$0xf]  ;;  %v19225_v12 = vpack.c.bf16 %v14592_v29, %v14591_v20  ;;  %v19269_v20 = vpack.c.bf16 %v14638_v7, %v14637_v1  ;;  %v14661_v1 = vld [vmem:[%s24214_s3 + $0x840] sm:$0xff] }
 0x256   : > { %19182 = vmatprep.subr.bf16.mxu1 %v19181_v60  ;;  %v14662_v7 = vld [vmem:[%s24214_s3 + $0x848] sm:$0xff] }
 0x258   : > { %17312 = vmatmul.mubr.msk.f32.vlgmr.msra.gmra.mrb[110].mxu1 %vm1391_vm1, %v4627_v39  ;;  %19180 = vmatpush3.bf16.msra.mxu0 %v19177_v31  ;;  %v22065_v31 = vld [vmem:[#allocation2 + $0x71] sm:$0xff]  ;;  %v14602_v39 = vld [vmem:[%s24214_s3 + $0x728] sm:$0xff] }
 0x259   : > { %19184 = vmatpush3.bf16.msra.mxu1 %v19181_v60  ;;  %17333 = vmatprep.mubr.msk.f32.mxu1 %vm1391_vm1, %v21993_v24  ;;  %v14598_v60 = vld [vmem:[%s24214_s3 + $0x708] sm:$0xff] }
 0x25a   : > { %19190 = vmatprep.subr.bf16.mxu0 %v19189_v30  ;;  %19186 = vmatprep.subr.bf16.mxu1 %v19185_v0  ;;  %v19237_v28 = vpack.c.bf16 %v14598_v60, %v14597_v58  ;;  %v5694_v60 = vld [vmem:[#allocation2 + $0xb9] sm:$0xf] }
 0x25b   : > { %17323 = vmatmul.mubr.msk.f32.vlgmr.msra.gmra.mrb[100].mxu0 %vm1391_vm1, %v5674_v2  ;;  %v22099_v2 = vld [vmem:[#allocation2 + $0x91] sm:$0xff] }
 0x25c   : > { %19192 = vmatpush3.bf16.msra.mxu0 %v19189_v30  ;;  %17344 = vmatprep.mubr.msk.f32.mxu0 %vm1391_vm1, %v21997_v18  ;;  %v14599_v30 = vld [vmem:[%s24214_s3 + $0x710] sm:$0xff] }
 0x25d   : > { %19188 = vmatpush3.bf16.msra.mxu1 %v19185_v0  ;;  %19194 = vmatprep.subr.bf16.mxu0 %v19193_v4  ;;  %v14600_v0 = vld [vmem:[%s24214_s3 + $0x718] sm:$0xff] }
 0x25e   : > { %19198 = vmatprep.subr.bf16.mxu1 %v19197_v41  ;;  %v19241_v17 = vpack.c.bf16 %v14600_v0, %v14599_v30  ;;  %v14644_v30 = vld [vmem:[%s24214_s3 + $0x7b8] sm:$0xff] }
 0x260   : > { %17334 = vmatmul.mubr.msk.f32.vlgmr.msra.gmra.mrb[100].mxu1 %vm1391_vm1, %v5676_v15  ;;  %19196 = vmatpush3.bf16.msra.mxu0 %v19193_v4  ;;  %v5686_v4 = vld [vmem:[#allocation2 + $0x79] sm:$0xf]  ;;  %v5688_v15 = vld [vmem:[#allocation2 + $0x89] sm:$0xf] }
 0x261   : > { %19200 = vmatpush3.bf16.msra.mxu1 %v19197_v41  ;;  %17355 = vmatprep.mubr.msk.f32.mxu1 %vm1391_vm1, %v22027_v14  ;;  %v19245_v41 = vpack.c.bf16 %v14602_v39, %v14601_v21  ;;  %v14647_v21 = vld [vmem:[%s24214_s3 + $0x7d0] sm:$0xff]  ;;  %v14648_v39 = vld [vmem:[%s24214_s3 + $0x7d8] sm:$0xff] }
 0x262   : > { %19206 = vmatprep.subr.bf16.mxu0 %v19205_v47  ;;  %19202 = vmatprep.subr.bf16.mxu1 %v19201_v50 }
 0x263   : > { %17345 = vmatmul.mubr.msk.f32.vlgmr.msra.gmra.mrb[102].mxu0 %vm1391_vm1, %v5678_v46  ;;  %v19257_v46 = vpack.c.bf16 %v14608_v32, %v14607_v8  ;;  %v14655_v32 = vld [vmem:[%s24214_s3 + $0x810] sm:$0xff] }
 0x264   : > { %19208 = vmatpush3.bf16.msra.mxu0 %v19205_v47  ;;  %17366 = vmatprep.mubr.msk.f32.mxu0 %vm1391_vm1, %v22031_v56  ;;  %v19253_v47 = vpack.c.bf16 %v14606_v62, %v14605_v42  ;;  %v6743_v42 = vld [vmem:[#allocation2 + $0x1a] sm:$0xf] }
 0x265   : > { %19204 = vmatpush3.bf16.msra.mxu1 %v19201_v50  ;;  %19210 = vmatprep.subr.bf16.mxu0 %v19209_v57  ;;  %v19249_v50 = vpack.c.bf16 %v14604_v36, %v14603_v44  ;;  %v14653_v44 = vld [vmem:[%s24214_s3 + $0x800] sm:$0xff]  ;;  %v14654_v36 = vld [vmem:[%s24214_s3 + $0x808] sm:$0xff] }
 0x266   : > { %19214 = vmatprep.subr.bf16.mxu1 %v19213_v5 }
 0x268   : > { %17356 = vmatmul.mubr.msk.f32.vlgmr.msra.gmra.mrb[102].mxu1 %vm1391_vm1, %v5680_v45  ;;  %19212 = vmatpush3.bf16.msra.mxu0 %v19209_v57  ;;  %v22129_v57 = vld [vmem:[#allocation2 + $0xa1] sm:$0xff]  ;;  %v14639_v45 = vld [vmem:[%s24214_s3 + $0x790] sm:$0xff] }
 0x269   : > { %19216 = vmatpush3.bf16.msra.mxu1 %v19213_v5  ;;  %17377 = vmatprep.mubr.msk.f32.mxu1 %vm1391_vm1, %v22061_v52  ;;  %v5690_v5 = vld [vmem:[#allocation2 + $0x99] sm:$0xf]  ;;  %v19273_v58 = vpack.c.bf16 %v14640_v40, %v14639_v45  ;;  %v6749_v40 = vld [vmem:[#allocation2 + $0x4a] sm:$0xf] }
 0x26a   : > { %19222 = vmatprep.subr.bf16.mxu0 %v19221_v63  ;;  %19218 = vmatprep.subr.bf16.mxu1 %v19217_v49  ;;  %v14664_v45 = vld [vmem:[%s24214_s3 + $0x858] sm:$0xff] }
 0x26b   : > { %17367 = vmatmul.mubr.msk.f32.vlgmr.msra.gmra.mrb[104].mxu0 %vm1391_vm1, %v5682_v35  ;;  %v14642_v35 = vld [vmem:[%s24214_s3 + $0x7a8] sm:$0xff] }
 0x26c   : > { %19224 = vmatpush3.bf16.msra.mxu0 %v19221_v63  ;;  %17388 = vmatprep.mubr.msk.f32.mxu0 %vm1391_vm1, %v22065_v31  ;;  %v14611_v63 = vld [vmem:[%s24214_s3 + $0x770] sm:$0xff] }
 0x26d   : > { %19220 = vmatpush3.bf16.msra.mxu1 %v19217_v49  ;;  %19226 = vmatprep.subr.bf16.mxu0 %v19225_v12  ;;  %v14612_v49 = vld [vmem:[%s24214_s3 + $0x778] sm:$0xff] }
 0x26e   : > { %19230 = vmatprep.subr.bf16.mxu1 %v19229_v11  ;;  %v19265_v29 = vpack.c.bf16 %v14612_v49, %v14611_v63  ;;  %v14659_v63 = vld [vmem:[%s24214_s3 + $0x830] sm:$0xff]  ;;  %v19317_v49 = vpack.c.bf16 %v14662_v7, %v14661_v1  ;;  %v14712_v1 = vld [vmem:[%s24214_s3 + $0x918] sm:$0xff]  ;;  %v6761_v7 = vld [vmem:[#allocation2 + $0xaa] sm:$0xf] }
 0x270   : > { %17378 = vmatmul.mubr.msk.f32.vlgmr.msra.gmra.mrb[104].mxu1 %vm1391_vm1, %v5684_v33  ;;  %19228 = vmatpush3.bf16.msra.mxu0 %v19225_v12  ;;  %v14641_v12 = vld [vmem:[%s24214_s3 + $0x7a0] sm:$0xff] }
 0x271   : > { %19232 = vmatpush3.bf16.msra.mxu1 %v19229_v11  ;;  %17399 = vmatprep.mubr.msk.f32.mxu1 %vm1391_vm1, %v22095_v37  ;;  %v22163_v11 = vld [vmem:[#allocation2 + $0xc1] sm:$0xff]  ;;  %v19277_v22 = vpack.c.bf16 %v14642_v35, %v14641_v12  ;;  %v6751_v35 = vld [vmem:[#allocation2 + $0x5a] sm:$0xf] }
 0x272   : > { %19238 = vmatprep.subr.bf16.mxu0 %v19237_v28  ;;  %19234 = vmatprep.subr.bf16.mxu1 %v19233_v43 }
 0x273   : > { %17389 = vmatmul.mubr.msk.f32.vlgmr.msra.gmra.mrb[106].mxu0 %vm1391_vm1, %v5686_v4  ;;  %v14649_v4 = vld [vmem:[%s24214_s3 + $0x7e0] sm:$0xff] }
 0x274   : > { %19240 = vmatpush3.bf16.msra.mxu0 %v19237_v28  ;;  %17410 = vmatprep.mubr.msk.f32.mxu0 %vm1391_vm1, %v22099_v2  ;;  %v14646_v28 = vld [vmem:[%s24214_s3 + $0x7c8] sm:$0xff] }
 0x275   : > { %19236 = vmatpush3.bf16.msra.mxu1 %v19233_v43  ;;  %19242 = vmatprep.subr.bf16.mxu0 %v19241_v17  ;;  %v14643_v43 = vld [vmem:[%s24214_s3 + $0x7b0] sm:$0xff]  ;;  %v19285_v0 = vpack.c.bf16 %v14646_v28, %v14645_v23 }
 0x276   : > { %19246 = vmatprep.subr.bf16.mxu1 %v19245_v41  ;;  %v19281_v33 = vpack.c.bf16 %v14644_v30, %v14643_v43  ;;  %v14667_v23 = vld [vmem:[%s24214_s3 + $0x870] sm:$0xff] }
 0x277   : > { %v14671_v30 = vld [vmem:[%s24214_s3 + $0x890] sm:$0xff] }
 0x278   : > { %17400 = vmatmul.mubr.msk.f32.vlgmr.msra.gmra.mrb[106].mxu1 %vm1391_vm1, %v5688_v15  ;;  %19244 = vmatpush3.bf16.msra.mxu0 %v19241_v17  ;;  %v5696_v17 = vld [vmem:[#allocation2 + $0xc9] sm:$0xf]  ;;  %v14656_v15 = vld [vmem:[%s24214_s3 + $0x818] sm:$0xff] }
 0x279   : > { %19248 = vmatpush3.bf16.msra.mxu1 %v19245_v41  ;;  %17421 = vmatprep.mubr.msk.f32.mxu1 %vm1391_vm1, %v22129_v57  ;;  %v19289_v41 = vpack.c.bf16 %v14648_v39, %v14647_v21  ;;  %v14673_v21 = vld [vmem:[%s24214_s3 + $0x8a0] sm:$0xff] }
 0x27a   : > { %19254 = vmatprep.subr.bf16.mxu0 %v19253_v47  ;;  %19250 = vmatprep.subr.bf16.mxu1 %v19249_v50 }
 0x27b   : > { %17411 = vmatmul.mubr.msk.f32.vlgmr.msra.gmra.mrb[108].mxu0 %vm1391_vm1, %v5690_v5  ;;  %v6747_v5 = vld [vmem:[#allocation2 + $0x3a] sm:$0xf] }
 0x27c   : > { %19256 = vmatpush3.bf16.msra.mxu0 %v19253_v47  ;;  %17432 = vmatprep.mubr.msk.f32.mxu0 %vm1391_vm1, %v22133_v55  ;;  %v14651_v47 = vld [vmem:[%s24214_s3 + $0x7f0] sm:$0xff] }
 0x27d   : > { %19252 = vmatpush3.bf16.msra.mxu1 %v19249_v50  ;;  %19258 = vmatprep.subr.bf16.mxu0 %v19257_v46  ;;  %v19301_v50 = vpack.c.bf16 %v14654_v36, %v14653_v44  ;;  %v14679_v36 = vld [vmem:[%s24214_s3 + $0x8d0] sm:$0xff] }
 0x27e   : > { %19262 = vmatprep.subr.bf16.mxu1 %v19261_v61 }
 0x280   : > { %17422 = vmatmul.mubr.msk.f32.vlgmr.msra.gmra.mrb[108].mxu1 %vm1391_vm1, %v5692_v54  ;;  %19260 = vmatpush3.bf16.msra.mxu0 %v19257_v46  ;;  %v19305_v46 = vpack.c.bf16 %v14656_v15, %v14655_v32  ;;  %v14665_v54 = vld [vmem:[%s24214_s3 + $0x860] sm:$0xff]  ;;  %v6759_v32 = vld [vmem:[#allocation2 + $0x9a] sm:$0xf] }
 0x281   : > { %19264 = vmatpush3.bf16.msra.mxu1 %v19261_v61  ;;  %17443 = vmatprep.mubr.msk.f32.mxu1 %vm1391_vm1, %v22163_v11 }
 0x282   : > { %19270 = vmatprep.subr.bf16.mxu0 %v19269_v20  ;;  %19266 = vmatprep.subr.bf16.mxu1 %v19265_v29 }
 0x283   : > { %17433 = vmatmul.mubr.msk.f32.vlgmr.msra.gmra.mrb[110].mxu0 %vm1391_vm1, %v5694_v60  ;;  %v14669_v60 = vld [vmem:[%s24214_s3 + $0x880] sm:$0xff] }
 0x284   : > { %19272 = vmatpush3.bf16.msra.mxu0 %v19269_v20  ;;  %17454 = vmatprep.mubr.msk.f32.mxu0 %vm1391_vm1, %v21610_v38  ;;  %v14650_v38 = vld [vmem:[%s24214_s3 + $0x7e8] sm:$0xff] }
 0x285   : > { %19268 = vmatpush3.bf16.msra.mxu1 %v19265_v29  ;;  %19274 = vmatprep.subr.bf16.mxu0 %v19273_v58  ;;  %v19293_v62 = vpack.c.bf16 %v14650_v38, %v14649_v4  ;;  %v14663_v29 = vld [vmem:[%s24214_s3 + $0x850] sm:$0xff]  ;;  %v14677_v38 = vld [vmem:[%s24214_s3 + $0x8c0] sm:$0xff] }
 0x286   : > { %19278 = vmatprep.subr.bf16.mxu1 %v19277_v22  ;;  %v19321_v12 = vpack.c.bf16 %v14664_v45, %v14663_v29  ;;  %v7811_v29 = vld [vmem:[#allocation2 + $0x20] sm:$0xff] }
 0x288   : > { %17444 = vmatmul.mubr.msk.f32.vlgmr.msra.gmra.mrb[110].mxu1 %vm1391_vm1, %v5696_v17  ;;  %19276 = vmatpush3.bf16.msra.mxu0 %v19273_v58  ;;  %v6755_v17 = vld [vmem:[#allocation2 + $0x7a] sm:$0xf] }
 0x289   : > { %19280 = vmatpush3.bf16.msra.mxu1 %v19277_v22  ;;  %17465 = vmatprep.mubr.msk.f32.mxu1 %vm1391_vm1, %v21621_v59  ;;  %v14652_v59 = vld [vmem:[%s24214_s3 + $0x7f8] sm:$0xff]  ;;  %v14670_v22 = vld [vmem:[%s24214_s3 + $0x888] sm:$0xff] }
 0x28a   : > { %19286 = vmatprep.subr.bf16.mxu0 %v19285_v0  ;;  %19282 = vmatprep.subr.bf16.mxu1 %v19281_v33  ;;  %v19297_v8 = vpack.c.bf16 %v14652_v59, %v14651_v47  ;;  %v19333_v28 = vpack.c.bf16 %v14670_v22, %v14669_v60  ;;  %v14680_v47 = vld [vmem:[%s24214_s3 + $0x8d8] sm:$0xff]  ;;  %v6757_v59 = vld [vmem:[#allocation2 + $0x8a] sm:$0xf]  ;;  %v14719_v60 = vld [vmem:[%s24214_s3 + $0x950] sm:$0xff] }
 0x28b   : > { %17455 = vmatmul.mubr.msk.f32.vlgmr.msra.gmra.mrb[100].mxu0 %vm1391_vm1, %v6743_v42  ;;  %v14675_v42 = vld [vmem:[%s24214_s3 + $0x8b0] sm:$0xff]  ;;  %v14720_v22 = vld [vmem:[%s24214_s3 + $0x958] sm:$0xff] }
 0x28c   : > { %19288 = vmatpush3.bf16.msra.mxu0 %v19285_v0  ;;  %17476 = vmatprep.mubr.msk.f32.mxu0 %vm1391_vm1, %v21644_v10  ;;  %v14658_v10 = vld [vmem:[%s24214_s3 + $0x828] sm:$0xff]  ;;  %v14672_v0 = vld [vmem:[%s24214_s3 + $0x898] sm:$0xff] }
 0x28d   : > { %19284 = vmatpush3.bf16.msra.mxu1 %v19281_v33  ;;  %19290 = vmatprep.subr.bf16.mxu0 %v19289_v41  ;;  %v19309_v61 = vpack.c.bf16 %v14658_v10, %v14657_v53  ;;  %v6753_v33 = vld [vmem:[#allocation2 + $0x6a] sm:$0xf]  ;;  %v19337_v39 = vpack.c.bf16 %v14672_v0, %v14671_v30  ;;  %v14683_v10 = vld [vmem:[%s24214_s3 + $0x8f0] sm:$0xff]  ;;  %v19385_v30 = vpack.c.bf16 %v14720_v22, %v14719_v60  ;;  %v14744_v60 = vld [vmem:[%s24214_s3 + $0xa18] sm:$0xff] }
 0x28e   : > { %19294 = vmatprep.subr.bf16.mxu1 %v19293_v62  ;;  %v14710_v53 = vld [vmem:[%s24214_s3 + $0x908] sm:$0xff]  ;;  %v7822_v22 = vld [vmem:[#allocation2 + $0x78] sm:$0xf] }
 0x28f   : > { %v7812_v0 = vld [vmem:[#allocation2 + $0x28] sm:$0xf] }
 0x290   : > { %17466 = vmatmul.mubr.msk.f32.vlgmr.msra.gmra.mrb[100].mxu1 %vm1391_vm1, %v6745_v51  ;;  %19292 = vmatpush3.bf16.msra.mxu0 %v19289_v41  ;;  %v14678_v41 = vld [vmem:[%s24214_s3 + $0x8c8] sm:$0xff]  ;;  %v14709_v51 = vld [vmem:[%s24214_s3 + $0x900] sm:$0xff] }
 0x291   : > { %19296 = vmatpush3.bf16.msra.mxu1 %v19293_v62  ;;  %17487 = vmatprep.mubr.msk.f32.mxu1 %vm1391_vm1, %v21655_v19  ;;  %v14660_v19 = vld [vmem:[%s24214_s3 + $0x838] sm:$0xff]  ;;  %v19349_v62 = vpack.c.bf16 %v14678_v41, %v14677_v38 }
 0x292   : > { %19302 = vmatprep.subr.bf16.mxu0 %v19301_v50  ;;  %19298 = vmatprep.subr.bf16.mxu1 %v19297_v8  ;;  %v19313_v20 = vpack.c.bf16 %v14660_v19, %v14659_v63  ;;  %v14713_v63 = vld [vmem:[%s24214_s3 + $0x920] sm:$0xff] }
 0x293   : > { %17477 = vmatmul.mubr.msk.f32.vlgmr.msra.gmra.mrb[102].mxu0 %vm1391_vm1, %v6747_v5  ;;  %v22345_v19 = vld [vmem:[#allocation2 + $0xc2] sm:$0xff] }
 0x294   : > { %19304 = vmatpush3.bf16.msra.mxu0 %v19301_v50  ;;  %17498 = vmatprep.mubr.msk.f32.mxu0 %vm1391_vm1, %v21678_v25  ;;  %v14666_v25 = vld [vmem:[%s24214_s3 + $0x868] sm:$0xff]  ;;  %v14681_v50 = vld [vmem:[%s24214_s3 + $0x8e0] sm:$0xff] }
 0x295   : > { %19300 = vmatpush3.bf16.msra.mxu1 %v19297_v8  ;;  %19306 = vmatprep.subr.bf16.mxu0 %v19305_v46  ;;  %v19325_v58 = vpack.c.bf16 %v14666_v25, %v14665_v54  ;;  %v19353_v8 = vpack.c.bf16 %v14680_v47, %v14679_v36  ;;  %v14718_v54 = vld [vmem:[%s24214_s3 + $0x948] sm:$0xff]  ;;  %v14715_v25 = vld [vmem:[%s24214_s3 + $0x930] sm:$0xff] }
 0x296   : > { %19310 = vmatprep.subr.bf16.mxu1 %v19309_v61  ;;  %v14730_v36 = vld [vmem:[%s24214_s3 + $0x9a8] sm:$0xff]  ;;  %v7817_v47 = vld [vmem:[#allocation2 + $0x50] sm:$0xff] }
 0x298   : > { %17488 = vmatmul.mubr.msk.f32.vlgmr.msra.gmra.mrb[102].mxu1 %vm1391_vm1, %v6749_v40  ;;  %19308 = vmatpush3.bf16.msra.mxu0 %v19305_v46  ;;  %v19365_v46 = vpack.c.bf16 %v14710_v53, %v14709_v51  ;;  %v14717_v40 = vld [vmem:[%s24214_s3 + $0x940] sm:$0xff]  ;;  %v14731_v51 = vld [vmem:[%s24214_s3 + $0x9b0] sm:$0xff]  ;;  %v14732_v53 = vld [vmem:[%s24214_s3 + $0x9b8] sm:$0xff] }
 0x299   : > { %19312 = vmatpush3.bf16.msra.mxu1 %v19309_v61  ;;  %17509 = vmatprep.mubr.msk.f32.mxu1 %vm1391_vm1, %v21689_v26  ;;  %v14668_v26 = vld [vmem:[%s24214_s3 + $0x878] sm:$0xff]  ;;  %v14711_v61 = vld [vmem:[%s24214_s3 + $0x910] sm:$0xff] }
 0x29a   : > { %19318 = vmatprep.subr.bf16.mxu0 %v19317_v49  ;;  %19314 = vmatprep.subr.bf16.mxu1 %v19313_v20  ;;  %v19329_v43 = vpack.c.bf16 %v14668_v26, %v14667_v23  ;;  %v6765_v23 = vld [vmem:[#allocation2 + $0xca] sm:$0xf]  ;;  %v14721_v26 = vld [vmem:[%s24214_s3 + $0x960] sm:$0xff] }
 0x29b   : > { %17499 = vmatmul.mubr.msk.f32.vlgmr.msra.gmra.mrb[104].mxu0 %vm1391_vm1, %v6751_v35  ;;  %v19381_v35 = vpack.c.bf16 %v14718_v54, %v14717_v40  ;;  %v14742_v40 = vld [vmem:[%s24214_s3 + $0xa08] sm:$0xff]  ;;  %v14739_v54 = vld [vmem:[%s24214_s3 + $0x9f0] sm:$0xff] }
 0x29c   : > { %19320 = vmatpush3.bf16.msra.mxu0 %v19317_v49  ;;  %17520 = vmatprep.mubr.msk.f32.mxu0 %vm1391_vm1, %v21712_v48  ;;  %v14674_v48 = vld [vmem:[%s24214_s3 + $0x8a8] sm:$0xff]  ;;  %v19369_v49 = vpack.c.bf16 %v14712_v1, %v14711_v61  ;;  %v7818_v61 = vld [vmem:[#allocation2 + $0x58] sm:$0xf]  ;;  %v14737_v1 = vld [vmem:[%s24214_s3 + $0x9e0] sm:$0xff] }
 0x29d   : > { %19316 = vmatpush3.bf16.msra.mxu1 %v19313_v20  ;;  %19322 = vmatprep.subr.bf16.mxu0 %v19321_v12  ;;  %v19341_v4 = vpack.c.bf16 %v14674_v48, %v14673_v21  ;;  %v6763_v20 = vld [vmem:[#allocation2 + $0xba] sm:$0xf]  ;;  %v14725_v48 = vld [vmem:[%s24214_s3 + $0x980] sm:$0xff] }
 0x29e   : > { %19326 = vmatprep.subr.bf16.mxu1 %v19325_v58 }
 0x2a0   : > { %17510 = vmatmul.mubr.msk.f32.vlgmr.msra.gmra.mrb[104].mxu1 %vm1391_vm1, %v6753_v33  ;;  %19324 = vmatpush3.bf16.msra.mxu0 %v19321_v12  ;;  %v14716_v12 = vld [vmem:[%s24214_s3 + $0x938] sm:$0xff]  ;;  %v7815_v33 = vld [vmem:[#allocation2 + $0x40] sm:$0xff] }
 0x2a1   : > { %19328 = vmatpush3.bf16.msra.mxu1 %v19325_v58  ;;  %17531 = vmatprep.mubr.msk.f32.mxu1 %vm1391_vm1, %v21723_v16  ;;  %v14676_v16 = vld [vmem:[%s24214_s3 + $0x8b8] sm:$0xff]  ;;  %v19377_v58 = vpack.c.bf16 %v14716_v12, %v14715_v25 }
 0x2a2   : > { %19334 = vmatprep.subr.bf16.mxu0 %v19333_v28  ;;  %19330 = vmatprep.subr.bf16.mxu1 %v19329_v43  ;;  %v19345_v44 = vpack.c.bf16 %v14676_v16, %v14675_v42  ;;  %v14727_v42 = vld [vmem:[%s24214_s3 + $0x990] sm:$0xff]  ;;  %v14728_v16 = vld [vmem:[%s24214_s3 + $0x998] sm:$0xff] }
 0x2a3   : > { %17521 = vmatmul.mubr.msk.f32.vlgmr.msra.gmra.mrb[106].mxu0 %vm1391_vm1, %v6755_v17  ;;  %v14723_v17 = vld [vmem:[%s24214_s3 + $0x970] sm:$0xff]  ;;  %v14740_v25 = vld [vmem:[%s24214_s3 + $0x9f8] sm:$0xff] }
 0x2a4   : > { %19336 = vmatpush3.bf16.msra.mxu0 %v19333_v28  ;;  %17542 = vmatprep.mubr.msk.f32.mxu0 %vm1391_vm1, %v21746_v9  ;;  %v14682_v9 = vld [vmem:[%s24214_s3 + $0x8e8] sm:$0xff] }
 0x2a5   : > { %19332 = vmatpush3.bf16.msra.mxu1 %v19329_v43  ;;  %19338 = vmatprep.subr.bf16.mxu0 %v19337_v39  ;;  %v19357_v15 = vpack.c.bf16 %v14682_v9, %v14681_v50  ;;  %v14722_v28 = vld [vmem:[%s24214_s3 + $0x968] sm:$0xff]  ;;  %v7813_v43 = vld [vmem:[#allocation2 + $0x30] sm:$0xff]  ;;  %v7819_v9 = vld [vmem:[#allocation2 + $0x60] sm:$0xff] }
 0x2a6   : > { %19342 = vmatprep.subr.bf16.mxu1 %v19341_v4  ;;  %v19389_v21 = vpack.c.bf16 %v14722_v28, %v14721_v26  ;;  %v7816_v50 = vld [vmem:[#allocation2 + $0x48] sm:$0xf]  ;;  %v7825_v28 = vld [vmem:[#allocation2 + $0x90] sm:$0xff] }
 0x2a7   : > { %v14746_v26 = vld [vmem:[%s24214_s3 + $0xa28] sm:$0xff] }
 0x2a8   : > { %17532 = vmatmul.mubr.msk.f32.vlgmr.msra.gmra.mrb[106].mxu1 %vm1391_vm1, %v6757_v59  ;;  %19340 = vmatpush3.bf16.msra.mxu0 %v19337_v39  ;;  %v14726_v39 = vld [vmem:[%s24214_s3 + $0x988] sm:$0xff]  ;;  %v19401_v59 = vpack.c.bf16 %v14728_v16, %v14727_v42  ;;  %v14752_v42 = vld [vmem:[%s24214_s3 + $0xa58] sm:$0xff] }
 0x2a9   : > { %19344 = vmatpush3.bf16.msra.mxu1 %v19341_v4  ;;  %17553 = vmatprep.mubr.msk.f32.mxu1 %vm1391_vm1, %v21757_v27  ;;  %v14684_v27 = vld [vmem:[%s24214_s3 + $0x8f8] sm:$0xff]  ;;  %v19397_v38 = vpack.c.bf16 %v14726_v39, %v14725_v48  ;;  %v14750_v48 = vld [vmem:[%s24214_s3 + $0xa48] sm:$0xff]  ;;  %v14747_v39 = vld [vmem:[%s24214_s3 + $0xa30] sm:$0xff] }
 0x2aa   : > { %19350 = vmatprep.subr.bf16.mxu0 %v19349_v62  ;;  %19346 = vmatprep.subr.bf16.mxu1 %v19345_v44  ;;  %v19361_v5 = vpack.c.bf16 %v14684_v27, %v14683_v10  ;;  %v14724_v4 = vld [vmem:[%s24214_s3 + $0x978] sm:$0xff]  ;;  %v19409_v27 = vpack.c.bf16 %v14732_v53, %v14731_v51 }
 0x2ab   : > { %17543 = vmatmul.mubr.msk.f32.vlgmr.msra.gmra.mrb[108].mxu0 %vm1391_vm1, %v6759_v32  ;;  %v19393_v41 = vpack.c.bf16 %v14724_v4, %v14723_v17  ;;  %v14733_v32 = vld [vmem:[%s24214_s3 + $0x9c0] sm:$0xff]  ;;  %v14748_v17 = vld [vmem:[%s24214_s3 + $0xa38] sm:$0xff] }
 0x2ac   : > { %19352 = vmatpush3.bf16.msra.mxu0 %v19349_v62  ;;  %17564 = vmatprep.mubr.msk.f32.mxu0 %vm1391_vm1, %v21780_v34  ;;  %v14714_v34 = vld [vmem:[%s24214_s3 + $0x928] sm:$0xff]  ;;  %v7814_v62 = vld [vmem:[#allocation2 + $0x38] sm:$0xf] }
 0x2ad   : > { %19348 = vmatpush3.bf16.msra.mxu1 %v19345_v44  ;;  %19354 = vmatprep.subr.bf16.mxu0 %v19353_v8  ;;  %v19373_v45 = vpack.c.bf16 %v14714_v34, %v14713_v63  ;;  %v14729_v44 = vld [vmem:[%s24214_s3 + $0x9a0] sm:$0xff]  ;;  %v7821_v63 = vld [vmem:[#allocation2 + $0x70] sm:$0xff]  ;;  %v7826_v16 = vld [vmem:[#allocation2 + $0x98] sm:$0xf] }
 0x2ae   : > { %19358 = vmatprep.subr.bf16.mxu1 %v19357_v15 }
 0x2b0   : > { %17554 = vmatmul.mubr.msk.f32.vlgmr.msra.gmra.mrb[108].mxu1 %vm1391_vm1, %v6761_v7  ;;  %19356 = vmatpush3.bf16.msra.mxu0 %v19353_v8  ;;  %v19405_v8 = vpack.c.bf16 %v14730_v36, %v14729_v44  ;;  %v14738_v7 = vld [vmem:[%s24214_s3 + $0x9e8] sm:$0xff]  ;;  %v7829_v36 = vld [vmem:[#allocation2 + $0xb0] sm:$0xff] }
 0x2b1   : > { %19360 = vmatpush3.bf16.msra.mxu1 %v19357_v15  ;;  %17575 = vmatprep.mubr.msk.f32.mxu1 %vm1391_vm1, %v22345_v19  ;;  %v14734_v15 = vld [vmem:[%s24214_s3 + $0x9c8] sm:$0xff] }
 0x2b2   : > { %19366 = vmatprep.subr.bf16.mxu0 %v19365_v46  ;;  %19362 = vmatprep.subr.bf16.mxu1 %v19361_v5  ;;  %v19413_v10 = vpack.c.bf16 %v14734_v15, %v14733_v32  ;;  %v14754_v44 = vld [vmem:[%s24214_s3 + $0xa68] sm:$0xff]  ;;  %v14755_v32 = vld [vmem:[%s24214_s3 + $0xa70] sm:$0xff]  ;;  %v14756_v15 = vld [vmem:[%s24214_s3 + $0xa78] sm:$0xff] }
 0x2b3   : > { %17565 = vmatmul.mubr.msk.f32.vlgmr.msra.gmra.mrb[110].mxu0 %vm1391_vm1, %v6763_v20  ;;  %v7823_v20 = vld [vmem:[#allocation2 + $0x80] sm:$0xff]  ;;  %v19457_v53 = vpack.c.bf16 %v14756_v15, %v14755_v32  ;;  %v14814_v15 = vld [vmem:[%s24214_s3 + $0xb88] sm:$0xff] }
 0x2b4   : > { %19368 = vmatpush3.bf16.msra.mxu0 %v19365_v46  ;;  %17586 = vmatprep.mubr.msk.f32.mxu0 %vm1391_vm1, %v7811_v29  ;;  %v14735_v46 = vld [vmem:[%s24214_s3 + $0x9d0] sm:$0xff]  ;;  %v19421_v29 = vpack.c.bf16 %v14738_v7, %v14737_v1  ;;  %v7832_v7 = vld [vmem:[#allocation2 + $0xc8] sm:$0xf]  ;;  %v14813_v32 = vld [vmem:[%s24214_s3 + $0xb80] sm:$0xff] }
 0x2b5   : > { %19364 = vmatpush3.bf16.msra.mxu1 %v19361_v5  ;;  %19370 = vmatprep.subr.bf16.mxu0 %v19369_v49  ;;  %v14736_v5 = vld [vmem:[%s24214_s3 + $0x9d8] sm:$0xff] }
 0x2b6   : > { %19374 = vmatprep.subr.bf16.mxu1 %v19373_v45  ;;  %v19417_v34 = vpack.c.bf16 %v14736_v5, %v14735_v46  ;;  %v7830_v46 = vld [vmem:[#allocation2 + $0xb8] sm:$0xf]  ;;  %v14785_v5 = vld [vmem:[%s24214_s3 + $0xaa0] sm:$0xff] }
 0x2b8   : > { %17576 = vmatmul.mubr.msk.f32.vlgmr.msra.gmra.mrb[110].mxu1 %vm1391_vm1, %v6765_v23  ;;  %19372 = vmatpush3.bf16.msra.mxu0 %v19369_v49  ;;  %v7820_v49 = vld [vmem:[#allocation2 + $0x68] sm:$0xf]  ;;  %v14745_v23 = vld [vmem:[%s24214_s3 + $0xa20] sm:$0xff] }
 0x2b9   : > { %19376 = vmatpush3.bf16.msra.mxu1 %v19373_v45  ;;  %17597 = vmatprep.mubr.msk.f32.mxu1 %vm1391_vm1, %v7813_v43  ;;  %v14741_v45 = vld [vmem:[%s24214_s3 + $0xa00] sm:$0xff] }
 0x2ba   : > { %19382 = vmatprep.subr.bf16.mxu0 %v19381_v35  ;;  %19378 = vmatprep.subr.bf16.mxu1 %v19377_v58  ;;  %v19429_v12 = vpack.c.bf16 %v14742_v40, %v14741_v45 }
 0x2bb   : > { %17587 = vmatmul.mubr.msk.f32.vlgmr.msra.gmra.mrb[100].mxu0 %vm1391_vm1, %v7812_v0  ;;  %v7827_v0 = vld [vmem:[#allocation2 + $0xa0] sm:$0xff] }
 0x2bc   : > { %19384 = vmatpush3.bf16.msra.mxu0 %v19381_v35  ;;  %17608 = vmatprep.mubr.msk.f32.mxu0 %vm1391_vm1, %v7815_v33  ;;  %v19425_v35 = vpack.c.bf16 %v14740_v25, %v14739_v54  ;;  %v19437_v33 = vpack.c.bf16 %v14746_v26, %v14745_v23  ;;  %v14791_v54 = vld [vmem:[%s24214_s3 + $0xad0] sm:$0xff]  ;;  %v14792_v25 = vld [vmem:[%s24214_s3 + $0xad8] sm:$0xff]  ;;  %v14797_v23 = vld [vmem:[%s24214_s3 + $0xb00] sm:$0xff] }
 0x2bd   : > { %19380 = vmatpush3.bf16.msra.mxu1 %v19377_v58  ;;  %19386 = vmatprep.subr.bf16.mxu0 %v19385_v30  ;;  %v14743_v58 = vld [vmem:[%s24214_s3 + $0xa10] sm:$0xff]  ;;  %v14798_v26 = vld [vmem:[%s24214_s3 + $0xb08] sm:$0xff] }
 0x2be   : > { %19390 = vmatprep.subr.bf16.mxu1 %v19389_v21  ;;  %v19433_v43 = vpack.c.bf16 %v14744_v60, %v14743_v58  ;;  %v19481_v58 = vpack.c.bf16 %v14792_v25, %v14791_v54  ;;  %v8881_v60 = vld [vmem:[#allocation2 + $0x29] sm:$0xf]  ;;  %v8895_v54 = vld [vmem:[#allocation2 + $0x99] sm:$0xf]  ;;  %v14825_v25 = vld [vmem:[%s24214_s3 + $0xbe0] sm:$0xff] }
 0x2c0   : > { %17598 = vmatmul.mubr.msk.f32.vlgmr.msra.gmra.mrb[100].mxu1 %vm1391_vm1, %v7814_v62  ;;  %19388 = vmatpush3.bf16.msra.mxu0 %v19385_v30  ;;  %v7824_v30 = vld [vmem:[#allocation2 + $0x88] sm:$0xf]  ;;  %v14753_v62 = vld [vmem:[%s24214_s3 + $0xa60] sm:$0xff] }
 0x2c1   : > { %19392 = vmatpush3.bf16.msra.mxu1 %v19389_v21  ;;  %17619 = vmatprep.mubr.msk.f32.mxu1 %vm1391_vm1, %v7817_v47  ;;  %v14749_v21 = vld [vmem:[%s24214_s3 + $0xa40] sm:$0xff] }
 0x2c2   : > { %19398 = vmatprep.subr.bf16.mxu0 %v19397_v38  ;;  %19394 = vmatprep.subr.bf16.mxu1 %v19393_v41  ;;  %v19445_v4 = vpack.c.bf16 %v14750_v48, %v14749_v21  ;;  %v8883_v21 = vld [vmem:[#allocation2 + $0x39] sm:$0xf]  ;;  %v14801_v48 = vld [vmem:[%s24214_s3 + $0xb20] sm:$0xff] }
 0x2c3   : > { %17609 = vmatmul.mubr.msk.f32.vlgmr.msra.gmra.mrb[102].mxu0 %vm1391_vm1, %v7816_v50  ;;  %v19453_v50 = vpack.c.bf16 %v14754_v44, %v14753_v62  ;;  %v14807_v44 = vld [vmem:[%s24214_s3 + $0xb50] sm:$0xff] }
 0x2c4   : > { %19400 = vmatpush3.bf16.msra.mxu0 %v19397_v38  ;;  %17630 = vmatprep.mubr.msk.f32.mxu0 %vm1391_vm1, %v7819_v9  ;;  %v19441_v38 = vpack.c.bf16 %v14748_v17, %v14747_v39  ;;  %v14781_v9 = vld [vmem:[%s24214_s3 + $0xa80] sm:$0xff]  ;;  %v8885_v17 = vld [vmem:[#allocation2 + $0x49] sm:$0xf] }
 0x2c5   : > { %19396 = vmatpush3.bf16.msra.mxu1 %v19393_v41  ;;  %19402 = vmatprep.subr.bf16.mxu0 %v19401_v59  ;;  %v14751_v41 = vld [vmem:[%s24214_s3 + $0xa50] sm:$0xff] }
 0x2c6   : > { %19406 = vmatprep.subr.bf16.mxu1 %v19405_v8  ;;  %v19449_v47 = vpack.c.bf16 %v14752_v42, %v14751_v41  ;;  %v14806_v41 = vld [vmem:[%s24214_s3 + $0xb48] sm:$0xff]  ;;  %v14803_v42 = vld [vmem:[%s24214_s3 + $0xb30] sm:$0xff] }
 0x2c8   : > { %17620 = vmatmul.mubr.msk.f32.vlgmr.msra.gmra.mrb[102].mxu1 %vm1391_vm1, %v7818_v61  ;;  %19404 = vmatpush3.bf16.msra.mxu0 %v19401_v59  ;;  %v7828_v59 = vld [vmem:[#allocation2 + $0xa8] sm:$0xf]  ;;  %v7833_v61 = vld [vmem:[#allocation2 + $0xd0] sm:$0xff] }
 0x2c9   : > { %19408 = vmatpush3.bf16.msra.mxu1 %v19405_v8  ;;  %17641 = vmatprep.mubr.msk.f32.mxu1 %vm1391_vm1, %v7821_v63  ;;  %v14782_v8 = vld [vmem:[%s24214_s3 + $0xa88] sm:$0xff] }
 0x2ca   : > { %19414 = vmatprep.subr.bf16.mxu0 %v19413_v10  ;;  %19410 = vmatprep.subr.bf16.mxu1 %v19409_v27  ;;  %v19461_v51 = vpack.c.bf16 %v14782_v8, %v14781_v9  ;;  %v8889_v9 = vld [vmem:[#allocation2 + $0x69] sm:$0xf] }
 0x2cb   : > { %17631 = vmatmul.mubr.msk.f32.vlgmr.msra.gmra.mrb[104].mxu0 %vm1391_vm1, %v7820_v49  ;;  %v14790_v49 = vld [vmem:[%s24214_s3 + $0xac8] sm:$0xff] }
 0x2cc   : > { %19416 = vmatpush3.bf16.msra.mxu0 %v19413_v10  ;;  %17652 = vmatprep.mubr.msk.f32.mxu0 %vm1391_vm1, %v7823_v20  ;;  %v14783_v10 = vld [vmem:[%s24214_s3 + $0xa90] sm:$0xff] }
 0x2cd   : > { %19412 = vmatpush3.bf16.msra.mxu1 %v19409_v27  ;;  %19418 = vmatprep.subr.bf16.mxu0 %v19417_v34  ;;  %v14784_v27 = vld [vmem:[%s24214_s3 + $0xa98] sm:$0xff]  ;;  %v14787_v20 = vld [vmem:[%s24214_s3 + $0xab0] sm:$0xff] }
 0x2ce   : > { %19422 = vmatprep.subr.bf16.mxu1 %v19421_v29  ;;  %v19465_v1 = vpack.c.bf16 %v14784_v27, %v14783_v10  ;;  %v14815_v27 = vld [vmem:[%s24214_s3 + $0xb90] sm:$0xff] }
 0x2d0   : > { %17642 = vmatmul.mubr.msk.f32.vlgmr.msra.gmra.mrb[104].mxu1 %vm1391_vm1, %v7822_v22  ;;  %19420 = vmatpush3.bf16.msra.mxu0 %v19417_v34  ;;  %v14789_v34 = vld [vmem:[%s24214_s3 + $0xac0] sm:$0xff] }
 0x2d1   : > { %19424 = vmatpush3.bf16.msra.mxu1 %v19421_v29  ;;  %17663 = vmatprep.mubr.msk.f32.mxu1 %vm1391_vm1, %v7825_v28  ;;  %v14788_v29 = vld [vmem:[%s24214_s3 + $0xab8] sm:$0xff]  ;;  %v19477_v45 = vpack.c.bf16 %v14790_v49, %v14789_v34  ;;  %v14795_v28 = vld [vmem:[%s24214_s3 + $0xaf0] sm:$0xff]  ;;  %v14822_v34 = vld [vmem:[%s24214_s3 + $0xbc8] sm:$0xff] }
 0x2d2   : > { %19430 = vmatprep.subr.bf16.mxu0 %v19429_v12  ;;  %19426 = vmatprep.subr.bf16.mxu1 %v19425_v35  ;;  %v19473_v40 = vpack.c.bf16 %v14788_v29, %v14787_v20  ;;  %v14819_v49 = vld [vmem:[%s24214_s3 + $0xbb0] sm:$0xff] }
 0x2d3   : > { %17653 = vmatmul.mubr.msk.f32.vlgmr.msra.gmra.mrb[106].mxu0 %vm1391_vm1, %v7824_v30 }
 0x2d4   : > { %19432 = vmatpush3.bf16.msra.mxu0 %v19429_v12  ;;  %17674 = vmatprep.mubr.msk.f32.mxu0 %vm1391_vm1, %v7827_v0  ;;  %v7834_v12 = vld [vmem:[#allocation2 + $0xd8] sm:$0xf]  ;;  %v14799_v0 = vld [vmem:[%s24214_s3 + $0xb10] sm:$0xff] }
 0x2d5   : > { %19428 = vmatpush3.bf16.msra.mxu1 %v19425_v35  ;;  %19434 = vmatprep.subr.bf16.mxu0 %v19433_v43  ;;  %v14793_v35 = vld [vmem:[%s24214_s3 + $0xae0] sm:$0xff] }
 0x2d6   : > { %19438 = vmatprep.subr.bf16.mxu1 %v19437_v33 }
 0x2d8   : > { %17664 = vmatmul.mubr.msk.f32.vlgmr.msra.gmra.mrb[106].mxu1 %vm1391_vm1, %v7826_v16  ;;  %19436 = vmatpush3.bf16.msra.mxu0 %v19433_v43  ;;  %v19493_v43 = vpack.c.bf16 %v14798_v26, %v14797_v23 }
 0x2d9   : > { %19440 = vmatpush3.bf16.msra.mxu1 %v19437_v33  ;;  %17685 = vmatprep.mubr.msk.f32.mxu1 %vm1391_vm1, %v7829_v36  ;;  %v14800_v33 = vld [vmem:[%s24214_s3 + $0xb18] sm:$0xff] }
 0x2da   : > { %19446 = vmatprep.subr.bf16.mxu0 %v19445_v4  ;;  %19442 = vmatprep.subr.bf16.mxu1 %v19441_v38  ;;  %v19497_v39 = vpack.c.bf16 %v14800_v33, %v14799_v0  ;;  %v14808_v36 = vld [vmem:[%s24214_s3 + $0xb58] sm:$0xff] }
 0x2db   : > { %17675 = vmatmul.mubr.msk.f32.vlgmr.msra.gmra.mrb[108].mxu0 %vm1391_vm1, %v7828_v59  ;;  %v14809_v59 = vld [vmem:[%s24214_s3 + $0xb60] sm:$0xff]  ;;  %v8902_v0 = vld [vmem:[#allocation2 + $0xd1] sm:$0xff] }
 0x2dc   : > { %19448 = vmatpush3.bf16.msra.mxu0 %v19445_v4  ;;  %17696 = vmatprep.mubr.msk.f32.mxu0 %vm1391_vm1, %v21962_v13  ;;  %v14786_v13 = vld [vmem:[%s24214_s3 + $0xaa8] sm:$0xff] }
 0x2dd   : > { %19444 = vmatpush3.bf16.msra.mxu1 %v19441_v38  ;;  %19450 = vmatprep.subr.bf16.mxu0 %v19449_v47  ;;  %v19469_v63 = vpack.c.bf16 %v14786_v13, %v14785_v5  ;;  %v14805_v38 = vld [vmem:[%s24214_s3 + $0xb40] sm:$0xff]  ;;  %v8891_v5 = vld [vmem:[#allocation2 + $0x79] sm:$0xf] }
 0x2de   : > { %19454 = vmatprep.subr.bf16.mxu1 %v19453_v50  ;;  %v19509_v16 = vpack.c.bf16 %v14806_v41, %v14805_v38  ;;  %v14817_v13 = vld [vmem:[%s24214_s3 + $0xba0] sm:$0xff]  ;;  %v14860_v38 = vld [vmem:[%s24214_s3 + $0xc38] sm:$0xff] }
 0x2e0   : > { %17686 = vmatmul.mubr.msk.f32.vlgmr.msra.gmra.mrb[108].mxu1 %vm1391_vm1, %v7830_v46  ;;  %19452 = vmatpush3.bf16.msra.mxu0 %v19449_v47  ;;  %v8887_v47 = vld [vmem:[#allocation2 + $0x59] sm:$0xf] }
 0x2e1   : > { %19456 = vmatpush3.bf16.msra.mxu1 %v19453_v50  ;;  %17707 = vmatprep.mubr.msk.f32.mxu1 %vm1391_vm1, %v7833_v61  ;;  %v19513_v50 = vpack.c.bf16 %v14808_v36, %v14807_v44  ;;  %v14816_v46 = vld [vmem:[%s24214_s3 + $0xb98] sm:$0xff]  ;;  %v14865_v44 = vld [vmem:[%s24214_s3 + $0xc60] sm:$0xff]  ;;  %v14866_v36 = vld [vmem:[%s24214_s3 + $0xc68] sm:$0xff] }
 0x2e2   : > { %19462 = vmatprep.subr.bf16.mxu0 %v19461_v51  ;;  %19458 = vmatprep.subr.bf16.mxu1 %v19457_v53  ;;  %v19529_v61 = vpack.c.bf16 %v14816_v46, %v14815_v27  ;;  %v14872_v27 = vld [vmem:[%s24214_s3 + $0xc98] sm:$0xff] }
 0x2e3   : > { %17697 = vmatmul.mubr.msk.f32.vlgmr.msra.gmra.mrb[110].mxu0 %vm1391_vm1, %v7832_v7  ;;  %v9952_v46 = vld [vmem:[#allocation2 + $0x3a] sm:$0xf] }
 0x2e4   : > { %19464 = vmatpush3.bf16.msra.mxu0 %v19461_v51  ;;  %17718 = vmatprep.mubr.msk.f32.mxu0 %vm1391_vm1, %v21993_v24  ;;  %v14794_v24 = vld [vmem:[%s24214_s3 + $0xae8] sm:$0xff]  ;;  %v14811_v51 = vld [vmem:[%s24214_s3 + $0xb70] sm:$0xff] }
 0x2e5   : > { %19460 = vmatpush3.bf16.msra.mxu1 %v19457_v53  ;;  %19466 = vmatprep.subr.bf16.mxu0 %v19465_v1  ;;  %v19485_v22 = vpack.c.bf16 %v14794_v24, %v14793_v35  ;;  %v19525_v53 = vpack.c.bf16 %v14814_v15, %v14813_v32  ;;  %v8897_v35 = vld [vmem:[#allocation2 + $0xa9] sm:$0xf]  ;;  %v14867_v15 = vld [vmem:[%s24214_s3 + $0xc70] sm:$0xff] }
 0x2e6   : > { %19470 = vmatprep.subr.bf16.mxu1 %v19469_v63  ;;  %v14870_v32 = vld [vmem:[%s24214_s3 + $0xc88] sm:$0xff] }
 0x2e8   : > { %17708 = vmatmul.mubr.msk.f32.vlgmr.msra.gmra.mrb[110].mxu1 %vm1391_vm1, %v7834_v12  ;;  %19468 = vmatpush3.bf16.msra.mxu0 %v19465_v1  ;;  %v8893_v1 = vld [vmem:[#allocation2 + $0x89] sm:$0xf] }
 0x2e9   : > { %19472 = vmatpush3.bf16.msra.mxu1 %v19469_v63  ;;  %17729 = vmatprep.mubr.msk.f32.mxu1 %vm1391_vm1, %v21997_v18  ;;  %v14796_v18 = vld [vmem:[%s24214_s3 + $0xaf8] sm:$0xff]  ;;  %v14821_v63 = vld [vmem:[%s24214_s3 + $0xbc0] sm:$0xff] }
 0x2ea   : > { %19478 = vmatprep.subr.bf16.mxu0 %v19477_v45  ;;  %19474 = vmatprep.subr.bf16.mxu1 %v19473_v40  ;;  %v19489_v30 = vpack.c.bf16 %v14796_v18, %v14795_v28  ;;  %v19541_v20 = vpack.c.bf16 %v14822_v34, %v14821_v63  ;;  %v14855_v28 = vld [vmem:[%s24214_s3 + $0xc10] sm:$0xff]  ;;  %v14856_v18 = vld [vmem:[%s24214_s3 + $0xc18] sm:$0xff]  ;;  %v14877_v34 = vld [vmem:[%s24214_s3 + $0xcc0] sm:$0xff] }
 0x2eb   : > { %17719 = vmatmul.mubr.msk.f32.vlgmr.msra.gmra.mrb[100].mxu0 %vm1391_vm1, %v8881_v60  ;;  %v14854_v60 = vld [vmem:[%s24214_s3 + $0xc08] sm:$0xff]  ;;  %v19561_v33 = vpack.c.bf16 %v14856_v18, %v14855_v28  ;;  %v14884_v28 = vld [vmem:[%s24214_s3 + $0xcf8] sm:$0xff] }
 0x2ec   : > { %19480 = vmatpush3.bf16.msra.mxu0 %v19477_v45  ;;  %17740 = vmatprep.mubr.msk.f32.mxu0 %vm1391_vm1, %v22027_v14  ;;  %v14802_v14 = vld [vmem:[%s24214_s3 + $0xb28] sm:$0xff]  ;;  %v14823_v45 = vld [vmem:[%s24214_s3 + $0xbd0] sm:$0xff] }
 0x2ed   : > { %19476 = vmatpush3.bf16.msra.mxu1 %v19473_v40  ;;  %19482 = vmatprep.subr.bf16.mxu0 %v19481_v58  ;;  %v19501_v4 = vpack.c.bf16 %v14802_v14, %v14801_v48  ;;  %v14824_v40 = vld [vmem:[%s24214_s3 + $0xbd8] sm:$0xff]  ;;  %v9949_v48 = vld [vmem:[#allocation2 + $0x22] sm:$0xff] }
 0x2ee   : > { %19486 = vmatprep.subr.bf16.mxu1 %v19485_v22  ;;  %v19545_v12 = vpack.c.bf16 %v14824_v40, %v14823_v45  ;;  %v14879_v40 = vld [vmem:[%s24214_s3 + $0xcd0] sm:$0xff] }
 0x2f0   : > { %17730 = vmatmul.mubr.msk.f32.vlgmr.msra.gmra.mrb[100].mxu1 %vm1391_vm1, %v8883_v21  ;;  %19484 = vmatpush3.bf16.msra.mxu0 %v19481_v58  ;;  %v14853_v58 = vld [vmem:[%s24214_s3 + $0xc00] sm:$0xff]  ;;  %v8901_v21 = vld [vmem:[#allocation2 + $0xc9] sm:$0xf] }
 0x2f1   : > { %19488 = vmatpush3.bf16.msra.mxu1 %v19485_v22  ;;  %17751 = vmatprep.mubr.msk.f32.mxu1 %vm1391_vm1, %v22031_v56  ;;  %v14804_v56 = vld [vmem:[%s24214_s3 + $0xb38] sm:$0xff]  ;;  %v14827_v22 = vld [vmem:[%s24214_s3 + $0xbf0] sm:$0xff]  ;;  %v19557_v23 = vpack.c.bf16 %v14854_v60, %v14853_v58  ;;  %v9958_v58 = vld [vmem:[#allocation2 + $0x6a] sm:$0xf] }
 0x2f2   : > { %19494 = vmatprep.subr.bf16.mxu0 %v19493_v43  ;;  %19490 = vmatprep.subr.bf16.mxu1 %v19489_v30  ;;  %v19505_v62 = vpack.c.bf16 %v14804_v56, %v14803_v42  ;;  %v14863_v56 = vld [vmem:[%s24214_s3 + $0xc50] sm:$0xff]  ;;  %v9961_v60 = vld [vmem:[#allocation2 + $0x82] sm:$0xff] }
 0x2f3   : > { %17741 = vmatmul.mubr.msk.f32.vlgmr.msra.gmra.mrb[102].mxu0 %vm1391_vm1, %v8885_v17  ;;  %v14862_v17 = vld [vmem:[%s24214_s3 + $0xc48] sm:$0xff] }
 0x2f4   : > { %19496 = vmatpush3.bf16.msra.mxu0 %v19493_v43  ;;  %17762 = vmatprep.mubr.msk.f32.mxu0 %vm1391_vm1, %v22061_v52  ;;  %v14810_v52 = vld [vmem:[%s24214_s3 + $0xb68] sm:$0xff]  ;;  %v8899_v43 = vld [vmem:[#allocation2 + $0xb9] sm:$0xf] }
 0x2f5   : > { %19492 = vmatpush3.bf16.msra.mxu1 %v19489_v30  ;;  %19498 = vmatprep.subr.bf16.mxu0 %v19497_v39  ;;  %v19517_v8 = vpack.c.bf16 %v14810_v52, %v14809_v59  ;;  %v14857_v30 = vld [vmem:[%s24214_s3 + $0xc20] sm:$0xff]  ;;  %v9950_v52 = vld [vmem:[#allocation2 + $0x2a] sm:$0xf] }
 0x2f6   : > { %19502 = vmatprep.subr.bf16.mxu1 %v19501_v4 }
 0x2f8   : > { %17752 = vmatmul.mubr.msk.f32.vlgmr.msra.gmra.mrb[102].mxu1 %vm1391_vm1, %v8887_v47  ;;  %19500 = vmatpush3.bf16.msra.mxu0 %v19497_v39  ;;  %v14861_v39 = vld [vmem:[%s24214_s3 + $0xc40] sm:$0xff]  ;;  %v9951_v47 = vld [vmem:[#allocation2 + $0x32] sm:$0xff] }
 0x2f9   : > { %19504 = vmatpush3.bf16.msra.mxu1 %v19501_v4  ;;  %17773 = vmatprep.mubr.msk.f32.mxu1 %vm1391_vm1, %v22065_v31  ;;  %v14812_v31 = vld [vmem:[%s24214_s3 + $0xb78] sm:$0xff]  ;;  %v14859_v4 = vld [vmem:[%s24214_s3 + $0xc30] sm:$0xff]  ;;  %v19573_v41 = vpack.c.bf16 %v14862_v17, %v14861_v39  ;;  %v9962_v39 = vld [vmem:[#allocation2 + $0x8a] sm:$0xf] }
 0x2fa   : > { %19510 = vmatprep.subr.bf16.mxu0 %v19509_v16  ;;  %19506 = vmatprep.subr.bf16.mxu1 %v19505_v62  ;;  %v19521_v10 = vpack.c.bf16 %v14812_v31, %v14811_v51  ;;  %v19569_v42 = vpack.c.bf16 %v14860_v38, %v14859_v4  ;;  %v14868_v51 = vld [vmem:[%s24214_s3 + $0xc78] sm:$0xff]  ;;  %v9965_v17 = vld [vmem:[#allocation2 + $0xa2] sm:$0xff] }
 0x2fb   : > { %17763 = vmatmul.mubr.msk.f32.vlgmr.msra.gmra.mrb[104].mxu0 %vm1391_vm1, %v8889_v9  ;;  %v19581_v9 = vpack.c.bf16 %v14866_v36, %v14865_v44  ;;  %v14893_v38 = vld [vmem:[%s24214_s3 + $0xd40] sm:$0xff]  ;;  %v14895_v44 = vld [vmem:[%s24214_s3 + $0xd50] sm:$0xff]  ;;  %v14896_v36 = vld [vmem:[%s24214_s3 + $0xd58] sm:$0xff] }
 0x2fc   : > { %19512 = vmatpush3.bf16.msra.mxu0 %v19509_v16  ;;  %17784 = vmatprep.mubr.msk.f32.mxu0 %vm1391_vm1, %v22095_v37  ;;  %v14818_v37 = vld [vmem:[%s24214_s3 + $0xba8] sm:$0xff]  ;;  %v14864_v16 = vld [vmem:[%s24214_s3 + $0xc58] sm:$0xff] }
 0x2fd   : > { %19508 = vmatpush3.bf16.msra.mxu1 %v19505_v62  ;;  %19514 = vmatprep.subr.bf16.mxu0 %v19513_v50  ;;  %v19533_v7 = vpack.c.bf16 %v14818_v37, %v14817_v13  ;;  %v8903_v62 = vld [vmem:[#allocation2 + $0xd9] sm:$0xf]  ;;  %v19577_v59 = vpack.c.bf16 %v14864_v16, %v14863_v56  ;;  %v14874_v13 = vld [vmem:[%s24214_s3 + $0xca8] sm:$0xff] }
 0x2fe   : > { %19518 = vmatprep.subr.bf16.mxu1 %v19517_v8  ;;  %v9955_v37 = vld [vmem:[#allocation2 + $0x52] sm:$0xff] }
 0x2ff   : > { %v14892_v56 = vld [vmem:[%s24214_s3 + $0xd38] sm:$0xff] }
 0x300   : > { %17774 = vmatmul.mubr.msk.f32.vlgmr.msra.gmra.mrb[104].mxu1 %vm1391_vm1, %v8891_v5  ;;  %19516 = vmatpush3.bf16.msra.mxu0 %v19513_v50  ;;  %v9953_v50 = vld [vmem:[#allocation2 + $0x42] sm:$0xff] }
 0x301   : > { %19520 = vmatpush3.bf16.msra.mxu1 %v19517_v8  ;;  %17795 = vmatprep.mubr.msk.f32.mxu1 %vm1391_vm1, %v22099_v2  ;;  %v14820_v2 = vld [vmem:[%s24214_s3 + $0xbb8] sm:$0xff]  ;;  %v14869_v8 = vld [vmem:[%s24214_s3 + $0xc80] sm:$0xff] }
 0x302   : > { %19526 = vmatprep.subr.bf16.mxu0 %v19525_v53  ;;  %19522 = vmatprep.subr.bf16.mxu1 %v19521_v10  ;;  %v19537_v29 = vpack.c.bf16 %v14820_v2, %v14819_v49  ;;  %v19589_v31 = vpack.c.bf16 %v14870_v32, %v14869_v8  ;;  %v14873_v5 = vld [vmem:[%s24214_s3 + $0xca0] sm:$0xff]  ;;  %v14878_v49 = vld [vmem:[%s24214_s3 + $0xcc8] sm:$0xff]  ;;  %v14875_v2 = vld [vmem:[%s24214_s3 + $0xcb0] sm:$0xff] }
 0x303   : > { %17785 = vmatmul.mubr.msk.f32.vlgmr.msra.gmra.mrb[106].mxu0 %vm1391_vm1, %v8893_v1  ;;  %v9954_v1 = vld [vmem:[#allocation2 + $0x4a] sm:$0xf]  ;;  %v19597_v63 = vpack.c.bf16 %v14874_v13, %v14873_v5 }
 0x304   : > { %19528 = vmatpush3.bf16.msra.mxu0 %v19525_v53  ;;  %17806 = vmatprep.mubr.msk.f32.mxu0 %vm1391_vm1, %v22129_v57  ;;  %v14826_v57 = vld [vmem:[%s24214_s3 + $0xbe8] sm:$0xff]  ;;  %v19585_v53 = vpack.c.bf16 %v14868_v51, %v14867_v15  ;;  %v14899_v15 = vld [vmem:[%s24214_s3 + $0xd70] sm:$0xff]  ;;  %v14900_v51 = vld [vmem:[%s24214_s3 + $0xd78] sm:$0xff] }
 0x305   : > { %19524 = vmatpush3.bf16.msra.mxu1 %v19521_v10  ;;  %19530 = vmatprep.subr.bf16.mxu0 %v19529_v61  ;;  %v19549_v24 = vpack.c.bf16 %v14826_v57, %v14825_v25  ;;  %v14871_v10 = vld [vmem:[%s24214_s3 + $0xc90] sm:$0xff]  ;;  %v9956_v25 = vld [vmem:[#allocation2 + $0x5a] sm:$0xf]  ;;  %v14881_v57 = vld [vmem:[%s24214_s3 + $0xce0] sm:$0xff] }
 0x306   : > { %19534 = vmatprep.subr.bf16.mxu1 %v19533_v7  ;;  %v9966_v8 = vld [vmem:[#allocation2 + $0xaa] sm:$0xf] }
 0x307   : > { %v14927_v5 = vld [vmem:[%s24216_s5 + $0x188] sm:$0xff] }
 0x308   : > { %17796 = vmatmul.mubr.msk.f32.vlgmr.msra.gmra.mrb[106].mxu1 %vm1391_vm1, %v8895_v54  ;;  %19532 = vmatpush3.bf16.msra.mxu0 %v19529_v61  ;;  %v19593_v61 = vpack.c.bf16 %v14872_v27, %v14871_v10  ;;  %v14880_v54 = vld [vmem:[%s24214_s3 + $0xcd8] sm:$0xff]  ;;  %v9970_v27 = vld [vmem:[#allocation2 + $0xca] sm:$0xf] }
 0x309   : > { %19536 = vmatpush3.bf16.msra.mxu1 %v19533_v7  ;;  %17817 = vmatprep.mubr.msk.f32.mxu1 %vm1391_vm1, %v22133_v55  ;;  %v14828_v55 = vld [vmem:[%s24214_s3 + $0xbf8] sm:$0xff]  ;;  %v9957_v7 = vld [vmem:[#allocation2 + $0x62] sm:$0xff] }
 0x30a   : > { %19542 = vmatprep.subr.bf16.mxu0 %v19541_v20  ;;  %19538 = vmatprep.subr.bf16.mxu1 %v19537_v29  ;;  %v19553_v26 = vpack.c.bf16 %v14828_v55, %v14827_v22  ;;  %v14885_v55 = vld [vmem:[%s24214_s3 + $0xd00] sm:$0xff]  ;;  %v9971_v10 = vld [vmem:[#allocation2 + $0xd2] sm:$0xff] }
 0x30b   : > { %17807 = vmatmul.mubr.msk.f32.vlgmr.msra.gmra.mrb[108].mxu0 %vm1391_vm1, %v8897_v35  ;;  %v9959_v35 = vld [vmem:[#allocation2 + $0x72] sm:$0xff] }
 0x30c   : > { %19544 = vmatpush3.bf16.msra.mxu0 %v19541_v20  ;;  %17828 = vmatprep.mubr.msk.f32.mxu0 %vm1391_vm1, %v22163_v11  ;;  %v14858_v11 = vld [vmem:[%s24214_s3 + $0xc28] sm:$0xff]  ;;  %v14876_v20 = vld [vmem:[%s24214_s3 + $0xcb8] sm:$0xff] }
 0x30d   : > { %19540 = vmatpush3.bf16.msra.mxu1 %v19537_v29  ;;  %19546 = vmatprep.subr.bf16.mxu0 %v19545_v12  ;;  %v19565_v14 = vpack.c.bf16 %v14858_v11, %v14857_v30  ;;  %v19605_v29 = vpack.c.bf16 %v14878_v49, %v14877_v34  ;;  %v19601_v45 = vpack.c.bf16 %v14876_v20, %v14875_v2  ;;  %v14887_v30 = vld [vmem:[%s24214_s3 + $0xd10] sm:$0xff]  ;;  %v14888_v11 = vld [vmem:[%s24214_s3 + $0xd18] sm:$0xff] }
 0x30e   : > { %19550 = vmatprep.subr.bf16.mxu1 %v19549_v24  ;;  %v14932_v49 = vld [vmem:[%s24216_s5 + $0x1b0] sm:$0xff]  ;;  %v14933_v2 = vld [vmem:[%s24216_s5 + $0x1b8] sm:$0xff] }
 0x30f   : > { %v19663_v20 = vpack.c.bf16 %v14933_v2, %v14932_v49 }
 0x310   : > { %17818 = vmatmul.mubr.msk.f32.vlgmr.msra.gmra.mrb[108].mxu1 %vm1391_vm1, %v8899_v43  ;;  %19548 = vmatpush3.bf16.msra.mxu0 %v19545_v12  ;;  %v14882_v12 = vld [vmem:[%s24214_s3 + $0xce8] sm:$0xff] }
 0x311   : > { %19552 = vmatpush3.bf16.msra.mxu1 %v19549_v24  ;;  %17839 = vmatprep.mubr.msk.f32.mxu1 %vm1391_vm1, %v8902_v0  ;;  %v19609_v24 = vpack.c.bf16 %v14880_v54, %v14879_v40  ;;  %v19613_v22 = vpack.c.bf16 %v14882_v12, %v14881_v57  ;;  %v9960_v0 = vld [vmem:[#allocation2 + $0x7a] sm:$0xf]  ;;  %v14944_v54 = vld [vmem:[%s24216_s5 + $0x210] sm:$0xff]  ;;  %v14946_v12 = vld [vmem:[%s24216_s5 + $0x220] sm:$0xff] }
 0x312   : > { %19558 = vmatprep.subr.bf16.mxu0 %v19557_v23  ;;  %19554 = vmatprep.subr.bf16.mxu1 %v19553_v26 }
 0x313   : > { %17829 = vmatmul.mubr.msk.f32.vlgmr.msra.gmra.mrb[110].mxu0 %vm1391_vm1, %v8901_v21  ;;  %v14890_v21 = vld [vmem:[%s24214_s3 + $0xd28] sm:$0xff] }
 0x314   : > { %19560 = vmatpush3.bf16.msra.mxu0 %v19557_v23  ;;  %17850 = vmatprep.mubr.msk.f32.mxu0 %vm1391_vm1, %v9949_v48  ;;  %v14886_v23 = vld [vmem:[%s24214_s3 + $0xd08] sm:$0xff]  ;;  %v9963_v48 = vld [vmem:[#allocation2 + $0x92] sm:$0xff] }
 0x315   : > { %19556 = vmatpush3.bf16.msra.mxu1 %v19553_v26  ;;  %19562 = vmatprep.subr.bf16.mxu0 %v19561_v33  ;;  %v14883_v26 = vld [vmem:[%s24214_s3 + $0xcf0] sm:$0xff]  ;;  %v19621_v18 = vpack.c.bf16 %v14886_v23, %v14885_v55  ;;  %v22915_v55 = vld [vmem:[%s24215_s4] ss:$0 sm:$0xff] }
 0x316   : > { %19566 = vmatprep.subr.bf16.mxu1 %v19565_v14  ;;  %v19617_v43 = vpack.c.bf16 %v14884_v28, %v14883_v26 }
 0x318   : > { %17840 = vmatmul.mubr.msk.f32.vlgmr.msra.gmra.mrb[110].mxu1 %vm1391_vm1, %v8903_v62  ;;  %19564 = vmatpush3.bf16.msra.mxu0 %v19561_v33  ;;  %v14889_v33 = vld [vmem:[%s24214_s3 + $0xd20] sm:$0xff] }
 0x319   : > { %19568 = vmatpush3.bf16.msra.mxu1 %v19565_v14  ;;  %17861 = vmatprep.mubr.msk.f32.mxu1 %vm1391_vm1, %v9951_v47  ;;  %v19625_v14 = vpack.c.bf16 %v14888_v11, %v14887_v30  ;;  %v19629_v4 = vpack.c.bf16 %v14890_v21, %v14889_v33  ;;  %v9964_v47 = vld [vmem:[#allocation2 + $0x9a] sm:$0xf] }
 0x31a   : > { %19574 = vmatprep.subr.bf16.mxu0 %v19573_v41  ;;  %19570 = vmatprep.subr.bf16.mxu1 %v19569_v42 }
 0x31b   : > { %17851 = vmatmul.mubr.msk.f32.vlgmr.msra.gmra.mrb[100].mxu0 %vm1391_vm1, %v9950_v52  ;;  %v14898_v52 = vld [vmem:[%s24214_s3 + $0xd68] sm:$0xff] }
 0x31c   : > { %19576 = vmatpush3.bf16.msra.mxu0 %v19573_v41  ;;  %17872 = vmatprep.mubr.msk.f32.mxu0 %vm1391_vm1, %v9953_v50  ;;  %v14894_v41 = vld [vmem:[%s24214_s3 + $0xd48] sm:$0xff]  ;;  %v9967_v50 = vld [vmem:[#allocation2 + $0xb2] sm:$0xff] }
 0x31d   : > { %19572 = vmatpush3.bf16.msra.mxu1 %v19569_v42  ;;  %19578 = vmatprep.subr.bf16.mxu0 %v19577_v59  ;;  %v14891_v42 = vld [vmem:[%s24214_s3 + $0xd30] sm:$0xff]  ;;  %v19637_v16 = vpack.c.bf16 %v14894_v41, %v14893_v38 }
 0x31e   : > { %19582 = vmatprep.subr.bf16.mxu1 %v19581_v9  ;;  %v19633_v62 = vpack.c.bf16 %v14892_v56, %v14891_v42 }
 0x320   : > { %17862 = vmatmul.mubr.msk.f32.vlgmr.msra.gmra.mrb[100].mxu1 %vm1391_vm1, %v9952_v46  ;;  %19580 = vmatpush3.bf16.msra.mxu0 %v19577_v59  ;;  %v14897_v59 = vld [vmem:[%s24214_s3 + $0xd60] sm:$0xff] }
 0x321   : > { %19584 = vmatpush3.bf16.msra.mxu1 %v19581_v9  ;;  %17883 = vmatprep.mubr.msk.f32.mxu1 %vm1391_vm1, %v9955_v37  ;;  %v19641_v9 = vpack.c.bf16 %v14896_v36, %v14895_v44  ;;  %v19645_v32 = vpack.c.bf16 %v14898_v52, %v14897_v59  ;;  %v14926_v46 = vld [vmem:[%s24216_s5 + $0x180] sm:$0xff]  ;;  %v14928_v37 = vld [vmem:[%s24216_s5 + $0x190] sm:$0xff]  ;;  %v14935_v44 = vld [vmem:[%s24216_s5 + $0x1c8] sm:$0xff] }
 0x322   : > { %19590 = vmatprep.subr.bf16.mxu0 %v19589_v31  ;;  %19586 = vmatprep.subr.bf16.mxu1 %v19585_v53  ;;  %v19654_v13 = vpack.c.bf16 %v14927_v5, %v14926_v46 }
 0x323   : > { %17873 = vmatmul.mubr.msk.f32.vlgmr.msra.gmra.mrb[102].mxu0 %vm1391_vm1, %v9954_v1  ;;  %v14930_v1 = vld [vmem:[%s24216_s5 + $0x1a0] sm:$0xff] }
 0x324   : > { %19592 = vmatpush3.bf16.msra.mxu0 %v19589_v31  ;;  %17894 = vmatprep.mubr.msk.f32.mxu0 %vm1391_vm1, %v9957_v7  ;;  %v19649_v31 = vpack.c.bf16 %v14900_v51, %v14899_v15 }
 0x325   : > { %19588 = vmatpush3.bf16.msra.mxu1 %v19585_v53  ;;  %19594 = vmatprep.subr.bf16.mxu0 %v19593_v61  ;;  %v9968_v53 = vld [vmem:[#allocation2 + $0xba] sm:$0xf] }
 0x326   : > { %19598 = vmatprep.subr.bf16.mxu1 %v19597_v63 }
 0x328   : > { %17884 = vmatmul.mubr.msk.f32.vlgmr.msra.gmra.mrb[102].mxu1 %vm1391_vm1, %v9956_v25  ;;  %19596 = vmatpush3.bf16.msra.mxu0 %v19593_v61  ;;  %v14929_v61 = vld [vmem:[%s24216_s5 + $0x198] sm:$0xff] }
 0x329   : > { %19600 = vmatpush3.bf16.msra.mxu1 %v19597_v63  ;;  %17905 = vmatprep.mubr.msk.f32.mxu1 %vm1391_vm1, %v9959_v35  ;;  %v19657_v7 = vpack.c.bf16 %v14929_v61, %v14928_v37  ;;  %v14931_v63 = vld [vmem:[%s24216_s5 + $0x1a8] sm:$0xff]  ;;  %v14945_v25 = vld [vmem:[%s24216_s5 + $0x218] sm:$0xff] }
 0x32a   : > { %19606 = vmatprep.subr.bf16.mxu0 %v19605_v29  ;;  %19602 = vmatprep.subr.bf16.mxu1 %v19601_v45  ;;  %v19660_v34 = vpack.c.bf16 %v14931_v63, %v14930_v1  ;;  %v19681_v57 = vpack.c.bf16 %v14945_v25, %v14944_v54  ;;  %v14947_v35 = vld [vmem:[%s24216_s5 + $0x228] sm:$0xff]  ;;  %v14938_v1 = vld [vmem:[%s24216_s5 + $0x1e0] sm:$0xff] }
 0x32b   : > { %17895 = vmatmul.mubr.msk.f32.vlgmr.msra.gmra.mrb[104].mxu0 %vm1391_vm1, %v9958_v58  ;;  %v14948_v58 = vld [vmem:[%s24216_s5 + $0x230] sm:$0xff] }
 0x32c   : > { %19608 = vmatpush3.bf16.msra.mxu0 %v19605_v29  ;;  %17916 = vmatprep.mubr.msk.f32.mxu0 %vm1391_vm1, %v9961_v60  ;;  %v14942_v29 = vld [vmem:[%s24216_s5 + $0x200] sm:$0xff]  ;;  %v14949_v60 = vld [vmem:[%s24216_s5 + $0x238] sm:$0xff] }
 0x32d   : > { %19604 = vmatpush3.bf16.msra.mxu1 %v19601_v45  ;;  %19610 = vmatprep.subr.bf16.mxu0 %v19609_v24  ;;  %v14943_v45 = vld [vmem:[%s24216_s5 + $0x208] sm:$0xff] }
 0x32e   : > { %19614 = vmatprep.subr.bf16.mxu1 %v19613_v22  ;;  %v19678_v40 = vpack.c.bf16 %v14943_v45, %v14942_v29 }
 0x330   : > { %17906 = vmatmul.mubr.msk.f32.vlgmr.msra.gmra.mrb[104].mxu1 %vm1391_vm1, %v9960_v0  ;;  %19612 = vmatpush3.bf16.msra.mxu0 %v19609_v24  ;;  %v19684_v24 = vpack.c.bf16 %v14947_v35, %v14946_v12  ;;  %v14940_v35 = vld [vmem:[%s24216_s5 + $0x1f0] sm:$0xff] }
 0x331   : > { %19616 = vmatpush3.bf16.msra.mxu1 %v19613_v22  ;;  %17927 = vmatprep.mubr.msk.f32.mxu1 %vm1391_vm1, %v9963_v48  ;;  %v19687_v22 = vpack.c.bf16 %v14949_v60, %v14948_v58 }
 0x332   : > { %19622 = vmatprep.subr.bf16.mxu0 %v19621_v18  ;;  %19618 = vmatprep.subr.bf16.mxu1 %v19617_v43 }
 0x333   : > { %17917 = vmatmul.mubr.msk.f32.vlgmr.msra.gmra.mrb[106].mxu0 %vm1391_vm1, %v9962_v39 }
 0x334   : > { %19624 = vmatpush3.bf16.msra.mxu0 %v19621_v18  ;;  %17938 = vmatprep.mubr.msk.f32.mxu0 %vm1391_vm1, %v9965_v17 }
 0x335   : > { %19620 = vmatpush3.bf16.msra.mxu1 %v19617_v43  ;;  %19626 = vmatprep.subr.bf16.mxu0 %v19625_v14 }
 0x336   : > { %19630 = vmatprep.subr.bf16.mxu1 %v19629_v4 }
 0x338   : > { %17928 = vmatmul.mubr.msk.f32.vlgmr.msra.gmra.mrb[106].mxu1 %vm1391_vm1, %v9964_v47  ;;  %19628 = vmatpush3.bf16.msra.mxu0 %v19625_v14 }
 0x339   : > { %19632 = vmatpush3.bf16.msra.mxu1 %v19629_v4  ;;  %17949 = vmatprep.mubr.msk.f32.mxu1 %vm1391_vm1, %v9967_v50 }
 0x33a   : > { %19638 = vmatprep.subr.bf16.mxu0 %v19637_v16  ;;  %19634 = vmatprep.subr.bf16.mxu1 %v19633_v62 }
 0x33b   : > { %17939 = vmatmul.mubr.msk.f32.vlgmr.msra.gmra.mrb[108].mxu0 %vm1391_vm1, %v9966_v8 }
 0x33c   : > { %19640 = vmatpush3.bf16.msra.mxu0 %v19637_v16  ;;  %17960 = vmatprep.mubr.msk.f32.mxu0 %vm1391_vm1, %v22345_v19  ;;  %v9972_v19 = vld [vmem:[#allocation2 + $0xda] sm:$0xf] }
 0x33d   : > { %19636 = vmatpush3.bf16.msra.mxu1 %v19633_v62  ;;  %19642 = vmatprep.subr.bf16.mxu0 %v19641_v9  ;;  %v14934_v62 = vld [vmem:[%s24216_s5 + $0x1c0] sm:$0xff] }
 0x33e   : > { %19646 = vmatprep.subr.bf16.mxu1 %v19645_v32 }
 0x340   : > { %17950 = vmatmul.mubr.msk.f32.vlgmr.msra.gmra.mrb[108].mxu1 %vm1391_vm1, %v9968_v53  ;;  %19644 = vmatpush3.bf16.msra.mxu0 %v19641_v9 }
 0x341   : > { %19648 = vmatpush3.bf16.msra.mxu1 %v19645_v32  ;;  %17971 = vmatprep.mubr.msk.f32.mxu1 %vm1391_vm1, %v9971_v10  ;;  %v19666_v32 = vpack.c.bf16 %v14935_v44, %v14934_v62  ;;  %v14953_v62 = vld [vmem:[%s24216_s5 + $0x258] sm:$0xff] }
 0x342   : > { %19650 = vmatprep.subr.bf16.mxu1 %v19649_v31  ;;  %19677 = vmatprep.subr.bf16.mxu0 %v20409_v3 }
 0x343   : > { %17961 = vmatmul.mubr.msk.f32.vlgmr.msra.gmra.mrb[110].mxu0 %vm1391_vm1, %v9970_v27  ;;  %v14936_v27 = vld [vmem:[%s24216_s5 + $0x1d0] sm:$0xff] }
 0x344   : > { %18028 = vmatprep.mubr.msk.f32.mxu0 %vm20410_vm0, %v20411_v6  ;;  %19679 = vmatpush3.bf16.msra.mxu0 %v19678_v40 }
 0x345   : > { %19652 = vmatpush3.bf16.msra.mxu1 %v19649_v31  ;;  %19680 = vmatprep.subr.bf16.mxu0 %v20409_v3 }
 0x346   : > { %19653 = vmatprep.subr.bf16.mxu1 %v20409_v3 }
 0x348   : > { %17972 = vmatmul.mubr.msk.f32.vlgmr.msra.gmra.mrb[110].mxu1 %vm1391_vm1, %v9972_v19  ;;  %19682 = vmatpush3.bf16.msra.mxu0 %v19681_v57  ;;  %v14937_v19 = vld [vmem:[%s24216_s5 + $0x1d8] sm:$0xff] }
 0x349   : > { %17990 = vmatprep.mubr.msk.f32.mxu1 %vm20410_vm0, %v20411_v6  ;;  %19655 = vmatpush3.bf16.msra.mxu1 %v19654_v13  ;;  %v19669_v13 = vpack.c.bf16 %v14937_v19, %v14936_v27  ;;  %v14955_v19 = vld [vmem:[%s24216_s5 + $0x268] sm:$0xff] }
 0x34a   : > { %19656 = vmatprep.subr.bf16.mxu1 %v20409_v3  ;;  %19683 = vmatprep.subr.bf16.mxu0 %v20409_v3 }
 0x34c   : > { %19685 = vmatpush3.bf16.msra.mxu0 %v19684_v24  ;;  %v14941_v24 = vld [vmem:[%s24216_s5 + $0x1f8] sm:$0xff] }
 0x34d   : > { %19658 = vmatpush3.bf16.msra.mxu1 %v19657_v7  ;;  %19686 = vmatprep.subr.bf16.mxu0 %v20409_v3  ;;  %v14939_v7 = vld [vmem:[%s24216_s5 + $0x1e8] sm:$0xff] }
 0x34e   : > { %19659 = vmatprep.subr.bf16.mxu1 %v20409_v3  ;;  %v19672_v40 = vpack.c.bf16 %v14939_v7, %v14938_v1 }
 0x350   : > { %19688 = vmatpush3.bf16.msra.mxu0 %v19687_v22 }
 0x351   : > { %19661 = vmatpush3.bf16.msra.mxu1 %v19660_v34  ;;  %19701 = vmatprep.subr.bf16.mxu0 %v20409_v3 }
 0x352   : > { %19662 = vmatprep.subr.bf16.mxu1 %v20409_v3 }
 0x355   : > { %19664 = vmatpush3.bf16.msra.mxu1 %v19663_v20 }
 0x356   : > { %19665 = vmatprep.subr.bf16.mxu1 %v20409_v3 }
 0x3ee   : > { %v17852_v23 = vpop.f32.mrb[100].mxu0 }
 0x3ef   : > { %v11026_v26 = vadd.f32 %v17852_v23, %v22915_v55  ;;  %v10094_v28 = vpop.f32.mrb[101].mxu0  ;;  %v19675_v23 = vpack.c.bf16 %v14941_v24, %v14940_v35  ;;  %v14965_v35 = vld [vmem:[%s24216_s5 + $0x2b8] sm:$0xff] }
 0x3f0   : > { %v11025_v18 = vadd.f32 %v22915_v55, %v10094_v28  ;;  %v14951_v28 = vld [vmem:[%s24216_s5 + $0x248] sm:$0xff] }
 0x3f1   : > { %v11050_v33 = vmax.f32 %v11026_v26, 0.0  ;;  %v14950_v26 = vld [vmem:[%s24216_s5 + $0x240] sm:$0xff] }
 0x3f2   : > { %v11049_v14 = vmax.f32 %v11025_v18, 0.0 }
 0x3f3   : > { %v17863_v43 = vpop.f32.mrb[100].mxu1 }
 0x3f4   : > { %v11028_v30 = vadd.f32 %v17863_v43, %v22915_v55  ;;  %v10175_v11 = vpop.f32.mrb[101].mxu1 }
 0x3f5   : > { %v11027_v0 = vadd.f32 %v22915_v55, %v10175_v11  ;;  %v14958_v11 = vld [vmem:[%s24216_s5 + $0x280] sm:$0xff] }
 0x3f6   : > { %v11052_v21 = vmax.f32 %v11028_v30, 0.0  ;;  %v17874_v48 = vpop.f32.mrb[102].mxu0 }
 0x3f7   : > { %v11051_v39 = vmax.f32 %v11027_v0, 0.0  ;;  %v11030_v17 = vadd.f32 %v17874_v48, %v22915_v55  ;;  %v10256_v4 = vpop.f32.mrb[103].mxu0  ;;  %v14959_v0 = vld [vmem:[%s24216_s5 + $0x288] sm:$0xff] }
 0x3f8   : > { %v22922_v38 = vmax.f32 %v11050_v33, %v11052_v21  ;;  %v11029_v56 = vadd.f32 %v22915_v55, %v10256_v4 }
 0x3f9   : > { %v11073_v41 = vmax.f32 %v11049_v14, %v11051_v39  ;;  %v11054_v50 = vmax.f32 %v11030_v17, 0.0  ;;  %v19690_v39 = vpack.c.bf16 %v14951_v28, %v14950_v26  ;;  %v14966_v28 = vld [vmem:[%s24216_s5 + $0x2c0] sm:$0xff] }
 0x3fa   : > { %v11053_v15 = vmax.f32 %v11029_v56, 0.0  ;;  %v19702_v56 = vpack.c.bf16 %v14959_v0, %v14958_v11  ;;  %v14967_v0 = vld [vmem:[%s24216_s5 + $0x2c8] sm:$0xff] }
 0x3fb   : > { %v11091_v42 = vrot.slane %v11073_v41, 1  ;;  %v17885_v16 = vpop.f32.mrb[102].mxu1 }
 0x3fc   : > { %v11032_v36 = vadd.f32 %v17885_v16, %v22915_v55  ;;  %v10337_v47 = vpop.f32.mrb[103].mxu1  ;;  %v14952_v16 = vld [vmem:[%s24216_s5 + $0x250] sm:$0xff] }
 0x3fd   : > { %v22932_v59 = vmax.f32 %v11073_v41, %v11091_v42  ;;  %v11031_v52 = vadd.f32 %v22915_v55, %v10337_v47 }
 0x3fe   : > { %v11056_v9 = vmax.f32 %v11032_v36, 0.0  ;;  %v17896_v8 = vpop.f32.mrb[104].mxu0 }
 0x3ff   : > { %v11055_v51 = vmax.f32 %v11031_v52, 0.0  ;;  %v11034_v31 = vadd.f32 %v17896_v8, %v22915_v55  ;;  %v10418_v53 = vpop.f32.mrb[105].mxu0  ;;  %v11207_v10 = vrot.slane %v22932_v59, 2  ;;  %v14961_v8 = vld [vmem:[%s24216_s5 + $0x298] sm:$0xff] }
 0x400   : > { %v22943_v46 = vmax.f32 %v11054_v50, %v11056_v9  ;;  %v11033_v37 = vadd.f32 %v22915_v55, %v10418_v53  ;;  %v14960_v9 = vld [vmem:[%s24216_s5 + $0x290] sm:$0xff]  ;;  %v14954_v53 = vld [vmem:[%s24216_s5 + $0x260] sm:$0xff] }
 0x401   : > { %v11075_v5 = vmax.f32 %v11053_v15, %v11055_v51  ;;  %17991 = vmatmul.mubr.msk.f32.vlgmr.msra.gmra.mrb[112].mxu1 %vm11208_vm8, %v11207_v10  ;;  %v11058_v20 = vmax.f32 %v11034_v31, 0.0  ;;  %v19693_v51 = vpack.c.bf16 %v14953_v62, %v14952_v16  ;;  %v19705_v31 = vpack.c.bf16 %v14961_v8, %v14960_v9  ;;  %v14968_v62 = vld [vmem:[%s24216_s5 + $0x2d0] sm:$0xff]  ;;  %v11112_v9 = vld [vmem:[%s24216_s5 + $0x18] sm:$0xff] }
 0x402   : > { %19667 = vmatpush3.bf16.msra.mxu1 %v19666_v32  ;;  %18009 = vmatprep.mubr.msk.f32.mxu1 %vm20410_vm0, %v20411_v6  ;;  %v11057_v54 = vmax.f32 %v11033_v37, 0.0 }
 0x403   : > { %v17907_v61 = vpop.f32.mrb[104].mxu1  ;;  %19668 = vmatprep.subr.bf16.mxu1 %v20409_v3  ;;  %v11092_v2 = vrot.slane %v11075_v5, 1 }
 0x404   : > { %v11036_v63 = vadd.f32 %v17907_v61, %v22915_v55  ;;  %v10499_v34 = vpop.f32.mrb[105].mxu1 }
 0x405   : > { %v11035_v49 = vadd.f32 %v22915_v55, %v10499_v34  ;;  %v22968_v22 = vmax.f32 %v11075_v5, %v11092_v2  ;;  %v14962_v5 = vld [vmem:[%s24216_s5 + $0x2a0] sm:$0xff] }
 0x406   : > { %v11060_v29 = vmax.f32 %v11036_v63, 0.0  ;;  %19670 = vmatpush3.bf16.msra.mxu1 %v19669_v13  ;;  %v17918_v45 = vpop.f32.mrb[106].mxu0  ;;  %v14963_v13 = vld [vmem:[%s24216_s5 + $0x2a8] sm:$0xff] }
 0x407   : > { %v11059_v25 = vmax.f32 %v11035_v49, 0.0  ;;  %v11038_v57 = vadd.f32 %v17918_v45, %v22915_v55  ;;  %v10580_v12 = vpop.f32.mrb[107].mxu0  ;;  %19671 = vmatprep.subr.bf16.mxu1 %v20409_v3  ;;  %v11282_v42 = vrot.slane %v22968_v22, 2  ;;  %v19696_v49 = vpack.c.bf16 %v14955_v19, %v14954_v53  ;;  %v14970_v53 = vld [vmem:[%s24216_s5 + $0x2e0] sm:$0xff]  ;;  %v11114_v19 = vld [vmem:[%s24216_s5 + $0x28] sm:$0xff] }
 0x408   : > { %v22966_v58 = vmax.f32 %v11058_v20, %v11060_v29  ;;  %v11037_v43 = vadd.f32 %v22915_v55, %v10580_v12  ;;  %v19708_v2 = vpack.c.bf16 %v14963_v13, %v14962_v5  ;;  %v14956_v20 = vld [vmem:[%s24216_s5 + $0x270] sm:$0xff]  ;;  %v14957_v29 = vld [vmem:[%s24216_s5 + $0x278] sm:$0xff] }
 0x409   : > { %v11077_v60 = vmax.f32 %v11057_v54, %v11059_v25  ;;  %v11062_v17 = vmax.f32 %v11038_v57, 0.0  ;;  %v14964_v12 = vld [vmem:[%s24216_s5 + $0x2b0] sm:$0xff] }
 0x40a   : > { %19673 = vmatpush3.bf16.msra.mxu1 %v19672_v40  ;;  %v11061_v44 = vmax.f32 %v11037_v43, 0.0  ;;  %v19711_v26 = vpack.c.bf16 %v14965_v35, %v14964_v12  ;;  %v11120_v35 = vld [vmem:[%s24216_s5 + $0x58] sm:$0xff] }
 0x40b   : > { %v11093_v18 = vrot.slane %v11077_v60, 1  ;;  %v17929_v30 = vpop.f32.mrb[106].mxu1  ;;  %19674 = vmatprep.subr.bf16.mxu1 %v20409_v3 }
 0x40c   : > { %v11040_v33 = vadd.f32 %v17929_v30, %v22915_v55  ;;  %v10661_v21 = vpop.f32.mrb[107].mxu1 }
 0x40d   : > { %v22985_v48 = vmax.f32 %v11077_v60, %v11093_v18  ;;  %v11039_v14 = vadd.f32 %v22915_v55, %v10661_v21  ;;  %v11110_v21 = vld [vmem:[%s24216_s5 + $0x8] sm:$0xff] }
 0x40e   : > { %v11064_v4 = vmax.f32 %v11040_v33, 0.0  ;;  %19676 = vmatpush3.bf16.msra.mxu1 %v19675_v23  ;;  %v17940_v41 = vpop.f32.mrb[108].mxu0  ;;  %v19699_v23 = vpack.c.bf16 %v14957_v29, %v14956_v20  ;;  %v11109_v33 = vld [vmem:[%s24216_s5] sm:$0xff]  ;;  %v11118_v29 = vld [vmem:[%s24216_s5 + $0x48] sm:$0xff] }
 0x40f   : > { %v11063_v36 = vmax.f32 %v11039_v14, 0.0  ;;  %v11042_v47 = vadd.f32 %v17940_v41, %v22915_v55  ;;  %v10742_v52 = vpop.f32.mrb[109].mxu0  ;;  %19689 = vmatprep.subr.bf16.mxu1 %v20409_v3  ;;  %v11356_v50 = vrot.slane %v22985_v48, 2  ;;  %v19726_v16 = vpack.c.bf16 %v11110_v21, %v11109_v33 }
 0x410   : > { %v23004_v32 = vmax.f32 %v11062_v17, %v11064_v4  ;;  %v11041_v10 = vadd.f32 %v22915_v55, %v10742_v52 }
 0x411   : > { %v11079_v15 = vmax.f32 %v11061_v44, %v11063_v36  ;;  %18010 = vmatmul.mubr.msk.f32.vlgmr.msra.gmra.mrb[114].mxu1 %vm11208_vm8, %v11282_v42  ;;  %18029 = vmatmul.mubr.msk.f32.vlgmr.msra.gmra.mrb[112].mxu0 %vm11208_vm8, %v11356_v50  ;;  %v11066_v7 = vmax.f32 %v11042_v47, 0.0  ;;  %v14969_v44 = vld [vmem:[%s24216_s5 + $0x2d8] sm:$0xff]  ;;  %v11111_v50 = vld [vmem:[%s24216_s5 + $0x10] sm:$0xff] }
 0x412   : > { %19691 = vmatpush3.bf16.msra.mxu1 %v19690_v39  ;;  %19703 = vmatpush3.bf16.msra.mxu0 %v19702_v56  ;;  %v11065_v40 = vmax.f32 %v11041_v10, 0.0  ;;  %v19714_v56 = vpack.c.bf16 %v14967_v0, %v14966_v28  ;;  %v14971_v10 = vld [vmem:[%s24216_s5 + $0x2e8] sm:$0xff] }
 0x413   : > { %v17951_v27 = vpop.f32.mrb[108].mxu1  ;;  %19692 = vmatprep.subr.bf16.mxu1 %v20409_v3  ;;  %19704 = vmatprep.subr.bf16.mxu0 %v20409_v3  ;;  %v11094_v45 = vrot.slane %v11079_v15, 1  ;;  %v19720_v5 = vpack.c.bf16 %v14971_v10, %v14970_v53  ;;  %v11130_v0 = vld [vmem:[%s24216_s5 + $0xa8] sm:$0xff]  ;;  %v11137_v53 = vld [vmem:[%s24216_s5 + $0xe0] sm:$0xff] }
 0x414   : > { %v11044_v37 = vadd.f32 %v17951_v27, %v22915_v55  ;;  %v10823_v61 = vpop.f32.mrb[109].mxu1  ;;  %18047 = vmatprep.mubr.msk.f32.mxu1 %vm20410_vm0, %v20411_v6  ;;  %18066 = vmatprep.mubr.msk.f32.mxu0 %vm20410_vm0, %v20411_v6  ;;  %v11113_v27 = vld [vmem:[%s24216_s5 + $0x20] sm:$0xff]  ;;  %v11138_v10 = vld [vmem:[%s24216_s5 + $0xe8] sm:$0xff] }
 0x415   : > { %v11043_v1 = vadd.f32 %v22915_v55, %v10823_v61  ;;  %v23049_v18 = vmax.f32 %v11079_v15, %v11094_v45  ;;  %v19732_v13 = vpack.c.bf16 %v11114_v19, %v11113_v27  ;;  %v11125_v45 = vld [vmem:[%s24216_s5 + $0x80] sm:$0xff]  ;;  %v11146_v19 = vld [vmem:[%s24216_s5 + $0x128] sm:$0xff] }
 0x416   : > { %v11068_v63 = vmax.f32 %v11044_v37, 0.0  ;;  %19694 = vmatpush3.bf16.msra.mxu1 %v19693_v51  ;;  %19706 = vmatpush3.bf16.msra.mxu0 %v19705_v31  ;;  %v17962_v34 = vpop.f32.mrb[110].mxu0  ;;  %v19717_v51 = vpack.c.bf16 %v14969_v44, %v14968_v62  ;;  %v19729_v31 = vpack.c.bf16 %v11112_v9, %v11111_v50  ;;  %v14972_v37 = vld [vmem:[%s24216_s5 + $0x2f0] sm:$0xff]  ;;  %v11134_v62 = vld [vmem:[%s24216_s5 + $0xc8] sm:$0xff]  ;;  %v11141_v44 = vld [vmem:[%s24216_s5 + $0x100] sm:$0xff] }
 0x417   : > { %v11067_v54 = vmax.f32 %v11043_v1, 0.0  ;;  %v11046_v25 = vadd.f32 %v17962_v34, %v22915_v55  ;;  %v10904_v57 = vpop.f32.mrb[111].mxu0  ;;  %19695 = vmatprep.subr.bf16.mxu1 %v20409_v3  ;;  %19707 = vmatprep.subr.bf16.mxu0 %v20409_v3  ;;  %v11430_v52 = vrot.slane %v23049_v18, 2  ;;  %v14973_v1 = vld [vmem:[%s24216_s5 + $0x2f8] sm:$0xff]  ;;  %v11143_v9 = vld [vmem:[%s24216_s5 + $0x110] sm:$0xff]  ;;  %v11145_v27 = vld [vmem:[%s24216_s5 + $0x120] sm:$0xff] }
 0x418   : > { %v23044_v24 = vmax.f32 %v11066_v7, %v11068_v63  ;;  %v11045_v30 = vadd.f32 %v22915_v55, %v10904_v57  ;;  %v11115_v7 = vld [vmem:[%s24216_s5 + $0x30] sm:$0xff]  ;;  %v11116_v63 = vld [vmem:[%s24216_s5 + $0x38] sm:$0xff]  ;;  %v19723_v34 = vpack.c.bf16 %v14973_v1, %v14972_v37 }
 0x419   : > { %v11081_v60 = vmax.f32 %v11065_v40, %v11067_v54  ;;  %v11070_v41 = vmax.f32 %v11046_v25, 0.0  ;;  %v11126_v40 = vld [vmem:[%s24216_s5 + $0x88] sm:$0xff]  ;;  %v11119_v57 = vld [vmem:[%s24216_s5 + $0x50] sm:$0xff]  ;;  %v11136_v50 = vld [vmem:[%s24216_s5 + $0xd8] sm:$0xff] }
 0x41a   : > { %19697 = vmatpush3.bf16.msra.mxu1 %v19696_v49  ;;  %19709 = vmatpush3.bf16.msra.mxu0 %v19708_v2  ;;  %v11069_v36 = vmax.f32 %v11045_v30, 0.0  ;;  %v19735_v49 = vpack.c.bf16 %v11116_v63, %v11115_v7  ;;  %v11117_v2 = vld [vmem:[%s24216_s5 + $0x40] sm:$0xff]  ;;  %v19750_v25 = vpack.c.bf16 %v11126_v40, %v11125_v45  ;;  %v11122_v30 = vld [vmem:[%s24216_s5 + $0x68] sm:$0xff]  ;;  %v11139_v37 = vld [vmem:[%s24216_s5 + $0xf0] sm:$0xff] }
 0x41b   : > { %v11095_v43 = vrot.slane %v11081_v60, 1  ;;  %v17973_v11 = vpop.f32.mrb[110].mxu1  ;;  %19698 = vmatprep.subr.bf16.mxu1 %v20409_v3  ;;  %19710 = vmatprep.subr.bf16.mxu0 %v20409_v3  ;;  %v19738_v54 = vpack.c.bf16 %v11118_v29, %v11117_v2  ;;  %v11147_v1 = vld [vmem:[%s24216_s5 + $0x130] sm:$0xff]  ;;  %v11148_v7 = vld [vmem:[%s24216_s5 + $0x138] sm:$0xff]  ;;  %v11150_v2 = vld [vmem:[%s24216_s5 + $0x148] sm:$0xff] }
 0x41c   : > { %v11048_v14 = vadd.f32 %v17973_v11, %v22915_v55  ;;  %v10985_v39 = vpop.f32.mrb[111].mxu1  ;;  %v11129_v11 = vld [vmem:[%s24216_s5 + $0xa0] sm:$0xff]  ;;  %v14987_v45 = vld [vmem:[%s24216_s5 + $0x308] sm:$0xff] }
 0x41d   : > { %v23064_v17 = vmax.f32 %v11081_v60, %v11095_v43  ;;  %v11047_v4 = vadd.f32 %v22915_v55, %v10985_v39  ;;  %v11127_v60 = vld [vmem:[%s24216_s5 + $0x90] sm:$0xff]  ;;  %v11121_v43 = vld [vmem:[%s24216_s5 + $0x60] sm:$0xff]  ;;  %v19756_v21 = vpack.c.bf16 %v11130_v0, %v11129_v11  ;;  %v11124_v39 = vld [vmem:[%s24216_s5 + $0x78] sm:$0xff] }
 0x41e   : > { %v11072_v42 = vmax.f32 %v11048_v14, 0.0  ;;  %19700 = vmatpush3.bf16.msra.mxu1 %v19699_v23  ;;  %19712 = vmatpush3.bf16.msra.mxu0 %v19711_v26  ;;  %v11128_v23 = vld [vmem:[%s24216_s5 + $0x98] sm:$0xff]  ;;  %v19741_v26 = vpack.c.bf16 %v11120_v35, %v11119_v57  ;;  %v19744_v33 = vpack.c.bf16 %v11122_v30, %v11121_v43  ;;  %v11123_v14 = vld [vmem:[%s24216_s5 + $0x70] sm:$0xff]  ;;  %v14986_v29 = vld [vmem:[%s24216_s5 + $0x300] sm:$0xff] }
 0x41f   : > { %v11071_v47 = vmax.f32 %v11047_v4, 0.0  ;;  %19713 = vmatprep.subr.bf16.mxu1 %v20409_v3  ;;  %19725 = vmatprep.subr.bf16.mxu0 %v20409_v3  ;;  %v11504_v55 = vrot.slane %v23064_v17, 2  ;;  %v19753_v28 = vpack.c.bf16 %v11128_v23, %v11127_v60  ;;  %v11131_v4 = vld [vmem:[%s24216_s5 + $0xb0] sm:$0xff]  ;;  %v11152_v57 = vld [vmem:[%s24216_s5 + $0x158] sm:$0xff]  ;;  %v14990_v43 = vld [vmem:[%s24216_s5 + $0x320] sm:$0xff] }
 0x420   : > { %v23083_v8 = vmax.f32 %v11070_v41, %v11072_v42  ;;  %v11132_v41 = vld [vmem:[%s24216_s5 + $0xb8] sm:$0xff]  ;;  %v19747_v42 = vpack.c.bf16 %v11124_v39, %v11123_v14  ;;  %v14991_v30 = vld [vmem:[%s24216_s5 + $0x328] sm:$0xff]  ;;  %v14992_v14 = vld [vmem:[%s24216_s5 + $0x330] sm:$0xff] }
 0x421   : > { %v11083_v15 = vmax.f32 %v11069_v36, %v11071_v47  ;;  %18048 = vmatmul.mubr.msk.f32.vlgmr.msra.gmra.mrb[116].mxu1 %vm11208_vm8, %v11430_v52  ;;  %18067 = vmatmul.mubr.msk.f32.vlgmr.msra.gmra.mrb[114].mxu0 %vm11208_vm8, %v11504_v55  ;;  %v11142_v36 = vld [vmem:[%s24216_s5 + $0x108] sm:$0xff]  ;;  %v11135_v55 = vld [vmem:[%s24216_s5 + $0xd0] sm:$0xff]  ;;  %v14989_v35 = vld [vmem:[%s24216_s5 + $0x318] sm:$0xff]  ;;  %v19804_v0 = vpack.c.bf16 %v14991_v30, %v14990_v43 }
 0x422   : > { %19715 = vmatpush3.bf16.msra.mxu1 %v19714_v56  ;;  %19727 = vmatpush3.bf16.msra.mxu0 %v19726_v16  ;;  %v19759_v56 = vpack.c.bf16 %v11132_v41, %v11131_v4  ;;  %v11133_v16 = vld [vmem:[%s24216_s5 + $0xc0] sm:$0xff]  ;;  %v19774_v52 = vpack.c.bf16 %v11142_v36, %v11141_v44  ;;  %v14993_v39 = vld [vmem:[%s24216_s5 + $0x338] sm:$0xff]  ;;  %v15015_v43 = vld [vmem:[%s24216_s5 + $0x3e8] sm:$0xff] }
 0x423   : > { %19716 = vmatprep.subr.bf16.mxu1 %v20409_v3  ;;  %19728 = vmatprep.subr.bf16.mxu0 %v20409_v3  ;;  %v11096_v61 = vrot.slane %v11083_v15, 1  ;;  %v19762_v47 = vpack.c.bf16 %v11134_v62, %v11133_v16  ;;  %v19807_v41 = vpack.c.bf16 %v14993_v39, %v14992_v14  ;;  %v15002_v16 = vld [vmem:[%s24216_s5 + $0x380] sm:$0xff]  ;;  %v15003_v62 = vld [vmem:[%s24216_s5 + $0x388] sm:$0xff]  ;;  %v15017_v14 = vld [vmem:[%s24216_s5 + $0x3f8] sm:$0xff] }
 0x424   : > { %18085 = vmatprep.mubr.msk.f32.mxu1 %vm20410_vm0, %v20411_v6  ;;  %18104 = vmatprep.mubr.msk.f32.mxu0 %vm20410_vm0, %v20411_v6  ;;  %v19822_v36 = vpack.c.bf16 %v15003_v62, %v15002_v16  ;;  %v15022_v30 = vld [vmem:[%s24216_s5 + $0x420] sm:$0xff]  ;;  %v15024_v39 = vld [vmem:[%s24216_s5 + $0x430] sm:$0xff]  ;;  %v15027_v16 = vld [vmem:[%s24216_s5 + $0x448] sm:$0xff] }
 0x425   : > { %v23122_v20 = vmax.f32 %v11083_v15, %v11096_v61  ;;  %v11144_v15 = vld [vmem:[%s24216_s5 + $0x118] sm:$0xff]  ;;  %v15040_v62 = vld [vmem:[%s24216_s5 + $0x480] sm:$0xff] }
 0x426   : > { %19718 = vmatpush3.bf16.msra.mxu1 %v19717_v51  ;;  %19730 = vmatpush3.bf16.msra.mxu0 %v19729_v31  ;;  %v19765_v51 = vpack.c.bf16 %v11136_v50, %v11135_v55  ;;  %v19777_v31 = vpack.c.bf16 %v11144_v15, %v11143_v9  ;;  %v11140_v61 = vld [vmem:[%s24216_s5 + $0xf8] sm:$0xff]  ;;  %v15004_v50 = vld [vmem:[%s24216_s5 + $0x390] sm:$0xff] }
 0x427   : > { %19719 = vmatprep.subr.bf16.mxu1 %v20409_v3  ;;  %19731 = vmatprep.subr.bf16.mxu0 %v20409_v3  ;;  %v11578_v12 = vrot.slane %v23122_v20, 2  ;;  %v19771_v63 = vpack.c.bf16 %v11140_v61, %v11139_v37  ;;  %v14997_v55 = vld [vmem:[%s24216_s5 + $0x358] sm:$0xff]  ;;  %v15008_v61 = vld [vmem:[%s24216_s5 + $0x3b0] sm:$0xff] }
 0x428   : > { %v15005_v9 = vld [vmem:[%s24216_s5 + $0x398] sm:$0xff] }
 0x429   : > { %v15001_v37 = vld [vmem:[%s24216_s5 + $0x378] sm:$0xff] }
 0x42a   : > { %19721 = vmatpush3.bf16.msra.mxu1 %v19720_v5  ;;  %19733 = vmatpush3.bf16.msra.mxu0 %v19732_v13  ;;  %v19768_v5 = vpack.c.bf16 %v11138_v10, %v11137_v53  ;;  %v19780_v13 = vpack.c.bf16 %v11146_v19, %v11145_v27  ;;  %v14999_v53 = vld [vmem:[%s24216_s5 + $0x368] sm:$0xff]  ;;  %v15006_v10 = vld [vmem:[%s24216_s5 + $0x3a0] sm:$0xff] }
 0x42b   : > { %19722 = vmatprep.subr.bf16.mxu1 %v20409_v3  ;;  %19734 = vmatprep.subr.bf16.mxu0 %v20409_v3  ;;  %v15007_v27 = vld [vmem:[%s24216_s5 + $0x3a8] sm:$0xff] }
 0x42e   : > { %19724 = vmatpush3.bf16.msra.mxu1 %v19723_v34  ;;  %19736 = vmatpush3.bf16.msra.mxu0 %v19735_v49  ;;  %v19783_v34 = vpack.c.bf16 %v11148_v7, %v11147_v1  ;;  %v11149_v49 = vld [vmem:[%s24216_s5 + $0x140] sm:$0xff]  ;;  %v15009_v1 = vld [vmem:[%s24216_s5 + $0x3b8] sm:$0xff] }
 0x42f   : > { %19737 = vmatprep.subr.bf16.mxu1 %v20409_v3  ;;  %19749 = vmatprep.subr.bf16.mxu0 %v20409_v3  ;;  %v19786_v40 = vpack.c.bf16 %v11150_v2, %v11149_v49  ;;  %v15011_v49 = vld [vmem:[%s24216_s5 + $0x3c8] sm:$0xff]  ;;  %v15018_v2 = vld [vmem:[%s24216_s5 + $0x400] sm:$0xff] }
 0x431   : > { %18086 = vmatmul.mubr.msk.f32.vlgmr.msra.gmra.mrb[118].mxu1 %vm11208_vm8, %v11578_v12  ;;  %18105 = vmatmul.mubr.msk.f32.vlgmr.msra.gmra.mrb[116].mxu0 %vm11208_vm8, %v22932_v59  ;;  %v14988_v12 = vld [vmem:[%s24216_s5 + $0x310] sm:$0xff] }
 0x432   : > { %19739 = vmatpush3.bf16.msra.mxu1 %v19738_v54  ;;  %19751 = vmatpush3.bf16.msra.mxu0 %v19750_v25  ;;  %v19798_v54 = vpack.c.bf16 %v14987_v45, %v14986_v29  ;;  %v11151_v25 = vld [vmem:[%s24216_s5 + $0x150] sm:$0xff]  ;;  %v19801_v23 = vpack.c.bf16 %v14989_v35, %v14988_v12  ;;  %v15019_v29 = vld [vmem:[%s24216_s5 + $0x408] sm:$0xff]  ;;  %v15013_v12 = vld [vmem:[%s24216_s5 + $0x3d8] sm:$0xff] }
 0x433   : > { %19740 = vmatprep.subr.bf16.mxu1 %v20409_v3  ;;  %19752 = vmatprep.subr.bf16.mxu0 %v20409_v3  ;;  %v19789_v60 = vpack.c.bf16 %v11152_v57, %v11151_v25  ;;  %v12205_v25 = vrot.slane %v22968_v22, 4  ;;  %v12278_v57 = vrot.slane %v22985_v48, 4  ;;  %v15020_v35 = vld [vmem:[%s24216_s5 + $0x410] sm:$0xff] }
 0x434   : > { %18123 = vmatprep.mubr.msk.f32.mxu1 %vm20410_vm0, %v20411_v6  ;;  %18142 = vmatprep.mubr.msk.f32.mxu0 %vm20410_vm0, %v20411_v6 }
 0x436   : > { %19742 = vmatpush3.bf16.msra.mxu1 %v19741_v26  ;;  %19754 = vmatpush3.bf16.msra.mxu0 %v19753_v28  ;;  %v11153_v26 = vld [vmem:[%s24216_s5 + $0x160] sm:$0xff]  ;;  %v11154_v28 = vld [vmem:[%s24216_s5 + $0x168] sm:$0xff] }
 0x437   : > { %19743 = vmatprep.subr.bf16.mxu1 %v20409_v3  ;;  %19755 = vmatprep.subr.bf16.mxu0 %v20409_v3  ;;  %v19792_v11 = vpack.c.bf16 %v11154_v28, %v11153_v26  ;;  %v15014_v28 = vld [vmem:[%s24216_s5 + $0x3e0] sm:$0xff] }
 0x43a   : > { %19745 = vmatpush3.bf16.msra.mxu1 %v19744_v33  ;;  %19757 = vmatpush3.bf16.msra.mxu0 %v19756_v21  ;;  %v11155_v33 = vld [vmem:[%s24216_s5 + $0x170] sm:$0xff]  ;;  %v11156_v21 = vld [vmem:[%s24216_s5 + $0x178] sm:$0xff] }
 0x43b   : > { %19746 = vmatprep.subr.bf16.mxu1 %v20409_v3  ;;  %19758 = vmatprep.subr.bf16.mxu0 %v20409_v3  ;;  %v19795_v4 = vpack.c.bf16 %v11156_v21, %v11155_v33  ;;  %v15016_v21 = vld [vmem:[%s24216_s5 + $0x3f0] sm:$0xff] }
 0x43e   : > { %19748 = vmatpush3.bf16.msra.mxu1 %v19747_v42  ;;  %19760 = vmatpush3.bf16.msra.mxu0 %v19759_v56  ;;  %v14994_v42 = vld [vmem:[%s24216_s5 + $0x340] sm:$0xff]  ;;  %v14995_v56 = vld [vmem:[%s24216_s5 + $0x348] sm:$0xff] }
 0x43f   : > { %19761 = vmatprep.subr.bf16.mxu1 %v20409_v3  ;;  %19773 = vmatprep.subr.bf16.mxu0 %v20409_v3  ;;  %v19810_v44 = vpack.c.bf16 %v14995_v56, %v14994_v42  ;;  %v15026_v56 = vld [vmem:[%s24216_s5 + $0x440] sm:$0xff] }
 0x441   : > { %18124 = vmatmul.mubr.msk.f32.vlgmr.msra.gmra.mrb[120].mxu1 %vm11208_vm8, %v22968_v22  ;;  %18143 = vmatmul.mubr.msk.f32.vlgmr.msra.gmra.mrb[118].mxu0 %vm11208_vm8, %v22985_v48 }
 0x442   : > { %19763 = vmatpush3.bf16.msra.mxu1 %v19762_v47  ;;  %19775 = vmatpush3.bf16.msra.mxu0 %v19774_v52  ;;  %v14996_v47 = vld [vmem:[%s24216_s5 + $0x350] sm:$0xff]  ;;  %v12132_v52 = vrot.slane %v22932_v59, 4 }
 0x443   : > { %19764 = vmatprep.subr.bf16.mxu1 %v20409_v3  ;;  %19776 = vmatprep.subr.bf16.mxu0 %v20409_v3  ;;  %v19813_v15 = vpack.c.bf16 %v14997_v55, %v14996_v47  ;;  %v12351_v55 = vrot.slane %v23049_v18, 4 }
 0x444   : > { %18161 = vmatprep.mubr.msk.f32.mxu1 %vm20410_vm0, %v20411_v6  ;;  %18180 = vmatprep.mubr.msk.f32.mxu0 %vm20410_vm0, %v20411_v6 }
 0x446   : > { %19766 = vmatpush3.bf16.msra.mxu1 %v19765_v51  ;;  %19778 = vmatpush3.bf16.msra.mxu0 %v19777_v31  ;;  %v19825_v51 = vpack.c.bf16 %v15005_v9, %v15004_v50  ;;  %v14998_v31 = vld [vmem:[%s24216_s5 + $0x360] sm:$0xff]  ;;  %v12424_v50 = vrot.slane %v23064_v17, 4  ;;  %v15029_v9 = vld [vmem:[%s24216_s5 + $0x458] sm:$0xff] }
 0x447   : > { %19767 = vmatprep.subr.bf16.mxu1 %v20409_v3  ;;  %19779 = vmatprep.subr.bf16.mxu0 %v20409_v3  ;;  %v19816_v19 = vpack.c.bf16 %v14999_v53, %v14998_v31 }
 0x44a   : > { %19769 = vmatpush3.bf16.msra.mxu1 %v19768_v5  ;;  %19781 = vmatpush3.bf16.msra.mxu0 %v19780_v13  ;;  %v19828_v5 = vpack.c.bf16 %v15007_v27, %v15006_v10  ;;  %v15000_v13 = vld [vmem:[%s24216_s5 + $0x370] sm:$0xff]  ;;  %v15030_v10 = vld [vmem:[%s24216_s5 + $0x460] sm:$0xff]  ;;  %v15031_v27 = vld [vmem:[%s24216_s5 + $0x468] sm:$0xff] }
 0x44b   : > { %19770 = vmatprep.subr.bf16.mxu1 %v20409_v3  ;;  %19782 = vmatprep.subr.bf16.mxu0 %v20409_v3  ;;  %v19819_v7 = vpack.c.bf16 %v15001_v37, %v15000_v13  ;;  %v19864_v13 = vpack.c.bf16 %v15031_v27, %v15030_v10  ;;  %v15069_v10 = vld [vmem:[%s24216_s5 + $0x568] sm:$0xff]  ;;  %v15076_v27 = vld [vmem:[%s24216_s5 + $0x5a0] sm:$0xff] }
 0x44e   : > { %19772 = vmatpush3.bf16.msra.mxu1 %v19771_v63  ;;  %19784 = vmatpush3.bf16.msra.mxu0 %v19783_v34  ;;  %v19831_v63 = vpack.c.bf16 %v15009_v1, %v15008_v61  ;;  %v15010_v34 = vld [vmem:[%s24216_s5 + $0x3c0] sm:$0xff]  ;;  %v15032_v61 = vld [vmem:[%s24216_s5 + $0x470] sm:$0xff]  ;;  %v15033_v1 = vld [vmem:[%s24216_s5 + $0x478] sm:$0xff] }
 0x44f   : > { %19785 = vmatprep.subr.bf16.mxu1 %v20409_v3  ;;  %19797 = vmatprep.subr.bf16.mxu0 %v20409_v3  ;;  %v19834_v45 = vpack.c.bf16 %v15011_v49, %v15010_v34  ;;  %v19867_v34 = vpack.c.bf16 %v15033_v1, %v15032_v61  ;;  %v15071_v61 = vld [vmem:[%s24216_s5 + $0x578] sm:$0xff]  ;;  %v15078_v1 = vld [vmem:[%s24216_s5 + $0x5b0] sm:$0xff] }
 0x451   : > { %18162 = vmatmul.mubr.msk.f32.vlgmr.msra.gmra.mrb[122].mxu1 %vm11208_vm8, %v23049_v18  ;;  %18181 = vmatmul.mubr.msk.f32.vlgmr.msra.gmra.mrb[120].mxu0 %vm11208_vm8, %v23064_v17 }
 0x452   : > { %19787 = vmatpush3.bf16.msra.mxu1 %v19786_v40  ;;  %19799 = vmatpush3.bf16.msra.mxu0 %v19798_v54  ;;  %v19846_v40 = vpack.c.bf16 %v15019_v29, %v15018_v2  ;;  %v15012_v54 = vld [vmem:[%s24216_s5 + $0x3d0] sm:$0xff]  ;;  %v15048_v2 = vld [vmem:[%s24216_s5 + $0x4c0] sm:$0xff]  ;;  %v15049_v29 = vld [vmem:[%s24216_s5 + $0x4c8] sm:$0xff] }
 0x453   : > { %19788 = vmatprep.subr.bf16.mxu1 %v20409_v3  ;;  %19800 = vmatprep.subr.bf16.mxu0 %v20409_v3 }
 0x454   : > { %18199 = vmatprep.mubr.msk.f32.mxu1 %vm20410_vm0, %v20411_v6  ;;  %18218 = vmatprep.mubr.msk.f32.mxu0 %vm20410_vm0, %v20411_v6 }
 0x456   : > { %19790 = vmatpush3.bf16.msra.mxu1 %v19789_v60  ;;  %19802 = vmatpush3.bf16.msra.mxu0 %v19801_v23  ;;  %v15021_v60 = vld [vmem:[%s24216_s5 + $0x418] sm:$0xff]  ;;  %v19837_v23 = vpack.c.bf16 %v15013_v12, %v15012_v54  ;;  %v19882_v54 = vpack.c.bf16 %v15049_v29, %v15048_v2  ;;  %v12497_v12 = vrot.slane %v23122_v20, 4  ;;  %v15081_v2 = vld [vmem:[%s24216_s5 + $0x5c8] sm:$0xff]  ;;  %v15094_v29 = vld [vmem:[%s24216_s5 + $0x600] sm:$0xff] }
 0x457   : > { %19791 = vmatprep.subr.bf16.mxu1 %v20409_v3  ;;  %19803 = vmatprep.subr.bf16.mxu0 %v20409_v3  ;;  %v19849_v26 = vpack.c.bf16 %v15021_v60, %v15020_v35  ;;  %v12625_v35 = vrot.slane %v22932_v59, 6  ;;  %v15051_v60 = vld [vmem:[%s24216_s5 + $0x4d8] sm:$0xff] }
 0x45a   : > { %19793 = vmatpush3.bf16.msra.mxu1 %v19792_v11  ;;  %19805 = vmatpush3.bf16.msra.mxu0 %v19804_v0  ;;  %v15023_v11 = vld [vmem:[%s24216_s5 + $0x428] sm:$0xff]  ;;  %v19840_v0 = vpack.c.bf16 %v15015_v43, %v15014_v28  ;;  %v15052_v43 = vld [vmem:[%s24216_s5 + $0x4e0] sm:$0xff] }
 0x45b   : > { %19794 = vmatprep.subr.bf16.mxu1 %v20409_v3  ;;  %19806 = vmatprep.subr.bf16.mxu0 %v20409_v3  ;;  %v19852_v33 = vpack.c.bf16 %v15023_v11, %v15022_v30  ;;  %v15053_v30 = vld [vmem:[%s24216_s5 + $0x4e8] sm:$0xff]  ;;  %v15060_v11 = vld [vmem:[%s24216_s5 + $0x520] sm:$0xff] }
 0x45e   : > { %19796 = vmatpush3.bf16.msra.mxu1 %v19795_v4  ;;  %19808 = vmatpush3.bf16.msra.mxu0 %v19807_v41  ;;  %v15025_v4 = vld [vmem:[%s24216_s5 + $0x438] sm:$0xff]  ;;  %v19843_v41 = vpack.c.bf16 %v15017_v14, %v15016_v21  ;;  %v15054_v14 = vld [vmem:[%s24216_s5 + $0x4f0] sm:$0xff] }
 0x45f   : > { %19809 = vmatprep.subr.bf16.mxu1 %v20409_v3  ;;  %19821 = vmatprep.subr.bf16.mxu0 %v20409_v3  ;;  %v19855_v42 = vpack.c.bf16 %v15025_v4, %v15024_v39  ;;  %v15055_v39 = vld [vmem:[%s24216_s5 + $0x4f8] sm:$0xff]  ;;  %v15062_v4 = vld [vmem:[%s24216_s5 + $0x530] sm:$0xff] }
 0x461   : > { %18200 = vmatmul.mubr.msk.f32.vlgmr.msra.gmra.mrb[124].mxu1 %vm11208_vm8, %v23122_v20  ;;  %18219 = vmatmul.mubr.msk.f32.vlgmr.msra.gmra.mrb[122].mxu0 %vm11208_vm8, %v12132_v52  ;;  %v15028_v52 = vld [vmem:[%s24216_s5 + $0x450] sm:$0xff] }
 0x462   : > { %19811 = vmatpush3.bf16.msra.mxu1 %v19810_v44  ;;  %19823 = vmatpush3.bf16.msra.mxu0 %v19822_v36  ;;  %v15041_v44 = vld [vmem:[%s24216_s5 + $0x488] sm:$0xff]  ;;  %v19858_v36 = vpack.c.bf16 %v15027_v16, %v15026_v56  ;;  %v19861_v31 = vpack.c.bf16 %v15029_v9, %v15028_v52  ;;  %v15064_v16 = vld [vmem:[%s24216_s5 + $0x540] sm:$0xff]  ;;  %v12771_v9 = vrot.slane %v22985_v48, 6 }
 0x463   : > { %19812 = vmatprep.subr.bf16.mxu1 %v20409_v3  ;;  %19824 = vmatprep.subr.bf16.mxu0 %v20409_v3  ;;  %v19870_v47 = vpack.c.bf16 %v15041_v44, %v15040_v62  ;;  %v15065_v62 = vld [vmem:[%s24216_s5 + $0x548] sm:$0xff]  ;;  %v15072_v44 = vld [vmem:[%s24216_s5 + $0x580] sm:$0xff] }
 0x464   : > { %18237 = vmatprep.mubr.msk.f32.mxu1 %vm20410_vm0, %v20411_v6  ;;  %18256 = vmatprep.mubr.msk.f32.mxu0 %vm20410_vm0, %v20411_v6 }
 0x466   : > { %19814 = vmatpush3.bf16.msra.mxu1 %v19813_v15  ;;  %19826 = vmatpush3.bf16.msra.mxu0 %v19825_v51  ;;  %v15042_v15 = vld [vmem:[%s24216_s5 + $0x490] sm:$0xff]  ;;  %v15043_v51 = vld [vmem:[%s24216_s5 + $0x498] sm:$0xff] }
 0x467   : > { %19815 = vmatprep.subr.bf16.mxu1 %v20409_v3  ;;  %19827 = vmatprep.subr.bf16.mxu0 %v20409_v3  ;;  %v19873_v53 = vpack.c.bf16 %v15043_v51, %v15042_v15  ;;  %v15067_v15 = vld [vmem:[%s24216_s5 + $0x558] sm:$0xff]  ;;  %v15074_v51 = vld [vmem:[%s24216_s5 + $0x590] sm:$0xff] }
 0x46a   : > { %19817 = vmatpush3.bf16.msra.mxu1 %v19816_v19  ;;  %19829 = vmatpush3.bf16.msra.mxu0 %v19828_v5  ;;  %v15044_v19 = vld [vmem:[%s24216_s5 + $0x4a0] sm:$0xff]  ;;  %v15045_v5 = vld [vmem:[%s24216_s5 + $0x4a8] sm:$0xff] }
 0x46b   : > { %19818 = vmatprep.subr.bf16.mxu1 %v20409_v3  ;;  %19830 = vmatprep.subr.bf16.mxu0 %v20409_v3  ;;  %v19876_v37 = vpack.c.bf16 %v15045_v5, %v15044_v19  ;;  %v15077_v19 = vld [vmem:[%s24216_s5 + $0x5a8] sm:$0xff] }
 0x46e   : > { %19820 = vmatpush3.bf16.msra.mxu1 %v19819_v7  ;;  %19832 = vmatpush3.bf16.msra.mxu0 %v19831_v63  ;;  %v15046_v7 = vld [vmem:[%s24216_s5 + $0x4b0] sm:$0xff]  ;;  %v15047_v63 = vld [vmem:[%s24216_s5 + $0x4b8] sm:$0xff] }
 0x46f   : > { %19833 = vmatprep.subr.bf16.mxu1 %v20409_v3  ;;  %19845 = vmatprep.subr.bf16.mxu0 %v20409_v3  ;;  %v19879_v49 = vpack.c.bf16 %v15047_v63, %v15046_v7  ;;  %v15079_v7 = vld [vmem:[%s24216_s5 + $0x5b8] sm:$0xff] }
 0x471   : > { %18238 = vmatmul.mubr.msk.f32.vlgmr.msra.gmra.mrb[126].mxu1 %vm11208_vm8, %v12205_v25  ;;  %18257 = vmatmul.mubr.msk.f32.vlgmr.msra.gmra.mrb[124].mxu0 %vm11208_vm8, %v12278_v57  ;;  %v15050_v57 = vld [vmem:[%s24216_s5 + $0x4d0] sm:$0xff] }
 0x472   : > { %19835 = vmatpush3.bf16.msra.mxu1 %v19834_v45  ;;  %19847 = vmatpush3.bf16.msra.mxu0 %v19846_v40  ;;  %v15056_v45 = vld [vmem:[%s24216_s5 + $0x500] sm:$0xff]  ;;  %v15057_v40 = vld [vmem:[%s24216_s5 + $0x508] sm:$0xff]  ;;  %v19885_v59 = vpack.c.bf16 %v15051_v60, %v15050_v57  ;;  %v12844_v57 = vrot.slane %v23049_v18, 6  ;;  %v15096_v60 = vld [vmem:[%s24216_s5 + $0x610] sm:$0xff] }
 0x473   : > { %19836 = vmatprep.subr.bf16.mxu1 %v20409_v3  ;;  %19848 = vmatprep.subr.bf16.mxu0 %v20409_v3  ;;  %v19894_v25 = vpack.c.bf16 %v15057_v40, %v15056_v45  ;;  %v15095_v45 = vld [vmem:[%s24216_s5 + $0x608] sm:$0xff] }
 0x474   : > { %18275 = vmatprep.mubr.msk.f32.mxu1 %vm20410_vm0, %v20411_v6  ;;  %18294 = vmatprep.mubr.msk.f32.mxu0 %vm20410_vm0, %v20411_v6 }
 0x476   : > { %19838 = vmatpush3.bf16.msra.mxu1 %v19837_v23  ;;  %19850 = vmatpush3.bf16.msra.mxu0 %v19849_v26  ;;  %v15058_v23 = vld [vmem:[%s24216_s5 + $0x510] sm:$0xff]  ;;  %v15059_v26 = vld [vmem:[%s24216_s5 + $0x518] sm:$0xff] }
 0x477   : > { %19839 = vmatprep.subr.bf16.mxu1 %v20409_v3  ;;  %19851 = vmatprep.subr.bf16.mxu0 %v20409_v3  ;;  %v19897_v28 = vpack.c.bf16 %v15059_v26, %v15058_v23  ;;  %v15097_v23 = vld [vmem:[%s24216_s5 + $0x618] sm:$0xff]  ;;  %v15084_v26 = vld [vmem:[%s24216_s5 + $0x5e0] sm:$0xff] }
 0x47a   : > { %19841 = vmatpush3.bf16.msra.mxu1 %v19840_v0  ;;  %19853 = vmatpush3.bf16.msra.mxu0 %v19852_v33  ;;  %v15061_v0 = vld [vmem:[%s24216_s5 + $0x528] sm:$0xff]  ;;  %v19888_v33 = vpack.c.bf16 %v15053_v30, %v15052_v43 }
 0x47b   : > { %19842 = vmatprep.subr.bf16.mxu1 %v20409_v3  ;;  %19854 = vmatprep.subr.bf16.mxu0 %v20409_v3  ;;  %v19900_v21 = vpack.c.bf16 %v15061_v0, %v15060_v11  ;;  %v15099_v43 = vld [vmem:[%s24216_s5 + $0x628] sm:$0xff]  ;;  %v15086_v0 = vld [vmem:[%s24216_s5 + $0x5f0] sm:$0xff] }
 0x47e   : > { %19844 = vmatpush3.bf16.msra.mxu1 %v19843_v41  ;;  %19856 = vmatpush3.bf16.msra.mxu0 %v19855_v42  ;;  %v15063_v41 = vld [vmem:[%s24216_s5 + $0x538] sm:$0xff]  ;;  %v19891_v42 = vpack.c.bf16 %v15055_v39, %v15054_v14 }
 0x47f   : > { %19857 = vmatprep.subr.bf16.mxu1 %v20409_v3  ;;  %19869 = vmatprep.subr.bf16.mxu0 %v20409_v3  ;;  %v19903_v56 = vpack.c.bf16 %v15063_v41, %v15062_v4  ;;  %v15101_v14 = vld [vmem:[%s24216_s5 + $0x638] sm:$0xff]  ;;  %v15102_v41 = vld [vmem:[%s24216_s5 + $0x640] sm:$0xff] }
 0x481   : > { %18276 = vmatmul.mubr.msk.f32.vlgmr.msra.gmra.mrb[128].mxu1 %vm11208_vm8, %v12351_v55  ;;  %18295 = vmatmul.mubr.msk.f32.vlgmr.msra.gmra.mrb[126].mxu0 %vm11208_vm8, %v12424_v50  ;;  %v15066_v55 = vld [vmem:[%s24216_s5 + $0x550] sm:$0xff]  ;;  %v12698_v50 = vrot.slane %v22968_v22, 6 }
 0x482   : > { %19859 = vmatpush3.bf16.msra.mxu1 %v19858_v36  ;;  %19871 = vmatpush3.bf16.msra.mxu0 %v19870_v47  ;;  %v15073_v36 = vld [vmem:[%s24216_s5 + $0x588] sm:$0xff]  ;;  %v19906_v47 = vpack.c.bf16 %v15065_v62, %v15064_v16  ;;  %v19909_v22 = vpack.c.bf16 %v15067_v15, %v15066_v55  ;;  %v15110_v16 = vld [vmem:[%s24216_s5 + $0x680] sm:$0xff]  ;;  %v12990_v55 = vrot.slane %v23122_v20, 6  ;;  %v15113_v15 = vld [vmem:[%s24216_s5 + $0x698] sm:$0xff] }
 0x483   : > { %19860 = vmatprep.subr.bf16.mxu1 %v20409_v3  ;;  %19872 = vmatprep.subr.bf16.mxu0 %v20409_v3  ;;  %v19918_v52 = vpack.c.bf16 %v15073_v36, %v15072_v44  ;;  %v15111_v62 = vld [vmem:[%s24216_s5 + $0x688] sm:$0xff] }
 0x484   : > { %18313 = vmatprep.mubr.msk.f32.mxu1 %vm20410_vm0, %v20411_v6  ;;  %18332 = vmatprep.mubr.msk.f32.mxu0 %vm20410_vm0, %v20411_v6  ;;  %v19966_v36 = vpack.c.bf16 %v15111_v62, %v15110_v16  ;;  %v15149_v16 = vld [vmem:[%s24216_s5 + $0x788] sm:$0xff] }
 0x486   : > { %19862 = vmatpush3.bf16.msra.mxu1 %v19861_v31  ;;  %19874 = vmatpush3.bf16.msra.mxu0 %v19873_v53  ;;  %v15075_v31 = vld [vmem:[%s24216_s5 + $0x598] sm:$0xff]  ;;  %v15068_v53 = vld [vmem:[%s24216_s5 + $0x560] sm:$0xff] }
 0x487   : > { %19863 = vmatprep.subr.bf16.mxu1 %v20409_v3  ;;  %19875 = vmatprep.subr.bf16.mxu0 %v20409_v3  ;;  %v19921_v48 = vpack.c.bf16 %v15075_v31, %v15074_v51  ;;  %v19912_v5 = vpack.c.bf16 %v15069_v10, %v15068_v53  ;;  %v15106_v51 = vld [vmem:[%s24216_s5 + $0x660] sm:$0xff]  ;;  %v15107_v31 = vld [vmem:[%s24216_s5 + $0x668] sm:$0xff] }
 0x488   : > { %v19960_v53 = vpack.c.bf16 %v15107_v31, %v15106_v51  ;;  %v15152_v51 = vld [vmem:[%s24216_s5 + $0x7a0] sm:$0xff]  ;;  %v15153_v31 = vld [vmem:[%s24216_s5 + $0x7a8] sm:$0xff] }
 0x48a   : > { %19865 = vmatpush3.bf16.msra.mxu1 %v19864_v13  ;;  %19877 = vmatpush3.bf16.msra.mxu0 %v19876_v37  ;;  %v19924_v13 = vpack.c.bf16 %v15077_v19, %v15076_v27  ;;  %v15070_v37 = vld [vmem:[%s24216_s5 + $0x570] sm:$0xff]  ;;  %v15109_v19 = vld [vmem:[%s24216_s5 + $0x678] sm:$0xff] }
 0x48b   : > { %19866 = vmatprep.subr.bf16.mxu1 %v20409_v3  ;;  %19878 = vmatprep.subr.bf16.mxu0 %v20409_v3  ;;  %v19915_v63 = vpack.c.bf16 %v15071_v61, %v15070_v37  ;;  %v15108_v27 = vld [vmem:[%s24216_s5 + $0x670] sm:$0xff] }
 0x48c   : > { %v19963_v37 = vpack.c.bf16 %v15109_v19, %v15108_v27  ;;  %v20020_v19 = vpack.c.bf16 %v15153_v31, %v15152_v51  ;;  %v15176_v51 = vld [vmem:[%s24216_s5 + $0x860] sm:$0xff]  ;;  %v15177_v31 = vld [vmem:[%s24216_s5 + $0x868] sm:$0xff] }
 0x48e   : > { %19868 = vmatpush3.bf16.msra.mxu1 %v19867_v34  ;;  %19880 = vmatpush3.bf16.msra.mxu0 %v19879_v49  ;;  %v19927_v34 = vpack.c.bf16 %v15079_v7, %v15078_v1  ;;  %v15080_v49 = vld [vmem:[%s24216_s5 + $0x5c0] sm:$0xff]  ;;  %v13076_v7 = vrot.slane %v22943_v46, 1 }
 0x48f   : > { %19881 = vmatprep.subr.bf16.mxu1 %v20409_v3  ;;  %19893 = vmatprep.subr.bf16.mxu0 %v20409_v3  ;;  %v19930_v40 = vpack.c.bf16 %v15081_v2, %v15080_v49  ;;  %v15118_v1 = vld [vmem:[%s24216_s5 + $0x6c0] sm:$0xff]  ;;  %v15127_v2 = vld [vmem:[%s24216_s5 + $0x708] sm:$0xff] }
 0x490   : > { %v15126_v49 = vld [vmem:[%s24216_s5 + $0x700] sm:$0xff] }
 0x491   : > { %18314 = vmatmul.mubr.msk.f32.vlgmr.msra.gmra.mrb[130].mxu1 %vm11208_vm8, %v12497_v12  ;;  %18333 = vmatmul.mubr.msk.f32.vlgmr.msra.gmra.mrb[128].mxu0 %vm11208_vm8, %v12625_v35  ;;  %v12917_v12 = vrot.slane %v23064_v17, 6  ;;  %v15083_v35 = vld [vmem:[%s24216_s5 + $0x5d8] sm:$0xff]  ;;  %v19945_v17 = vpack.c.bf16 %v15097_v23, %v15096_v60  ;;  %v15122_v60 = vld [vmem:[%s24216_s5 + $0x6e0] sm:$0xff]  ;;  %v15123_v23 = vld [vmem:[%s24216_s5 + $0x6e8] sm:$0xff] }
 0x492   : > { %19883 = vmatpush3.bf16.msra.mxu1 %v19882_v54  ;;  %19895 = vmatpush3.bf16.msra.mxu0 %v19894_v25  ;;  %v19942_v54 = vpack.c.bf16 %v15095_v45, %v15094_v29  ;;  %v15082_v25 = vld [vmem:[%s24216_s5 + $0x5d0] sm:$0xff]  ;;  %v19990_v45 = vpack.c.bf16 %v15127_v2, %v15126_v49  ;;  %v15157_v49 = vld [vmem:[%s24216_s5 + $0x7c8] sm:$0xff]  ;;  %v15164_v2 = vld [vmem:[%s24216_s5 + $0x800] sm:$0xff] }
 0x493   : > { %19884 = vmatprep.subr.bf16.mxu1 %v20409_v3  ;;  %19896 = vmatprep.subr.bf16.mxu0 %v20409_v3  ;;  %v19933_v18 = vpack.c.bf16 %v15083_v35, %v15082_v25 }
 0x494   : > { %18351 = vmatprep.mubr.msk.f32.mxu1 %vm20410_vm0, %v20411_v6  ;;  %18370 = vmatprep.mubr.msk.f32.mxu0 %vm20410_vm0, %v20411_v6 }
 0x496   : > { %19886 = vmatpush3.bf16.msra.mxu1 %v19885_v59  ;;  %19898 = vmatpush3.bf16.msra.mxu0 %v19897_v28  ;;  %v15085_v59 = vld [vmem:[%s24216_s5 + $0x5e8] sm:$0xff]  ;;  %v15098_v28 = vld [vmem:[%s24216_s5 + $0x620] sm:$0xff] }
 0x497   : > { %19887 = vmatprep.subr.bf16.mxu1 %v20409_v3  ;;  %19899 = vmatprep.subr.bf16.mxu0 %v20409_v3  ;;  %v19936_v30 = vpack.c.bf16 %v15085_v59, %v15084_v26  ;;  %v19948_v11 = vpack.c.bf16 %v15099_v43, %v15098_v28  ;;  %v19984_v28 = vpack.c.bf16 %v15123_v23, %v15122_v60  ;;  %v15167_v60 = vld [vmem:[%s24216_s5 + $0x818] sm:$0xff]  ;;  %v15160_v23 = vld [vmem:[%s24216_s5 + $0x7e0] sm:$0xff] }
 0x49a   : > { %19889 = vmatpush3.bf16.msra.mxu1 %v19888_v33  ;;  %19901 = vmatpush3.bf16.msra.mxu0 %v19900_v21  ;;  %v15087_v33 = vld [vmem:[%s24216_s5 + $0x5f8] sm:$0xff]  ;;  %v15100_v21 = vld [vmem:[%s24216_s5 + $0x630] sm:$0xff] }
 0x49b   : > { %19890 = vmatprep.subr.bf16.mxu1 %v20409_v3  ;;  %19902 = vmatprep.subr.bf16.mxu0 %v20409_v3  ;;  %v19939_v39 = vpack.c.bf16 %v15087_v33, %v15086_v0  ;;  %v19951_v4 = vpack.c.bf16 %v15101_v14, %v15100_v21  ;;  %v15132_v0 = vld [vmem:[%s24216_s5 + $0x730] sm:$0xff]  ;;  %v15133_v33 = vld [vmem:[%s24216_s5 + $0x738] sm:$0xff] }
 0x49c   : > { %v19999_v14 = vpack.c.bf16 %v15133_v33, %v15132_v0 }
 0x49e   : > { %19892 = vmatpush3.bf16.msra.mxu1 %v19891_v42  ;;  %19904 = vmatpush3.bf16.msra.mxu0 %v19903_v56  ;;  %v13075_v42 = vrot.slane %v22922_v38, 1  ;;  %v15103_v56 = vld [vmem:[%s24216_s5 + $0x648] sm:$0xff] }
 0x49f   : > { %19905 = vmatprep.subr.bf16.mxu1 %v20409_v3  ;;  %19917 = vmatprep.subr.bf16.mxu0 %v20409_v3  ;;  %v19954_v44 = vpack.c.bf16 %v15103_v56, %v15102_v41  ;;  %v13079_v41 = vrot.slane %v23044_v24, 1  ;;  %v15148_v56 = vld [vmem:[%s24216_s5 + $0x780] sm:$0xff] }
 0x4a1   : > { %18352 = vmatmul.mubr.msk.f32.vlgmr.msra.gmra.mrb[132].mxu1 %vm11208_vm8, %v12698_v50  ;;  %18371 = vmatmul.mubr.msk.f32.vlgmr.msra.gmra.mrb[130].mxu0 %vm11208_vm8, %v12771_v9  ;;  %v15105_v50 = vld [vmem:[%s24216_s5 + $0x658] sm:$0xff]  ;;  %v15112_v9 = vld [vmem:[%s24216_s5 + $0x690] sm:$0xff] }
 0x4a2   : > { %19907 = vmatpush3.bf16.msra.mxu1 %v19906_v47  ;;  %19919 = vmatpush3.bf16.msra.mxu0 %v19918_v52  ;;  %v15104_v47 = vld [vmem:[%s24216_s5 + $0x650] sm:$0xff]  ;;  %v23716_v52 = vmax.f32 %v22922_v38, %v13075_v42  ;;  %v19969_v20 = vpack.c.bf16 %v15113_v15, %v15112_v9  ;;  %v15135_v42 = vld [vmem:[%s24216_s5 + $0x748] sm:$0xff] }
 0x4a3   : > { %19908 = vmatprep.subr.bf16.mxu1 %v20409_v3  ;;  %19920 = vmatprep.subr.bf16.mxu0 %v20409_v3  ;;  %v19957_v38 = vpack.c.bf16 %v15105_v50, %v15104_v47  ;;  %v15137_v50 = vld [vmem:[%s24216_s5 + $0x758] sm:$0xff]  ;;  %v15150_v9 = vld [vmem:[%s24216_s5 + $0x790] sm:$0xff] }
 0x4a4   : > { %18389 = vmatprep.mubr.msk.f32.mxu1 %vm20410_vm0, %v20411_v6  ;;  %18408 = vmatprep.mubr.msk.f32.mxu0 %vm20410_vm0, %v20411_v6 }
 0x4a6   : > { %19910 = vmatpush3.bf16.msra.mxu1 %v19909_v22  ;;  %19922 = vmatpush3.bf16.msra.mxu0 %v19921_v48  ;;  %v15114_v22 = vld [vmem:[%s24216_s5 + $0x6a0] sm:$0xff]  ;;  %v15115_v48 = vld [vmem:[%s24216_s5 + $0x6a8] sm:$0xff] }
 0x4a7   : > { %19911 = vmatprep.subr.bf16.mxu1 %v20409_v3  ;;  %19923 = vmatprep.subr.bf16.mxu0 %v20409_v3  ;;  %v19972_v10 = vpack.c.bf16 %v15115_v48, %v15114_v22 }
 0x4aa   : > { %19913 = vmatpush3.bf16.msra.mxu1 %v19912_v5  ;;  %19925 = vmatpush3.bf16.msra.mxu0 %v19924_v13  ;;  %v15116_v5 = vld [vmem:[%s24216_s5 + $0x6b0] sm:$0xff]  ;;  %v15117_v13 = vld [vmem:[%s24216_s5 + $0x6b8] sm:$0xff] }
 0x4ab   : > { %19914 = vmatprep.subr.bf16.mxu1 %v20409_v3  ;;  %19926 = vmatprep.subr.bf16.mxu0 %v20409_v3  ;;  %v19975_v61 = vpack.c.bf16 %v15117_v13, %v15116_v5  ;;  %v15140_v5 = vld [vmem:[%s24216_s5 + $0x770] sm:$0xff]  ;;  %v15141_v13 = vld [vmem:[%s24216_s5 + $0x778] sm:$0xff] }
 0x4ae   : > { %19916 = vmatpush3.bf16.msra.mxu1 %v19915_v63  ;;  %19928 = vmatpush3.bf16.msra.mxu0 %v19927_v34  ;;  %v13077_v63 = vrot.slane %v22966_v58, 1  ;;  %v15119_v34 = vld [vmem:[%s24216_s5 + $0x6c8] sm:$0xff] }
 0x4af   : > { %19929 = vmatprep.subr.bf16.mxu1 %v20409_v3  ;;  %19941 = vmatprep.subr.bf16.mxu0 %v20409_v3  ;;  %v19978_v29 = vpack.c.bf16 %v15119_v34, %v15118_v1  ;;  %v20011_v1 = vpack.c.bf16 %v15141_v13, %v15140_v5  ;;  %v13080_v34 = vrot.slane %v23083_v8, 1 }
 0x4b0   : > { %v23788_v25 = vmax.f32 %v22966_v58, %v13077_v63  ;;  %v15156_v63 = vld [vmem:[%s24216_s5 + $0x7c0] sm:$0xff] }
 0x4b1   : > { %18390 = vmatmul.mubr.msk.f32.vlgmr.msra.gmra.mrb[134].mxu1 %vm11208_vm8, %v12844_v57  ;;  %18409 = vmatmul.mubr.msk.f32.vlgmr.msra.gmra.mrb[132].mxu0 %vm11208_vm8, %v12917_v12  ;;  %v15121_v57 = vld [vmem:[%s24216_s5 + $0x6d8] sm:$0xff]  ;;  %v15128_v12 = vld [vmem:[%s24216_s5 + $0x710] sm:$0xff] }
 0x4b2   : > { %19931 = vmatpush3.bf16.msra.mxu1 %v19930_v40  ;;  %19943 = vmatpush3.bf16.msra.mxu0 %v19942_v54  ;;  %v15120_v40 = vld [vmem:[%s24216_s5 + $0x6d0] sm:$0xff]  ;;  %v23785_v54 = vmax.f32 %v22943_v46, %v13076_v7  ;;  %v15129_v46 = vld [vmem:[%s24216_s5 + $0x718] sm:$0xff] }
 0x4b3   : > { %19932 = vmatprep.subr.bf16.mxu1 %v20409_v3  ;;  %19944 = vmatprep.subr.bf16.mxu0 %v20409_v3  ;;  %v19981_v58 = vpack.c.bf16 %v15121_v57, %v15120_v40  ;;  %v19993_v35 = vpack.c.bf16 %v15129_v46, %v15128_v12  ;;  %v15158_v57 = vld [vmem:[%s24216_s5 + $0x7d0] sm:$0xff]  ;;  %v13635_v12 = vrot.slane %v23716_v52, 2  ;;  %v23935_v46 = vmax.f32 %v23083_v8, %v13080_v34  ;;  %v15187_v34 = vld [vmem:[%s24216_s5 + $0x8b8] sm:$0xff] }
 0x4b4   : > { %18427 = vmatprep.mubr.msk.f32.mxu1 %vm20410_vm0, %v20411_v6  ;;  %18446 = vmatprep.mubr.msk.f32.mxu0 %vm20410_vm0, %v20411_v6 }
 0x4b6   : > { %19934 = vmatpush3.bf16.msra.mxu1 %v19933_v18  ;;  %19946 = vmatpush3.bf16.msra.mxu0 %v19945_v17  ;;  %v15130_v18 = vld [vmem:[%s24216_s5 + $0x720] sm:$0xff]  ;;  %v15131_v17 = vld [vmem:[%s24216_s5 + $0x728] sm:$0xff] }
 0x4b7   : > { %19935 = vmatprep.subr.bf16.mxu1 %v20409_v3  ;;  %19947 = vmatprep.subr.bf16.mxu0 %v20409_v3  ;;  %v19996_v43 = vpack.c.bf16 %v15131_v17, %v15130_v18  ;;  %v15161_v18 = vld [vmem:[%s24216_s5 + $0x7e8] sm:$0xff]  ;;  %v15168_v17 = vld [vmem:[%s24216_s5 + $0x820] sm:$0xff] }
 0x4b8   : > { %v20032_v0 = vpack.c.bf16 %v15161_v18, %v15160_v23 }
 0x4ba   : > { %19937 = vmatpush3.bf16.msra.mxu1 %v19936_v30  ;;  %19949 = vmatpush3.bf16.msra.mxu0 %v19948_v11  ;;  %v15124_v30 = vld [vmem:[%s24216_s5 + $0x6f0] sm:$0xff]  ;;  %v15125_v11 = vld [vmem:[%s24216_s5 + $0x6f8] sm:$0xff] }
 0x4bb   : > { %19938 = vmatprep.subr.bf16.mxu1 %v20409_v3  ;;  %19950 = vmatprep.subr.bf16.mxu0 %v20409_v3  ;;  %v19987_v21 = vpack.c.bf16 %v15125_v11, %v15124_v30 }
 0x4be   : > { %19940 = vmatpush3.bf16.msra.mxu1 %v19939_v39  ;;  %19952 = vmatpush3.bf16.msra.mxu0 %v19951_v4  ;;  %v15134_v39 = vld [vmem:[%s24216_s5 + $0x740] sm:$0xff]  ;;  %v13078_v4 = vrot.slane %v23004_v32, 1 }
 0x4bf   : > { %19953 = vmatprep.subr.bf16.mxu1 %v20409_v3  ;;  %19965 = vmatprep.subr.bf16.mxu0 %v20409_v3  ;;  %v20002_v62 = vpack.c.bf16 %v15135_v42, %v15134_v39  ;;  %v15170_v39 = vld [vmem:[%s24216_s5 + $0x830] sm:$0xff] }
 0x4c0   : > { %v23859_v47 = vmax.f32 %v23004_v32, %v13078_v4  ;;  %v15151_v32 = vld [vmem:[%s24216_s5 + $0x798] sm:$0xff] }
 0x4c1   : > { %18428 = vmatmul.mubr.msk.f32.vlgmr.msra.gmra.mrb[136].mxu1 %vm11208_vm8, %v12990_v55  ;;  %18447 = vmatmul.mubr.msk.f32.vlgmr.msra.gmra.mrb[134].mxu0 %vm11208_vm8, %v23716_v52  ;;  %v23862_v55 = vmax.f32 %v23044_v24, %v13079_v41  ;;  %v20017_v15 = vpack.c.bf16 %v15151_v32, %v15150_v9  ;;  %v15171_v4 = vld [vmem:[%s24216_s5 + $0x838] sm:$0xff]  ;;  %v15174_v9 = vld [vmem:[%s24216_s5 + $0x850] sm:$0xff]  ;;  %v13708_v32 = vrot.slane %v23785_v54, 2 }
 0x4c2   : > { %19955 = vmatpush3.bf16.msra.mxu1 %v19954_v44  ;;  %19967 = vmatpush3.bf16.msra.mxu0 %v19966_v36  ;;  %v20014_v44 = vpack.c.bf16 %v15149_v16, %v15148_v56  ;;  %v15136_v36 = vld [vmem:[%s24216_s5 + $0x750] sm:$0xff]  ;;  %v20047_v42 = vpack.c.bf16 %v15171_v4, %v15170_v39  ;;  %v15172_v56 = vld [vmem:[%s24216_s5 + $0x840] sm:$0xff]  ;;  %v15173_v16 = vld [vmem:[%s24216_s5 + $0x848] sm:$0xff] }
 0x4c3   : > { %19956 = vmatprep.subr.bf16.mxu1 %v20409_v3  ;;  %19968 = vmatprep.subr.bf16.mxu0 %v20409_v3  ;;  %v20005_v24 = vpack.c.bf16 %v15137_v50, %v15136_v36  ;;  %v20050_v36 = vpack.c.bf16 %v15173_v16, %v15172_v56 }
 0x4c4   : > { %18465 = vmatprep.mubr.msk.f32.mxu1 %vm20410_vm0, %v20411_v6  ;;  %18484 = vmatprep.mubr.msk.f32.mxu0 %vm20410_vm0, %v20411_v6 }
 0x4c6   : > { %19958 = vmatpush3.bf16.msra.mxu1 %v19957_v38  ;;  %19970 = vmatpush3.bf16.msra.mxu0 %v19969_v20  ;;  %v15138_v38 = vld [vmem:[%s24216_s5 + $0x760] sm:$0xff]  ;;  %v15139_v20 = vld [vmem:[%s24216_s5 + $0x768] sm:$0xff] }
 0x4c7   : > { %19959 = vmatprep.subr.bf16.mxu1 %v20409_v3  ;;  %19971 = vmatprep.subr.bf16.mxu0 %v20409_v3  ;;  %v20008_v27 = vpack.c.bf16 %v15139_v20, %v15138_v38  ;;  %v15182_v38 = vld [vmem:[%s24216_s5 + $0x890] sm:$0xff]  ;;  %v15183_v20 = vld [vmem:[%s24216_s5 + $0x898] sm:$0xff] }
 0x4ca   : > { %19961 = vmatpush3.bf16.msra.mxu1 %v19960_v53  ;;  %19973 = vmatpush3.bf16.msra.mxu0 %v19972_v10 }
 0x4cb   : > { %19962 = vmatprep.subr.bf16.mxu1 %v20409_v3  ;;  %19974 = vmatprep.subr.bf16.mxu0 %v20409_v3 }
 0x4ce   : > { %19964 = vmatpush3.bf16.msra.mxu1 %v19963_v37  ;;  %19976 = vmatpush3.bf16.msra.mxu0 %v19975_v61  ;;  %v15154_v37 = vld [vmem:[%s24216_s5 + $0x7b0] sm:$0xff]  ;;  %v15155_v61 = vld [vmem:[%s24216_s5 + $0x7b8] sm:$0xff] }
 0x4cf   : > { %19977 = vmatprep.subr.bf16.mxu1 %v20409_v3  ;;  %19989 = vmatprep.subr.bf16.mxu0 %v20409_v3  ;;  %v20023_v7 = vpack.c.bf16 %v15155_v61, %v15154_v37  ;;  %v20056_v61 = vpack.c.bf16 %v15177_v31, %v15176_v51  ;;  %v14088_v51 = vld [vmem:[%s24218_s7 + $0x8] sm:$0xff]  ;;  %v14089_v31 = vld [vmem:[%s24218_s7 + $0x10] sm:$0xff] }
 0x4d1   : > { %18466 = vmatmul.mubr.msk.f32.vlgmr.msra.gmra.mrb[138].mxu1 %vm11208_vm8, %v23785_v54  ;;  %18485 = vmatmul.mubr.msk.f32.vlgmr.msra.gmra.mrb[136].mxu0 %vm11208_vm8, %v23788_v25 }
 0x4d2   : > { %19979 = vmatpush3.bf16.msra.mxu1 %v19978_v29  ;;  %19991 = vmatpush3.bf16.msra.mxu0 %v19990_v45  ;;  %v15165_v29 = vld [vmem:[%s24216_s5 + $0x808] sm:$0xff]  ;;  %v20026_v45 = vpack.c.bf16 %v15157_v49, %v15156_v63  ;;  %v15179_v63 = vld [vmem:[%s24216_s5 + $0x878] sm:$0xff] }
 0x4d3   : > { %19980 = vmatprep.subr.bf16.mxu1 %v20409_v3  ;;  %19992 = vmatprep.subr.bf16.mxu0 %v20409_v3  ;;  %v20038_v40 = vpack.c.bf16 %v15165_v29, %v15164_v2  ;;  %v15188_v29 = vld [vmem:[%s24216_s5 + $0x8c0] sm:$0xff] }
 0x4d4   : > { %v23819_v26 = vpop.f32.mrb[112].mxu1  ;;  %18503 = vmatprep.mubr.msk.f32.mxu1 %vm20410_vm0, %v20411_v6  ;;  %18522 = vmatprep.mubr.msk.f32.mxu0 %vm20410_vm0, %v20411_v6 }
 0x4d5   : > { %v17992_v59 = vpop.f32.mrb[113].mxu1 }
 0x4d6   : > { %19982 = vmatpush3.bf16.msra.mxu1 %v19981_v58  ;;  %19994 = vmatpush3.bf16.msra.mxu0 %v19993_v35  ;;  %v15159_v58 = vld [vmem:[%s24216_s5 + $0x7d8] sm:$0xff]  ;;  %v15166_v35 = vld [vmem:[%s24216_s5 + $0x810] sm:$0xff]  ;;  %v15169_v59 = vld [vmem:[%s24216_s5 + $0x828] sm:$0xff] }
 0x4d7   : > { %19983 = vmatprep.subr.bf16.mxu1 %v20409_v3  ;;  %19995 = vmatprep.subr.bf16.mxu0 %v20409_v3  ;;  %v20029_v8 = vpack.c.bf16 %v15159_v58, %v15158_v57  ;;  %v20041_v52 = vpack.c.bf16 %v15167_v60, %v15166_v35  ;;  %v20044_v33 = vpack.c.bf16 %v15169_v59, %v15168_v17  ;;  %v13854_v57 = vrot.slane %v23859_v47, 2  ;;  %v15190_v58 = vld [vmem:[%s24216_s5 + $0x8d0] sm:$0xff]  ;;  %v15191_v35 = vld [vmem:[%s24216_s5 + $0x8d8] sm:$0xff]  ;;  %v15193_v60 = vld [vmem:[%s24216_s5 + $0x8e8] sm:$0xff] }
 0x4da   : > { %19985 = vmatpush3.bf16.msra.mxu1 %v19984_v28  ;;  %19997 = vmatpush3.bf16.msra.mxu0 %v19996_v43 }
 0x4db   : > { %19986 = vmatprep.subr.bf16.mxu1 %v20409_v3  ;;  %19998 = vmatprep.subr.bf16.mxu0 %v20409_v3 }
 0x4de   : > { %19988 = vmatpush3.bf16.msra.mxu1 %v19987_v21  ;;  %20000 = vmatpush3.bf16.msra.mxu0 %v19999_v14  ;;  %v15162_v21 = vld [vmem:[%s24216_s5 + $0x7f0] sm:$0xff]  ;;  %v15163_v14 = vld [vmem:[%s24216_s5 + $0x7f8] sm:$0xff] }
 0x4df   : > { %20001 = vmatprep.subr.bf16.mxu1 %v20409_v3  ;;  %20013 = vmatprep.subr.bf16.mxu0 %v20409_v3  ;;  %v20035_v41 = vpack.c.bf16 %v15163_v14, %v15162_v21 }
 0x4e1   : > { %18504 = vmatmul.mubr.msk.f32.vlgmr.msra.gmra.mrb[140].mxu1 %vm11208_vm8, %v23859_v47  ;;  %18523 = vmatmul.mubr.msk.f32.vlgmr.msra.gmra.mrb[138].mxu0 %vm11208_vm8, %v23862_v55  ;;  %v20077_v47 = vpack.c.bf16 %v15191_v35, %v15190_v58 }
 0x4e2   : > { %20003 = vmatpush3.bf16.msra.mxu1 %v20002_v62  ;;  %20015 = vmatpush3.bf16.msra.mxu0 %v20014_v44  ;;  %v15180_v62 = vld [vmem:[%s24216_s5 + $0x880] sm:$0xff]  ;;  %v15181_v44 = vld [vmem:[%s24216_s5 + $0x888] sm:$0xff] }
 0x4e3   : > { %20004 = vmatprep.subr.bf16.mxu1 %v20409_v3  ;;  %20016 = vmatprep.subr.bf16.mxu0 %v20409_v3  ;;  %v20062_v50 = vpack.c.bf16 %v15181_v44, %v15180_v62 }
 0x4e4   : > { %v23893_v22 = vpop.f32.mrb[114].mxu1  ;;  %v23895_v48 = vpop.f32.mrb[112].mxu0  ;;  %18541 = vmatprep.mubr.msk.f32.mxu1 %vm20410_vm0, %v20411_v6  ;;  %18560 = vmatprep.mubr.msk.f32.mxu0 %vm20410_vm0, %v20411_v6 }
 0x4e5   : > { %v18011_v53 = vpop.f32.mrb[115].mxu1  ;;  %v18030_v10 = vpop.f32.mrb[113].mxu0 }
 0x4e6   : > { %20006 = vmatpush3.bf16.msra.mxu1 %v20005_v24  ;;  %20018 = vmatpush3.bf16.msra.mxu0 %v20017_v15  ;;  %v13781_v24 = vrot.slane %v23788_v25, 2  ;;  %v15175_v15 = vld [vmem:[%s24216_s5 + $0x858] sm:$0xff]  ;;  %v20065_v25 = vpack.c.bf16 %v15183_v20, %v15182_v38  ;;  %v15184_v53 = vld [vmem:[%s24216_s5 + $0x8a0] sm:$0xff]  ;;  %v15185_v10 = vld [vmem:[%s24216_s5 + $0x8a8] sm:$0xff] }
 0x4e7   : > { %20007 = vmatprep.subr.bf16.mxu1 %v20409_v3  ;;  %20019 = vmatprep.subr.bf16.mxu0 %v20409_v3  ;;  %v20053_v54 = vpack.c.bf16 %v15175_v15, %v15174_v9 }
 0x4ea   : > { %20009 = vmatpush3.bf16.msra.mxu1 %v20008_v27  ;;  %20021 = vmatpush3.bf16.msra.mxu0 %v20020_v19 }
 0x4eb   : > { %20010 = vmatprep.subr.bf16.mxu1 %v20409_v3  ;;  %20022 = vmatprep.subr.bf16.mxu0 %v20409_v3 }
 0x4ee   : > { %20012 = vmatpush3.bf16.msra.mxu1 %v20011_v1  ;;  %20024 = vmatpush3.bf16.msra.mxu0 %v20023_v7  ;;  %v20068_v1 = vpack.c.bf16 %v15185_v10, %v15184_v53  ;;  %v15178_v7 = vld [vmem:[%s24216_s5 + $0x870] sm:$0xff]  ;;  %v14090_v10 = vld [vmem:[%s24218_s7 + $0x18] sm:$0xff] }
 0x4ef   : > { %20025 = vmatprep.subr.bf16.mxu1 %v20409_v3  ;;  %20037 = vmatprep.subr.bf16.mxu0 %v20409_v3  ;;  %v20059_v49 = vpack.c.bf16 %v15179_v63, %v15178_v7  ;;  %v14091_v7 = vld [vmem:[%s24218_s7 + $0x20] sm:$0xff]  ;;  %v14092_v63 = vld [vmem:[%s24218_s7 + $0x28] sm:$0xff] }
 0x4f1   : > { %18542 = vmatmul.mubr.msk.f32.vlgmr.msra.gmra.mrb[142].mxu1 %vm11208_vm8, %v23935_v46  ;;  %18561 = vmatmul.mubr.msk.f32.vlgmr.msra.gmra.mrb[140].mxu0 %vm11208_vm8, %v13635_v12  ;;  %v13927_v12 = vrot.slane %v23862_v55, 2  ;;  %v15192_v55 = vld [vmem:[%s24216_s5 + $0x8e0] sm:$0xff] }
 0x4f2   : > { %20027 = vmatpush3.bf16.msra.mxu1 %v20026_v45  ;;  %20039 = vmatpush3.bf16.msra.mxu0 %v20038_v40  ;;  %v15189_v45 = vld [vmem:[%s24216_s5 + $0x8c8] sm:$0xff] }
 0x4f3   : > { %20028 = vmatprep.subr.bf16.mxu1 %v20409_v3  ;;  %20040 = vmatprep.subr.bf16.mxu0 %v20409_v3  ;;  %v20074_v40 = vpack.c.bf16 %v15189_v45, %v15188_v29  ;;  %v14095_v29 = vld [vmem:[%s24218_s7 + $0x40] sm:$0xff]  ;;  %v14096_v45 = vld [vmem:[%s24218_s7 + $0x48] sm:$0xff] }
 0x4f4   : > { %v23965_v28 = vpop.f32.mrb[116].mxu1  ;;  %v23967_v43 = vpop.f32.mrb[114].mxu0  ;;  %18579 = vmatprep.mubr.msk.f32.mxu1 %vm20410_vm0, %v20411_v6  ;;  %18598 = vmatprep.mubr.msk.f32.mxu0 %vm20410_vm0, %v20411_v6 }
 0x4f5   : > { %v18049_v30 = vpop.f32.mrb[117].mxu1  ;;  %v18068_v11 = vpop.f32.mrb[115].mxu0 }
 0x4f6   : > { %20030 = vmatpush3.bf16.msra.mxu1 %v20029_v8  ;;  %20042 = vmatpush3.bf16.msra.mxu0 %v20041_v52  ;;  %v20080_v30 = vpack.c.bf16 %v15193_v60, %v15192_v55  ;;  %v15194_v11 = vld [vmem:[%s24216_s5 + $0x8f0] sm:$0xff] }
 0x4f7   : > { %20031 = vmatprep.subr.bf16.mxu1 %v20409_v3  ;;  %20043 = vmatprep.subr.bf16.mxu0 %v20409_v3 }
 0x4fa   : > { %20033 = vmatpush3.bf16.msra.mxu1 %v20032_v0  ;;  %20045 = vmatpush3.bf16.msra.mxu0 %v20044_v33 }
 0x4fb   : > { %20034 = vmatprep.subr.bf16.mxu1 %v20409_v3  ;;  %20046 = vmatprep.subr.bf16.mxu0 %v20409_v3 }
 0x4fe   : > { %20036 = vmatpush3.bf16.msra.mxu1 %v20035_v41  ;;  %20048 = vmatpush3.bf16.msra.mxu0 %v20047_v42 }
 0x4ff   : > { %20049 = vmatprep.subr.bf16.mxu1 %v20409_v3  ;;  %20061 = vmatprep.subr.bf16.mxu0 %v20409_v3 }
 0x501   : > { %18580 = vmatmul.mubr.msk.f32.vlgmr.msra.gmra.mrb[144].mxu1 %vm11208_vm8, %v13708_v32  ;;  %18599 = vmatmul.mubr.msk.f32.vlgmr.msra.gmra.mrb[142].mxu0 %vm11208_vm8, %v13781_v24 }
 0x502   : > { %20051 = vmatpush3.bf16.msra.mxu1 %v20050_v36  ;;  %20063 = vmatpush3.bf16.msra.mxu0 %v20062_v50 }
 0x503   : > { %20052 = vmatprep.subr.bf16.mxu1 %v20409_v3  ;;  %20064 = vmatprep.subr.bf16.mxu0 %v20409_v3 }
 0x504   : > { %v24033_v27 = vpop.f32.mrb[118].mxu1  ;;  %v11719_v19 = vpop.f32.mrb[116].mxu0  ;;  %18617 = vmatprep.mubr.msk.f32.mxu1 %vm20410_vm0, %v20411_v6  ;;  %18636 = vmatprep.mubr.msk.f32.mxu0 %vm20410_vm0, %v20411_v6 }
 0x505   : > { %v24040_v5 = vadd.f32 %v11719_v19, %v23819_v26  ;;  %v18087_v13 = vpop.f32.mrb[119].mxu1  ;;  %v18106_v37 = vpop.f32.mrb[117].mxu0  ;;  %v15186_v26 = vld [vmem:[%s24216_s5 + $0x8b0] sm:$0xff] }
 0x506   : > { %20054 = vmatpush3.bf16.msra.mxu1 %v20053_v54  ;;  %20066 = vmatpush3.bf16.msra.mxu0 %v20065_v25  ;;  %v20071_v2 = vpack.c.bf16 %v15187_v34, %v15186_v26  ;;  %v14087_v25 = vld [vmem:[%s24218_s7] sm:$0xff]  ;;  %v14093_v26 = vld [vmem:[%s24218_s7 + $0x30] sm:$0xff]  ;;  %v20092_v34 = vpack.c.bf16 %v14092_v63, %v14091_v7 }
 0x507   : > { %20055 = vmatprep.subr.bf16.mxu1 %v20409_v3  ;;  %20067 = vmatprep.subr.bf16.mxu0 %v20409_v3  ;;  %v20086_v53 = vpack.c.bf16 %v14088_v51, %v14087_v25 }
 0x50a   : > { %20057 = vmatpush3.bf16.msra.mxu1 %v20056_v61  ;;  %20069 = vmatpush3.bf16.msra.mxu0 %v20068_v1 }
 0x50b   : > { %20058 = vmatprep.subr.bf16.mxu1 %v20409_v3  ;;  %20070 = vmatprep.subr.bf16.mxu0 %v20409_v3 }
 0x50e   : > { %20060 = vmatpush3.bf16.msra.mxu1 %v20059_v49  ;;  %20072 = vmatpush3.bf16.msra.mxu0 %v20071_v2  ;;  %v14094_v49 = vld [vmem:[%s24218_s7 + $0x38] sm:$0xff] }
 0x50f   : > { %20073 = vmatprep.subr.bf16.mxu1 %v20409_v3  ;;  %20085 = vmatprep.subr.bf16.mxu0 %v20409_v3  ;;  %v20095_v2 = vpack.c.bf16 %v14094_v49, %v14093_v26 }
 0x511   : > { %18618 = vmatmul.mubr.msk.f32.vlgmr.msra.gmra.mrb[146].mxu1 %vm11208_vm8, %v13854_v57  ;;  %18637 = vmatmul.mubr.msk.f32.vlgmr.msra.gmra.mrb[144].mxu0 %vm11208_vm8, %v13927_v12  ;;  %v14097_v57 = vld [vmem:[%s24218_s7 + $0x50] sm:$0xff]  ;;  %v14098_v12 = vld [vmem:[%s24218_s7 + $0x58] sm:$0xff] }
 0x512   : > { %20075 = vmatpush3.bf16.msra.mxu1 %v20074_v40  ;;  %18655 = vmatprep.mubr.msk.f32.mxu1 %vm20410_vm0, %v20411_v6  ;;  %v20098_v40 = vpack.c.bf16 %v14096_v45, %v14095_v29 }
 0x513   : > { %20076 = vmatprep.subr.bf16.mxu1 %v20409_v3  ;;  %18690 = vmatprep.mubr.msk.f32.mxu0 %vm20410_vm0, %v20411_v6  ;;  %v15195_v6 = vld [vmem:[%s24216_s5 + $0x8f8] sm:$0xff] }
 0x514   : > { %v11791_v8 = vpop.f32.mrb[120].mxu1  ;;  %v11863_v52 = vpop.f32.mrb[118].mxu0  ;;  %v20083_v0 = vpack.c.bf16 %v15195_v6, %v15194_v11  ;;  %20087 = vmatpush3.bf16.msra.mxu0 %v20086_v53 }
 0x515   : > { %v11792_v23 = vadd.f32 %v11791_v8, %v23893_v22  ;;  %v11864_v18 = vadd.f32 %v11863_v52, %v23895_v48  ;;  %v18125_v17 = vpop.f32.mrb[121].mxu1  ;;  %v18144_v59 = vpop.f32.mrb[119].mxu0  ;;  %v14000_v22 = vrot.slane %v23935_v46, 2  ;;  %20088 = vmatprep.subr.bf16.mxu0 %v20409_v3 }
 0x516   : > { %20078 = vmatpush3.bf16.msra.mxu1 %v20077_v47  ;;  %v20101_v47 = vpack.c.bf16 %v14098_v12, %v14097_v57  ;;  %v14101_v17 = vld [vmem:[%s24218_s7 + $0x70] sm:$0xff]  ;;  %v14084_v57 = vld [vmem:[%s24217_s6] sm:$0x1] }
 0x517   : > { %20079 = vmatprep.subr.bf16.mxu1 %v20409_v3 }
 0x51a   : > { %20081 = vmatpush3.bf16.msra.mxu1 %v20080_v30  ;;  %v14102_v30 = vld [vmem:[%s24218_s7 + $0x78] sm:$0xff] }
 0x51b   : > { %20082 = vmatprep.subr.bf16.mxu1 %v20409_v3  ;;  %v20107_v11 = vpack.c.bf16 %v14102_v30, %v14101_v17 }
 0x51e   : > { %20084 = vmatpush3.bf16.msra.mxu1 %v20083_v0 }
 0x521   : > { %18656 = vmatmul.mubr.msk.f32.vlgmr.msra.gmra.mrb[148].mxu1 %vm11208_vm8, %v14000_v22 }
 0x524   : > { %v11935_v48 = vpop.f32.mrb[122].mxu1  ;;  %v12007_v33 = vpop.f32.mrb[120].mxu0 }
 0x525   : > { %v11936_v21 = vadd.f32 %v11935_v48, %v23965_v28  ;;  %v12008_v14 = vadd.f32 %v12007_v33, %v23967_v43  ;;  %v18163_v39 = vpop.f32.mrb[123].mxu1  ;;  %v18182_v4 = vpop.f32.mrb[121].mxu0 }
 0x534   : > { %v12079_v41 = vpop.f32.mrb[124].mxu1  ;;  %v12201_v42 = vpop.f32.mrb[122].mxu0 }
 0x535   : > { %v12080_v56 = vadd.f32 %v12079_v41, %v24033_v27  ;;  %v12570_v16 = vadd.f32 %v12201_v42, %v24040_v5  ;;  %v18201_v62 = vpop.f32.mrb[125].mxu1  ;;  %v18220_v44 = vpop.f32.mrb[123].mxu0  ;;  %v20089_v27 = vpack.c.bf16 %v14090_v10, %v14089_v31 }
 0x537   : > { %20090 = vmatpush3.bf16.msra.mxu0 %v20089_v27 }
 0x538   : > { %20091 = vmatprep.subr.bf16.mxu0 %v20409_v3 }
 0x53b   : > { %20093 = vmatpush3.bf16.msra.mxu0 %v20092_v34 }
 0x53c   : > { %20094 = vmatprep.subr.bf16.mxu0 %v20409_v3 }
 0x53f   : > { %20096 = vmatpush3.bf16.msra.mxu0 %v20095_v2 }
 0x540   : > { %20097 = vmatprep.subr.bf16.mxu0 %v20409_v3 }
 0x543   : > { %20099 = vmatpush3.bf16.msra.mxu0 %v20098_v40 }
 0x544   : > { %v12274_v36 = vpop.f32.mrb[126].mxu1  ;;  %v12347_v46 = vpop.f32.mrb[124].mxu0  ;;  %20100 = vmatprep.subr.bf16.mxu0 %v20409_v3 }
 0x545   : > { %v12571_v50 = vadd.f32 %v12274_v36, %v11792_v23  ;;  %v12572_v9 = vadd.f32 %v12347_v46, %v11864_v18  ;;  %v18239_v32 = vpop.f32.mrb[127].mxu1  ;;  %v18258_v24 = vpop.f32.mrb[125].mxu0  ;;  %v14099_v23 = vld [vmem:[%s24218_s7 + $0x60] sm:$0xff]  ;;  %v14100_v18 = vld [vmem:[%s24218_s7 + $0x68] sm:$0xff] }
 0x546   : > { %v20104_v59 = vpack.c.bf16 %v14100_v18, %v14099_v23 }
 0x547   : > { %20102 = vmatpush3.bf16.msra.mxu0 %v20101_v47  ;;  %v14103_v47 = vld [vmem:[%s24219_s8] sm:$0x1] }
 0x548   : > { %20103 = vmatprep.subr.bf16.mxu0 %v20409_v3 }
 0x54b   : > { %20105 = vmatpush3.bf16.msra.mxu0 %v20104_v59 }
 0x54c   : > { %20106 = vmatprep.subr.bf16.mxu0 %v20409_v3 }
 0x54f   : > { %20108 = vmatpush3.bf16.msra.mxu0 %v20107_v11 }
 0x554   : > { %v12420_v15 = vpop.f32.mrb[128].mxu1  ;;  %v12493_v28 = vpop.f32.mrb[126].mxu0 }
 0x555   : > { %v12573_v38 = vadd.f32 %v12420_v15, %v11936_v21  ;;  %v12574_v43 = vadd.f32 %v12493_v28, %v12008_v14  ;;  %v18277_v20 = vpop.f32.mrb[129].mxu1  ;;  %v18296_v54 = vpop.f32.mrb[127].mxu0 }
 0x564   : > { %v12566_v19 = vpop.f32.mrb[130].mxu1  ;;  %v12694_v5 = vpop.f32.mrb[128].mxu0 }
 0x565   : > { %v12575_v13 = vadd.f32 %v12566_v19, %v12080_v56  ;;  %v13063_v37 = vadd.f32 %v12694_v5, %v12570_v16  ;;  %v18315_v61 = vpop.f32.mrb[131].mxu1  ;;  %v18334_v1 = vpop.f32.mrb[129].mxu0 }
 0x574   : > { %v12767_v58 = vpop.f32.mrb[132].mxu1  ;;  %v12840_v35 = vpop.f32.mrb[130].mxu0 }
 0x575   : > { %v13064_v55 = vadd.f32 %v12767_v58, %v12571_v50  ;;  %v13065_v60 = vadd.f32 %v12840_v35, %v12572_v9  ;;  %v18353_v8 = vpop.f32.mrb[133].mxu1  ;;  %v18372_v52 = vpop.f32.mrb[131].mxu0 }
 0x584   : > { %v12913_v6 = vpop.f32.mrb[134].mxu1  ;;  %v12986_v0 = vpop.f32.mrb[132].mxu0 }
 0x585   : > { %v13066_v22 = vadd.f32 %v12913_v6, %v12573_v38  ;;  %v13067_v48 = vadd.f32 %v12986_v0, %v12574_v43  ;;  %v18391_v33 = vpop.f32.mrb[135].mxu1  ;;  %v18410_v21 = vpop.f32.mrb[133].mxu0 }
 0x594   : > { %v13059_v14 = vpop.f32.mrb[136].mxu1  ;;  %v13211_v39 = vpop.f32.mrb[134].mxu0 }
 0x595   : > { %v13068_v4 = vadd.f32 %v13059_v14, %v12575_v13  ;;  %v13580_v41 = vadd.f32 %v13211_v39, %v13063_v37  ;;  %v18429_v42 = vpop.f32.mrb[137].mxu1  ;;  %v18448_v56 = vpop.f32.mrb[135].mxu0 }
 0x5a4   : > { %v13284_v16 = vpop.f32.mrb[138].mxu1  ;;  %v13357_v62 = vpop.f32.mrb[136].mxu0 }
 0x5a5   : > { %v13581_v44 = vadd.f32 %v13284_v16, %v13064_v55  ;;  %v13582_v36 = vadd.f32 %v13357_v62, %v13065_v60  ;;  %v18467_v46 = vpop.f32.mrb[139].mxu1  ;;  %v18486_v50 = vpop.f32.mrb[137].mxu0 }
 0x5b4   : > { %v13430_v3 = vpop.f32.mrb[140].mxu1  ;;  %v13503_v9 = vpop.f32.mrb[138].mxu0 }
 0x5b5   : > { %v13583_v32 = vadd.f32 %v13430_v3, %v13066_v22  ;;  %v13584_v24 = vadd.f32 %v13503_v9, %v13067_v48  ;;  %v18505_v15 = vpop.f32.mrb[141].mxu1  ;;  %v18524_v28 = vpop.f32.mrb[139].mxu0 }
 0x5c4   : > { %v13576_v38 = vpop.f32.mrb[142].mxu1  ;;  %v13704_v43 = vpop.f32.mrb[140].mxu0 }
 0x5c5   : > { %v13585_v20 = vadd.f32 %v13576_v38, %v13068_v4  ;;  %v14073_v54 = vadd.f32 %v13704_v43, %v13580_v41  ;;  %v18543_v25 = vpop.f32.mrb[143].mxu1  ;;  %v18562_v51 = vpop.f32.mrb[141].mxu0 }
 0x5d4   : > { %v13777_v31 = vpop.f32.mrb[144].mxu1  ;;  %v13850_v53 = vpop.f32.mrb[142].mxu0 }
 0x5d5   : > { %v14074_v10 = vadd.f32 %v13777_v31, %v13581_v44  ;;  %v14075_v27 = vadd.f32 %v13850_v53, %v13582_v36  ;;  %v18581_v19 = vpop.f32.mrb[145].mxu1  ;;  %v18600_v5 = vpop.f32.mrb[143].mxu0 }
 0x5d7   : > { %v14079_v13 = vadd.f32 %v14074_v10, %v14073_v54 }
 0x5d9   : > { %v14080_v37 = vadd.f32 %v14079_v13, %v14075_v27 }
 0x5e4   : > { %v13923_v61 = vpop.f32.mrb[146].mxu1  ;;  %v13996_v1 = vpop.f32.mrb[144].mxu0 }
 0x5e5   : > { %v14076_v7 = vadd.f32 %v13923_v61, %v13583_v32  ;;  %v14077_v63 = vadd.f32 %v13996_v1, %v13584_v24  ;;  %v18619_v26 = vpop.f32.mrb[147].mxu1  ;;  %v18638_v34 = vpop.f32.mrb[145].mxu0 }
 0x5e7   : > { %v14081_v49 = vadd.f32 %v14080_v37, %v14076_v7 }
 0x5e9   : > { %v14082_v2 = vadd.f32 %v14081_v49, %v14077_v63 }
 0x5f4   : > { %v14069_v29 = vpop.f32.mrb[148].mxu1 }
 0x5f5   : > { %v14078_v45 = vadd.f32 %v14069_v29, %v13585_v20  ;;  %v18657_v40 = vpop.f32.mrb[149].mxu1 }
 0x5f7   : > { %v14083_v12 = vadd.f32 %v14082_v2, %v14078_v45 }
 0x5f9   : > { %v14085_v58 = vadd.f32 %v14084_v57, %v14083_v12 }
 0x5fb   : > { %v14086_v35 = vmax.f32 %v14085_v58, 0.0 }
 0x5fd   : > { %18691 = vmatmul.mubr.f32.vlgmr.msra.gmra.mrb[146].mxu0 %v14086_v35 }
 0x6d0   : > { %v14170_v55 = vpop.f32.mrb[146].mxu0 }
 0x6d1   : > { %v14171_v60 = vadd.f32 %v14170_v55, %v14103_v47  ;;  %v18692_v8 = vpop.f32.mrb[147].mxu0 }
 0x6d3   : > { %14175 = vst.msk [vmem:[%s324_s14] sm:$0x1] %vm14174_vm9, %v14171_v60 }
 0x6d4   : > { %20358 = shalt.err (!%p20355_p3)
}
 0x6d5   : > { %s20359_s21 = scalar_lea.hbm %s24169_s23, 16  ;;  %s20363_s14 = scalar_lea.hbm %s24220_s9, 32 }
 0x6d6   : > { %p20360_p4 = scmp.ne.s32.totalorder %s24169_s23, %s20359_s21  ;;  %p20364_p9 = scmp.lt.u32.totalorder %s24169_s23, %s24220_s9 }
 0x6d7   : > { %p20365_p10 = scmp.lt.u32.totalorder %s20363_s14, %s20359_s21  ;;  %p20367_p12 = scmp.lt.u32.totalorder %s20359_s21, %s24169_s23 }
 0x6d8   : > { %p20361_p7 = pnand %p20360_p4, %p20501_p5 }
 0x6d9   : > { %p20366_p11 = por %p20365_p10, %p20364_p9 }
 0x6da   : > { %p20362_p8 = pneg %p20361_p7 }
 0x6db   : > { %p20368_p13 = por %p20367_p12, %p20366_p11 }
 0x6dd   : > { %p20369_p0 = pnand %p20368_p13, %p20362_p8 }
 0x6df   : > { %20372 = shalt.err (!%p20369_p0)
}
 0x6e0   : > { %20302 = dma.vmem_to_hbm [thread:$0]  (%p20501_p5), %s24171_s16, 16, %s24169_s23, %s14177_s24  }
 0x6e1 PF: > { %p20308_p1 = scmp.ge.s32.totalorder %s20407_s12, 2  ;;  %s14201_s25 = sand.u32 1, %s20395_s30  }
 0x6e2   : > { %s14202_s13 = scalar_lea.sflag [#allocation4], %s14201_s25 }
 0x6e3   : > { %p20305_p2 = pnand %p20308_p1, %p20505_p6 }
 0x6e5   : > { %20390 = dma.done.wait (!%p20305_p2), %s14202_s13, 16  }
 0x6e6   : > { %20392 = vsyncadd (!%p20305_p2), %s14202_s13, 4294967280  ;;  %p19_p3 = scmp.ge.s32.totalorder %s20488_s15, 4   ;;  %s24223_s30 = smov %s20399_s10 }
 0x6e7   : > { %s24224_s10 = smov %s20403_s11  ;;  %s24225_s11 = smov %s20499_s18 }
 0x6e8   : > { %s24226_s12 = smov %s20488_s15  ;;  %21 = sbr.rel (!%p19_p3) target bundleno = 3 (0x3), region = 120 }
 0x6ef   :  { %14206 = vsyncpa [#allocation4], 1 }
 0x6f0   :  { %14208 = vsyncpa [#allocation4 + $0x1], 1 }

</bundles_post_ra>
